<compile_context>
chip_gen: v7x
topology: tpu7x:2x2x1
jax: 0.10.0
libtpu: 0.0.40
codegen_flags: <defaults>
</compile_context>

<pallas_src>
import functools

import numpy as np
import jax
import jax.numpy as jnp
from jax.experimental import pallas as pl
from jax.experimental.pallas import tpu as pltpu


_VMEM_LIMIT = 32 * 1024 * 1024          # safe on v5e/v6e (128 MiB) and v7x (64 MiB)


def _vmem_budget():
    """Per-grid-step working-set budget (bytes), derived from the device."""
    cap = None
    try:
        cap = getattr(pltpu.get_tpu_info(), "vmem_capacity_bytes", None)
    except Exception:
        cap = None
    if not cap:
        cap = 64 * 1024 * 1024          # assume the smallest generation (v7x)
    return max(4 * 1024 * 1024, min(cap // 4, 16 * 1024 * 1024))


def _pick_row_tile(m, bytes_per_row, budget):
    """Row tile (multiple of 8) fitting the budget; rows get padded to it."""
    cap = max(8, (budget // max(bytes_per_row, 1)) // 8 * 8)
    tm = min(cap, ((m + 7) // 8) * 8)
    if tm >= m and m > 8:               # prefer >=2 grid steps (v7x megacore)
        tm = max(8, (((m + 1) // 2) + 7) // 8 * 8)
    return tm


def _choose_frames(bf, rp_frame, bytes_per_row, fixed_bytes, budget):
    """Frames per residual-stack grid step (rows multiple of 8, VMEM-bounded)."""
    bt0 = 1
    while (bt0 * rp_frame) % 8:
        bt0 *= 2                        # 1, 2, 4 or 8
    avail = max(budget - fixed_bytes, bt0 * rp_frame * bytes_per_row)
    bt_cap = max(bt0, (avail // (rp_frame * bytes_per_row)) // bt0 * bt0)
    bf_ceil = ((bf + bt0 - 1) // bt0) * bt0
    bt = min(bt_cap, bf_ceil)
    if bf_ceil > bt0:                   # prefer >=2 grid steps (v7x megacore)
        half = ((bf_ceil // 2 + bt0 - 1) // bt0) * bt0
        bt = min(bt, max(bt0, half))
    return bt


# ----------------------------------------------------------------------------
# Kernel 1: fused patchify matmul + bias  (rows x K) @ (K x C) + b
# ----------------------------------------------------------------------------
def _patchify_kernel(a_ref, w_ref, b_ref, o_ref):
    y = jnp.dot(a_ref[...], w_ref[...], preferred_element_type=jnp.float32)
    o_ref[...] = (y + b_ref[...]).astype(o_ref.dtype)


def patchify_matmul(cols_bf16, w_bf16, b_f32):
    """cols:(M,K) bf16 @ w:(K,N) bf16 + b:(N,) -> (M,N) f32, tiled over rows."""
    M, K = cols_bf16.shape
    N = w_bf16.shape[1]
    budget = _vmem_budget() - K * 128 * 2 * 2 - (1 << 20)   # weight + headroom
    budget = max(budget, 2 * 1024 * 1024)
    per_row = K * 2 * 2 + 128 * 4 * 2                        # dbl-buffered in/out
    tm = _pick_row_tile(M, per_row, budget)
    m_pad = ((M + tm - 1) // tm) * tm
    if m_pad != M:
        cols_bf16 = jnp.pad(cols_bf16, ((0, m_pad - M), (0, 0)))

    out = pl.pallas_call(
        _patchify_kernel,
        out_shape=jax.ShapeDtypeStruct((m_pad, N), jnp.float32),
        grid=(m_pad // tm,),
        in_specs=[
            pl.BlockSpec((tm, K), lambda i: (i, 0)),
            pl.BlockSpec((K, N), lambda i: (0, 0)),
            pl.BlockSpec((1, N), lambda i: (0, 0)),
        ],
        out_specs=pl.BlockSpec((tm, N), lambda i: (i, 0)),
        compiler_params=pltpu.CompilerParams(
            dimension_semantics=("parallel",),
            vmem_limit_bytes=_VMEM_LIMIT),
    )(cols_bf16, w_bf16, b_f32.reshape(1, N).astype(jnp.float32))
    return out[:M]


# ----------------------------------------------------------------------------
# Kernel 2: fully fused residual stack (all blocks in one pallas_call)
#   per block:  out = conv2(relu(conv1(x))) + x     (3x3 convs, padding=1)
# Activations live in a padded per-frame row layout: (ho+2)*(wo+2) rows/frame,
# borders are kept at zero, each 3x3 conv is ONE (rows, 9C) @ (9C, C) matmul.
# ----------------------------------------------------------------------------
def _residual_stack_kernel(x_ref, w1_ref, b1_ref, w2_ref, b2_ref, mask_ref,
                           o_ref, act_ref, col_ref,
                           *, nblocks, cdim, rp, wo2, slack):
    # Zero the slack strips so shifted reads at the block edges stay finite
    # (their results land on border rows, which the mask forces to zero).
    act_ref[0:slack, :] = jnp.zeros((slack, cdim), act_ref.dtype)
    act_ref[slack + rp:slack + rp + slack, :] = jnp.zeros((slack, cdim),
                                                          act_ref.dtype)

    mask = mask_ref[...]                                   # (rp, 1) f32 interior

    # conv-1 input of block 0 (bf16 scratch; residual stays f32 via x_ref/o_ref)
    act_ref[slack:slack + rp, :] = x_ref[...].astype(act_ref.dtype)

    def build_cols():
        # 9 contiguous shifted slices -> (rp, 9*C) bf16 im2col
        for t in range(9):
            dy, dx = t // 3 - 1, t % 3 - 1
            shift = dy * wo2 + dx
            col_ref[:, t * cdim:(t + 1) * cdim] = (
                act_ref[slack + shift:slack + shift + rp, :])

    for blk in range(nblocks):
        # conv1 + bias + ReLU  (single K = 9*C matmul)
        build_cols()
        t1 = jnp.dot(col_ref[...], w1_ref[blk],
                     preferred_element_type=jnp.float32)
        t1 = jnp.maximum(t1 + b1_ref[blk], 0.0) * mask     # zero frame borders
        act_ref[slack:slack + rp, :] = t1.astype(act_ref.dtype)

        # conv2 + bias + residual
        build_cols()
        y = jnp.dot(col_ref[...], w2_ref[blk],
                    preferred_element_type=jnp.float32) + b2_ref[blk]
        resid = x_ref[...] if blk == 0 else o_ref[...]     # f32 residual chain
        out = (y + resid) * mask
        o_ref[...] = out
        if blk + 1 < nblocks:
            act_ref[slack:slack + rp, :] = out.astype(act_ref.dtype)


def fused_residual_stack(x_pad_rows, w1s, b1s, w2s, b2s, *, bf, ho, wo):
    """x_pad_rows: (bf*(ho+2)*(wo+2), C) f32, padded-per-frame rows, zero borders."""
    C = x_pad_rows.shape[-1]
    nblocks = w1s.shape[0]
    rp_frame = (ho + 2) * (wo + 2)
    wo2 = wo + 2
    slack = ((wo + 3 + 7) // 8) * 8                        # 8-aligned top/bot slack

    budget = _vmem_budget()
    bytes_per_row = 4608                                   # io(dbl,f32) + bf16 scratches
    fixed = nblocks * 320 * 1024 + (2 << 20)               # weights + headroom
    bt = _choose_frames(bf, rp_frame, bytes_per_row, fixed, budget)
    bf_pad = ((bf + bt - 1) // bt) * bt
    if bf_pad != bf:
        x_pad_rows = jnp.pad(x_pad_rows, ((0, (bf_pad - bf) * rp_frame), (0, 0)))
    rp = bt * rp_frame
    g = bf_pad // bt

    # Interior-row mask (trace-time numpy), tiled over the bt frames of a block.
    yy = np.repeat(np.arange(ho + 2), wo + 2)
    xx = np.tile(np.arange(wo + 2), ho + 2)
    m = ((yy >= 1) & (yy <= ho) & (xx >= 1) & (xx <= wo)).astype(np.float32)
    mask = jnp.asarray(np.tile(m, bt).reshape(rp, 1))

    kern = functools.partial(_residual_stack_kernel, nblocks=nblocks, cdim=C,
                             rp=rp, wo2=wo2, slack=slack)
    out = pl.pallas_call(
        kern,
        out_shape=jax.ShapeDtypeStruct((bf_pad * rp_frame, C), jnp.float32),
        grid=(g,),
        in_specs=[
            pl.BlockSpec((rp, C), lambda i: (i, 0)),
            pl.BlockSpec((nblocks, 9 * C, C), lambda i: (0, 0, 0)),
            pl.BlockSpec((nblocks, 1, C), lambda i: (0, 0, 0)),
            pl.BlockSpec((nblocks, 9 * C, C), lambda i: (0, 0, 0)),
            pl.BlockSpec((nblocks, 1, C), lambda i: (0, 0, 0)),
            pl.BlockSpec((rp, 1), lambda i: (0, 0)),
        ],
        out_specs=pl.BlockSpec((rp, C), lambda i: (i, 0)),
        scratch_shapes=[
            pltpu.VMEM((rp + 2 * slack, C), jnp.bfloat16),   # padded conv input
            pltpu.VMEM((rp, 9 * C), jnp.bfloat16),           # im2col
        ],
        compiler_params=pltpu.CompilerParams(
            dimension_semantics=("parallel",),
            vmem_limit_bytes=_VMEM_LIMIT),
    )(x_pad_rows, w1s, b1s, w2s, b2s, mask)
    return out[:bf * rp_frame]


# ----------------------------------------------------------------------------
# XLA glue for the general fallback (stride != kernel_size only)
# ----------------------------------------------------------------------------
def pixel_unshuffle(x, r):
    n, c, hr, wr = x.shape
    h, w = hr // r, wr // r
    x = x.reshape(n, c, h, r, w, r)
    x = jnp.transpose(x, (0, 1, 3, 5, 2, 4))
    return x.reshape(n, c * r * r, h, w)


def im2col_nchw(x, k, stride, padding):
    n, c, h, w = x.shape
    if padding:
        x = jnp.pad(x, ((0, 0), (0, 0), (padding, padding), (padding, padding)))
    hp, wp = h + 2 * padding, w + 2 * padding
    ho = (hp - k) // stride + 1
    wo = (wp - k) // stride + 1
    cols = []
    for ky in range(k):
        for kx in range(k):
            cols.append(x[:, :, ky:ky + stride * ho:stride,
                          kx:kx + stride * wo:stride])
    cols = jnp.stack(cols, axis=2)                           # (N, C, k*k, Ho, Wo)
    cols = jnp.transpose(cols, (0, 3, 4, 1, 2))              # (N, Ho, Wo, C, k*k)
    return cols.reshape(n * ho * wo, c * k * k), (n, ho, wo)


# ----------------------------------------------------------------------------
# WanCamAdapter forward (Pallas-backed)
# ----------------------------------------------------------------------------
def wan_cam_adapter_forward(x, params, *, kernel_size, stride, num_residual_blocks):
    bs, c, f, h, w = x.shape
    out_dim = params["conv_b"].shape[0]
    C = out_dim
    BF = bs * f

    # (bs, c, f, h, w) -> (bs*f, c, h, w); cast to bf16 BEFORE the big reshuffle.
    xr = jnp.transpose(x, (0, 2, 1, 3, 4)).reshape(BF, c, h, w).astype(jnp.bfloat16)

    if stride == kernel_size:
        # Fold pixel_unshuffle(8) + patchify conv into a single (8k x 8k,
        # stride 8k) patch extraction (one transpose) + one matmul kernel.
        P = 8 * kernel_size
        ho = (h // 8 - kernel_size) // stride + 1
        wo = (w // 8 - kernel_size) // stride + 1
        xc = xr[:, :, :ho * P, :wo * P]
        cols = xc.reshape(BF, c, ho, P, wo, P)
        cols = jnp.transpose(cols, (0, 2, 4, 1, 3, 5)).reshape(BF * ho * wo,
                                                               c * P * P)
        wp = params["conv_w"].reshape(out_dim, c, 8, 8, kernel_size, kernel_size)
        wp = jnp.transpose(wp, (0, 1, 4, 2, 5, 3)).reshape(out_dim, c * P * P)
    else:
        # TODO(synk): stride != kernel_size keeps the XLA unshuffle+im2col glue.
        xu = pixel_unshuffle(xr, 8)
        cols, (_, ho, wo) = im2col_nchw(xu, kernel_size, stride, 0)
        wp = params["conv_w"].reshape(out_dim, -1)

    out = patchify_matmul(cols, jnp.transpose(wp).astype(jnp.bfloat16),
                          params["conv_b"])                  # (BF*ho*wo, C) f32

    if num_residual_blocks > 0:
        w1s = jnp.stack([jnp.transpose(w1, (2, 3, 1, 0)).reshape(9 * C, C)
                         for (w1, _, _, _) in params["res"]]).astype(jnp.bfloat16)
        b1s = jnp.stack([b1 for (_, b1, _, _) in params["res"]]
                        ).reshape(-1, 1, C).astype(jnp.float32)
        w2s = jnp.stack([jnp.transpose(w2, (2, 3, 1, 0)).reshape(9 * C, C)
                         for (_, _, w2, _) in params["res"]]).astype(jnp.bfloat16)
        b2s = jnp.stack([b2 for (_, _, _, b2) in params["res"]]
                        ).reshape(-1, 1, C).astype(jnp.float32)

        # Flat rows -> padded-per-frame rows with zero borders (cheap XLA pad).
        act = out.reshape(BF, ho, wo, C)
        act = jnp.pad(act, ((0, 0), (1, 1), (1, 1), (0, 0)))
        act = act.reshape(BF * (ho + 2) * (wo + 2), C)
        act = fused_residual_stack(act, w1s, b1s, w2s, b2s, bf=BF, ho=ho, wo=wo)
        out = act.reshape(BF, ho + 2, wo + 2, C)[:, 1:-1, 1:-1, :]
    else:
        out = out.reshape(BF, ho, wo, C)

    out = out.reshape(bs, f, ho, wo, C)
    return jnp.transpose(out, (0, 4, 1, 2, 3))               # (bs, out_dim, f, ho, wo)


# ----------------------------------------------------------------------------
# Pure-JAX (XLA conv) reference for verification
# ----------------------------------------------------------------------------
def _conv2d_ref(x, w, b, stride, padding):
    y = jax.lax.conv_general_dilated(
        x, w, window_strides=(stride, stride),
        padding=[(padding, padding), (padding, padding)],
        dimension_numbers=("NCHW", "OIHW", "NCHW"),
        precision=jax.lax.Precision.HIGHEST)
    return y + b[None, :, None, None]


def wan_cam_adapter_ref(x, params, *, kernel_size, stride, num_residual_blocks):
    bs, c, f, h, w = x.shape
    xr = jnp.transpose(x, (0, 2, 1, 3, 4)).reshape(bs * f, c, h, w)
    xu = pixel_unshuffle(xr, 8)
    out = _conv2d_ref(xu, params["conv_w"], params["conv_b"], stride, 0)
    for i in range(num_residual_blocks):
        w1, b1, w2, b2 = params["res"][i]
        t = jax.nn.relu(_conv2d_ref(out, w1, b1, 1, 1))
        out = out + _conv2d_ref(t, w2, b2, 1, 1)
    bf, oc, ho, wo = out.shape
    out = out.reshape(bs, f, oc, ho, wo)
    return jnp.transpose(out, (0, 2, 1, 3, 4))


# ----------------------------------------------------------------------------
# Main
# ----------------------------------------------------------------------------
if __name__ == "__main__":
    # Module config: in_dim=4, out_dim=32, kernel_size=2, stride=2, 2 res blocks.
    bs, in_dim, f, h, w = 2, 4, 2, 64, 64
    out_dim, kernel_size, stride, num_blocks = 32, 2, 2, 2

    key = jax.random.PRNGKey(0)
    keys = jax.random.split(key, 3 + 4 * num_blocks)

    x = jax.random.normal(keys[0], (bs, in_dim, f, h, w), jnp.float32)

    res_params = []
    for i in range(num_blocks):
        k0, k1, k2, k3 = keys[3 + 4 * i:3 + 4 * (i + 1)]
        res_params.append((
            jax.random.normal(k0, (out_dim, out_dim, 3, 3), jnp.float32) * 0.05,
            jax.random.normal(k1, (out_dim,), jnp.float32) * 0.05,
            jax.random.normal(k2, (out_dim, out_dim, 3, 3), jnp.float32) * 0.05,
            jax.random.normal(k3, (out_dim,), jnp.float32) * 0.05,
        ))

    params = {
        "conv_w": jax.random.normal(
            keys[1], (out_dim, in_dim * 64, kernel_size, kernel_size),
            jnp.float32) * 0.02,
        "conv_b": jax.random.normal(keys[2], (out_dim,), jnp.float32) * 0.02,
        "res": res_params,
    }

    fwd = jax.jit(functools.partial(
        wan_cam_adapter_forward,
        kernel_size=kernel_size, stride=stride, num_residual_blocks=num_blocks))

    out = fwd(x, params)
    out = jax.block_until_ready(out)

    ref = wan_cam_adapter_ref(
        x, params, kernel_size=kernel_size, stride=stride,
        num_residual_blocks=num_blocks)
    ref = jax.block_until_ready(ref)

    ho = (h // 8 - kernel_size) // stride + 1
    wo = (w // 8 - kernel_size) // stride + 1
    assert out.shape == (bs, out_dim, f, ho, wo), out.shape

    err = np.max(np.abs(np.asarray(out) - np.asarray(ref)))
    scale = np.max(np.abs(np.asarray(ref))) + 1e-6
    # Loose tolerance: bf16 MXU operands (f32 accumulation) in the Pallas path.
    assert err / scale < 5e-2, (err, scale)

    print("KERNEL_OK")
</pallas_src>

<mosaic_0001>
module attributes {stable_mosaic.version = 11 : i64} {
  func.func @_patchify_kernel(%arg0: i32, %arg1: memref<32x1024xbf16, #tpu.memory_space<vmem>>, %arg2: memref<1024x32xbf16, #tpu.memory_space<vmem>>, %arg3: memref<1x32xf32, #tpu.memory_space<vmem>>, %arg4: memref<32x32xf32, #tpu.memory_space<vmem>>) attributes {dimension_semantics = [#tpu.dimension_semantics<parallel>], iteration_bounds = array<i64: 2>, scalar_prefetch = 0 : i64, scratch_operands = 0 : i64, tpu.core_type = #tpu.core_type<tc>, window_params = [{transform_indices = @transform_0, window_bounds = array<i64: 32, 1024>}, {pipeline_mode = #tpu.pipeline_mode<synchronous>, transform_indices = @transform_1, window_bounds = array<i64: 1024, 32>}, {pipeline_mode = #tpu.pipeline_mode<synchronous>, transform_indices = @transform_2, window_bounds = array<i64: 1, 32>}, {transform_indices = @transform_3, window_bounds = array<i64: 32, 32>}]} {
    %c0 = arith.constant 0 : index
    %c0_0 = arith.constant 0 : index
    %0 = vector.load %arg1[%c0, %c0_0] : memref<32x1024xbf16, #tpu.memory_space<vmem>>, vector<32x1024xbf16>
    %c0_1 = arith.constant 0 : index
    %c0_2 = arith.constant 0 : index
    %1 = vector.load %arg2[%c0_1, %c0_2] : memref<1024x32xbf16, #tpu.memory_space<vmem>>, vector<1024x32xbf16>
    %cst = arith.constant dense<0.000000e+00> : vector<32x32xf32>
    %2 = tpu.matmul %0, %1, %cst {dimension_numbers = #tpu.dot_dimension_numbers<[1], [0], [0], [1], [0, 0, 1, 1], [], []>} : vector<32x1024xbf16>, vector<1024x32xbf16>, vector<32x32xf32> -> vector<32x32xf32>
    %c0_3 = arith.constant 0 : index
    %c0_4 = arith.constant 0 : index
    %3 = vector.load %arg3[%c0_3, %c0_4] : memref<1x32xf32, #tpu.memory_space<vmem>>, vector<1x32xf32>
    %4 = vector.broadcast %3 : vector<1x32xf32> to vector<32x32xf32>
    %5 = arith.addf %2, %4 : vector<32x32xf32>
    %c0_5 = arith.constant 0 : index
    %c0_6 = arith.constant 0 : index
    %6 = vector.load %arg4[%c0_5, %c0_6] : memref<32x32xf32, #tpu.memory_space<vmem>>, vector<32x32xf32>
    tpu.vector_store %arg4[%c0_5, %c0_6], %5 {strides = array<i32>} : memref<32x32xf32, #tpu.memory_space<vmem>>, vector<32x32xf32>,
    return
  }
  func.func @transform_0(%arg0: i32) -> (i32, i32) {
    %c0_i32 = arith.constant 0 : i32
    %c0_i32_0 = arith.constant 0 : i32
    return %arg0, %c0_i32 : i32, i32
  }
  func.func @transform_1(%arg0: i32) -> (i32, i32) {
    %c0_i32 = arith.constant 0 : i32
    %c0_i32_0 = arith.constant 0 : i32
    %c0_i32_1 = arith.constant 0 : i32
    return %c0_i32, %c0_i32_0 : i32, i32
  }
  func.func @transform_2(%arg0: i32) -> (i32, i32) {
    %c0_i32 = arith.constant 0 : i32
    %c0_i32_0 = arith.constant 0 : i32
    %c0_i32_1 = arith.constant 0 : i32
    return %c0_i32, %c0_i32_0 : i32, i32
  }
  func.func @transform_3(%arg0: i32) -> (i32, i32) {
    %c0_i32 = arith.constant 0 : i32
    %c0_i32_0 = arith.constant 0 : i32
    return %arg0, %c0_i32 : i32, i32
  }
}

module attributes {stable_mosaic.version = 11 : i64} {
  func.func @_residual_stack_kernel(%arg0: i32, %arg1: memref<72x32xf32, #tpu.memory_space<vmem>>, %arg2: memref<2x288x32xbf16, #tpu.memory_space<vmem>>, %arg3: memref<2x1x32xf32, #tpu.memory_space<vmem>>, %arg4: memref<2x288x32xbf16, #tpu.memory_space<vmem>>, %arg5: memref<2x1x32xf32, #tpu.memory_space<vmem>>, %arg6: memref<72x1xf32, #tpu.memory_space<vmem>>, %arg7: memref<72x32xf32, #tpu.memory_space<vmem>>, %arg8: memref<88x32xbf16, #tpu.memory_space<vmem>>, %arg9: memref<72x288xbf16, #tpu.memory_space<vmem>>) attributes {dimension_semantics = [#tpu.dimension_semantics<parallel>], iteration_bounds = array<i64: 2>, scalar_prefetch = 0 : i64, scratch_operands = 2 : i64, tpu.core_type = #tpu.core_type<tc>, window_params = [{transform_indices = @transform_0, window_bounds = array<i64: 72, 32>}, {pipeline_mode = #tpu.pipeline_mode<synchronous>, transform_indices = @transform_1, window_bounds = array<i64: 2, 288, 32>}, {pipeline_mode = #tpu.pipeline_mode<synchronous>, transform_indices = @transform_2, window_bounds = array<i64: 2, 1, 32>}, {pipeline_mode = #tpu.pipeline_mode<synchronous>, transform_indices = @transform_3, window_bounds = array<i64: 2, 288, 32>}, {pipeline_mode = #tpu.pipeline_mode<synchronous>, transform_indices = @transform_4, window_bounds = array<i64: 2, 1, 32>}, {pipeline_mode = #tpu.pipeline_mode<synchronous>, transform_indices = @transform_5, window_bounds = array<i64: 72, 1>}, {transform_indices = @transform_6, window_bounds = array<i64: 72, 32>}]} {
    %cst = arith.constant 0.000000e+00 : bf16
    %0 = vector.broadcast %cst : bf16 to vector<8x32xbf16>
    %c0 = arith.constant 0 : index
    %c0_0 = arith.constant 0 : index
    %1 = vector.load %arg8[%c0, %c0_0] : memref<88x32xbf16, #tpu.memory_space<vmem>>, vector<8x32xbf16>
    tpu.vector_store %arg8[%c0, %c0_0], %0 {strides = array<i32>} : memref<88x32xbf16, #tpu.memory_space<vmem>>, vector<8x32xbf16>,
    %cst_1 = arith.constant 0.000000e+00 : bf16
    %2 = vector.broadcast %cst_1 : bf16 to vector<8x32xbf16>
    %c80 = arith.constant 80 : index
    %c0_2 = arith.constant 0 : index
    %3 = vector.load %arg8[%c80, %c0_2] : memref<88x32xbf16, #tpu.memory_space<vmem>>, vector<8x32xbf16>
    tpu.vector_store %arg8[%c80, %c0_2], %2 {strides = array<i32>} : memref<88x32xbf16, #tpu.memory_space<vmem>>, vector<8x32xbf16>,
    %c0_3 = arith.constant 0 : index
    %c0_4 = arith.constant 0 : index
    %4 = vector.load %arg6[%c0_3, %c0_4] : memref<72x1xf32, #tpu.memory_space<vmem>>, vector<72x1xf32>
    %c0_5 = arith.constant 0 : index
    %c0_6 = arith.constant 0 : index
    %5 = vector.load %arg1[%c0_5, %c0_6] : memref<72x32xf32, #tpu.memory_space<vmem>>, vector<72x32xf32>
    %6 = arith.truncf %5 : vector<72x32xf32> to vector<72x32xbf16>
    %c8 = arith.constant 8 : index
    %c0_7 = arith.constant 0 : index
    %7 = vector.load %arg8[%c8, %c0_7] : memref<88x32xbf16, #tpu.memory_space<vmem>>, vector<72x32xbf16>
    tpu.vector_store %arg8[%c8, %c0_7], %6 {strides = array<i32>} : memref<88x32xbf16, #tpu.memory_space<vmem>>, vector<72x32xbf16>,
    %c1 = arith.constant 1 : index
    %c0_8 = arith.constant 0 : index
    %8 = vector.load %arg8[%c1, %c0_8] : memref<88x32xbf16, #tpu.memory_space<vmem>>, vector<72x32xbf16>
    %c0_9 = arith.constant 0 : index
    %c0_10 = arith.constant 0 : index
    %9 = vector.load %arg9[%c0_9, %c0_10] : memref<72x288xbf16, #tpu.memory_space<vmem>>, vector<72x32xbf16>
    tpu.vector_store %arg9[%c0_9, %c0_10], %8 {strides = array<i32>} : memref<72x288xbf16, #tpu.memory_space<vmem>>, vector<72x32xbf16>,
    %c2 = arith.constant 2 : index
    %c0_11 = arith.constant 0 : index
    %10 = vector.load %arg8[%c2, %c0_11] : memref<88x32xbf16, #tpu.memory_space<vmem>>, vector<72x32xbf16>
    %c0_12 = arith.constant 0 : index
    %c32 = arith.constant 32 : index
    %11 = vector.load %arg9[%c0_12, %c32] : memref<72x288xbf16, #tpu.memory_space<vmem>>, vector<72x32xbf16>
    tpu.vector_store %arg9[%c0_12, %c32], %10 {strides = array<i32>} : memref<72x288xbf16, #tpu.memory_space<vmem>>, vector<72x32xbf16>,
    %c3 = arith.constant 3 : index
    %c0_13 = arith.constant 0 : index
    %12 = vector.load %arg8[%c3, %c0_13] : memref<88x32xbf16, #tpu.memory_space<vmem>>, vector<72x32xbf16>
    %c0_14 = arith.constant 0 : index
    %c64 = arith.constant 64 : index
    %13 = vector.load %arg9[%c0_14, %c64] : memref<72x288xbf16, #tpu.memory_space<vmem>>, vector<72x32xbf16>
    tpu.vector_store %arg9[%c0_14, %c64], %12 {strides = array<i32>} : memref<72x288xbf16, #tpu.memory_space<vmem>>, vector<72x32xbf16>,
    %c7 = arith.constant 7 : index
    %c0_15 = arith.constant 0 : index
    %14 = vector.load %arg8[%c7, %c0_15] : memref<88x32xbf16, #tpu.memory_space<vmem>>, vector<72x32xbf16>
    %c0_16 = arith.constant 0 : index
    %c96 = arith.constant 96 : index
    %15 = vector.load %arg9[%c0_16, %c96] : memref<72x288xbf16, #tpu.memory_space<vmem>>, vector<72x32xbf16>
    tpu.vector_store %arg9[%c0_16, %c96], %14 {strides = array<i32>} : memref<72x288xbf16, #tpu.memory_space<vmem>>, vector<72x32xbf16>,
    %c8_17 = arith.constant 8 : index
    %c0_18 = arith.constant 0 : index
    %16 = vector.load %arg8[%c8_17, %c0_18] : memref<88x32xbf16, #tpu.memory_space<vmem>>, vector<72x32xbf16>
    %c0_19 = arith.constant 0 : index
    %c128 = arith.constant 128 : index
    %17 = vector.load %arg9[%c0_19, %c128] : memref<72x288xbf16, #tpu.memory_space<vmem>>, vector<72x32xbf16>
    tpu.vector_store %arg9[%c0_19, %c128], %16 {strides = array<i32>} : memref<72x288xbf16, #tpu.memory_space<vmem>>, vector<72x32xbf16>,
    %c9 = arith.constant 9 : index
    %c0_20 = arith.constant 0 : index
    %18 = vector.load %arg8[%c9, %c0_20] : memref<88x32xbf16, #tpu.memory_space<vmem>>, vector<72x32xbf16>
    %c0_21 = arith.constant 0 : index
    %c160 = arith.constant 160 : index
    %19 = vector.load %arg9[%c0_21, %c160] : memref<72x288xbf16, #tpu.memory_space<vmem>>, vector<72x32xbf16>
    tpu.vector_store %arg9[%c0_21, %c160], %18 {strides = array<i32>} : memref<72x288xbf16, #tpu.memory_space<vmem>>, vector<72x32xbf16>,
    %c13 = arith.constant 13 : index
    %c0_22 = arith.constant 0 : index
    %20 = vector.load %arg8[%c13, %c0_22] : memref<88x32xbf16, #tpu.memory_space<vmem>>, vector<72x32xbf16>
    %c0_23 = arith.constant 0 : index
    %c192 = arith.constant 192 : index
    %21 = vector.load %arg9[%c0_23, %c192] : memref<72x288xbf16, #tpu.memory_space<vmem>>, vector<72x32xbf16>
    tpu.vector_store %arg9[%c0_23, %c192], %20 {strides = array<i32>} : memref<72x288xbf16, #tpu.memory_space<vmem>>, vector<72x32xbf16>,
    %c14 = arith.constant 14 : index
    %c0_24 = arith.constant 0 : index
    %22 = vector.load %arg8[%c14, %c0_24] : memref<88x32xbf16, #tpu.memory_space<vmem>>, vector<72x32xbf16>
    %c0_25 = arith.constant 0 : index
    %c224 = arith.constant 224 : index
    %23 = vector.load %arg9[%c0_25, %c224] : memref<72x288xbf16, #tpu.memory_space<vmem>>, vector<72x32xbf16>
    tpu.vector_store %arg9[%c0_25, %c224], %22 {strides = array<i32>} : memref<72x288xbf16, #tpu.memory_space<vmem>>, vector<72x32xbf16>,
    %c15 = arith.constant 15 : index
    %c0_26 = arith.constant 0 : index
    %24 = vector.load %arg8[%c15, %c0_26] : memref<88x32xbf16, #tpu.memory_space<vmem>>, vector<72x32xbf16>
    %c0_27 = arith.constant 0 : index
    %c256 = arith.constant 256 : index
    %25 = vector.load %arg9[%c0_27, %c256] : memref<72x288xbf16, #tpu.memory_space<vmem>>, vector<72x32xbf16>
    tpu.vector_store %arg9[%c0_27, %c256], %24 {strides = array<i32>} : memref<72x288xbf16, #tpu.memory_space<vmem>>, vector<72x32xbf16>,
    %c0_28 = arith.constant 0 : index
    %c0_29 = arith.constant 0 : index
    %26 = vector.load %arg9[%c0_28, %c0_29] : memref<72x288xbf16, #tpu.memory_space<vmem>>, vector<72x288xbf16>
    %c0_30 = arith.constant 0 : index
    %c0_31 = arith.constant 0 : index
    %c0_32 = arith.constant 0 : index
    %27 = vector.load %arg2[%c0_30, %c0_31, %c0_32] : memref<2x288x32xbf16, #tpu.memory_space<vmem>>, vector<1x288x32xbf16>
    %28 = vector.shape_cast %27 : vector<1x288x32xbf16> to vector<288x32xbf16>
    %cst_33 = arith.constant dense<0.000000e+00> : vector<72x32xf32>
    %29 = tpu.matmul %26, %28, %cst_33 {dimension_numbers = #tpu.dot_dimension_numbers<[1], [0], [0], [1], [0, 0, 1, 1], [], []>} : vector<72x288xbf16>, vector<288x32xbf16>, vector<72x32xf32> -> vector<72x32xf32>
    %c0_34 = arith.constant 0 : index
    %c0_35 = arith.constant 0 : index
    %c0_36 = arith.constant 0 : index
    %30 = vector.load %arg3[%c0_34, %c0_35, %c0_36] : memref<2x1x32xf32, #tpu.memory_space<vmem>>, vector<1x1x32xf32>
    %31 = vector.shape_cast %30 : vector<1x1x32xf32> to vector<1x32xf32>
    %32 = vector.broadcast %31 : vector<1x32xf32> to vector<72x32xf32>
    %33 = arith.addf %29, %32 : vector<72x32xf32>
    %cst_37 = arith.constant 0.000000e+00 : f32
    %34 = vector.broadcast %cst_37 : f32 to vector<72x32xf32>
    %35 = arith.maximumf %33, %34 : vector<72x32xf32>
    %36 = vector.broadcast %4 : vector<72x1xf32> to vector<72x32xf32>
    %37 = arith.mulf %35, %36 : vector<72x32xf32>
    %38 = arith.truncf %37 : vector<72x32xf32> to vector<72x32xbf16>
    %c8_38 = arith.constant 8 : index
    %c0_39 = arith.constant 0 : index
    %39 = vector.load %arg8[%c8_38, %c0_39] : memref<88x32xbf16, #tpu.memory_space<vmem>>, vector<72x32xbf16>
    tpu.vector_store %arg8[%c8_38, %c0_39], %38 {strides = array<i32>} : memref<88x32xbf16, #tpu.memory_space<vmem>>, vector<72x32xbf16>,
    %c1_40 = arith.constant 1 : index
    %c0_41 = arith.constant 0 : index
    %40 = vector.load %arg8[%c1_40, %c0_41] : memref<88x32xbf16, #tpu.memory_space<vmem>>, vector<72x32xbf16>
    %c0_42 = arith.constant 0 : index
    %c0_43 = arith.constant 0 : index
    %41 = vector.load %arg9[%c0_42, %c0_43] : memref<72x288xbf16, #tpu.memory_space<vmem>>, vector<72x32xbf16>
    tpu.vector_store %arg9[%c0_42, %c0_43], %40 {strides = array<i32>} : memref<72x288xbf16, #tpu.memory_space<vmem>>, vector<72x32xbf16>,
    %c2_44 = arith.constant 2 : index
    %c0_45 = arith.constant 0 : index
    %42 = vector.load %arg8[%c2_44, %c0_45] : memref<88x32xbf16, #tpu.memory_space<vmem>>, vector<72x32xbf16>
    %c0_46 = arith.constant 0 : index
    %c32_47 = arith.constant 32 : index
    %43 = vector.load %arg9[%c0_46, %c32_47] : memref<72x288xbf16, #tpu.memory_space<vmem>>, vector<72x32xbf16>
    tpu.vector_store %arg9[%c0_46, %c32_47], %42 {strides = array<i32>} : memref<72x288xbf16, #tpu.memory_space<vmem>>, vector<72x32xbf16>,
    %c3_48 = arith.constant 3 : index
    %c0_49 = arith.constant 0 : index
    %44 = vector.load %arg8[%c3_48, %c0_49] : memref<88x32xbf16, #tpu.memory_space<vmem>>, vector<72x32xbf16>
    %c0_50 = arith.constant 0 : index
    %c64_51 = arith.constant 64 : index
    %45 = vector.load %arg9[%c0_50, %c64_51] : memref<72x288xbf16, #tpu.memory_space<vmem>>, vector<72x32xbf16>
    tpu.vector_store %arg9[%c0_50, %c64_51], %44 {strides = array<i32>} : memref<72x288xbf16, #tpu.memory_space<vmem>>, vector<72x32xbf16>,
    %c7_52 = arith.constant 7 : index
    %c0_53 = arith.constant 0 : index
    %46 = vector.load %arg8[%c7_52, %c0_53] : memref<88x32xbf16, #tpu.memory_space<vmem>>, vector<72x32xbf16>
    %c0_54 = arith.constant 0 : index
    %c96_55 = arith.constant 96 : index
    %47 = vector.load %arg9[%c0_54, %c96_55] : memref<72x288xbf16, #tpu.memory_space<vmem>>, vector<72x32xbf16>
    tpu.vector_store %arg9[%c0_54, %c96_55], %46 {strides = array<i32>} : memref<72x288xbf16, #tpu.memory_space<vmem>>, vector<72x32xbf16>,
    %c8_56 = arith.constant 8 : index
    %c0_57 = arith.constant 0 : index
    %48 = vector.load %arg8[%c8_56, %c0_57] : memref<88x32xbf16, #tpu.memory_space<vmem>>, vector<72x32xbf16>
    %c0_58 = arith.constant 0 : index
    %c128_59 = arith.constant 128 : index
    %49 = vector.load %arg9[%c0_58, %c128_59] : memref<72x288xbf16, #tpu.memory_space<vmem>>, vector<72x32xbf16>
    tpu.vector_store %arg9[%c0_58, %c128_59], %48 {strides = array<i32>} : memref<72x288xbf16, #tpu.memory_space<vmem>>, vector<72x32xbf16>,
    %c9_60 = arith.constant 9 : index
    %c0_61 = arith.constant 0 : index
    %50 = vector.load %arg8[%c9_60, %c0_61] : memref<88x32xbf16, #tpu.memory_space<vmem>>, vector<72x32xbf16>
    %c0_62 = arith.constant 0 : index
    %c160_63 = arith.constant 160 : index
    %51 = vector.load %arg9[%c0_62, %c160_63] : memref<72x288xbf16, #tpu.memory_space<vmem>>, vector<72x32xbf16>
    tpu.vector_store %arg9[%c0_62, %c160_63], %50 {strides = array<i32>} : memref<72x288xbf16, #tpu.memory_space<vmem>>, vector<72x32xbf16>,
    %c13_64 = arith.constant 13 : index
    %c0_65 = arith.constant 0 : index
    %52 = vector.load %arg8[%c13_64, %c0_65] : memref<88x32xbf16, #tpu.memory_space<vmem>>, vector<72x32xbf16>
    %c0_66 = arith.constant 0 : index
    %c192_67 = arith.constant 192 : index
    %53 = vector.load %arg9[%c0_66, %c192_67] : memref<72x288xbf16, #tpu.memory_space<vmem>>, vector<72x32xbf16>
    tpu.vector_store %arg9[%c0_66, %c192_67], %52 {strides = array<i32>} : memref<72x288xbf16, #tpu.memory_space<vmem>>, vector<72x32xbf16>,
    %c14_68 = arith.constant 14 : index
    %c0_69 = arith.constant 0 : index
    %54 = vector.load %arg8[%c14_68, %c0_69] : memref<88x32xbf16, #tpu.memory_space<vmem>>, vector<72x32xbf16>
    %c0_70 = arith.constant 0 : index
    %c224_71 = arith.constant 224 : index
    %55 = vector.load %arg9[%c0_70, %c224_71] : memref<72x288xbf16, #tpu.memory_space<vmem>>, vector<72x32xbf16>
    tpu.vector_store %arg9[%c0_70, %c224_71], %54 {strides = array<i32>} : memref<72x288xbf16, #tpu.memory_space<vmem>>, vector<72x32xbf16>,
    %c15_72 = arith.constant 15 : index
    %c0_73 = arith.constant 0 : index
    %56 = vector.load %arg8[%c15_72, %c0_73] : memref<88x32xbf16, #tpu.memory_space<vmem>>, vector<72x32xbf16>
    %c0_74 = arith.constant 0 : index
    %c256_75 = arith.constant 256 : index
    %57 = vector.load %arg9[%c0_74, %c256_75] : memref<72x288xbf16, #tpu.memory_space<vmem>>, vector<72x32xbf16>
    tpu.vector_store %arg9[%c0_74, %c256_75], %56 {strides = array<i32>} : memref<72x288xbf16, #tpu.memory_space<vmem>>, vector<72x32xbf16>,
    %c0_76 = arith.constant 0 : index
    %c0_77 = arith.constant 0 : index
    %58 = vector.load %arg9[%c0_76, %c0_77] : memref<72x288xbf16, #tpu.memory_space<vmem>>, vector<72x288xbf16>
    %c0_78 = arith.constant 0 : index
    %c0_79 = arith.constant 0 : index
    %c0_80 = arith.constant 0 : index
    %59 = vector.load %arg4[%c0_78, %c0_79, %c0_80] : memref<2x288x32xbf16, #tpu.memory_space<vmem>>, vector<1x288x32xbf16>
    %60 = vector.shape_cast %59 : vector<1x288x32xbf16> to vector<288x32xbf16>
    %cst_81 = arith.constant dense<0.000000e+00> : vector<72x32xf32>
    %61 = tpu.matmul %58, %60, %cst_81 {dimension_numbers = #tpu.dot_dimension_numbers<[1], [0], [0], [1], [0, 0, 1, 1], [], []>} : vector<72x288xbf16>, vector<288x32xbf16>, vector<72x32xf32> -> vector<72x32xf32>
    %c0_82 = arith.constant 0 : index
    %c0_83 = arith.constant 0 : index
    %c0_84 = arith.constant 0 : index
    %62 = vector.load %arg5[%c0_82, %c0_83, %c0_84] : memref<2x1x32xf32, #tpu.memory_space<vmem>>, vector<1x1x32xf32>
    %63 = vector.shape_cast %62 : vector<1x1x32xf32> to vector<1x32xf32>
    %64 = vector.broadcast %63 : vector<1x32xf32> to vector<72x32xf32>
    %65 = arith.addf %61, %64 : vector<72x32xf32>
    %c0_85 = arith.constant 0 : index
    %c0_86 = arith.constant 0 : index
    %66 = vector.load %arg1[%c0_85, %c0_86] : memref<72x32xf32, #tpu.memory_space<vmem>>, vector<72x32xf32>
    %67 = arith.addf %65, %66 : vector<72x32xf32>
    %68 = vector.broadcast %4 : vector<72x1xf32> to vector<72x32xf32>
    %69 = arith.mulf %67, %68 : vector<72x32xf32>
    %c0_87 = arith.constant 0 : index
    %c0_88 = arith.constant 0 : index
    %70 = vector.load %arg7[%c0_87, %c0_88] : memref<72x32xf32, #tpu.memory_space<vmem>>, vector<72x32xf32>
    tpu.vector_store %arg7[%c0_87, %c0_88], %69 {strides = array<i32>} : memref<72x32xf32, #tpu.memory_space<vmem>>, vector<72x32xf32>,
    %71 = arith.truncf %69 : vector<72x32xf32> to vector<72x32xbf16>
    %c8_89 = arith.constant 8 : index
    %c0_90 = arith.constant 0 : index
    %72 = vector.load %arg8[%c8_89, %c0_90] : memref<88x32xbf16, #tpu.memory_space<vmem>>, vector<72x32xbf16>
    tpu.vector_store %arg8[%c8_89, %c0_90], %71 {strides = array<i32>} : memref<88x32xbf16, #tpu.memory_space<vmem>>, vector<72x32xbf16>,
    %c1_91 = arith.constant 1 : index
    %c0_92 = arith.constant 0 : index
    %73 = vector.load %arg8[%c1_91, %c0_92] : memref<88x32xbf16, #tpu.memory_space<vmem>>, vector<72x32xbf16>
    %c0_93 = arith.constant 0 : index
    %c0_94 = arith.constant 0 : index
    %74 = vector.load %arg9[%c0_93, %c0_94] : memref<72x288xbf16, #tpu.memory_space<vmem>>, vector<72x32xbf16>
    tpu.vector_store %arg9[%c0_93, %c0_94], %73 {strides = array<i32>} : memref<72x288xbf16, #tpu.memory_space<vmem>>, vector<72x32xbf16>,
    %c2_95 = arith.constant 2 : index
    %c0_96 = arith.constant 0 : index
    %75 = vector.load %arg8[%c2_95, %c0_96] : memref<88x32xbf16, #tpu.memory_space<vmem>>, vector<72x32xbf16>
    %c0_97 = arith.constant 0 : index
    %c32_98 = arith.constant 32 : index
    %76 = vector.load %arg9[%c0_97, %c32_98] : memref<72x288xbf16, #tpu.memory_space<vmem>>, vector<72x32xbf16>
    tpu.vector_store %arg9[%c0_97, %c32_98], %75 {strides = array<i32>} : memref<72x288xbf16, #tpu.memory_space<vmem>>, vector<72x32xbf16>,
    %c3_99 = arith.constant 3 : index
    %c0_100 = arith.constant 0 : index
    %77 = vector.load %arg8[%c3_99, %c0_100] : memref<88x32xbf16, #tpu.memory_space<vmem>>, vector<72x32xbf16>
    %c0_101 = arith.constant 0 : index
    %c64_102 = arith.constant 64 : index
    %78 = vector.load %arg9[%c0_101, %c64_102] : memref<72x288xbf16, #tpu.memory_space<vmem>>, vector<72x32xbf16>
    tpu.vector_store %arg9[%c0_101, %c64_102], %77 {strides = array<i32>} : memref<72x288xbf16, #tpu.memory_space<vmem>>, vector<72x32xbf16>,
    %c7_103 = arith.constant 7 : index
    %c0_104 = arith.constant 0 : index
    %79 = vector.load %arg8[%c7_103, %c0_104] : memref<88x32xbf16, #tpu.memory_space<vmem>>, vector<72x32xbf16>
    %c0_105 = arith.constant 0 : index
    %c96_106 = arith.constant 96 : index
    %80 = vector.load %arg9[%c0_105, %c96_106] : memref<72x288xbf16, #tpu.memory_space<vmem>>, vector<72x32xbf16>
    tpu.vector_store %arg9[%c0_105, %c96_106], %79 {strides = array<i32>} : memref<72x288xbf16, #tpu.memory_space<vmem>>, vector<72x32xbf16>,
    %c8_107 = arith.constant 8 : index
    %c0_108 = arith.constant 0 : index
    %81 = vector.load %arg8[%c8_107, %c0_108] : memref<88x32xbf16, #tpu.memory_space<vmem>>, vector<72x32xbf16>
    %c0_109 = arith.constant 0 : index
    %c128_110 = arith.constant 128 : index
    %82 = vector.load %arg9[%c0_109, %c128_110] : memref<72x288xbf16, #tpu.memory_space<vmem>>, vector<72x32xbf16>
    tpu.vector_store %arg9[%c0_109, %c128_110], %81 {strides = array<i32>} : memref<72x288xbf16, #tpu.memory_space<vmem>>, vector<72x32xbf16>,
    %c9_111 = arith.constant 9 : index
    %c0_112 = arith.constant 0 : index
    %83 = vector.load %arg8[%c9_111, %c0_112] : memref<88x32xbf16, #tpu.memory_space<vmem>>, vector<72x32xbf16>
    %c0_113 = arith.constant 0 : index
    %c160_114 = arith.constant 160 : index
    %84 = vector.load %arg9[%c0_113, %c160_114] : memref<72x288xbf16, #tpu.memory_space<vmem>>, vector<72x32xbf16>
    tpu.vector_store %arg9[%c0_113, %c160_114], %83 {strides = array<i32>} : memref<72x288xbf16, #tpu.memory_space<vmem>>, vector<72x32xbf16>,
    %c13_115 = arith.constant 13 : index
    %c0_116 = arith.constant 0 : index
    %85 = vector.load %arg8[%c13_115, %c0_116] : memref<88x32xbf16, #tpu.memory_space<vmem>>, vector<72x32xbf16>
    %c0_117 = arith.constant 0 : index
    %c192_118 = arith.constant 192 : index
    %86 = vector.load %arg9[%c0_117, %c192_118] : memref<72x288xbf16, #tpu.memory_space<vmem>>, vector<72x32xbf16>
    tpu.vector_store %arg9[%c0_117, %c192_118], %85 {strides = array<i32>} : memref<72x288xbf16, #tpu.memory_space<vmem>>, vector<72x32xbf16>,
    %c14_119 = arith.constant 14 : index
    %c0_120 = arith.constant 0 : index
    %87 = vector.load %arg8[%c14_119, %c0_120] : memref<88x32xbf16, #tpu.memory_space<vmem>>, vector<72x32xbf16>
    %c0_121 = arith.constant 0 : index
    %c224_122 = arith.constant 224 : index
    %88 = vector.load %arg9[%c0_121, %c224_122] : memref<72x288xbf16, #tpu.memory_space<vmem>>, vector<72x32xbf16>
    tpu.vector_store %arg9[%c0_121, %c224_122], %87 {strides = array<i32>} : memref<72x288xbf16, #tpu.memory_space<vmem>>, vector<72x32xbf16>,
    %c15_123 = arith.constant 15 : index
    %c0_124 = arith.constant 0 : index
    %89 = vector.load %arg8[%c15_123, %c0_124] : memref<88x32xbf16, #tpu.memory_space<vmem>>, vector<72x32xbf16>
    %c0_125 = arith.constant 0 : index
    %c256_126 = arith.constant 256 : index
    %90 = vector.load %arg9[%c0_125, %c256_126] : memref<72x288xbf16, #tpu.memory_space<vmem>>, vector<72x32xbf16>
    tpu.vector_store %arg9[%c0_125, %c256_126], %89 {strides = array<i32>} : memref<72x288xbf16, #tpu.memory_space<vmem>>, vector<72x32xbf16>,
    %c0_127 = arith.constant 0 : index
    %c0_128 = arith.constant 0 : index
    %91 = vector.load %arg9[%c0_127, %c0_128] : memref<72x288xbf16, #tpu.memory_space<vmem>>, vector<72x288xbf16>
    %c1_129 = arith.constant 1 : index
    %c0_130 = arith.constant 0 : index
    %c0_131 = arith.constant 0 : index
    %92 = vector.load %arg2[%c1_129, %c0_130, %c0_131] : memref<2x288x32xbf16, #tpu.memory_space<vmem>>, vector<1x288x32xbf16>
    %93 = vector.shape_cast %92 : vector<1x288x32xbf16> to vector<288x32xbf16>
    %cst_132 = arith.constant dense<0.000000e+00> : vector<72x32xf32>
    %94 = tpu.matmul %91, %93, %cst_132 {dimension_numbers = #tpu.dot_dimension_numbers<[1], [0], [0], [1], [0, 0, 1, 1], [], []>} : vector<72x288xbf16>, vector<288x32xbf16>, vector<72x32xf32> -> vector<72x32xf32>
    %c1_133 = arith.constant 1 : index
    %c0_134 = arith.constant 0 : index
    %c0_135 = arith.constant 0 : index
    %95 = vector.load %arg3[%c1_133, %c0_134, %c0_135] : memref<2x1x32xf32, #tpu.memory_space<vmem>>, vector<1x1x32xf32>
    %96 = vector.shape_cast %95 : vector<1x1x32xf32> to vector<1x32xf32>
    %97 = vector.broadcast %96 : vector<1x32xf32> to vector<72x32xf32>
    %98 = arith.addf %94, %97 : vector<72x32xf32>
    %cst_136 = arith.constant 0.000000e+00 : f32
    %99 = vector.broadcast %cst_136 : f32 to vector<72x32xf32>
    %100 = arith.maximumf %98, %99 : vector<72x32xf32>
    %101 = vector.broadcast %4 : vector<72x1xf32> to vector<72x32xf32>
    %102 = arith.mulf %100, %101 : vector<72x32xf32>
    %103 = arith.truncf %102 : vector<72x32xf32> to vector<72x32xbf16>
    %c8_137 = arith.constant 8 : index
    %c0_138 = arith.constant 0 : index
    %104 = vector.load %arg8[%c8_137, %c0_138] : memref<88x32xbf16, #tpu.memory_space<vmem>>, vector<72x32xbf16>
    tpu.vector_store %arg8[%c8_137, %c0_138], %103 {strides = array<i32>} : memref<88x32xbf16, #tpu.memory_space<vmem>>, vector<72x32xbf16>,
    %c1_139 = arith.constant 1 : index
    %c0_140 = arith.constant 0 : index
    %105 = vector.load %arg8[%c1_139, %c0_140] : memref<88x32xbf16, #tpu.memory_space<vmem>>, vector<72x32xbf16>
    %c0_141 = arith.constant 0 : index
    %c0_142 = arith.constant 0 : index
    %106 = vector.load %arg9[%c0_141, %c0_142] : memref<72x288xbf16, #tpu.memory_space<vmem>>, vector<72x32xbf16>
    tpu.vector_store %arg9[%c0_141, %c0_142], %105 {strides = array<i32>} : memref<72x288xbf16, #tpu.memory_space<vmem>>, vector<72x32xbf16>,
    %c2_143 = arith.constant 2 : index
    %c0_144 = arith.constant 0 : index
    %107 = vector.load %arg8[%c2_143, %c0_144] : memref<88x32xbf16, #tpu.memory_space<vmem>>, vector<72x32xbf16>
    %c0_145 = arith.constant 0 : index
    %c32_146 = arith.constant 32 : index
    %108 = vector.load %arg9[%c0_145, %c32_146] : memref<72x288xbf16, #tpu.memory_space<vmem>>, vector<72x32xbf16>
    tpu.vector_store %arg9[%c0_145, %c32_146], %107 {strides = array<i32>} : memref<72x288xbf16, #tpu.memory_space<vmem>>, vector<72x32xbf16>,
    %c3_147 = arith.constant 3 : index
    %c0_148 = arith.constant 0 : index
    %109 = vector.load %arg8[%c3_147, %c0_148] : memref<88x32xbf16, #tpu.memory_space<vmem>>, vector<72x32xbf16>
    %c0_149 = arith.constant 0 : index
    %c64_150 = arith.constant 64 : index
    %110 = vector.load %arg9[%c0_149, %c64_150] : memref<72x288xbf16, #tpu.memory_space<vmem>>, vector<72x32xbf16>
    tpu.vector_store %arg9[%c0_149, %c64_150], %109 {strides = array<i32>} : memref<72x288xbf16, #tpu.memory_space<vmem>>, vector<72x32xbf16>,
    %c7_151 = arith.constant 7 : index
    %c0_152 = arith.constant 0 : index
    %111 = vector.load %arg8[%c7_151, %c0_152] : memref<88x32xbf16, #tpu.memory_space<vmem>>, vector<72x32xbf16>
    %c0_153 = arith.constant 0 : index
    %c96_154 = arith.constant 96 : index
    %112 = vector.load %arg9[%c0_153, %c96_154] : memref<72x288xbf16, #tpu.memory_space<vmem>>, vector<72x32xbf16>
    tpu.vector_store %arg9[%c0_153, %c96_154], %111 {strides = array<i32>} : memref<72x288xbf16, #tpu.memory_space<vmem>>, vector<72x32xbf16>,
    %c8_155 = arith.constant 8 : index
    %c0_156 = arith.constant 0 : index
    %113 = vector.load %arg8[%c8_155, %c0_156] : memref<88x32xbf16, #tpu.memory_space<vmem>>, vector<72x32xbf16>
    %c0_157 = arith.constant 0 : index
    %c128_158 = arith.constant 128 : index
    %114 = vector.load %arg9[%c0_157, %c128_158] : memref<72x288xbf16, #tpu.memory_space<vmem>>, vector<72x32xbf16>
    tpu.vector_store %arg9[%c0_157, %c128_158], %113 {strides = array<i32>} : memref<72x288xbf16, #tpu.memory_space<vmem>>, vector<72x32xbf16>,
    %c9_159 = arith.constant 9 : index
    %c0_160 = arith.constant 0 : index
    %115 = vector.load %arg8[%c9_159, %c0_160] : memref<88x32xbf16, #tpu.memory_space<vmem>>, vector<72x32xbf16>
    %c0_161 = arith.constant 0 : index
    %c160_162 = arith.constant 160 : index
    %116 = vector.load %arg9[%c0_161, %c160_162] : memref<72x288xbf16, #tpu.memory_space<vmem>>, vector<72x32xbf16>
    tpu.vector_store %arg9[%c0_161, %c160_162], %115 {strides = array<i32>} : memref<72x288xbf16, #tpu.memory_space<vmem>>, vector<72x32xbf16>,
    %c13_163 = arith.constant 13 : index
    %c0_164 = arith.constant 0 : index
    %117 = vector.load %arg8[%c13_163, %c0_164] : memref<88x32xbf16, #tpu.memory_space<vmem>>, vector<72x32xbf16>
    %c0_165 = arith.constant 0 : index
    %c192_166 = arith.constant 192 : index
    %118 = vector.load %arg9[%c0_165, %c192_166] : memref<72x288xbf16, #tpu.memory_space<vmem>>, vector<72x32xbf16>
    tpu.vector_store %arg9[%c0_165, %c192_166], %117 {strides = array<i32>} : memref<72x288xbf16, #tpu.memory_space<vmem>>, vector<72x32xbf16>,
    %c14_167 = arith.constant 14 : index
    %c0_168 = arith.constant 0 : index
    %119 = vector.load %arg8[%c14_167, %c0_168] : memref<88x32xbf16, #tpu.memory_space<vmem>>, vector<72x32xbf16>
    %c0_169 = arith.constant 0 : index
    %c224_170 = arith.constant 224 : index
    %120 = vector.load %arg9[%c0_169, %c224_170] : memref<72x288xbf16, #tpu.memory_space<vmem>>, vector<72x32xbf16>
    tpu.vector_store %arg9[%c0_169, %c224_170], %119 {strides = array<i32>} : memref<72x288xbf16, #tpu.memory_space<vmem>>, vector<72x32xbf16>,
    %c15_171 = arith.constant 15 : index
    %c0_172 = arith.constant 0 : index
    %121 = vector.load %arg8[%c15_171, %c0_172] : memref<88x32xbf16, #tpu.memory_space<vmem>>, vector<72x32xbf16>
    %c0_173 = arith.constant 0 : index
    %c256_174 = arith.constant 256 : index
    %122 = vector.load %arg9[%c0_173, %c256_174] : memref<72x288xbf16, #tpu.memory_space<vmem>>, vector<72x32xbf16>
    tpu.vector_store %arg9[%c0_173, %c256_174], %121 {strides = array<i32>} : memref<72x288xbf16, #tpu.memory_space<vmem>>, vector<72x32xbf16>,
    %c0_175 = arith.constant 0 : index
    %c0_176 = arith.constant 0 : index
    %123 = vector.load %arg9[%c0_175, %c0_176] : memref<72x288xbf16, #tpu.memory_space<vmem>>, vector<72x288xbf16>
    %c1_177 = arith.constant 1 : index
    %c0_178 = arith.constant 0 : index
    %c0_179 = arith.constant 0 : index
    %124 = vector.load %arg4[%c1_177, %c0_178, %c0_179] : memref<2x288x32xbf16, #tpu.memory_space<vmem>>, vector<1x288x32xbf16>
    %125 = vector.shape_cast %124 : vector<1x288x32xbf16> to vector<288x32xbf16>
    %cst_180 = arith.constant dense<0.000000e+00> : vector<72x32xf32>
    %126 = tpu.matmul %123, %125, %cst_180 {dimension_numbers = #tpu.dot_dimension_numbers<[1], [0], [0], [1], [0, 0, 1, 1], [], []>} : vector<72x288xbf16>, vector<288x32xbf16>, vector<72x32xf32> -> vector<72x32xf32>
    %c1_181 = arith.constant 1 : index
    %c0_182 = arith.constant 0 : index
    %c0_183 = arith.constant 0 : index
    %127 = vector.load %arg5[%c1_181, %c0_182, %c0_183] : memref<2x1x32xf32, #tpu.memory_space<vmem>>, vector<1x1x32xf32>
    %128 = vector.shape_cast %127 : vector<1x1x32xf32> to vector<1x32xf32>
    %129 = vector.broadcast %128 : vector<1x32xf32> to vector<72x32xf32>
    %130 = arith.addf %126, %129 : vector<72x32xf32>
    %c0_184 = arith.constant 0 : index
    %c0_185 = arith.constant 0 : index
    %131 = vector.load %arg7[%c0_184, %c0_185] : memref<72x32xf32, #tpu.memory_space<vmem>>, vector<72x32xf32>
    %132 = arith.addf %130, %131 : vector<72x32xf32>
    %133 = vector.broadcast %4 : vector<72x1xf32> to vector<72x32xf32>
    %134 = arith.mulf %132, %133 : vector<72x32xf32>
    %c0_186 = arith.constant 0 : index
    %c0_187 = arith.constant 0 : index
    %135 = vector.load %arg7[%c0_186, %c0_187] : memref<72x32xf32, #tpu.memory_space<vmem>>, vector<72x32xf32>
    tpu.vector_store %arg7[%c0_186, %c0_187], %134 {strides = array<i32>} : memref<72x32xf32, #tpu.memory_space<vmem>>, vector<72x32xf32>,
    return
  }
  func.func @transform_0(%arg0: i32) -> (i32, i32) {
    %c0_i32 = arith.constant 0 : i32
    %c0_i32_0 = arith.constant 0 : i32
    return %arg0, %c0_i32 : i32, i32
  }
  func.func @transform_1(%arg0: i32) -> (i32, i32, i32) {
    %c0_i32 = arith.constant 0 : i32
    %c0_i32_0 = arith.constant 0 : i32
    %c0_i32_1 = arith.constant 0 : i32
    %c0_i32_2 = arith.constant 0 : i32
    return %c0_i32, %c0_i32_0, %c0_i32_1 : i32, i32, i32
  }
  func.func @transform_2(%arg0: i32) -> (i32, i32, i32) {
    %c0_i32 = arith.constant 0 : i32
    %c0_i32_0 = arith.constant 0 : i32
    %c0_i32_1 = arith.constant 0 : i32
    %c0_i32_2 = arith.constant 0 : i32
    return %c0_i32, %c0_i32_0, %c0_i32_1 : i32, i32, i32
  }
  func.func @transform_3(%arg0: i32) -> (i32, i32, i32) {
    %c0_i32 = arith.constant 0 : i32
    %c0_i32_0 = arith.constant 0 : i32
    %c0_i32_1 = arith.constant 0 : i32
    %c0_i32_2 = arith.constant 0 : i32
    return %c0_i32, %c0_i32_0, %c0_i32_1 : i32, i32, i32
  }
  func.func @transform_4(%arg0: i32) -> (i32, i32, i32) {
    %c0_i32 = arith.constant 0 : i32
    %c0_i32_0 = arith.constant 0 : i32
    %c0_i32_1 = arith.constant 0 : i32
    %c0_i32_2 = arith.constant 0 : i32
    return %c0_i32, %c0_i32_0, %c0_i32_1 : i32, i32, i32
  }
  func.func @transform_5(%arg0: i32) -> (i32, i32) {
    %c0_i32 = arith.constant 0 : i32
    %c0_i32_0 = arith.constant 0 : i32
    %c0_i32_1 = arith.constant 0 : i32
    return %c0_i32, %c0_i32_0 : i32, i32
  }
  func.func @transform_6(%arg0: i32) -> (i32, i32) {
    %c0_i32 = arith.constant 0 : i32
    %c0_i32_0 = arith.constant 0 : i32
    return %arg0, %c0_i32 : i32, i32
  }
}

</mosaic_0001>

<bundles_post_ra>
// kernel: wan_cam_adapter_forward.2
= control target key start
LH: loop header
LB: loop body
LE: loop exit
PB: predicated region body
PF: predicated region fallthrough
CT: control target
= control target key end

     0   :  { %s1356_s12 = smov 0   ;;  %s1596_s0 = inlined_call_operand.vmem [shape: bf16[64,1024], index: 0, kind: input, shape index: {}]   ;;  %s1597_s1 = inlined_call_operand.vmem [shape: bf16[1024,32], index: 1, kind: input, shape index: {}]   ;;  %s1598_s2 = inlined_call_operand.vmem [shape: f32[1,32], index: 2, kind: input, shape index: {}]   ;;  %s1599_s3 = inlined_call_operand.vmem [shape: f32[64,32], index: 3, kind: output, shape index: {}]  }
   0x1 LB: > { %s1050_s13 = sadd.s32 4294967295, %s1334_s12   ;;  %p1054_p0 = scmp.ge.s32.totalorder %s1334_s12, 1  ;;  %s1334_s12 = sphi %s1356_s12, %s13_s12  }
   0x2   : > { %p139_p1 = scmp.lt.s32.totalorder %s1334_s12, 3 }
   0x4   : > { %p140_p2 = pnand %p1054_p0, %p139_p1 }
   0x5   : > { %v1264_v0 = vld [vmem:[%s1597_s1 + $0x40] sm:$0xff] (!%p140_p2)   ;;  %v1268_v4 = vld [vmem:[%s1597_s1 + $0x48] sm:$0xff] (!%p140_p2)   ;;  %v1272_v8 = vld [vmem:[%s1597_s1 + $0x50] sm:$0xff] (!%p140_p2)   ;;  %s1055_s21 = sshll.u32 (!%p140_p2), %s1050_s13, 2  ;;  %vm989_vm0 = vcmask (!%p140_p2), 261120  }
   0x6   : > { %143 = sbr.rel (%p140_p2) target bundleno = 301 (0x12d), region = 32  ;;  %v1265_v1 = vld [vmem:[%s1597_s1 + $0xc0] sm:$0xff] (!%p140_p2)   ;;  %1144 = vmatprep.subr.bf16.mxu0 (!%p140_p2), %v1264_v0  ;;  %v1269_v5 = vld [vmem:[%s1597_s1 + $0xc8] sm:$0xff] (!%p140_p2)   ;;  %v1273_v9 = vld [vmem:[%s1597_s1 + $0xd0] sm:$0xff] (!%p140_p2)   ;;  %p165_p3 = scmp.lt.s32.totalorder (!%p140_p2), %s1055_s21, 7 }
   0x7   : > { %v1266_v2 = vld [vmem:[%s1597_s1] sm:$0xff] (!%p140_p2)   ;;  %1172 = vmatprep.subr.bf16.mxu1 (!%p140_p2), %v1265_v1  ;;  %v1270_v6 = vld [vmem:[%s1597_s1 + $0x8] sm:$0xff] (!%p140_p2)   ;;  %v1274_v10 = vld [vmem:[%s1597_s1 + $0x10] sm:$0xff] (!%p140_p2)  }
   0x8   : > { %v1267_v3 = vld [vmem:[%s1597_s1 + $0x80] sm:$0xff] (!%p140_p2)   ;;  %1145 = vmatpush3.bf16.msra.mxu0 (!%p140_p2), %v1266_v2  ;;  %v1271_v7 = vld [vmem:[%s1597_s1 + $0x88] sm:$0xff] (!%p140_p2)   ;;  %v1275_v11 = vld [vmem:[%s1597_s1 + $0x90] sm:$0xff] (!%p140_p2)  }
   0x9   : > { %1173 = vmatpush3.bf16.msra.mxu1 (!%p140_p2), %v1267_v3  ;;  %1146 = vmatprep.subr.bf16.mxu0 (!%p140_p2), %v1268_v4  ;;  %v1276_v12 = vld [vmem:[%s1597_s1 + $0x58] sm:$0xff] (!%p140_p2)   ;;  %v1280_v16 = vld [vmem:[%s1597_s1 + $0x60] sm:$0xff] (!%p140_p2)   ;;  %v1284_v20 = vld [vmem:[%s1597_s1 + $0x68] sm:$0xff] (!%p140_p2)  }
   0xa   : > { %1174 = vmatprep.subr.bf16.mxu1 (!%p140_p2), %v1269_v5  ;;  %v1277_v13 = vld [vmem:[%s1597_s1 + $0xd8] sm:$0xff] (!%p140_p2)   ;;  %v1281_v17 = vld [vmem:[%s1597_s1 + $0xe0] sm:$0xff] (!%p140_p2)   ;;  %v1285_v21 = vld [vmem:[%s1597_s1 + $0xe8] sm:$0xff] (!%p140_p2)  }
   0xb   : > { %v1278_v14 = vld [vmem:[%s1597_s1 + $0x18] sm:$0xff] (!%p140_p2)   ;;  %v1282_v18 = vld [vmem:[%s1597_s1 + $0x20] sm:$0xff] (!%p140_p2)   ;;  %v1286_v22 = vld [vmem:[%s1597_s1 + $0x28] sm:$0xff] (!%p140_p2)  }
   0xc   : > { %1147 = vmatpush3.bf16.msra.mxu0 (!%p140_p2), %v1270_v6  ;;  %v1279_v15 = vld [vmem:[%s1597_s1 + $0x98] sm:$0xff] (!%p140_p2)   ;;  %v1283_v19 = vld [vmem:[%s1597_s1 + $0xa0] sm:$0xff] (!%p140_p2)   ;;  %v1287_v23 = vld [vmem:[%s1597_s1 + $0xa8] sm:$0xff] (!%p140_p2)  }
   0xd   : > { %1175 = vmatpush3.bf16.msra.mxu1 %v1271_v7  ;;  %1148 = vmatprep.subr.bf16.mxu0 %v1272_v8  ;;  %s1601_s21 = smov (!%p165_p3, %s1055_s21), 7  ;;  %v1288_v24 = vld [vmem:[%s1597_s1 + $0x70] sm:$0xff]   ;;  %v1292_v28 = vld [vmem:[%s1597_s1 + $0x78] sm:$0xff]   ;;  %v1296_v40 = vld [vmem:[%s1597_s1 + $0x140] sm:$0xff]  }
   0xe   : > { %1176 = vmatprep.subr.bf16.mxu1 %v1273_v9  ;;  %v1289_v25 = vld [vmem:[%s1597_s1 + $0xf0] sm:$0xff]   ;;  %s1143_s18 = sshll.u32 %s1601_s21, 5  ;;  %v1293_v29 = vld [vmem:[%s1597_s1 + $0xf8] sm:$0xff]   ;;  %v1297_v41 = vld [vmem:[%s1597_s1 + $0x1c0] sm:$0xff]  }
   0xf   : > { %v1290_v26 = vld [vmem:[%s1597_s1 + $0x30] sm:$0xff]   ;;  %s1462_s28 = scalar_lea.vmem %s1596_s0, %s1143_s18  ;;  %v1294_v30 = vld [vmem:[%s1597_s1 + $0x38] sm:$0xff]   ;;  %v1298_v42 = vld [vmem:[%s1597_s1 + $0x100] sm:$0xff]  }
  0x10   : > { %1149 = vmatpush3.bf16.msra.mxu0 %v1274_v10  ;;  %v1291_v27 = vld [vmem:[%s1597_s1 + $0xb0] sm:$0xff]   ;;  %v1295_v31 = vld [vmem:[%s1597_s1 + $0xb8] sm:$0xff]   ;;  %v178_v32 = vld [vmem:[%s1462_s28] sm:$0xff] }
  0x11   : > { %1177 = vmatpush3.bf16.msra.mxu1 %v1275_v11  ;;  %1150 = vmatprep.subr.bf16.mxu0 %v1276_v12  ;;  %v182_v33 = vld [vmem:[%s1462_s28 + $0x20] sm:$0xff]  ;;  %v179_v34 = vld [vmem:[%s1462_s28 + $0x8] sm:$0xff]  ;;  %v1304_v48 = vld [vmem:[%s1597_s1 + $0x150] sm:$0xff]  }
  0x12   : > { %1178 = vmatprep.subr.bf16.mxu1 %v1277_v13  ;;  %v1061_v35 = vcombine.low %v178_v32, %v182_v33  ;;  %v1062_v36 = vcombine.high %v178_v32, %v182_v33  ;;  %v183_v37 = vld [vmem:[%s1462_s28 + $0x28] sm:$0xff]  ;;  %v1299_v43 = vld [vmem:[%s1597_s1 + $0x180] sm:$0xff]   ;;  %v1305_v49 = vld [vmem:[%s1597_s1 + $0x1d0] sm:$0xff]  }
  0x13   : > { %v1063_v38 = vcombine.low %v179_v34, %v183_v37  ;;  %v1064_v39 = vcombine.high %v179_v34, %v183_v37  ;;  %v1300_v44 = vld [vmem:[%s1597_s1 + $0x148] sm:$0xff]   ;;  %v1306_v50 = vld [vmem:[%s1597_s1 + $0x110] sm:$0xff]   ;;  %v1308_v52 = vld [vmem:[%s1597_s1 + $0x158] sm:$0xff]  }
  0x14   : > { %1151 = vmatpush3.bf16.msra.mxu0 %v1278_v14  ;;  %825 = vmatprep.mubr.bf16.mxu0 %v1062_v36  ;;  %v1301_v45 = vld [vmem:[%s1597_s1 + $0x1c8] sm:$0xff]   ;;  %v1307_v51 = vld [vmem:[%s1597_s1 + $0x190] sm:$0xff]   ;;  %v1309_v53 = vld [vmem:[%s1597_s1 + $0x1d8] sm:$0xff]  }
  0x15   : > { %1179 = vmatpush3.bf16.msra.mxu1 %v1279_v15  ;;  %1152 = vmatprep.subr.bf16.mxu0 %v1280_v16  ;;  %v1302_v46 = vld [vmem:[%s1597_s1 + $0x108] sm:$0xff]   ;;  %v1310_v54 = vld [vmem:[%s1597_s1 + $0x118] sm:$0xff]   ;;  %v1312_v56 = vld [vmem:[%s1597_s1 + $0x160] sm:$0xff]  }
  0x16   : > { %1180 = vmatprep.subr.bf16.mxu1 %v1281_v17  ;;  %874 = vmatprep.mubr.bf16.mxu1 %v1064_v39  ;;  %v1303_v47 = vld [vmem:[%s1597_s1 + $0x188] sm:$0xff]   ;;  %v1311_v55 = vld [vmem:[%s1597_s1 + $0x198] sm:$0xff]   ;;  %v1313_v57 = vld [vmem:[%s1597_s1 + $0x1e0] sm:$0xff]  }
  0x17   : > { %v1314_v58 = vld [vmem:[%s1597_s1 + $0x120] sm:$0xff]   ;;  %v1316_v63 = vld [vmem:[%s1597_s1 + $0x168] sm:$0xff]   ;;  %v1320_v8 = vld [vmem:[%s1597_s1 + $0x170] sm:$0xff]  }
  0x18   : > { %1153 = vmatpush3.bf16.msra.mxu0 %v1282_v18  ;;  %v1315_v59 = vld [vmem:[%s1597_s1 + $0x1a0] sm:$0xff]   ;;  %v1317_v1 = vld [vmem:[%s1597_s1 + $0x1e8] sm:$0xff]   ;;  %v1321_v9 = vld [vmem:[%s1597_s1 + $0x1f0] sm:$0xff]  }
  0x19   : > { %1181 = vmatpush3.bf16.msra.mxu1 %v1283_v19  ;;  %1154 = vmatprep.subr.bf16.mxu0 %v1284_v20  ;;  %v186_v60 = vld [vmem:[%s1462_s28 + $0x40] sm:$0xff]  ;;  %v1318_v2 = vld [vmem:[%s1597_s1 + $0x128] sm:$0xff]   ;;  %v1322_v10 = vld [vmem:[%s1597_s1 + $0x130] sm:$0xff]  }
  0x1a   : > { %1182 = vmatprep.subr.bf16.mxu1 %v1285_v21  ;;  %v190_v61 = vld [vmem:[%s1462_s28 + $0x60] sm:$0xff]  ;;  %v1319_v3 = vld [vmem:[%s1597_s1 + $0x1a8] sm:$0xff]   ;;  %v1323_v11 = vld [vmem:[%s1597_s1 + $0x1b0] sm:$0xff]  }
  0x1b   : > { %v1070_v62 = vcombine.high %v186_v60, %v190_v61  ;;  %v1069_v0 = vcombine.low %v186_v60, %v190_v61  ;;  %v187_v4 = vld [vmem:[%s1462_s28 + $0x48] sm:$0xff]  ;;  %v1324_v12 = vld [vmem:[%s1597_s1 + $0x178] sm:$0xff]   ;;  %v180_v16 = vld [vmem:[%s1462_s28 + $0x10] sm:$0xff] }
  0x1c   : > { %1155 = vmatpush3.bf16.msra.mxu0 %v1286_v22  ;;  %v191_v5 = vld [vmem:[%s1462_s28 + $0x68] sm:$0xff]  ;;  %v1325_v13 = vld [vmem:[%s1597_s1 + $0x1f8] sm:$0xff]   ;;  %v184_v17 = vld [vmem:[%s1462_s28 + $0x30] sm:$0xff] }
  0x1d   : > { %1183 = vmatpush3.bf16.msra.mxu1 %v1287_v23  ;;  %1156 = vmatprep.subr.bf16.mxu0 %v1288_v24  ;;  %v1072_v6 = vcombine.high %v187_v4, %v191_v5  ;;  %v1071_v7 = vcombine.low %v187_v4, %v191_v5  ;;  %v1326_v14 = vld [vmem:[%s1597_s1 + $0x138] sm:$0xff]   ;;  %v1065_v20 = vcombine.low %v180_v16, %v184_v17  ;;  %v188_v24 = vld [vmem:[%s1462_s28 + $0x50] sm:$0xff]  ;;  %v1060_v34 = vld [vmem:[%s1598_s2] ss:$0 sm:$0xff] }
  0x1e   : > { %1184 = vmatprep.subr.bf16.mxu1 %v1289_v25  ;;  %v1327_v15 = vld [vmem:[%s1597_s1 + $0x1b8] sm:$0xff]   ;;  %v1066_v21 = vcombine.high %v180_v16, %v184_v17  ;;  %v192_v25 = vld [vmem:[%s1462_s28 + $0x70] sm:$0xff] }
  0x1f   : > { %v181_v18 = vld [vmem:[%s1462_s28 + $0x18] sm:$0xff] }
  0x20   : > { %1157 = vmatpush3.bf16.msra.mxu0 %v1290_v26  ;;  %v185_v19 = vld [vmem:[%s1462_s28 + $0x38] sm:$0xff] }
  0x21   : > { %1185 = vmatpush3.bf16.msra.mxu1 %v1291_v27  ;;  %1158 = vmatprep.subr.bf16.mxu0 %v1292_v28  ;;  %v1067_v22 = vcombine.low %v181_v18, %v185_v19  ;;  %v1068_v23 = vcombine.high %v181_v18, %v185_v19  ;;  %v189_v26 = vld [vmem:[%s1462_s28 + $0x58] sm:$0xff]  ;;  %v1074_v27 = vcombine.high %v188_v24, %v192_v25 }
  0x22   : > { %1186 = vmatprep.subr.bf16.mxu1 %v1293_v29  ;;  %v193_v28 = vld [vmem:[%s1462_s28 + $0x78] sm:$0xff]  ;;  %s1059_s28 = sshll.u32 %s1601_s21, 3 }
  0x23   : > { %v1076_v29 = vcombine.high %v189_v26, %v193_v28  ;;  %s175_s29 = scalar_lea.vmem %s1599_s3, %s1059_s28 }
  0x24   : > { %1159 = vmatpush3.bf16.msra.mxu0 %v1294_v30  ;;  %v1073_v30 = vcombine.low %v188_v24, %v192_v25 }
  0x25   : > { %1187 = vmatpush3.bf16.msra.mxu1 %v1295_v31  ;;  %1200 = vmatprep.subr.bf16.mxu0 %v1296_v40  ;;  %v1075_v31 = vcombine.low %v189_v26, %v193_v28 }
  0x26   : > { %1228 = vmatprep.subr.bf16.mxu1 %v1297_v41 }
  0x27   : > { %826 = vmatmul.mubr.bf16.vlgmr.msra.gmra.mrb[0].mxu0 %v1061_v35 }
  0x28   : > { %875 = vmatmul.mubr.bf16.vlgmr.msra.gmra.mrb[0].mxu1 %v1063_v38  ;;  %1201 = vmatpush3.bf16.msra.mxu0 %v1298_v42 }
  0x29   : > { %1229 = vmatpush3.bf16.msra.mxu1 %v1299_v43  ;;  %1202 = vmatprep.subr.bf16.mxu0 %v1300_v44 }
  0x2a   : > { %1230 = vmatprep.subr.bf16.mxu1 %v1301_v45  ;;  %833 = vmatprep.mubr.bf16.mxu0 %v1070_v62 }
  0x2b   : > { %882 = vmatprep.mubr.bf16.mxu1 %v1072_v6 }
  0x2c   : > { %1203 = vmatpush3.bf16.msra.mxu0 %v1302_v46 }
  0x2d   : > { %1231 = vmatpush3.bf16.msra.mxu1 %v1303_v47  ;;  %1204 = vmatprep.subr.bf16.mxu0 %v1304_v48 }
  0x2e   : > { %1232 = vmatprep.subr.bf16.mxu1 %v1305_v49 }
  0x2f   : > { %834 = vmatmul.mubr.bf16.gmra.mrb[4].mxu0 %v1069_v0 }
  0x30   : > { %1205 = vmatpush3.bf16.msra.mxu0 %v1306_v50  ;;  %883 = vmatmul.mubr.bf16.gmra.mrb[4].mxu1 %v1071_v7 }
  0x31   : > { %1233 = vmatpush3.bf16.msra.mxu1 %v1307_v51  ;;  %1206 = vmatprep.subr.bf16.mxu0 %v1308_v52 }
  0x32   : > { %1234 = vmatprep.subr.bf16.mxu1 %v1309_v53  ;;  %923 = vmatprep.mubr.bf16.mxu0 %v1066_v21 }
  0x33   : > { %972 = vmatprep.mubr.bf16.mxu1 %v1068_v23 }
  0x34   : > { %1207 = vmatpush3.bf16.msra.mxu0 %v1310_v54 }
  0x35   : > { %1235 = vmatpush3.bf16.msra.mxu1 %v1311_v55  ;;  %1208 = vmatprep.subr.bf16.mxu0 %v1312_v56 }
  0x36   : > { %1236 = vmatprep.subr.bf16.mxu1 %v1313_v57 }
  0x38   : > { %1209 = vmatpush3.bf16.msra.mxu0 %v1314_v58 }
  0x39   : > { %1237 = vmatpush3.bf16.msra.mxu1 %v1315_v59  ;;  %1210 = vmatprep.subr.bf16.mxu0 %v1316_v63 }
  0x3a   : > { %1238 = vmatprep.subr.bf16.mxu1 %v1317_v1 }
  0x3c   : > { %1211 = vmatpush3.bf16.msra.mxu0 %v1318_v2 }
  0x3d   : > { %1239 = vmatpush3.bf16.msra.mxu1 %v1319_v3  ;;  %1212 = vmatprep.subr.bf16.mxu0 %v1320_v8 }
  0x3e   : > { %1240 = vmatprep.subr.bf16.mxu1 %v1321_v9 }
  0x40   : > { %1213 = vmatpush3.bf16.msra.mxu0 %v1322_v10 }
  0x41   : > { %1241 = vmatpush3.bf16.msra.mxu1 %v1323_v11  ;;  %1214 = vmatprep.subr.bf16.mxu0 %v1324_v12 }
  0x42   : > { %1242 = vmatprep.subr.bf16.mxu1 %v1325_v13 }
  0x44   : > { %1215 = vmatpush3.bf16.msra.mxu0 %v1326_v14 }
  0x45   : > { %1243 = vmatpush3.bf16.msra.mxu1 %v1327_v15 }
  0x47   : > { %924 = vmatmul.mubr.bf16.vlgmr.msra.gmra.mrb[8].mxu0 %v1065_v20 }
  0x48   : > { %973 = vmatmul.mubr.bf16.vlgmr.msra.gmra.mrb[8].mxu1 %v1067_v22  ;;  %931 = vmatprep.mubr.bf16.mxu0 %v1074_v27 }
  0x49   : > { %980 = vmatprep.mubr.bf16.mxu1 %v1076_v29 }
  0x4f   : > { %932 = vmatmul.mubr.bf16.gmra.mrb[12].mxu0 %v1073_v30 }
  0x50   : > { %981 = vmatmul.mubr.bf16.gmra.mrb[12].mxu1 %v1075_v31 }
  0xfa   : > { %v1160_v32 = vpop.f32.mrb[0].mxu0 }
  0xfb   : > { %v1188_v33 = vpop.f32.mrb[0].mxu1  ;;  %v1161_v35 = vpop.f32.mrb[1].mxu0 }
  0xfc   : > { %v1162_v36 = vadd.f32 %v1161_v35, %v1160_v32  ;;  %v1189_v37 = vpop.f32.mrb[1].mxu1  ;;  %v1163_v38 = vpop.f32.mrb[2].mxu0 }
  0xfd   : > { %v1190_v39 = vadd.f32 %v1189_v37, %v1188_v33  ;;  %v1191_v40 = vpop.f32.mrb[2].mxu1  ;;  %v1164_v41 = vpop.f32.mrb[3].mxu0 }
  0xfe   : > { %v828_v42 = vadd.f32 %v1162_v36, %v1060_v34  ;;  %v1165_v43 = vadd.f32 %v1164_v41, %v1163_v38  ;;  %v1192_v44 = vpop.f32.mrb[3].mxu1 }
  0xff   : > { %v1193_v45 = vadd.f32 %v1192_v44, %v1191_v40 }
 0x100   : > { %v877_v46 = vadd.f32 %v1190_v39, %v828_v42  ;;  %v831_v47 = vadd.f32 %v1165_v43, %v1060_v34 }
 0x102   : > { %v880_v48 = vadd.f32 %v1193_v45, %v831_v47  ;;  %v1166_v49 = vpop.f32.mrb[4].mxu0 }
 0x103   : > { %v1167_v50 = vpop.f32.mrb[5].mxu0  ;;  %v1194_v56 = vpop.f32.mrb[4].mxu1 }
 0x104   : > { %v1168_v51 = vadd.f32 %v1167_v50, %v1166_v49  ;;  %v1169_v52 = vpop.f32.mrb[6].mxu0  ;;  %v1195_v57 = vpop.f32.mrb[5].mxu1 }
 0x105   : > { %v1170_v53 = vpop.f32.mrb[7].mxu0  ;;  %v1196_v59 = vadd.f32 %v1195_v57, %v1194_v56  ;;  %v1197_v60 = vpop.f32.mrb[6].mxu1 }
 0x106   : > { %v1171_v54 = vadd.f32 %v1170_v53, %v1169_v52  ;;  %v836_v55 = vadd.f32 %v1168_v51, %v1060_v34  ;;  %v1198_v61 = vpop.f32.mrb[7].mxu1 }
 0x107   : > { %v1199_v63 = vadd.f32 %v1198_v61, %v1197_v60 }
 0x108   : > { %v839_v58 = vadd.f32 %v1171_v54, %v1060_v34  ;;  %v885_v62 = vadd.f32 %v1196_v59, %v836_v55 }
 0x10a   : > { %v888_v0 = vadd.f32 %v1199_v63, %v839_v58 }
 0x11a   : > { %v1216_v1 = vpop.f32.mrb[8].mxu0 }
 0x11b   : > { %v1244_v2 = vpop.f32.mrb[8].mxu1  ;;  %v1217_v3 = vpop.f32.mrb[9].mxu0 }
 0x11c   : > { %v1245_v4 = vpop.f32.mrb[9].mxu1  ;;  %v1218_v5 = vadd.f32 %v1217_v3, %v1216_v1  ;;  %v1219_v7 = vpop.f32.mrb[10].mxu0 }
 0x11d   : > { %v1246_v6 = vadd.f32 %v1245_v4, %v1244_v2  ;;  %v1247_v8 = vpop.f32.mrb[10].mxu1  ;;  %v1220_v9 = vpop.f32.mrb[11].mxu0 }
 0x11e   : > { %v1248_v10 = vpop.f32.mrb[11].mxu1  ;;  %v926_v11 = vadd.f32 %v1218_v5, %v877_v46  ;;  %v1221_v12 = vadd.f32 %v1220_v9, %v1219_v7 }
 0x11f   : > { %v1249_v13 = vadd.f32 %v1248_v10, %v1247_v8 }
 0x120   : > { %v975_v14 = vadd.f32 %v1246_v6, %v926_v11  ;;  %v929_v15 = vadd.f32 %v1221_v12, %v880_v48 }
 0x122   : > { %990 = vst.msk [vmem:[%s175_s29] sm:$0xff] %vm989_vm0, %v975_v14  ;;  %v978_v16 = vadd.f32 %v1249_v13, %v929_v15  ;;  %v1222_v17 = vpop.f32.mrb[12].mxu0 }
 0x123   : > { %v1250_v18 = vpop.f32.mrb[12].mxu1  ;;  %v1223_v19 = vpop.f32.mrb[13].mxu0 }
 0x124   : > { %v1251_v20 = vpop.f32.mrb[13].mxu1  ;;  %991 = vst.msk [vmem:[%s175_s29 + $0x8] sm:$0xff] %vm989_vm0, %v978_v16  ;;  %v1224_v21 = vadd.f32 %v1223_v19, %v1222_v17  ;;  %v1225_v23 = vpop.f32.mrb[14].mxu0 }
 0x125   : > { %v1252_v22 = vadd.f32 %v1251_v20, %v1250_v18  ;;  %v1253_v24 = vpop.f32.mrb[14].mxu1  ;;  %v1226_v25 = vpop.f32.mrb[15].mxu0 }
 0x126   : > { %v1254_v26 = vpop.f32.mrb[15].mxu1  ;;  %v934_v27 = vadd.f32 %v1224_v21, %v885_v62  ;;  %v1227_v28 = vadd.f32 %v1226_v25, %v1225_v23 }
 0x127   : > { %v1255_v29 = vadd.f32 %v1254_v26, %v1253_v24 }
 0x128   : > { %v983_v30 = vadd.f32 %v1252_v22, %v934_v27  ;;  %v937_v31 = vadd.f32 %v1227_v28, %v888_v0 }
 0x12a   : > { %992 = vst.msk [vmem:[%s175_s29 + $0x10] sm:$0xff] %vm989_vm0, %v983_v30  ;;  %v986_v32 = vadd.f32 %v1255_v29, %v937_v31 }
 0x12c   : > { %993 = vst.msk [vmem:[%s175_s29 + $0x18] sm:$0xff] %vm989_vm0, %v986_v32 }
 0x12d PF: > { %s13_s12 = sadd.s32 1, %s1334_s12  }
 0x12e   : > { %p10_p4 = scmp.ge.s32.totalorder %s13_s12, 4  }
 0x130   :  { %12 = sbr.rel (!%p10_p4) target bundleno = 1 (0x1), region = 62 }

// kernel: wan_cam_adapter_forward.3
= control target key start
LH: loop header
LB: loop body
LE: loop exit
PB: predicated region body
PF: predicated region fallthrough
CT: control target
= control target key end

     0   :  { %s7036_s21 = smov 0   ;;  %s9937_s0 = inlined_call_operand.vmem [shape: f32[144,32], index: 0, kind: input, shape index: {}]   ;;  %s9938_s1 = inlined_call_operand.vmem [shape: bf16[2,288,32], index: 1, kind: input, shape index: {}]   ;;  %s9939_s2 = inlined_call_operand.vmem [shape: f32[2,1,32], index: 2, kind: input, shape index: {}]   ;;  %s9940_s3 = inlined_call_operand.vmem [shape: bf16[2,288,32], index: 3, kind: input, shape index: {}]   ;;  %s9941_s4 = inlined_call_operand.vmem [shape: f32[2,1,32], index: 4, kind: input, shape index: {}]   ;;  %s9942_s5 = inlined_call_operand.vmem [shape: f32[72,1], index: 5, kind: input, shape index: {}]   ;;  %s9943_s6 = inlined_call_operand.vmem [shape: f32[144,32], index: 6, kind: output, shape index: {}]  }
   0x1 LB: > { %s6208_s22 = sadd.s32 4294967295, %s6993_s21   ;;  %p6212_p0 = scmp.ge.s32.totalorder %s6993_s21, 1  ;;  %s6993_s21 = sphi %s7036_s21, %s16_s21  }
   0x2   : > { %p213_p1 = scmp.lt.s32.totalorder %s6993_s21, 3 }
   0x4   : > { %p214_p2 = pnand %p6212_p0, %p213_p1 }
   0x5   : > { %s243_s23 = smul.u32 (!%p214_p2), 9, %s6208_s22  ;;  %vm256_vm0 = vcmask (!%p214_p2), 257024   ;;  %v6995_v0 = vmov (!%p214_p2), 0   ;;  %vm468_vm1 = vcmask (!%p214_p2), 1042432   ;;  %vm469_vm2 = vcmask (!%p214_p2), 1046532   ;;  %v6863_v30 = vld [vmem:[%s9938_s1 + $0x40] sm:$0xff] (!%p214_p2)  }
   0x6   : > { %217 = sbr.rel (%p214_p2) target bundleno = 1685 (0x695), region = 44  ;;  %257 = vst.msk [vmem:[#allocation2] sm:$0xf] (!%p214_p2), %vm256_vm0, %v6995_v0  ;;  %258 = vst.msk [vmem:[#allocation2 + $0x28] sm:$0xf] (!%p214_p2), %vm256_vm0, %v6995_v0  ;;  %6862 = vset.pattern.permute.xlu1 (!%p214_p2), %v6995_v0  ;;  %6861 = vset.pattern.permute.xlu0 (!%p214_p2), %v6995_v0  ;;  %vm1144_vm3 = vcmask (!%p214_p2), 1040384  }
   0x7   : > { %p244_p3 = scmp.lt.s32.totalorder (!%p214_p2), %s243_s23, 17  ;;  %vm1145_vm4 = vcmask (!%p214_p2), 1044484   ;;  %v6864_v33 = vld [vmem:[%s9938_s1] sm:$0xff] (!%p214_p2)   ;;  %vm694_vm5 = vsmask.f32 (!%p214_p2), 256  ;;  %6535 = vmatprep.subr.bf16.mxu0 (!%p214_p2), %v6863_v30  ;;  %vm7095_vm7 = vmor (!%p214_p2), %vm468_vm1, %vm469_vm2  ;;  %v6865_v43 = vld [vmem:[%s9938_s1 + $0x48] sm:$0xff] (!%p214_p2)  }
   0x8   : > { %vm695_vm6 = vsmask.f32 (!%p214_p2), 4368  ;;  %6536 = vmatpush3.bf16.msra.mxu0 (!%p214_p2), %v6864_v33  ;;  %vm333_vm8 = vsmask.f32 (!%p214_p2), 3328  ;;  %vm334_vm9 = vsmask.f32 (!%p214_p2), 7440  ;;  %vm7113_vm12 = vmor (!%p214_p2), %vm1144_vm3, %vm1145_vm4 }
   0x9   : > { %vm546_vm10 = vsmask.f32 (!%p214_p2), 2304  ;;  %vm547_vm11 = vsmask.f32 (!%p214_p2), 6416  ;;  %6537 = vmatprep.subr.bf16.mxu0 (!%p214_p2), %v6865_v43  ;;  %v6866_v51 = vld [vmem:[%s9938_s1 + $0x8] sm:$0xff] (!%p214_p2)   ;;  %s6996_s12 = smov (!%p214_p2), 32   ;;  %vm7161_vm13 = vmor (!%p214_p2), %vm694_vm5, %vm695_vm6 }
   0xa   : > { %s6997_s15 = smov (!%p214_p2), 96   ;;  %vm7179_vm14 = vmor (!%p214_p2), %vm333_vm8, %vm334_vm9  ;;  %vm987_vm15 = vsmask.f32 (!%p214_p2), 1280  ;;  %vm988_vm1 = vsmask.f32 (!%p214_p2), 5392  ;;  %s6998_s10 = smov (!%p214_p2), 64  }
   0xb   : > { %vm7188_vm2 = vmor (!%p214_p2), %vm546_vm10, %vm547_vm11  ;;  %vm7000_vm4 = vmmov (!%p214_p2), 0   ;;  %vm1563_vm5 = vcmask (!%p214_p2), 261120   ;;  %vm526_vm6 = vcmask (!%p214_p2), 519424   ;;  %vm674_vm8 = vcmask (!%p214_p2), 781824  }
   0xc   : > { %6538 = vmatpush3.bf16.msra.mxu0 (!%p214_p2), %v6866_v51  ;;  %vm7238_vm3 = vmor (!%p214_p2), %vm987_vm15, %vm988_vm1  ;;  %vm809_vm9 = vcmask (!%p214_p2), 1044224  }
   0xd   : > { %s9973_s23 = smov (!%p244_p3, %s243_s23), 17  ;;  %v536_v7 = vld [vmem:[#allocation2] sm:$0xe]  ;;  %v7069_v26 = vld [vmem:[#allocation2 + $0x28] sm:$0x7] }
   0xe   : > { %s6213_s24 = sshll.u32 %s9973_s23, 3  ;;  %v550_v10 = vshrl.u32 %v536_v7, 16  ;;  %v553_v11 = vshll.u32 %v536_v7, 16  ;;  %v684_v12 = vld [vmem:[#allocation2] sm:$0x8]  ;;  %v1080_v29 = vshrl.u32 %v7069_v26, 16 }
   0xf   : > { %s7054_s27 = scalar_lea.vmem %s9937_s0, %s6213_s24  ;;  %v698_v15 = vshrl.u32 %v684_v12, 16  ;;  %v448_v21 = vld [vmem:[#allocation2] sm:$0xe]  ;;  %v7073_v28 = vld [vmem:[#allocation2 + $0x28] sm:$0x1]  ;;  %v1083_v38 = vshll.u32 %v7069_v26, 16  ;;  %s8489_s22 = scalar_lea.vmem %s9943_s6, %s6213_s24 }
  0x10   : > { %v268_v1 = vld [vmem:[%s7054_s27] sm:$0xff]  ;;  %v269_v2 = vld [vmem:[%s7054_s27 + $0x8] sm:$0xff]  ;;  %v270_v4 = vld [vmem:[%s7054_s27 + $0x10] sm:$0xff]  ;;  %v552_v22 = vrot.slane %v550_v10, 5  ;;  %v555_v23 = vrot.slane %v553_v11, 6  ;;  %v6224_v34 = vrot.slane %v448_v21, 9 }
  0x11   : > { %v6499_v3 = vpack.c.bf16 %v268_v1, %v268_v1  ;;  %v6500_v5 = vpack.c.bf16 %v269_v2, %v269_v2  ;;  %v271_v6 = vld [vmem:[%s7054_s27 + $0x18] sm:$0xff]  ;;  %v6501_v8 = vpack.c.bf16 %v270_v4, %v270_v4  ;;  %v272_v13 = vld [vmem:[%s7054_s27 + $0x20] sm:$0xff]  ;;  %v273_v14 = vld [vmem:[%s7054_s27 + $0x28] sm:$0xff]  ;;  %v7088_v35 = vrot.slane %v698_v15, 11 }
  0x12   : > { %v6502_v9 = vpack.c.bf16 %v271_v6, %v271_v6  ;;  %v6503_v16 = vpack.c.bf16 %v272_v13, %v272_v13  ;;  %v6504_v17 = vpack.c.bf16 %v273_v14, %v273_v14  ;;  %v274_v18 = vld [vmem:[%s7054_s27 + $0x30] sm:$0xff]  ;;  %v275_v19 = vld [vmem:[%s7054_s27 + $0x38] sm:$0xff]  ;;  %v276_v20 = vld [vmem:[%s7054_s27 + $0x40] sm:$0xff]  ;;  %v556_v36 = vor.u32 %v555_v23, %v552_v22 }
  0x13   : > { %314 = vst.msk [vmem:[#allocation2 + $0x4] sm:$0xf] %vm256_vm0, %v6499_v3  ;;  %315 = vst.msk [vmem:[#allocation2 + $0x8] sm:$0xf] %vm256_vm0, %v6500_v5  ;;  %v6505_v24 = vpack.c.bf16 %v274_v18, %v274_v18  ;;  %v6506_v25 = vpack.c.bf16 %v275_v19, %v275_v19  ;;  %v6507_v27 = vpack.c.bf16 %v276_v20, %v276_v20  ;;  %v7081_v31 = vld [vmem:[#allocation2 + $0x28] sm:$0x7] }
  0x14   : > { %316 = vst.msk [vmem:[#allocation2 + $0xc] sm:$0xf] %vm256_vm0, %v6501_v8  ;;  %317 = vst.msk [vmem:[#allocation2 + $0x10] sm:$0xf] %vm256_vm0, %v6502_v9  ;;  %v7083_v32 = vld [vmem:[#allocation2] sm:$0xf] }
  0x15   : > { %318 = vst.msk [vmem:[#allocation2 + $0x14] sm:$0xf] %vm256_vm0, %v6503_v16  ;;  %319 = vst.msk [vmem:[#allocation2 + $0x18] sm:$0xf] %vm256_vm0, %v6504_v17  ;;  %v937_v37 = vshll.u32 %v7073_v28, 16  ;;  %v7099_v40 = vrot.slane %v1080_v29, 6 }
  0x16   : > { %320 = vst.msk [vmem:[#allocation2 + $0x1c] sm:$0xf] %vm256_vm0, %v6505_v24  ;;  %321 = vst.msk [vmem:[#allocation2 + $0x20] sm:$0xf] %vm256_vm0, %v6506_v25  ;;  %v1173_v41 = vrot.slane %v7081_v31, 7  ;;  %v337_v42 = vshrl.u32 %v7083_v32, 16 }
  0x17   : > { %322 = vst.msk [vmem:[#allocation2 + $0x24] sm:$0xf] %vm256_vm0, %v6507_v27  ;;  %v7122_v56 = vrot.slane %v556_v36, 4  ;;  %v6867_v9 = vld [vmem:[%s9938_s1 + $0x50] sm:$0xff]   ;;  %v6869_v20 = vld [vmem:[%s9938_s1 + $0x58] sm:$0xff]   ;;  %v259_v31 = vld [vmem:[%s9942_s5] sm:$0xff] }
  0x18   : > { %v6868_v14 = vld [vmem:[%s9938_s1 + $0x10] sm:$0xff]   ;;  %6539 = vmatprep.subr.bf16.mxu0 %v6867_v9  ;;  %v6870_v29 = vld [vmem:[%s9938_s1 + $0x18] sm:$0xff]  }
  0x19   : > { %6540 = vmatpush3.bf16.msra.mxu0 %v6868_v14 }
  0x1a   : > { %v449_v44 = vld [vmem:[#allocation2 + $0x4] sm:$0xf]  ;;  %v1125_v45 = vld [vmem:[#allocation2 + $0x8] sm:$0xf]  ;;  %6541 = vmatprep.subr.bf16.mxu0 %v6869_v20 }
  0x1b   : > { %v1124_v46 = vld [vmem:[#allocation2 + $0x4] sm:$0x8]  ;;  %v473_v47 = vrot.slane %v449_v44, 5  ;;  %v7106_v48 = vld [vmem:[#allocation2 + $0xc] sm:$0xf]  ;;  %v1149_v49 = vrot.slane %v1125_v45, 7 }
  0x1c   : > { %v6226_v50 = vrot.slane %v1124_v46, 11  ;;  %v1152_v53 = vrot.slane %v7106_v48, 7  ;;  %v7118_v54 = vld [vmem:[#allocation2 + $0xc] sm:$0xf]  ;;  %v7120_v55 = vld [vmem:[#allocation2 + $0x10] sm:$0xf] }
  0x1d   : > { %v474_v57 = vsel %vm7095_vm7, %v6224_v34, %v473_v47  ;;  %v1151_v58 = vrot.slane %v1149_v49, 4  ;;  %v479_v60 = vrot.slane %v7118_v54, 5  ;;  %v450_v61 = vld [vmem:[#allocation2 + $0x8] sm:$0xf]  ;;  %v7129_v62 = vld [vmem:[#allocation2 + $0x4] sm:$0xf]  ;;  %6542 = vmatpush3.bf16.msra.mxu0 %v6870_v29 }
  0x1e   : > { %v1150_v59 = vsel %vm7113_vm12, %v6226_v50, %v1149_v49  ;;  %499 = vrot.lane.b32.xlu0 %v474_v57, %s6996_s12  ;;  %v482_v63 = vrot.slane %v7120_v55, 5  ;;  %v475_v0 = vrot.slane %v473_v47, 4  ;;  %v476_v1 = vrot.slane %v450_v61, 5  ;;  %v686_v2 = vld [vmem:[#allocation2 + $0x8] sm:$0xf] }
  0x1f   : > { %v703_v3 = vshrl.u32 %v7129_v62, 16  ;;  %v1153_v4 = vsel %vm7113_vm12, %v1151_v58, %v1152_v53  ;;  %v481_v5 = vrot.slane %v479_v60, 4  ;;  %v712_v6 = vshrl.u32 %v686_v2, 16  ;;  %v837_v8 = vld [vmem:[#allocation2 + $0x4] sm:$0xf] }
  0x20   : > { %v715_v7 = vshll.u32 %v686_v2, 16  ;;  %1177 = vrot.lane.b32.xlu1 %v1153_v4, %s6997_s15  ;;  %v478_v11 = vrot.slane %v476_v1, 4  ;;  %v838_v12 = vld [vmem:[#allocation2 + $0x8] sm:$0xf]  ;;  %v848_v13 = vshrl.u32 %v837_v8, 16  ;;  %v851_v17 = vshll.u32 %v837_v8, 16 }
  0x21   : > { %v7142_v10 = vrot.slane %v703_v3, 7  ;;  %v483_v15 = vsel %vm7095_vm7, %v481_v5, %v482_v63  ;;  %v7151_v16 = vrot.slane %v712_v6, 7  ;;  %v857_v18 = vshll.u32 %v838_v12, 16  ;;  %v537_v19 = vld [vmem:[#allocation2 + $0x4] sm:$0xf] }
  0x22   : > { %1175 = vrot.lane.b32.xlu0 %v1150_v59, %s6997_s15  ;;  %v477_v21 = vsel %vm7095_vm7, %v475_v0, %v476_v1  ;;  %v850_v24 = vrot.slane %v848_v13, 4  ;;  %v559_v25 = vshrl.u32 %v537_v19, 16  ;;  %v7166_v27 = vld [vmem:[#allocation2 + $0xc] sm:$0xf]  ;;  %v853_v33 = vrot.slane %v851_v17, 5  ;;  %v6871_v2 = vld [vmem:[%s9938_s1 + $0x60] sm:$0xff]  }
  0x23   : > { %v710_v23 = vrot.slane %v7142_v10, 4  ;;  %v717_v30 = vor.u32 %v715_v7, %v7151_v16  ;;  %v859_v34 = vrot.slane %v857_v18, 5  ;;  %v562_v36 = vshll.u32 %v537_v19, 16  ;;  %v538_v43 = vld [vmem:[#allocation2 + $0x8] sm:$0xf]  ;;  %v6872_v7 = vld [vmem:[%s9938_s1 + $0x20] sm:$0xff]   ;;  %6543 = vmatprep.subr.bf16.mxu0 %v6871_v2 }
  0x24   : > { %505 = vrot.lane.b32.xlu1 %v483_v15, %s6996_s12  ;;  %v561_v44 = vrot.slane %v559_v25, 5  ;;  %v861_v45 = vshrl.u32 %v838_v12, 16  ;;  %v867_v46 = vshll.u32 %v7166_v27, 16  ;;  %v706_v47 = vshll.u32 %v7129_v62, 16  ;;  %v977_v49 = vld [vmem:[#allocation2 + $0x4] sm:$0xc]  ;;  %6544 = vmatpush3.bf16.msra.mxu0 %v6872_v7 }
  0x25   : > { %v718_v50 = vsel %vm7161_vm13, %v710_v23, %v717_v30  ;;  %v854_v54 = vor.u32 %v853_v33, %v850_v24  ;;  %v564_v57 = vrot.slane %v562_v36, 6  ;;  %v569_v58 = vshrl.u32 %v538_v43, 16  ;;  %v979_v13 = vld [vmem:[#allocation2 + $0xc] sm:$0xf]  ;;  %v840_v19 = vld [vmem:[#allocation2 + $0x10] sm:$0xf] }
  0x26   : > { %501 = vrot.lane.b32.xlu0 %v477_v21, %s6996_s12  ;;  %v480_v59 = vsel %vm7095_vm7, %v478_v11, %v479_v60  ;;  %v863_v62 = vrot.slane %v861_v45, 4  ;;  %v572_v0 = vshll.u32 %v538_v43, 16  ;;  %v340_v1 = vshll.u32 %v7083_v32, 16  ;;  %v978_v60 = vld [vmem:[#allocation2 + $0x8] sm:$0xf] }
  0x27   : > { %v855_v3 = vrot.slane %v854_v54, 4  ;;  %v565_v4 = vor.u32 %v564_v57, %v561_v44  ;;  %v7196_v5 = vrot.slane %v867_v46, 5  ;;  %v991_v6 = vshrl.u32 %v977_v49, 16  ;;  %v6873_v25 = vld [vmem:[%s9938_s1 + $0x68] sm:$0xff]   ;;  %v842_v28 = vld [vmem:[#allocation2 + $0x18] sm:$0xf] }
  0x28   : > { %784 = vrot.lane.b32.xlu1 %v718_v50, %s6997_s15  ;;  %v864_v8 = vor.u32 %v863_v62, %v859_v34  ;;  %v571_v9 = vrot.slane %v569_v58, 5  ;;  %v574_v11 = vrot.slane %v572_v0, 6  ;;  %v994_v12 = vshll.u32 %v977_v49, 16  ;;  %6545 = vmatprep.subr.bf16.mxu0 %v6873_v25  ;;  %v6874_v45 = vld [vmem:[%s9938_s1 + $0x28] sm:$0xff]   ;;  %v542_v55 = vld [vmem:[#allocation2 + $0x18] sm:$0xf] }
  0x29   : > { %v860_v14 = vsel %vm7179_vm14, %v855_v3, %v859_v34  ;;  %v566_v15 = vsel %vm7188_vm2, %v7122_v56, %v565_v4  ;;  %v708_v17 = vor.u32 %v706_v47, %v7142_v10  ;;  %v993_v18 = vrot.slane %v991_v6, 6  ;;  %v7213_v34 = vld [vmem:[#allocation2 + $0x14] sm:$0xf]  ;;  %v539_v50 = vld [vmem:[#allocation2 + $0xc] sm:$0xf]  ;;  %6546 = vmatpush3.bf16.msra.mxu0 %v6874_v45 }
  0x2a   : > { %503 = vrot.lane.b32.xlu0 %v480_v59, %s6996_s12  ;;  %v865_v20 = vrot.slane %v864_v8, 4  ;;  %v567_v21 = vrot.slane %v565_v4, 4  ;;  %v996_v23 = vrot.slane %v994_v12, 7  ;;  %v1000_v24 = vshrl.u32 %v978_v60, 16  ;;  %v540_v4 = vld [vmem:[#allocation2 + $0x10] sm:$0xf] }
  0x2b   : > { %v1003_v29 = vshll.u32 %v978_v60, 16  ;;  %v1010_v30 = vshrl.u32 %v979_v13, 16  ;;  %v1013_v33 = vshll.u32 %v979_v13, 16  ;;  %v871_v56 = vshrl.u32 %v7166_v27, 16  ;;  %v6875_v60 = vld [vmem:[%s9938_s1 + $0x70] sm:$0xff]  }
  0x2c   : > { %941 = vrot.lane.b32.xlu1 %v860_v14, %s6996_s12  ;;  %v870_v10 = vsel %vm7179_vm14, %v865_v20, %v7196_v5  ;;  %v7219_v36 = vor.u32 %v574_v11, %v571_v9  ;;  %v997_v43 = vor.u32 %v996_v23, %v993_v18  ;;  %v1002_v44 = vrot.slane %v1000_v24, 6  ;;  %v980_v14 = vld [vmem:[#allocation2 + $0x10] sm:$0xf]  ;;  %6547 = vmatprep.subr.bf16.mxu0 %v6875_v60  ;;  %v6877_v20 = vld [vmem:[%s9938_s1 + $0x78] sm:$0xff]  }
  0x2d   : > { %v1005_v46 = vrot.slane %v1003_v29, 7  ;;  %v1012_v47 = vrot.slane %v1010_v30, 6  ;;  %v1015_v27 = vrot.slane %v1013_v33, 7  ;;  %v873_v49 = vrot.slane %v871_v56, 4 }
  0x2e   : > { %647 = vrot.lane.b32.xlu0 %v566_v15, %s6998_s10  ;;  %v709_v54 = vsel %vm7161_vm13, %v7088_v35, %v708_v17  ;;  %v877_v57 = vshll.u32 %v840_v19, 16  ;;  %v881_v58 = vshrl.u32 %v840_v19, 16  ;;  %v887_v59 = vshll.u32 %v7213_v34, 16  ;;  %v6876_v15 = vld [vmem:[%s9938_s1 + $0x30] sm:$0xff]  }
  0x2f   : > { %v998_v62 = vrot.slane %v997_v43, 4  ;;  %v1006_v0 = vor.u32 %v1005_v46, %v1002_v44  ;;  %v7229_v2 = vor.u32 %v1015_v27, %v1012_v47  ;;  %v874_v3 = vor.u32 %v873_v49, %v7196_v5  ;;  %v981_v19 = vld [vmem:[#allocation2 + $0x14] sm:$0xf]  ;;  %6548 = vmatpush3.bf16.msra.mxu0 %v6876_v15  ;;  %v688_v47 = vld [vmem:[#allocation2 + $0x10] sm:$0xf]  ;;  %v6878_v27 = vld [vmem:[%s9938_s1 + $0x38] sm:$0xff]  }
  0x30   : > { %943 = vrot.lane.b32.xlu1 %v870_v10, %s6996_s12  ;;  %v879_v6 = vrot.slane %v877_v57, 5  ;;  %v883_v7 = vrot.slane %v881_v58, 4  ;;  %v579_v8 = vshrl.u32 %v539_v50, 16  ;;  %v7244_v9 = vrot.slane %v1083_v38, 7  ;;  %v687_v10 = vld [vmem:[#allocation2 + $0xc] sm:$0xf]  ;;  %6549 = vmatprep.subr.bf16.mxu0 %v6877_v20 }
  0x31   : > { %v576_v5 = vsel %vm7188_vm2, %v567_v21, %v7219_v36  ;;  %v1008_v11 = vrot.slane %v1006_v0, 4  ;;  %v7249_v12 = vrot.slane %v887_v59, 5  ;;  %v582_v13 = vshll.u32 %v539_v50, 16 }
  0x32   : > { %782 = vrot.lane.b32.xlu0 %v709_v54, %s6997_s15  ;;  %v884_v17 = vor.u32 %v883_v7, %v879_v6  ;;  %v581_v26 = vrot.slane %v579_v8, 5  ;;  %v589_v38 = vshrl.u32 %v540_v4, 16  ;;  %v592_v18 = vshll.u32 %v540_v4, 16 }
  0x33   : > { %v1007_v21 = vsel %vm7238_vm3, %v998_v62, %v1006_v0  ;;  %v1017_v23 = vsel %vm7238_vm3, %v1008_v11, %v7229_v2  ;;  %v875_v24 = vrot.slane %v874_v3, 4  ;;  %v584_v25 = vrot.slane %v582_v13, 6  ;;  %6550 = vmatpush3.bf16.msra.mxu0 %v6878_v27 }
  0x34   : > { %649 = vrot.lane.b32.xlu1 %v576_v5, %s6998_s10  ;;  %v885_v29 = vrot.slane %v884_v17, 4  ;;  %v591_v30 = vrot.slane %v589_v38, 5  ;;  %v594_v33 = vrot.slane %v592_v18, 6  ;;  %v1020_v56 = vshrl.u32 %v980_v14, 16  ;;  %v453_v18 = vld [vmem:[#allocation2 + $0x14] sm:$0xf] }
  0x35   : > { %v585_v43 = vor.u32 %v584_v25, %v581_v26  ;;  %v1023_v44 = vshll.u32 %v980_v14, 16  ;;  %v1030_v45 = vshrl.u32 %v981_v19, 16  ;;  %v1033_v46 = vshll.u32 %v981_v19, 16  ;;  %v7295_v14 = vld [vmem:[#allocation2 + $0x14] sm:$0xf] }
  0x36   : > { %1088 = vrot.lane.b32.xlu0 %v1007_v21, %s6998_s10  ;;  %v577_v49 = vrot.slane %v7219_v36, 4  ;;  %v1022_v50 = vrot.slane %v1020_v56, 6  ;;  %v7271_v54 = vrot.slane %v337_v42, 4  ;;  %v7275_v57 = vrot.slane %v340_v1, 5  ;;  %v7282_v42 = vld [vmem:[#allocation2 + $0x10] sm:$0xf] }
  0x37   : > { %v880_v58 = vsel %vm7179_vm14, %v875_v24, %v879_v6  ;;  %v7279_v59 = vor.u32 %v594_v33, %v591_v30  ;;  %v1025_v62 = vrot.slane %v1023_v44, 7  ;;  %v1032_v0 = vrot.slane %v1030_v45, 6  ;;  %v7307_v19 = vld [vmem:[#allocation2 + $0x18] sm:$0xf] }
  0x38   : > { %1090 = vrot.lane.b32.xlu1 %v1017_v23, %s6998_s10  ;;  %v587_v36 = vrot.slane %v585_v43, 4  ;;  %v1035_v3 = vrot.slane %v1033_v46, 7  ;;  %v721_v4 = vshrl.u32 %v687_v10, 16  ;;  %v730_v60 = vshrl.u32 %v688_v47, 16 }
  0x39   : > { %v890_v32 = vsel %vm7179_vm14, %v885_v29, %v7249_v12  ;;  %v1018_v1 = vrot.slane %v7229_v2, 4  ;;  %v1026_v6 = vor.u32 %v1025_v62, %v1022_v50  ;;  %v7290_v7 = vrot.slane %v937_v37, 5  ;;  %v7320_v29 = vld [vmem:[#allocation2 + $0x1c] sm:$0xf]  ;;  %v982_v62 = vld [vmem:[#allocation2 + $0x18] sm:$0xf] }
  0x3a   : > { %945 = vrot.lane.b32.xlu0 %v880_v58, %s6996_s12  ;;  %v586_v8 = vsel %vm7188_vm2, %v577_v49, %v585_v43  ;;  %v723_v5 = vrot.slane %v721_v4, 7  ;;  %v724_v11 = vshll.u32 %v687_v10, 16  ;;  %v733_v13 = vshll.u32 %v688_v47, 16  ;;  %v541_v43 = vld [vmem:[#allocation2 + $0x14] sm:$0xf] }
  0x3b   : > { %v1028_v15 = vrot.slane %v1026_v6, 4  ;;  %v7297_v17 = vor.u32 %v1035_v3, %v1032_v0  ;;  %v7299_v26 = vrot.slane %v730_v60, 7  ;;  %v1155_v2 = vrot.slane %v7282_v42, 7  ;;  %v983_v60 = vld [vmem:[#allocation2 + $0x1c] sm:$0xf] }
  0x3c   : > { %947 = vrot.lane.b32.xlu1 %v890_v32, %s6996_s12  ;;  %v596_v37 = vsel %vm7188_vm2, %v587_v36, %v7279_v59  ;;  %v719_v38 = vrot.slane %v7151_v16, 4  ;;  %v1086_v20 = vor.u32 %v7244_v9, %v7099_v40  ;;  %v343_v21 = vor.u32 %v7275_v57, %v7271_v54 }
  0x3d   : > { %v1027_v23 = vsel %vm7238_vm3, %v1018_v1, %v1026_v6  ;;  %v1154_v24 = vrot.slane %v1152_v53, 4  ;;  %v1158_v25 = vrot.slane %v7295_v14, 7  ;;  %v484_v16 = vrot.slane %v482_v63, 4 }
  0x3e   : > { %651 = vrot.lane.b32.xlu0 %v586_v8, %s6998_s10  ;;  %v726_v30 = vor.u32 %v724_v11, %v723_v5  ;;  %v728_v33 = vrot.slane %v723_v5, 4  ;;  %v891_v56 = vshrl.u32 %v7213_v34, 16  ;;  %v897_v10 = vshll.u32 %v842_v28, 16  ;;  %v689_v8 = vld [vmem:[#allocation2 + $0x14] sm:$0xf] }
  0x3f   : > { %v1037_v48 = vsel %vm7238_vm3, %v1028_v15, %v7297_v17  ;;  %v735_v53 = vor.u32 %v733_v13, %v7299_v26  ;;  %v1157_v44 = vrot.slane %v1155_v2, 4  ;;  %v901_v45 = vshrl.u32 %v842_v28, 16 }
  0x40   : > { %653 = vrot.lane.b32.xlu1 %v596_v37, %s6998_s10  ;;  %v485_v63 = vrot.slane %v453_v18, 5  ;;  %v893_v46 = vrot.slane %v891_v56, 4  ;;  %v7329_v47 = vrot.slane %v897_v10, 5  ;;  %v907_v27 = vshll.u32 %v7320_v29, 16 }
  0x41   : > { %v488_v34 = vrot.slane %v7307_v19, 5  ;;  %v903_v49 = vrot.slane %v901_v45, 4  ;;  %v599_v50 = vshrl.u32 %v541_v43, 16  ;;  %v602_v58 = vshll.u32 %v541_v43, 16  ;;  %v820_v43 = vld [vmem:[#allocation2 + $0x8] sm:$0xf] }
  0x42   : > { %1092 = vrot.lane.b32.xlu0 %v1027_v23, %s6998_s10  ;;  %v727_v0 = vsel %vm7161_vm13, %v719_v38, %v726_v30  ;;  %v894_v36 = vor.u32 %v893_v46, %v7249_v12  ;;  %v609_v3 = vshrl.u32 %v542_v55, 16  ;;  %v612_v4 = vshll.u32 %v542_v55, 16  ;;  %v690_v12 = vld [vmem:[#allocation2 + $0x18] sm:$0xf]  ;;  %v819_v23 = vld [vmem:[#allocation2 + $0x4] sm:$0xf] }
  0x43   : > { %v736_v42 = vsel %vm7161_vm13, %v728_v33, %v735_v53  ;;  %v904_v32 = vor.u32 %v903_v49, %v7329_v47  ;;  %v601_v1 = vrot.slane %v599_v50, 5  ;;  %v604_v6 = vrot.slane %v602_v58, 6  ;;  %828 = vst.msk [vmem:[#allocation3 + $0x4] sm:$0xf] %vm256_vm0, %v819_v23  ;;  %v1129_v46 = vld [vmem:[#allocation2 + $0x18] sm:$0xf] }
  0x44   : > { %1094 = vrot.lane.b32.xlu1 %v1037_v48, %s6998_s10  ;;  %v487_v5 = vrot.slane %v485_v63, 4  ;;  %v7341_v11 = vrot.slane %v894_v36, 4  ;;  %v7343_v13 = vrot.slane %v907_v27, 5  ;;  %v1040_v15 = vshrl.u32 %v982_v62, 16  ;;  %829 = vst.msk [vmem:[#allocation3 + $0x10] sm:$0xf] %vm256_vm0, %v820_v43 }
  0x45   : > { %v611_v28 = vrot.slane %v609_v3, 5  ;;  %v614_v37 = vrot.slane %v612_v4, 6  ;;  %v1043_v38 = vshll.u32 %v982_v62, 16  ;;  %v1050_v18 = vshrl.u32 %v983_v60, 16  ;;  %v7364_v58 = vld [vmem:[#allocation2 + $0x1c] sm:$0xf] }
  0x46   : > { %786 = vrot.lane.b32.xlu0 %v727_v0, %s6997_s15  ;;  %v1156_v30 = vsel %vm7113_vm12, %v1154_v24, %v1155_v2  ;;  %v1159_v33 = vsel %vm7113_vm12, %v1157_v44, %v1158_v25  ;;  %v1042_v56 = vrot.slane %v1040_v15, 6  ;;  %v1053_v10 = vshll.u32 %v983_v60, 16  ;;  %v7366_v62 = vld [vmem:[#allocation2 + $0x1c] sm:$0xf]  ;;  %v544_v23 = vld [vmem:[#allocation2 + $0x20] sm:$0xf] }
  0x47   : > { %v486_v48 = vsel %vm7095_vm7, %v484_v16, %v485_v63  ;;  %v7355_v53 = vrot.slane %v904_v32, 4  ;;  %v605_v45 = vor.u32 %v604_v6, %v601_v1  ;;  %v1045_v55 = vrot.slane %v1043_v38, 7  ;;  %v844_v1 = vld [vmem:[#allocation2 + $0x20] sm:$0xf]  ;;  %v821_v43 = vld [vmem:[#allocation2 + $0xc] sm:$0xf] }
  0x48   : > { %788 = vrot.lane.b32.xlu1 %v736_v42, %s6997_s15  ;;  %v597_v2 = vrot.slane %v7279_v59, 4  ;;  %v1052_v24 = vrot.slane %v1050_v18, 6  ;;  %v1055_v44 = vrot.slane %v1053_v10, 7  ;;  %v739_v27 = vshrl.u32 %v689_v8, 16  ;;  %830 = vst.msk [vmem:[#allocation3 + $0x1c] sm:$0xf] %vm256_vm0, %v821_v43 }
  0x49   : > { %v489_v49 = vsel %vm7095_vm7, %v487_v5, %v488_v34  ;;  %v1046_v16 = vor.u32 %v1045_v55, %v1042_v56  ;;  %v742_v63 = vshll.u32 %v689_v8, 16  ;;  %v748_v50 = vshrl.u32 %v690_v12, 16  ;;  %v7387_v5 = vld [vmem:[#allocation2 + $0x20] sm:$0xf]  ;;  %v7402_v56 = vld [vmem:[#allocation2 + $0x24] sm:$0xf] }
  0x4a   : > { %1179 = vrot.lane.b32.xlu0 %v1156_v30, %s6997_s15  ;;  %v900_v59 = vsel %vm7179_vm14, %v7341_v11, %v7329_v47  ;;  %v1038_v0 = vrot.slane %v7297_v17, 4  ;;  %v741_v36 = vrot.slane %v739_v27, 7  ;;  %v751_v3 = vshll.u32 %v690_v12, 16  ;;  %v543_v11 = vld [vmem:[#allocation2 + $0x1c] sm:$0xf] }
  0x4b   : > { %v910_v4 = vsel %vm7179_vm14, %v7355_v53, %v7343_v13  ;;  %v607_v60 = vrot.slane %v605_v45, 4  ;;  %v7378_v42 = vor.u32 %v614_v37, %v611_v28  ;;  %v7380_v32 = vrot.slane %v748_v50, 7  ;;  %v984_v55 = vld [vmem:[#allocation2 + $0x20] sm:$0xf] }
  0x4c   : > { %1181 = vrot.lane.b32.xlu1 %v1159_v33, %s6997_s15  ;;  %v1048_v6 = vrot.slane %v1046_v16, 4  ;;  %v7383_v8 = vor.u32 %v1055_v44, %v1052_v24  ;;  %v1160_v17 = vrot.slane %v1158_v25, 4  ;;  %v1161_v47 = vrot.slane %v1129_v46, 7  ;;  %v822_v46 = vld [vmem:[#allocation2 + $0x10] sm:$0xf] }
  0x4d   : > { %v606_v15 = vsel %vm7188_vm2, %v597_v2, %v605_v45  ;;  %v737_v12 = vrot.slane %v7299_v26, 4  ;;  %v744_v28 = vor.u32 %v742_v63, %v741_v36  ;;  %v746_v37 = vrot.slane %v741_v36, 4  ;;  %831 = vst.msk [vmem:[#allocation3 + $0x28] sm:$0xf] %vm256_vm0, %v822_v46 }
  0x4e   : > { %507 = vrot.lane.b32.xlu0 %v486_v48, %s6996_s12  ;;  %v753_v38 = vor.u32 %v751_v3, %v7380_v32  ;;  %v1164_v18 = vrot.slane %v7364_v58, 7  ;;  %v491_v14 = vrot.slane %v7366_v62, 5  ;;  %v911_v25 = vshrl.u32 %v7320_v29, 16  ;;  %v824_v58 = vld [vmem:[#allocation2 + $0x18] sm:$0xf] }
  0x4f   : > { %v616_v30 = vsel %vm7188_vm2, %v607_v60, %v7378_v42  ;;  %v1047_v26 = vsel %vm7238_vm3, %v1038_v0, %v1046_v16  ;;  %v917_v33 = vshll.u32 %v844_v1, 16  ;;  %v921_v10 = vshrl.u32 %v844_v1, 16  ;;  %833 = vst.msk [vmem:[#allocation3 + $0x40] sm:$0xf] %vm256_vm0, %v824_v58 }
  0x50   : > { %509 = vrot.lane.b32.xlu1 %v489_v49, %s6996_s12  ;;  %v1057_v48 = vsel %vm7238_vm3, %v1048_v6, %v7383_v8  ;;  %v7410_v29 = vsel %vm7113_vm12, %v1160_v17, %v1161_v47  ;;  %v490_v53 = vrot.slane %v488_v34, 4  ;;  %v913_v45 = vrot.slane %v911_v25, 4  ;;  %v985_v49 = vld [vmem:[#allocation2 + $0x24] sm:$0xf]  ;;  %v691_v6 = vld [vmem:[#allocation2 + $0x1c] sm:$0xf] }
  0x51   : > { %v1163_v2 = vrot.slane %v1161_v47, 4  ;;  %v494_v24 = vrot.slane %v7387_v5, 5  ;;  %v7416_v44 = vrot.slane %v917_v33, 5  ;;  %v619_v27 = vshrl.u32 %v543_v11, 16  ;;  %v7494_v5 = vld [vmem:[#allocation2 + $0x24] sm:$0xf] }
  0x52   : > { %949 = vrot.lane.b32.xlu0 %v900_v59, %s6996_s12  ;;  %v745_v19 = vsel %vm7161_vm13, %v737_v12, %v744_v28  ;;  %v7424_v34 = vsel %vm7161_vm13, %v746_v37, %v753_v38  ;;  %v923_v16 = vrot.slane %v921_v10, 4  ;;  %v622_v63 = vshll.u32 %v543_v11, 16  ;;  %v692_v37 = vld [vmem:[#allocation2 + $0x20] sm:$0xf] }
  0x53   : > { %v493_v50 = vrot.slane %v491_v14, 4  ;;  %v621_v62 = vrot.slane %v619_v27, 5  ;;  %v629_v0 = vshrl.u32 %v544_v23, 16  ;;  %v632_v36 = vshll.u32 %v544_v23, 16  ;;  %v1131_v10 = vld [vmem:[#allocation2 + $0x20] sm:$0xf] }
  0x54   : > { %951 = vrot.lane.b32.xlu1 %v910_v4, %s6996_s12  ;;  %v914_v3 = vor.u32 %v913_v45, %v7343_v13  ;;  %v927_v60 = vshll.u32 %v7402_v56, 16  ;;  %v624_v59 = vrot.slane %v622_v63, 6  ;;  %v1060_v1 = vshrl.u32 %v984_v55, 16  ;;  %v1132_v63 = vld [vmem:[#allocation2 + $0x24] sm:$0xf] }
  0x55   : > { %v617_v17 = vrot.slane %v7378_v42, 4  ;;  %v631_v47 = vrot.slane %v629_v0, 5  ;;  %v634_v12 = vrot.slane %v632_v36, 6  ;;  %v1063_v28 = vshll.u32 %v984_v55, 16 }
  0x56   : > { %655 = vrot.lane.b32.xlu0 %v606_v15, %s6998_s10  ;;  %v7435_v4 = vsel %vm7113_vm12, %v1163_v2, %v1164_v18  ;;  %v924_v13 = vor.u32 %v923_v16, %v7416_v44  ;;  %v1062_v11 = vrot.slane %v1060_v1, 6  ;;  %v1070_v38 = vshrl.u32 %v985_v49, 16 }
  0x57   : > { %v7440_v25 = vsel %vm7095_vm7, %v490_v53, %v491_v14  ;;  %v625_v42 = vor.u32 %v624_v59, %v621_v62  ;;  %v1065_v23 = vrot.slane %v1063_v28, 7  ;;  %v1073_v33 = vshll.u32 %v985_v49, 16 }
  0x58   : > { %657 = vrot.lane.b32.xlu1 %v616_v30, %s6998_s10  ;;  %v7447_v15 = vsel %vm7095_vm7, %v493_v50, %v494_v24  ;;  %v7449_v43 = vrot.slane %v914_v3, 4  ;;  %v7451_v45 = vrot.slane %v927_v60, 5  ;;  %v1072_v55 = vrot.slane %v1070_v38, 6 }
  0x59   : > { %v1066_v46 = vor.u32 %v1065_v23, %v1062_v11  ;;  %v1075_v14 = vrot.slane %v1073_v33, 7  ;;  %v757_v53 = vshrl.u32 %v691_v6, 16  ;;  %v760_v2 = vshll.u32 %v691_v6, 16 }
  0x5a   : > { %1096 = vrot.lane.b32.xlu0 %v1047_v26, %s6998_s10  ;;  %v7454_v27 = vrot.slane %v924_v13, 4  ;;  %v1058_v30 = vrot.slane %v7383_v8, 4  ;;  %v766_v49 = vshrl.u32 %v692_v37, 16  ;;  %v769_v16 = vshll.u32 %v692_v37, 16  ;;  %v457_v8 = vld [vmem:[#allocation2 + $0x24] sm:$0x1] }
  0x5b   : > { %v627_v50 = vrot.slane %v625_v42, 4  ;;  %v7457_v62 = vor.u32 %v634_v12, %v631_v47  ;;  %v755_v0 = vrot.slane %v7380_v32, 4  ;;  %v759_v36 = vrot.slane %v757_v53, 7  ;;  %v545_v12 = vld [vmem:[#allocation2 + $0x24] sm:$0x3] }
  0x5c   : > { %1098 = vrot.lane.b32.xlu1 %v1057_v48, %s6998_s10  ;;  %v7461_v3 = vrot.slane %v766_v49, 7  ;;  %v1166_v26 = vrot.slane %v1164_v18, 4  ;;  %v1167_v60 = vrot.slane %v1131_v10, 7  ;;  %v931_v59 = vshrl.u32 %v7402_v56, 16  ;;  %v823_v37 = vld [vmem:[#allocation2 + $0x14] sm:$0xf] }
  0x5d   : > { %v1068_v1 = vrot.slane %v1066_v46, 4  ;;  %v7466_v6 = vor.u32 %v1075_v14, %v1072_v55  ;;  %v762_v28 = vor.u32 %v760_v2, %v759_v36  ;;  %v1170_v47 = vrot.slane %v1132_v63, 7  ;;  %832 = vst.msk [vmem:[#allocation3 + $0x34] sm:$0xf] %vm256_vm0, %v823_v37  ;;  %v326_v55 = vld [vmem:[#allocation2 + $0xc] sm:$0xf] }
  0x5e   : > { %790 = vrot.lane.b32.xlu0 %v745_v19, %s6997_s15  ;;  %v764_v32 = vrot.slane %v759_v36, 4  ;;  %v771_v48 = vor.u32 %v769_v16, %v7461_v3  ;;  %v1169_v13 = vrot.slane %v1167_v60, 4  ;;  %v933_v11 = vrot.slane %v931_v59, 4  ;;  %v825_v14 = vld [vmem:[#allocation2 + $0x1c] sm:$0xf] }
  0x5f   : > { %v920_v18 = vsel %vm7179_vm14, %v7449_v43, %v7416_v44  ;;  %v930_v56 = vsel %vm7179_vm14, %v7454_v27, %v7451_v45  ;;  %v496_v19 = vrot.slane %v494_v24, 4  ;;  %v497_v38 = vrot.slane %v457_v8, 5  ;;  %v324_v24 = vld [vmem:[#allocation2 + $0x4] sm:$0xf]  ;;  %v826_v53 = vld [vmem:[#allocation2 + $0x20] sm:$0xf] }
  0x60   : > { %792 = vrot.lane.b32.xlu1 %v7424_v34, %s6997_s15  ;;  %v7486_v23 = vsel %vm7188_vm2, %v617_v17, %v625_v42  ;;  %v7491_v44 = vsel %vm7188_vm2, %v627_v50, %v7457_v62  ;;  %v934_v33 = vor.u32 %v933_v11, %v7451_v45  ;;  %v639_v10 = vshrl.u32 %v545_v12, 16  ;;  %v7525_v16 = vld [vmem:[#allocation2 + $0x10] sm:$0xf]  ;;  %v325_v63 = vld [vmem:[#allocation2 + $0x8] sm:$0xf] }
  0x61   : > { %v7498_v43 = vsel %vm7238_vm3, %v1058_v30, %v1066_v46  ;;  %v7503_v34 = vsel %vm7238_vm3, %v1068_v1, %v7466_v6  ;;  %v7507_v17 = vsel %vm7161_vm13, %v755_v0, %v762_v28  ;;  %v7511_v42 = vsel %vm7113_vm12, %v1166_v26, %v1167_v60  ;;  %834 = vst.msk [vmem:[#allocation3 + $0x4c] sm:$0xf] %vm256_vm0, %v825_v14 }
  0x62   : > { %1183 = vrot.lane.b32.xlu0 %v7410_v29, %s6997_s15  ;;  %v7517_v46 = vsel %vm7161_vm13, %v764_v32, %v771_v48  ;;  %v7521_v2 = vsel %vm7113_vm12, %v1169_v13, %v1170_v47  ;;  %v1078_v30 = vrot.slane %v7466_v6, 4  ;;  %v637_v49 = vrot.slane %v7457_v62, 4  ;;  %835 = vst.msk [vmem:[#allocation3 + $0x58] sm:$0xf] %vm256_vm0, %v826_v53  ;;  %v1212_v48 = vld [vmem:[#allocation2 + $0x8] sm:$0xf] }
  0x63   : > { %v7529_v29 = vrot.slane %v934_v33, 4  ;;  %v7533_v50 = vsel %vm7095_vm7, %v496_v19, %v497_v38  ;;  %v642_v0 = vshll.u32 %v545_v12, 16  ;;  %v7535_v36 = vrot.slane %v1170_v47, 4  ;;  %v6879_v47 = vld [vmem:[%s9938_s1 + $0x80] sm:$0xff]   ;;  %v1213_v13 = vld [vmem:[#allocation2 + $0xc] sm:$0xf] }
  0x64   : > { %1185 = vrot.lane.b32.xlu1 %v7435_v4, %s6997_s15  ;;  %v7539_v26 = vrot.slane %v639_v10, 5  ;;  %v344_v60 = vrot.slane %v343_v21, 4  ;;  %v346_v59 = vshll.u32 %v324_v24, 16  ;;  %v366_v8 = vshll.u32 %v326_v55, 16  ;;  %v1211_v12 = vld [vmem:[#allocation2 + $0x4] sm:$0x8] }
  0x65   : > { %v775_v1 = vshrl.u32 %v7494_v5, 16  ;;  %v370_v28 = vshrl.u32 %v326_v55, 16  ;;  %v376_v37 = vshll.u32 %v7525_v16, 16  ;;  %v356_v32 = vshll.u32 %v325_v63, 16 }
  0x66   : > { %511 = vrot.lane.b32.xlu0 %v7440_v25, %s6996_s12  ;;  %v773_v4 = vrot.slane %v7461_v3, 4  ;;  %v348_v54 = vrot.slane %v346_v59, 5  ;;  %v7552_v57 = vrot.slane %v366_v8, 5  ;;  %v350_v21 = vshrl.u32 %v324_v24, 16 }
  0x67   : > { %v7554_v11 = vrot.slane %v642_v0, 6  ;;  %v778_v58 = vshll.u32 %v7494_v5, 16  ;;  %v372_v19 = vrot.slane %v370_v28, 4  ;;  %v358_v38 = vrot.slane %v356_v32, 5 }
  0x68   : > { %513 = vrot.lane.b32.xlu1 %v7447_v15, %s6996_s12  ;;  %v940_v25 = vsel %vm7179_vm14, %v7529_v29, %v7290_v7  ;;  %v349_v33 = vsel %vm7179_vm14, %v344_v60, %v348_v54  ;;  %v352_v10 = vrot.slane %v350_v21, 4  ;;  %v360_v24 = vshrl.u32 %v325_v63, 16  ;;  %v6880_v60 = vld [vmem:[%s9938_s1 + $0x88] sm:$0xff]   ;;  %v329_v21 = vld [vmem:[#allocation2 + $0x18] sm:$0xf] }
  0x69   : > { %v7565_v55 = vrot.slane %v775_v1, 7  ;;  %439 = vst.msk [vmem:[#allocation3] sm:$0xf] %vm256_vm0, %v349_v33  ;;  %v373_v14 = vor.u32 %v372_v19, %v7552_v57  ;;  %v7569_v53 = vrot.slane %v376_v37, 5  ;;  %v9944_v59 = vmov 0.0  }
  0x6a   : > { %953 = vrot.lane.b32.xlu0 %v920_v18, %s6996_s12  ;;  %v353_v15 = vor.u32 %v352_v10, %v348_v54  ;;  %v362_v0 = vrot.slane %v360_v24, 4  ;;  %6747 = vmatprep.subr.bf16.mxu1 %v9944_v59  ;;  %v1222_v63 = vshrl.u32 %v1211_v12, 16  ;;  %v1227_v1 = vshrl.u32 %v1212_v48, 16  ;;  %v328_v18 = vld [vmem:[#allocation2 + $0x14] sm:$0xf] }
  0x6b   : > { %v374_v8 = vrot.slane %v373_v14, 4  ;;  %6748 = vmatpush3.bf16.msra.mxu1 %v6879_v47  ;;  %6751 = vmatprep.mubr.msk.bf16.mxu1 %vm7000_vm4, %v9944_v59  ;;  %v1230_v28 = vshll.u32 %v1212_v48, 16  ;;  %v1236_v37 = vshrl.u32 %v1213_v13, 16  ;;  %v645_v32 = vor.u32 %v7554_v11, %v7539_v26  ;;  %v1214_v24 = vld [vmem:[#allocation2 + $0x10] sm:$0xf] }
  0x6c   : > { %955 = vrot.lane.b32.xlu1 %v930_v56, %s6996_s12  ;;  %v354_v12 = vrot.slane %v353_v15, 4  ;;  %v363_v47 = vor.u32 %v362_v0, %v358_v38  ;;  %6749 = vmatprep.subr.bf16.mxu1 %v9944_v59  ;;  %v1239_v54 = vshll.u32 %v1213_v13, 16  ;;  %v6227_v19 = vrot.slane %v1222_v63, 11  ;;  %v1215_v14 = vld [vmem:[#allocation2 + $0x14] sm:$0xf] }
  0x6d   : > { %v379_v48 = vsel %vm7179_vm14, %v374_v8, %v7569_v53  ;;  %v1229_v33 = vrot.slane %v1227_v1, 7  ;;  %v7590_v10 = vrot.slane %v1236_v37, 7  ;;  %6771 = vmatprep.subr.bf16.mxu0 %v9944_v59  ;;  %v380_v56 = vshrl.u32 %v7525_v16, 16  ;;  %v330_v1 = vld [vmem:[#allocation2 + $0x1c] sm:$0xf] }
  0x6e   : > { %659 = vrot.lane.b32.xlu0 %v7486_v23, %s6998_s10  ;;  %442 = vst.msk [vmem:[#allocation3 + $0x24] sm:$0xf] %vm256_vm0, %v379_v48  ;;  %v359_v45 = vsel %vm7179_vm14, %v354_v12, %v358_v38  ;;  %v364_v27 = vrot.slane %v363_v47, 4  ;;  %v386_v13 = vshll.u32 %v328_v18, 16  ;;  %v390_v8 = vshrl.u32 %v328_v18, 16 }
  0x6f   : > { %440 = vst.msk [vmem:[#allocation3 + $0xc] sm:$0xf] %vm256_vm0, %v359_v45  ;;  %6750 = vmatpush3.bf16.msra.mxu1 %v6880_v60  ;;  %v1232_v15 = vor.u32 %v1230_v28, %v1229_v33  ;;  %v1234_v0 = vrot.slane %v1229_v33, 4  ;;  %v1241_v63 = vor.u32 %v1239_v54, %v7590_v10  ;;  %v382_v16 = vrot.slane %v380_v56, 4  ;;  %v7617_v48 = vld [vmem:[#allocation2 + $0x20] sm:$0xf] }
  0x70   : > { %661 = vrot.lane.b32.xlu1 %v7491_v44, %s6998_s10  ;;  %v369_v23 = vsel %vm7179_vm14, %v364_v27, %v7552_v57  ;;  %v388_v38 = vrot.slane %v386_v13, 5  ;;  %v396_v37 = vshll.u32 %v329_v21, 16  ;;  %v392_v18 = vrot.slane %v390_v8, 4  ;;  %v1216_v56 = vld [vmem:[#allocation2 + $0x18] sm:$0xf] }
  0x71   : > { %441 = vst.msk [vmem:[#allocation3 + $0x18] sm:$0xf] %vm256_vm0, %v369_v23  ;;  %v1233_v60 = vsel %vm7161_vm13, %v6227_v19, %v1232_v15  ;;  %v1242_v28 = vsel %vm7161_vm13, %v1234_v0, %v1241_v63  ;;  %v1243_v12 = vrot.slane %v7590_v10, 4  ;;  %v383_v44 = vor.u32 %v382_v16, %v7569_v53 }
  0x72   : > { %1100 = vrot.lane.b32.xlu0 %v7498_v43, %s6998_s10  ;;  %1315 = vst.msk [vmem:[#allocation3 + $0x8] sm:$0xf] %vm256_vm0, %v1233_v60  ;;  %1316 = vst.msk [vmem:[#allocation3 + $0x14] sm:$0xf] %vm256_vm0, %v1242_v28  ;;  %v398_v57 = vrot.slane %v396_v37, 5  ;;  %v1245_v47 = vshrl.u32 %v1214_v24, 16  ;;  %v393_v19 = vor.u32 %v392_v18, %v388_v38 }
  0x73   : > { %v1248_v54 = vshll.u32 %v1214_v24, 16  ;;  %v1254_v33 = vshrl.u32 %v1215_v14, 16  ;;  %v1257_v45 = vshll.u32 %v1215_v14, 16  ;;  %v400_v27 = vshrl.u32 %v329_v21, 16  ;;  %v1217_v24 = vld [vmem:[#allocation2 + $0x1c] sm:$0xf] }
  0x74   : > { %1102 = vrot.lane.b32.xlu1 %v7503_v34, %s6998_s10  ;;  %v384_v43 = vrot.slane %v383_v44, 4  ;;  %v1247_v10 = vrot.slane %v1245_v47, 7  ;;  %v406_v13 = vshll.u32 %v330_v1, 16  ;;  %v410_v15 = vshrl.u32 %v330_v1, 16  ;;  %v827_v34 = vld [vmem:[#allocation2 + $0x24] sm:$0xf] }
  0x75   : > { %v394_v0 = vrot.slane %v393_v19, 4  ;;  %v1256_v63 = vrot.slane %v1254_v33, 7  ;;  %v402_v53 = vrot.slane %v400_v27, 4  ;;  %v416_v8 = vshll.u32 %v7617_v48, 16  ;;  %v332_v37 = vld [vmem:[#allocation2 + $0x24] sm:$0x1] }
  0x76   : > { %794 = vrot.lane.b32.xlu0 %v7507_v17, %s6997_s15  ;;  %v389_v21 = vsel %vm7179_vm14, %v384_v43, %v388_v38  ;;  %v1250_v14 = vor.u32 %v1248_v54, %v1247_v10  ;;  %v1252_v23 = vrot.slane %v1247_v10, 4  ;;  %v408_v16 = vrot.slane %v406_v13, 5  ;;  %836 = vst.msk [vmem:[#allocation3 + $0x64] sm:$0xf] %vm256_vm0, %v827_v34  ;;  %v1218_v54 = vld [vmem:[#allocation2 + $0x20] sm:$0xf] }
  0x77   : > { %443 = vst.msk [vmem:[#allocation3 + $0x30] sm:$0xf] %vm256_vm0, %v389_v21  ;;  %v399_v1 = vsel %vm7179_vm14, %v394_v0, %v398_v57  ;;  %v1259_v60 = vor.u32 %v1257_v45, %v1256_v63  ;;  %v403_v28 = vor.u32 %v402_v53, %v398_v57  ;;  %v412_v18 = vrot.slane %v410_v15, 4  ;;  %v1220_v27 = vld [vmem:[#allocation2 + $0x28] sm:$0xf] }
  0x78   : > { %796 = vrot.lane.b32.xlu1 %v7517_v46, %s6997_s15  ;;  %444 = vst.msk [vmem:[#allocation3 + $0x3c] sm:$0xf] %vm256_vm0, %v399_v1  ;;  %v1251_v17 = vsel %vm7161_vm13, %v1243_v12, %v1250_v14  ;;  %v418_v38 = vrot.slane %v416_v8, 5  ;;  %v1261_v44 = vrot.slane %v1256_v63, 4  ;;  %v1263_v47 = vshrl.u32 %v1216_v56, 16 }
  0x79   : > { %v646_v57 = vsel %vm7188_vm2, %v637_v49, %v645_v32  ;;  %v780_v46 = vor.u32 %v778_v58, %v7565_v55  ;;  %v6881_v19 = vld [vmem:[#allocation3 + $0x8] ss:$12 sps:$4 sm:$0xff]   ;;  %v1260_v12 = vsel %vm7161_vm13, %v1252_v23, %v1259_v60  ;;  %1317 = vst.msk [vmem:[#allocation3 + $0x20] sm:$0xf] %vm256_vm0, %v1251_v17  ;;  %v413_v33 = vor.u32 %v412_v18, %v408_v16  ;;  %v1219_v32 = vld [vmem:[#allocation2 + $0x24] sm:$0xf] }
  0x7a   : > { %1187 = vrot.lane.b32.xlu0 %v7511_v42, %s6997_s15  ;;  %1318 = vst.msk [vmem:[#allocation3 + $0x2c] sm:$0xf] %vm256_vm0, %v1260_v12  ;;  %v404_v62 = vrot.slane %v403_v28, 4  ;;  %v1265_v26 = vrot.slane %v1263_v47, 7  ;;  %v1266_v11 = vshll.u32 %v1216_v56, 16  ;;  %v1272_v49 = vshrl.u32 %v1217_v24, 16  ;;  %6752 = vmatmul.mubr.msk.bf16.vlgmr.msra.gmra.mrb[0].mxu1 %vm1563_vm5, %v6881_v19 }
  0x7b   : > { %v414_v5 = vrot.slane %v413_v33, 4  ;;  %v1275_v58 = vshll.u32 %v1217_v24, 16  ;;  %v420_v55 = vshrl.u32 %v7617_v48, 16  ;;  %v426_v45 = vshll.u32 %v332_v37, 16  ;;  %6755 = vmatprep.mubr.msk.bf16.mxu1 %vm7000_vm4, %v9944_v59  ;;  %v264_v47 = vld [vmem:[%s9942_s5 + $0x28] sm:$0xff]  ;;  %v266_v19 = vld [vmem:[%s9942_s5 + $0x38] sm:$0xff] }
  0x7c   : > { %1189 = vrot.lane.b32.xlu1 %v7521_v2, %s6997_s15  ;;  %v409_v42 = vsel %vm7179_vm14, %v404_v62, %v408_v16  ;;  %v1268_v56 = vor.u32 %v1266_v11, %v1265_v26  ;;  %v1270_v43 = vrot.slane %v1265_v26, 4  ;;  %v1274_v10 = vrot.slane %v1272_v49, 7  ;;  %v265_v33 = vld [vmem:[%s9942_s5 + $0x30] sm:$0xff]  ;;  %v267_v49 = vld [vmem:[%s9942_s5 + $0x40] sm:$0xff] }
  0x7d   : > { %445 = vst.msk [vmem:[#allocation3 + $0x48] sm:$0xf] %vm256_vm0, %v409_v42  ;;  %v419_v13 = vsel %vm7179_vm14, %v414_v5, %v418_v38  ;;  %v422_v48 = vrot.slane %v420_v55, 4  ;;  %v428_v15 = vrot.slane %v426_v45, 5  ;;  %v1281_v0 = vshrl.u32 %v1218_v54, 16 }
  0x7e   : > { %515 = vrot.lane.b32.xlu0 %v7533_v50, %s6996_s12  ;;  %446 = vst.msk [vmem:[#allocation3 + $0x54] sm:$0xf] %vm256_vm0, %v419_v13  ;;  %v1269_v2 = vsel %vm7161_vm13, %v1261_v44, %v1268_v56  ;;  %v1277_v63 = vor.u32 %v1275_v58, %v1274_v10  ;;  %v1279_v53 = vrot.slane %v1274_v10, 4  ;;  %v1284_v8 = vshll.u32 %v1218_v54, 16  ;;  %v261_v44 = vld [vmem:[%s9942_s5 + $0x10] sm:$0xff] }
  0x7f   : > { %1319 = vst.msk [vmem:[#allocation3 + $0x38] sm:$0xf] %vm256_vm0, %v1269_v2  ;;  %v423_v24 = vor.u32 %v422_v48, %v418_v38  ;;  %v1283_v21 = vrot.slane %v1281_v0, 7  ;;  %v1290_v14 = vshrl.u32 %v1219_v32, 16  ;;  %v1293_v23 = vshll.u32 %v1219_v32, 16 }
  0x80   : > { %957 = vrot.lane.b32.xlu1 %v940_v25, %s6996_s12  ;;  %v1278_v50 = vsel %vm7161_vm13, %v1270_v43, %v1277_v63  ;;  %v1299_v16 = vshrl.u32 %v1220_v27, 16  ;;  %v1302_v34 = vshll.u32 %v1220_v27, 16  ;;  %v1087_v37 = vsel %vm7238_vm3, %v1078_v30, %v1086_v20 }
  0x81   : > { %v6882_v1 = vld [vmem:[#allocation3 + $0x20] ss:$12 sps:$4 sm:$0xff]   ;;  %1320 = vst.msk [vmem:[#allocation3 + $0x44] sm:$0xf] %vm256_vm0, %v1278_v50  ;;  %v424_v60 = vrot.slane %v423_v24, 4  ;;  %v1286_v28 = vor.u32 %v1284_v8, %v1283_v21  ;;  %v1288_v7 = vrot.slane %v1283_v21, 4  ;;  %v781_v40 = vsel %vm7161_vm13, %v773_v4, %v780_v46 }
  0x82   : > { %663 = vrot.lane.b32.xlu0 %v646_v57, %s6998_s10  ;;  %v1292_v29 = vrot.slane %v1290_v14, 7  ;;  %v1301_v25 = vrot.slane %v1299_v16, 7  ;;  %6756 = vmatmul.mubr.msk.bf16.gmra.mrb[4].mxu1 %vm1563_vm5, %v6882_v1  ;;  %v1174_v4 = vsel %vm7113_vm12, %v7535_v36, %v1173_v41  ;;  %v260_v41 = vld [vmem:[%s9942_s5 + $0x8] sm:$0xff]  ;;  %v262_v36 = vld [vmem:[%s9942_s5 + $0x18] sm:$0xff]  ;;  %v263_v57 = vld [vmem:[%s9942_s5 + $0x20] sm:$0xff] }
  0x83   : > { %v429_v9 = vsel %vm7179_vm14, %v424_v60, %v428_v15  ;;  %v1287_v20 = vsel %vm7161_vm13, %v1279_v53, %v1286_v28  ;;  %6759 = vmatprep.mubr.msk.bf16.mxu1 %vm7000_vm4, %v9944_v59 }
  0x84   : > { %1104 = vrot.lane.b32.xlu1 %v1087_v37, %s6998_s10  ;;  %447 = vst.msk [vmem:[#allocation3 + $0x60] sm:$0xf] %vm256_vm0, %v429_v9  ;;  %v1295_v6 = vor.u32 %v1293_v23, %v1292_v29  ;;  %1321 = vst.msk [vmem:[#allocation3 + $0x50] sm:$0xf] %vm256_vm0, %v1287_v20  ;;  %v1297_v3 = vrot.slane %v1292_v29, 4  ;;  %v1304_v30 = vor.u32 %v1302_v34, %v1301_v25 }
  0x86   : > { %798 = vrot.lane.b32.xlu0 %v781_v40, %s6997_s15  ;;  %v1296_v18 = vsel %vm7161_vm13, %v1288_v7, %v1295_v6  ;;  %v1305_v17 = vsel %vm7161_vm13, %v1297_v3, %v1304_v30 }
  0x87   : > { %1322 = vst.msk [vmem:[#allocation3 + $0x5c] sm:$0xf] %vm256_vm0, %v1296_v18  ;;  %1323 = vst.msk [vmem:[#allocation3 + $0x68] sm:$0xf] %vm256_vm0, %v1305_v17 }
  0x88   : > { %1191 = vrot.lane.b32.xlu1 %v1174_v4, %s6997_s15  ;;  %v6883_v38 = vld [vmem:[#allocation3 + $0x38] ss:$12 sps:$4 sm:$0xff]  }
  0x8a   : > { %1734 = vperm.xlu0 %6861, %v259_v31   ;;  %6760 = vmatmul.mubr.msk.bf16.gmra.mrb[8].mxu1 %vm1563_vm5, %v6883_v38 }
  0x8b   : > { %6763 = vmatprep.mubr.msk.bf16.mxu1 %vm7000_vm4, %v9944_v59 }
  0x8c   : > { %1739 = vperm.xlu1 %6862, %v260_v41  }
  0x8e   : > { %1749 = vperm.xlu0 %6861, %v262_v36   ;;  %v6884_v54 = vld [vmem:[#allocation3 + $0x50] ss:$12 sps:$4 sm:$0xff]   ;;  %v6885_v26 = vld [vmem:[#allocation3 + $0x68] ss:$0 sps:$4 sm:$0xff]  }
  0x90   : > { %v500_v46 = vpop.permute.xlu0 %499  ;;  %1744 = vperm.xlu1 %6862, %v261_v44  }
  0x91   : > { %527 = vst.msk [vmem:[#allocation3] sm:$0xf] %vm526_vm6, %v500_v46 }
  0x92   : > { %v1178_v12 = vpop.permute.xlu1 %1177  ;;  %1759 = vperm.xlu0 %6861, %v264_v47   ;;  %6764 = vmatmul.mubr.msk.bf16.gmra.mrb[12].mxu1 %vm1563_vm5, %v6884_v54 }
  0x93   : > { %6767 = vmatprep.mubr.msk.bf16.mxu1 %vm7000_vm4, %v9944_v59 }
  0x94   : > { %v1176_v62 = vpop.permute.xlu0 %1175  ;;  %1754 = vperm.xlu1 %6862, %v263_v57  }
  0x96   : > { %v506_v11 = vpop.permute.xlu1 %505  ;;  %1769 = vperm.xlu0 %6861, %v266_v19  }
  0x97   : > { %530 = vst.msk [vmem:[#allocation3 + $0x24] sm:$0xf] %vm526_vm6, %v506_v11 }
  0x98   : > { %v502_v32 = vpop.permute.xlu0 %501  ;;  %1764 = vperm.xlu1 %6862, %v265_v33  }
  0x99   : > { %528 = vst.msk [vmem:[#allocation3 + $0xc] sm:$0xf] %vm526_vm6, %v502_v32 }
  0x9a   : > { %v785_v5 = vpop.permute.xlu1 %784  ;;  %6768 = vmatmul.mubr.msk.bf16.gmra.mrb[16].mxu1 %vm1563_vm5, %v6885_v26 }
  0x9c   : > { %v504_v58 = vpop.permute.xlu0 %503  ;;  %1774 = vperm.xlu1 %6862, %v267_v49  }
  0x9d   : > { %529 = vst.msk [vmem:[#allocation3 + $0x18] sm:$0xf] %vm526_vm6, %v504_v58 }
  0x9e   : > { %v942_v55 = vpop.permute.xlu1 %941 }
  0x9f   : > { %968 = vst.msk [vmem:[#allocation3 + $0x4] sm:$0xf] %vm526_vm6, %v942_v55 }
  0xa0   : > { %v648_v45 = vpop.permute.xlu0 %647 }
  0xa1   : > { %675 = vst.msk [vmem:[#allocation3] sm:$0xf] %vm674_vm8, %v648_v45 }
  0xa2   : > { %v944_v27 = vpop.permute.xlu1 %943 }
  0xa3   : > { %969 = vst.msk [vmem:[#allocation3 + $0x10] sm:$0xf] %vm526_vm6, %v944_v27 }
  0xa4   : > { %v783_v42 = vpop.permute.xlu0 %782 }
  0xa5   : > { %810 = vst.msk [vmem:[#allocation3] sm:$0xf] %vm809_vm9, %v783_v42 }
  0xa6   : > { %v650_v56 = vpop.permute.xlu1 %649 }
  0xa7   : > { %676 = vst.msk [vmem:[#allocation3 + $0xc] sm:$0xf] %vm674_vm8, %v650_v56 }
  0xa8   : > { %811 = vst.msk [vmem:[#allocation3 + $0xc] sm:$0xf] %vm809_vm9, %v785_v5  ;;  %v1089_v43 = vpop.permute.xlu0 %1088 }
  0xa9   : > { %1115 = vst.msk [vmem:[#allocation3 + $0x4] sm:$0xf] %vm674_vm8, %v1089_v43 }
  0xaa   : > { %1202 = vst.msk [vmem:[#allocation3 + $0x4] sm:$0xf] %vm809_vm9, %v1176_v62  ;;  %v1091_v10 = vpop.permute.xlu1 %1090 }
  0xab   : > { %1116 = vst.msk [vmem:[#allocation3 + $0x10] sm:$0xf] %vm674_vm8, %v1091_v10 }
  0xac   : > { %1203 = vst.msk [vmem:[#allocation3 + $0x10] sm:$0xf] %vm809_vm9, %v1178_v12  ;;  %v946_v13 = vpop.permute.xlu0 %945 }
  0xad   : > { %970 = vst.msk [vmem:[#allocation3 + $0x1c] sm:$0xf] %vm526_vm6, %v946_v13 }
  0xae   : > { %v948_v48 = vpop.permute.xlu1 %947 }
  0xaf   : > { %971 = vst.msk [vmem:[#allocation3 + $0x28] sm:$0xf] %vm526_vm6, %v948_v48 }
  0xb0   : > { %v652_v15 = vpop.permute.xlu0 %651 }
  0xb1   : > { %677 = vst.msk [vmem:[#allocation3 + $0x18] sm:$0xf] %vm674_vm8, %v652_v15  ;;  %v1324_v2 = vld [vmem:[#allocation3] sm:$0xff]  ;;  %v6886_v15 = vld [vmem:[%s9940_s3 + $0x80] sm:$0xff]  }
  0xb2   : > { %v654_v0 = vpop.permute.xlu1 %653 }
  0xb3   : > { %v1326_v63 = vld [vmem:[#allocation3 + $0xc] sm:$0xff]  ;;  %678 = vst.msk [vmem:[#allocation3 + $0x24] sm:$0xf] %vm674_vm8, %v654_v0  ;;  %v6887_v0 = vld [vmem:[%s9940_s3 + $0x88] sm:$0xff]  }
  0xb4   : > { %v1093_v53 = vpop.permute.xlu0 %1092  ;;  %v6230_v8 = vcombine.high %v1324_v2, %v1326_v63  ;;  %v6229_v24 = vcombine.low %v1324_v2, %v1326_v63 }
  0xb5   : > { %1117 = vst.msk [vmem:[#allocation3 + $0x1c] sm:$0xf] %vm674_vm8, %v1093_v53 }
  0xb6   : > { %v1095_v21 = vpop.permute.xlu1 %1094  ;;  %1611 = vmatprep.mubr.bf16.mxu0 %v6230_v8 }
  0xb7   : > { %1118 = vst.msk [vmem:[#allocation3 + $0x28] sm:$0xf] %vm674_vm8, %v1095_v21  ;;  %1612 = vmatmul.mubr.bf16.vlgmr.msra.gmra.mrb[0].mxu0 %v6229_v24 }
  0xb8   : > { %v787_v14 = vpop.permute.xlu0 %786  ;;  %6772 = vmatpush3.bf16.msra.mxu0 %v6886_v15 }
  0xb9   : > { %812 = vst.msk [vmem:[#allocation3 + $0x18] sm:$0xf] %vm809_vm9, %v787_v14  ;;  %6773 = vmatprep.subr.bf16.mxu0 %v9944_v59 }
  0xba   : > { %v789_v23 = vpop.permute.xlu1 %788 }
  0xbb   : > { %813 = vst.msk [vmem:[#allocation3 + $0x24] sm:$0xf] %vm809_vm9, %v789_v23 }
  0xbc   : > { %v1180_v50 = vpop.permute.xlu0 %1179  ;;  %6774 = vmatpush3.bf16.msra.mxu0 %v6887_v0  ;;  %v7842_v0 = vld [vmem:[#allocation2 + $0x28] sm:$0x7] }
  0xbd   : > { %1204 = vst.msk [vmem:[#allocation3 + $0x1c] sm:$0xf] %vm809_vm9, %v1180_v50  ;;  %6795 = vmatprep.subr.bf16.mxu0 %v9944_v59 }
  0xbe   : > { %v1182_v16 = vpop.permute.xlu1 %1181 }
  0xbf   : > { %1205 = vst.msk [vmem:[#allocation3 + $0x28] sm:$0xf] %vm809_vm9, %v1182_v16 }
  0xc0   : > { %v508_v34 = vpop.permute.xlu0 %507 }
  0xc1   : > { %531 = vst.msk [vmem:[#allocation3 + $0x30] sm:$0xf] %vm526_vm6, %v508_v34 }
  0xc2   : > { %v510_v37 = vpop.permute.xlu1 %509 }
  0xc3   : > { %532 = vst.msk [vmem:[#allocation3 + $0x3c] sm:$0xf] %vm526_vm6, %v510_v37 }
  0xc4   : > { %v950_v1 = vpop.permute.xlu0 %949  ;;  %v1328_v60 = vld [vmem:[#allocation3 + $0x18] sm:$0xff] }
  0xc5   : > { %972 = vst.msk [vmem:[#allocation3 + $0x34] sm:$0xf] %vm526_vm6, %v950_v1 }
  0xc6   : > { %v1330_v28 = vld [vmem:[#allocation3 + $0x24] sm:$0xff]  ;;  %v952_v7 = vpop.permute.xlu1 %951 }
  0xc7   : > { %973 = vst.msk [vmem:[#allocation3 + $0x40] sm:$0xf] %vm526_vm6, %v952_v7  ;;  %v6233_v29 = vcombine.high %v1328_v60, %v1330_v28  ;;  %v6232_v25 = vcombine.low %v1328_v60, %v1330_v28 }
  0xc8   : > { %v656_v40 = vpop.permute.xlu0 %655 }
  0xc9   : > { %679 = vst.msk [vmem:[#allocation3 + $0x30] sm:$0xf] %vm674_vm8, %v656_v40  ;;  %1619 = vmatprep.mubr.bf16.mxu0 %v6233_v29 }
  0xca   : > { %v658_v9 = vpop.permute.xlu1 %657  ;;  %1620 = vmatmul.mubr.bf16.gmra.mrb[4].mxu0 %v6232_v25 }
  0xcb   : > { %680 = vst.msk [vmem:[#allocation3 + $0x3c] sm:$0xf] %vm674_vm8, %v658_v9 }
  0xcc   : > { %v1097_v20 = vpop.permute.xlu0 %1096 }
  0xcd   : > { %1119 = vst.msk [vmem:[#allocation3 + $0x34] sm:$0xf] %vm674_vm8, %v1097_v20 }
  0xce   : > { %v1099_v6 = vpop.permute.xlu1 %1098 }
  0xcf   : > { %1120 = vst.msk [vmem:[#allocation3 + $0x40] sm:$0xf] %vm674_vm8, %v1099_v6 }
  0xd0   : > { %v791_v3 = vpop.permute.xlu0 %790 }
  0xd1   : > { %814 = vst.msk [vmem:[#allocation3 + $0x30] sm:$0xf] %vm809_vm9, %v791_v3  ;;  %v7827_v3 = vld [vmem:[%s9939_s2] ss:$0 sm:$0xff] }
  0xd2   : > { %v793_v30 = vpop.permute.xlu1 %792 }
  0xd3   : > { %815 = vst.msk [vmem:[#allocation3 + $0x3c] sm:$0xf] %vm809_vm9, %v793_v30 }
  0xd4   : > { %v1184_v4 = vpop.permute.xlu0 %1183 }
  0xd5   : > { %1206 = vst.msk [vmem:[#allocation3 + $0x34] sm:$0xf] %vm809_vm9, %v1184_v4 }
  0xd6   : > { %v1186_v18 = vpop.permute.xlu1 %1185 }
  0xd7   : > { %1207 = vst.msk [vmem:[#allocation3 + $0x40] sm:$0xf] %vm809_vm9, %v1186_v18 }
  0xd8   : > { %v512_v17 = vpop.permute.xlu0 %511 }
  0xd9   : > { %533 = vst.msk [vmem:[#allocation3 + $0x48] sm:$0xf] %vm526_vm6, %v512_v17 }
  0xda   : > { %v514_v31 = vpop.permute.xlu1 %513 }
  0xdb   : > { %534 = vst.msk [vmem:[#allocation3 + $0x54] sm:$0xf] %vm526_vm6, %v514_v31 }
  0xdc   : > { %v954_v38 = vpop.permute.xlu0 %953  ;;  %v1332_v41 = vld [vmem:[#allocation3 + $0x30] sm:$0xff] }
  0xdd   : > { %974 = vst.msk [vmem:[#allocation3 + $0x4c] sm:$0xf] %vm526_vm6, %v954_v38  ;;  %v2038_v38 = vld [vmem:[#allocation2] sm:$0xe] }
  0xde   : > { %v1334_v36 = vld [vmem:[#allocation3 + $0x3c] sm:$0xff]  ;;  %v956_v44 = vpop.permute.xlu1 %955 }
  0xdf   : > { %975 = vst.msk [vmem:[#allocation3 + $0x58] sm:$0xf] %vm526_vm6, %v956_v44  ;;  %v6236_v47 = vcombine.high %v1332_v41, %v1334_v36  ;;  %v6235_v54 = vcombine.low %v1332_v41, %v1334_v36  ;;  %v1832_v41 = vld [vmem:[#allocation2] sm:$0xf] }
  0xe0   : > { %v660_v57 = vpop.permute.xlu0 %659 }
  0xe1   : > { %681 = vst.msk [vmem:[#allocation3 + $0x48] sm:$0xf] %vm674_vm8, %v660_v57  ;;  %1627 = vmatprep.mubr.bf16.mxu0 %v6236_v47  ;;  %v2049_v47 = vshrl.u32 %v2038_v38, 16  ;;  %v1843_v57 = vshrl.u32 %v1832_v41, 16 }
  0xe2   : > { %v662_v46 = vpop.permute.xlu1 %661  ;;  %1628 = vmatmul.mubr.bf16.gmra.mrb[8].mxu0 %v6235_v54  ;;  %v2052_v54 = vshll.u32 %v2038_v38, 16 }
  0xe3   : > { %682 = vst.msk [vmem:[#allocation3 + $0x54] sm:$0xf] %vm674_vm8, %v662_v46  ;;  %v1846_v46 = vshll.u32 %v1832_v41, 16 }
  0xe4   : > { %v1101_v19 = vpop.permute.xlu0 %1100 }
  0xe5   : > { %1121 = vst.msk [vmem:[#allocation3 + $0x4c] sm:$0xf] %vm674_vm8, %v1101_v19 }
  0xe6   : > { %v1103_v12 = vpop.permute.xlu1 %1102 }
  0xe7   : > { %1122 = vst.msk [vmem:[#allocation3 + $0x58] sm:$0xf] %vm674_vm8, %v1103_v12 }
  0xe8   : > { %v795_v33 = vpop.permute.xlu0 %794 }
  0xe9   : > { %816 = vst.msk [vmem:[#allocation3 + $0x48] sm:$0xf] %vm809_vm9, %v795_v33 }
  0xea   : > { %v797_v62 = vpop.permute.xlu1 %796 }
  0xeb   : > { %817 = vst.msk [vmem:[#allocation3 + $0x54] sm:$0xf] %vm809_vm9, %v797_v62 }
  0xec   : > { %v1188_v26 = vpop.permute.xlu0 %1187 }
  0xed   : > { %1208 = vst.msk [vmem:[#allocation3 + $0x4c] sm:$0xf] %vm809_vm9, %v1188_v26 }
  0xee   : > { %v1190_v11 = vpop.permute.xlu1 %1189 }
  0xef   : > { %1209 = vst.msk [vmem:[#allocation3 + $0x58] sm:$0xf] %vm809_vm9, %v1190_v11 }
  0xf0   : > { %v516_v49 = vpop.permute.xlu0 %515 }
  0xf1   : > { %535 = vst.msk [vmem:[#allocation3 + $0x60] sm:$0xf] %vm526_vm6, %v516_v49  ;;  %v2051_v49 = vrot.slane %v2049_v47, 5 }
  0xf2   : > { %v958_v32 = vpop.permute.xlu1 %957 }
  0xf3   : > { %976 = vst.msk [vmem:[#allocation3 + $0x64] sm:$0xf] %vm526_vm6, %v958_v32  ;;  %v2054_v32 = vrot.slane %v2052_v54, 6 }
  0xf4   : > { %v664_v5 = vpop.permute.xlu0 %663  ;;  %v1336_v58 = vld [vmem:[#allocation3 + $0x48] sm:$0xff] }
  0xf5   : > { %683 = vst.msk [vmem:[#allocation3 + $0x60] sm:$0xf] %vm674_vm8, %v664_v5  ;;  %v1845_v5 = vrot.slane %v1843_v57, 4 }
  0xf6   : > { %v1338_v55 = vld [vmem:[#allocation3 + $0x54] sm:$0xff]  ;;  %v1105_v45 = vpop.permute.xlu1 %1104 }
  0xf7   : > { %1123 = vst.msk [vmem:[#allocation3 + $0x64] sm:$0xf] %vm674_vm8, %v1105_v45  ;;  %v6239_v27 = vcombine.high %v1336_v58, %v1338_v55  ;;  %v6238_v42 = vcombine.low %v1336_v58, %v1338_v55  ;;  %v1848_v58 = vrot.slane %v1846_v46, 5 }
  0xf8   : > { %v799_v56 = vpop.permute.xlu0 %798 }
  0xf9   : > { %1635 = vmatprep.mubr.bf16.mxu0 %v6239_v27  ;;  %818 = vst.msk [vmem:[#allocation3 + $0x60] sm:$0xf] %vm809_vm9, %v799_v56  ;;  %v2182_v27 = vld [vmem:[#allocation2] sm:$0x8] }
  0xfa   : > { %v1192_v43 = vpop.permute.xlu1 %1191  ;;  %1636 = vmatmul.mubr.bf16.gmra.mrb[12].mxu0 %v6238_v42  ;;  %v7837_v42 = vld [vmem:[#allocation2 + $0x28] sm:$0xf] }
  0xfb   : > { %1210 = vst.msk [vmem:[#allocation3 + $0x64] sm:$0xf] %vm809_vm9, %v1192_v43  ;;  %v1954_v43 = vld [vmem:[#allocation2] sm:$0xe]  ;;  %v2787_v15 = vshrl.u32 %v7837_v42, 16 }
 0x102   : > { %v1340_v10 = vld [vmem:[#allocation3 + $0x60] sm:$0xff] }
 0x103   : > { %v6242_v13 = vcombine.high %v1340_v10, %v1340_v10  ;;  %v6241_v48 = vcombine.low %v1340_v10, %v1340_v10  ;;  %v2055_v10 = vor.u32 %v2054_v32, %v2051_v49 }
 0x105   : > { %1643 = vmatprep.mubr.bf16.mxu0 %v6242_v13  ;;  %v2193_v13 = vshrl.u32 %v2182_v27, 16 }
 0x106   : > { %1644 = vmatmul.mubr.bf16.gmra.mrb[16].mxu0 %v6241_v48  ;;  %v1849_v48 = vor.u32 %v1848_v58, %v1845_v5 }
 0x107   : > { %6775 = vmatprep.mubr.msk.bf16.mxu0 %vm7000_vm4, %v9944_v59 }
 0x109   : > { %v7831_v33 = vpop.permute.xlu0 %1734 }
 0x10b   : > { %v7834_v11 = vpop.permute.xlu1 %1739 }
 0x14d   : > { %v1685_v2 = vpop.f32.mrb[0].mxu1 }
 0x14e   : > { %v6753_v63 = vpop.f32.mrb[1].mxu1 }
 0x14f   : > { %v1688_v53 = vpop.f32.mrb[2].mxu1  ;;  %v7844_v63 = vld [vmem:[#allocation2 + $0x28] sm:$0x1] }
 0x150   : > { %v6754_v8 = vpop.f32.mrb[3].mxu1 }
 0x151   : > { %v7846_v8 = vrot.slane %v2055_v10, 4 }
 0x155   : > { %v7810_v24 = vpop.f32.mrb[4].mxu1 }
 0x156   : > { %v6757_v21 = vpop.f32.mrb[5].mxu1 }
 0x157   : > { %v7812_v14 = vpop.f32.mrb[6].mxu1  ;;  %v7848_v21 = vrot.slane %v2193_v13, 11 }
 0x158   : > { %v6758_v23 = vpop.f32.mrb[7].mxu1 }
 0x159   : > { %v7850_v23 = vld [vmem:[#allocation2 + $0x28] sm:$0x7] }
 0x15d   : > { %v7814_v50 = vpop.f32.mrb[8].mxu1 }
 0x15e   : > { %v6761_v16 = vpop.f32.mrb[9].mxu1 }
 0x15f   : > { %v7816_v34 = vpop.f32.mrb[10].mxu1  ;;  %v7852_v16 = vrot.slane %v1849_v48, 4 }
 0x160   : > { %v6762_v37 = vpop.f32.mrb[11].mxu1 }
 0x165   : > { %v7818_v1 = vpop.f32.mrb[12].mxu1 }
 0x166   : > { %v6765_v60 = vpop.f32.mrb[13].mxu1 }
 0x167   : > { %v7820_v28 = vpop.f32.mrb[14].mxu1  ;;  %v7854_v60 = vrot.slane %v2787_v15, 7  ;;  %v6893_v15 = vld [vmem:[%s9940_s3 + $0x40] sm:$0xff]  }
 0x168   : > { %v6766_v7 = vpop.f32.mrb[15].mxu1  ;;  %6588 = vmatprep.subr.bf16.mxu1 %v6893_v15 }
 0x16d   : > { %v7822_v29 = vpop.f32.mrb[16].mxu1 }
 0x16e   : > { %v6769_v25 = vpop.f32.mrb[17].mxu1 }
 0x16f   : > { %v1720_v40 = vpop.f32.mrb[18].mxu1  ;;  %v2571_v25 = vshrl.u32 %v7842_v0, 16 }
 0x170   : > { %v6770_v9 = vpop.f32.mrb[19].mxu1 }
 0x18a   : > { %v6551_v20 = vpop.f32.mrb[0].mxu0 }
 0x18b   : > { %v6552_v6 = vpop.f32.mrb[1].mxu0 }
 0x18c   : > { %v6553_v30 = vadd.f32 %v6552_v6, %v6551_v20  ;;  %v6554_v4 = vpop.f32.mrb[2].mxu0 }
 0x18d   : > { %v6555_v18 = vpop.f32.mrb[3].mxu0 }
 0x18e   : > { %v6556_v17 = vadd.f32 %v6555_v18, %v6554_v4  ;;  %v1614_v31 = vadd.f32 %v6553_v30, %v7827_v3 }
 0x190   : > { %v1686_v36 = vadd.f32 %v1685_v2, %v1614_v31  ;;  %v1617_v44 = vadd.f32 %v6556_v17, %v7827_v3  ;;  %v6276_v2 = vrot.slane %v1954_v43, 9 }
 0x192   : > { %v1723_v19 = vmax.f32 %v1686_v36, 0.0  ;;  %v1689_v12 = vadd.f32 %v1688_v53, %v1617_v44 }
 0x194   : > { %v1777_v62 = vmul.f32 %v7831_v33, %v1723_v19  ;;  %v1724_v26 = vmax.f32 %v1689_v12, 0.0 }
 0x196   : > { %v6508_v55 = vpack.c.bf16 %v1777_v62, %v1777_v62  ;;  %v1778_v45 = vmul.f32 %v7834_v11, %v1724_v26 }
 0x198   : > { %1823 = vst.msk [vmem:[#allocation2 + $0x4] sm:$0xf] %vm256_vm0, %v6508_v55  ;;  %v6509_v56 = vpack.c.bf16 %v1778_v45, %v1778_v45 }
 0x19a   : > { %1824 = vst.msk [vmem:[#allocation2 + $0x8] sm:$0xf] %vm256_vm0, %v6509_v56 }
 0x19d   : > { %v6557_v53 = vpop.f32.mrb[4].mxu0 }
 0x19e   : > { %v6558_v37 = vpop.f32.mrb[5].mxu0 }
 0x19f   : > { %v6559_v9 = vadd.f32 %v6558_v37, %v6557_v53  ;;  %v6560_v20 = vpop.f32.mrb[6].mxu0  ;;  %v1955_v6 = vld [vmem:[#allocation2 + $0x4] sm:$0xf] }
 0x1a0   : > { %v2615_v30 = vld [vmem:[#allocation2 + $0x4] sm:$0x8]  ;;  %v6561_v18 = vpop.f32.mrb[7].mxu0  ;;  %v1976_v17 = vrot.slane %v1955_v6, 5 }
 0x1a1   : > { %v6278_v31 = vrot.slane %v2615_v30, 11  ;;  %v2039_v38 = vld [vmem:[#allocation2 + $0x4] sm:$0xf]  ;;  %v1622_v36 = vadd.f32 %v6559_v9, %v7827_v3  ;;  %v6562_v44 = vadd.f32 %v6561_v18, %v6560_v20  ;;  %v7862_v47 = vld [vmem:[#allocation2 + $0x8] sm:$0xf] }
 0x1a2   : > { %v7864_v54 = vld [vmem:[#allocation2 + $0x8] sm:$0xf]  ;;  %v1977_v46 = vsel %vm7095_vm7, %v6276_v2, %v1976_v17  ;;  %v1978_v19 = vrot.slane %v1976_v17, 4  ;;  %v1979_v12 = vrot.slane %v7862_v47, 5  ;;  %v2058_v32 = vshrl.u32 %v2039_v38, 16  ;;  %v7886_v2 = vpop.permute.xlu1 %1744 }
 0x1a3   : > { %v2040_v57 = vld [vmem:[#allocation2 + $0x8] sm:$0xf]  ;;  %v2637_v62 = vrot.slane %v7864_v54, 7  ;;  %v1694_v26 = vadd.f32 %v7810_v24, %v1622_v36  ;;  %v1625_v49 = vadd.f32 %v6562_v44, %v7827_v3  ;;  %2002 = vrot.lane.b32.xlu0 %v1977_v46, %s6996_s12  ;;  %v2061_v5 = vshll.u32 %v2039_v38, 16  ;;  %v2183_v58 = vld [vmem:[#allocation2 + $0x4] sm:$0xf] }
 0x1a4   : > { %v2184_v55 = vld [vmem:[#allocation2 + $0x8] sm:$0xf]  ;;  %v1980_v45 = vsel %vm7095_vm7, %v1978_v19, %v1979_v12  ;;  %v2068_v56 = vshrl.u32 %v2040_v57, 16  ;;  %v2071_v24 = vshll.u32 %v2040_v57, 16  ;;  %v2060_v13 = vrot.slane %v2058_v32, 5  ;;  %v6894_v19 = vld [vmem:[%s9940_s3] sm:$0xff]  }
 0x1a5   : > { %v2638_v27 = vsel %vm7113_vm12, %v6278_v31, %v2637_v62  ;;  %v1725_v43 = vmax.f32 %v1694_v26, 0.0  ;;  %v1697_v10 = vadd.f32 %v7812_v14, %v1625_v49  ;;  %2004 = vrot.lane.b32.xlu1 %v1980_v45, %s6996_s12  ;;  %v2063_v48 = vrot.slane %v2061_v5, 6  ;;  %v2331_v17 = vld [vmem:[#allocation2 + $0x4] sm:$0xf]  ;;  %v7890_v31 = vpop.permute.xlu0 %1749  ;;  %v2332_v46 = vld [vmem:[#allocation2 + $0x8] sm:$0xf]  ;;  %6589 = vmatpush3.bf16.msra.mxu1 %v6894_v19 }
 0x1a6   : > { %v2070_v53 = vrot.slane %v2068_v56, 5  ;;  %v2073_v37 = vrot.slane %v2071_v24, 6  ;;  %v2198_v9 = vshrl.u32 %v2183_v58, 16  ;;  %v2207_v20 = vshrl.u32 %v2184_v55, 16  ;;  %v6895_v45 = vld [vmem:[%s9940_s3 + $0x48] sm:$0xff]  }
 0x1a7   : > { %v1779_v6 = vmul.f32 %v7886_v2, %v1725_v43  ;;  %v1726_v30 = vmax.f32 %v1697_v10, 0.0  ;;  %2663 = vrot.lane.b32.xlu0 %v2638_v27, %s6997_s15  ;;  %v2064_v14 = vor.u32 %v2063_v48, %v2060_v13  ;;  %v2210_v18 = vshll.u32 %v2184_v55, 16  ;;  %v2471_v55 = vld [vmem:[#allocation2 + $0x4] sm:$0xc]  ;;  %v6896_v10 = vld [vmem:[%s9940_s3 + $0x8] sm:$0xff]   ;;  %6590 = vmatprep.subr.bf16.mxu1 %v6895_v45 }
 0x1a8   : > { %v7892_v38 = vor.u32 %v2073_v37, %v2070_v53  ;;  %v2200_v36 = vrot.slane %v2198_v9, 7  ;;  %v7894_v44 = vrot.slane %v2207_v20, 7  ;;  %v2201_v57 = vshll.u32 %v2183_v58, 16  ;;  %v2313_v27 = vld [vmem:[#allocation2 + $0x4] sm:$0xf]  ;;  %v6897_v9 = vld [vmem:[%s9940_s3 + $0x50] sm:$0xff]  }
 0x1a9   : > { %v6510_v26 = vpack.c.bf16 %v1779_v6, %v1779_v6  ;;  %v1780_v49 = vmul.f32 %v7890_v31, %v1726_v30  ;;  %v2066_v32 = vrot.slane %v2064_v14, 4  ;;  %v2065_v5 = vsel %vm7188_vm2, %v7846_v8, %v2064_v14  ;;  %2322 = vst.msk [vmem:[#allocation3 + $0x4] sm:$0xf] %vm256_vm0, %v2313_v27  ;;  %v2314_v13 = vld [vmem:[#allocation2 + $0x8] sm:$0xf]  ;;  %6591 = vmatpush3.bf16.msra.mxu1 %v6896_v10 }
 0x1aa   : > { %v2205_v58 = vrot.slane %v2200_v36, 4  ;;  %v2212_v56 = vor.u32 %v2210_v18, %v7894_v44  ;;  %v2203_v24 = vor.u32 %v2201_v57, %v2200_v36  ;;  %v2342_v43 = vshrl.u32 %v2331_v17, 16  ;;  %v2472_v37 = vld [vmem:[#allocation2 + $0x8] sm:$0xf]  ;;  %2323 = vst.msk [vmem:[#allocation3 + $0x10] sm:$0xf] %vm256_vm0, %v2314_v13  ;;  %6592 = vmatprep.subr.bf16.mxu1 %v6897_v9 }
 0x1ab   : > { %1825 = vst.msk [vmem:[#allocation2 + $0xc] sm:$0xf] %vm256_vm0, %v6510_v26  ;;  %v6511_v8 = vpack.c.bf16 %v1780_v49, %v1780_v49  ;;  %v2075_v48 = vsel %vm7188_vm2, %v2066_v32, %v7892_v38  ;;  %2146 = vrot.lane.b32.xlu0 %v2065_v5, %s6998_s10  ;;  %v2345_v15 = vshll.u32 %v2331_v17, 16  ;;  %v2351_v53 = vshll.u32 %v2332_v46, 16  ;;  %v7933_v19 = vld [vmem:[#allocation2 + $0x4] sm:$0x8] }
 0x1ac   : > { %2148 = vrot.lane.b32.xlu1 %v2075_v48, %s6998_s10  ;;  %v2213_v20 = vsel %vm7161_vm13, %v2205_v58, %v2212_v56  ;;  %v2204_v6 = vsel %vm7161_vm13, %v7848_v21, %v2203_v24  ;;  %v2344_v30 = vrot.slane %v2342_v43, 4  ;;  %v7928_v14 = vrot.slane %v2571_v25, 6  ;;  %v7935_v21 = vld [vmem:[#allocation2 + $0x8] sm:$0xf] }
 0x1ad   : > { %1826 = vst.msk [vmem:[#allocation2 + $0x10] sm:$0xf] %vm256_vm0, %v6511_v8  ;;  %v2347_v18 = vrot.slane %v2345_v15, 5  ;;  %v2639_v17 = vrot.slane %v2637_v62, 4  ;;  %v2482_v36 = vshrl.u32 %v2471_v55, 16  ;;  %v2485_v57 = vshll.u32 %v2471_v55, 16 }
 0x1ae   : > { %v2353_v26 = vrot.slane %v2351_v53, 5  ;;  %v2491_v49 = vshrl.u32 %v2472_v37, 16  ;;  %v2494_v32 = vshll.u32 %v2472_v37, 16  ;;  %v2355_v5 = vshrl.u32 %v2332_v46, 16 }
 0x1af   : > { %2277 = vrot.lane.b32.xlu0 %v2204_v6, %s6997_s15  ;;  %v2348_v25 = vor.u32 %v2347_v18, %v2344_v30  ;;  %v2484_v45 = vrot.slane %v2482_v36, 6  ;;  %v2487_v27 = vrot.slane %v2485_v57, 7  ;;  %v1981_v54 = vrot.slane %v1979_v12, 4  ;;  %v6898_v6 = vld [vmem:[%s9940_s3 + $0x10] sm:$0xff]  }
 0x1b0   : > { %2279 = vrot.lane.b32.xlu1 %v2213_v20, %s6997_s15  ;;  %v2493_v62 = vrot.slane %v2491_v49, 6  ;;  %v2496_v55 = vrot.slane %v2494_v32, 7  ;;  %v2357_v58 = vrot.slane %v2355_v5, 4  ;;  %v2076_v56 = vrot.slane %v7892_v38, 4  ;;  %6593 = vmatpush3.bf16.msra.mxu1 %v6898_v6 }
 0x1b1   : > { %v2349_v46 = vrot.slane %v2348_v25, 4  ;;  %v2488_v24 = vor.u32 %v2487_v27, %v2484_v45  ;;  %v2710_v43 = vshrl.u32 %v7933_v19, 16  ;;  %v2715_v10 = vshrl.u32 %v7935_v21, 16  ;;  %v6899_v45 = vld [vmem:[%s9940_s3 + $0x58] sm:$0xff]   ;;  %v8008_v19 = vpop.permute.xlu1 %1754 }
 0x1b2   : > { %v2617_v13 = vld [vmem:[#allocation2 + $0xc] sm:$0xf]  ;;  %v7944_v8 = vor.u32 %v2496_v55, %v2493_v62  ;;  %v2358_v47 = vor.u32 %v2357_v58, %v2353_v26  ;;  %v2718_v57 = vshll.u32 %v7935_v21, 16  ;;  %6594 = vmatprep.subr.bf16.mxu1 %v6899_v45 }
 0x1b3   : > { %v7946_v48 = vld [vmem:[#allocation2 + $0xc] sm:$0xf]  ;;  %v2354_v15 = vsel %vm7179_vm14, %v2349_v46, %v2353_v26  ;;  %v2640_v53 = vrot.slane %v2617_v13, 7  ;;  %v2489_v37 = vrot.slane %v2488_v24, 4 }
 0x1b4   : > { %v1957_v12 = vld [vmem:[#allocation2 + $0xc] sm:$0xf]  ;;  %v2361_v9 = vshll.u32 %v7946_v48, 16  ;;  %2435 = vrot.lane.b32.xlu0 %v2354_v15, %s6996_s12  ;;  %v7955_v18 = vld [vmem:[#allocation2 + $0x10] sm:$0xf]  ;;  %v2359_v32 = vrot.slane %v2358_v47, 4 }
 0x1b5   : > { %v2473_v20 = vld [vmem:[#allocation2 + $0xc] sm:$0xf]  ;;  %v1982_v30 = vrot.slane %v1957_v12, 5  ;;  %v7957_v36 = vld [vmem:[#allocation2 + $0x10] sm:$0xf]  ;;  %v6563_v49 = vpop.f32.mrb[8].mxu0  ;;  %v2641_v26 = vsel %vm7113_vm12, %v2639_v17, %v2640_v53  ;;  %v2498_v21 = vsel %vm7238_vm3, %v2489_v37, %v7944_v8 }
 0x1b6   : > { %v7962_v5 = vrot.slane %v2361_v9, 5  ;;  %v2041_v25 = vld [vmem:[#allocation2 + $0xc] sm:$0xf]  ;;  %v6564_v27 = vpop.f32.mrb[9].mxu0  ;;  %2665 = vrot.lane.b32.xlu1 %v2641_v26, %s6997_s15  ;;  %v1985_v55 = vrot.slane %v7955_v18, 5  ;;  %v2642_v17 = vrot.slane %v2640_v53, 4 }
 0x1b7   : > { %v1984_v62 = vrot.slane %v1982_v30, 4  ;;  %v6565_v58 = vadd.f32 %v6564_v27, %v6563_v49  ;;  %v6566_v46 = vpop.f32.mrb[10].mxu0  ;;  %v1983_v24 = vsel %vm7095_vm7, %v1981_v54, %v1982_v30  ;;  %v2643_v13 = vrot.slane %v7957_v36, 7  ;;  %v2701_v12 = vld [vmem:[#allocation2 + $0xc] sm:$0xf]  ;;  %v6900_v15 = vld [vmem:[%s9940_s3 + $0x18] sm:$0xff]  }
 0x1b8   : > { %v2501_v47 = vshrl.u32 %v2473_v20, 16  ;;  %2579 = vrot.lane.b32.xlu0 %v2498_v21, %s6998_s10  ;;  %v6567_v37 = vpop.f32.mrb[11].mxu0  ;;  %v2364_v53 = vsel %vm7179_vm14, %v2359_v32, %v7962_v5  ;;  %v2499_v9 = vrot.slane %v7944_v8, 4  ;;  %v2504_v6 = vshll.u32 %v2473_v20, 16  ;;  %v6901_v30 = vld [vmem:[%s9940_s3 + $0x60] sm:$0xff]   ;;  %6595 = vmatpush3.bf16.msra.mxu1 %v6900_v15 }
 0x1b9   : > { %v2078_v54 = vshrl.u32 %v2041_v25, 16  ;;  %v1630_v49 = vadd.f32 %v6565_v58, %v7827_v3  ;;  %v6568_v26 = vadd.f32 %v6567_v37, %v6566_v46  ;;  %v2081_v27 = vshll.u32 %v2041_v25, 16  ;;  %6596 = vmatprep.subr.bf16.mxu1 %v6901_v30 }
 0x1ba   : > { %v2503_v45 = vrot.slane %v2501_v47, 6  ;;  %2437 = vrot.lane.b32.xlu1 %v2364_v53, %s6996_s12  ;;  %v1986_v32 = vsel %vm7095_vm7, %v1984_v62, %v1985_v55  ;;  %v2506_v8 = vrot.slane %v2504_v6, 7  ;;  %v2717_v21 = vrot.slane %v2715_v10, 7  ;;  %v2042_v47 = vld [vmem:[#allocation2 + $0x10] sm:$0xf]  ;;  %v6902_v10 = vld [vmem:[%s9940_s3 + $0x20] sm:$0xff]  }
 0x1bb   : > { %v2080_v20 = vrot.slane %v2078_v54, 5  ;;  %v1702_v41 = vadd.f32 %v7814_v50, %v1630_v49  ;;  %v1633_v4 = vadd.f32 %v6568_v26, %v7827_v3  ;;  %v2083_v58 = vrot.slane %v2081_v27, 6  ;;  %v2185_v53 = vld [vmem:[#allocation2 + $0xc] sm:$0xf]  ;;  %v2186_v49 = vld [vmem:[#allocation2 + $0x10] sm:$0xf] }
 0x1bc   : > { %v2724_v46 = vshrl.u32 %v2701_v12, 16  ;;  %2006 = vrot.lane.b32.xlu0 %v1983_v24, %s6996_s12  ;;  %v7995_v25 = vor.u32 %v2506_v8, %v2503_v45  ;;  %v6279_v15 = vrot.slane %v2710_v43, 11  ;;  %v2720_v37 = vor.u32 %v2718_v57, %v2717_v21  ;;  %v6903_v24 = vld [vmem:[%s9940_s3 + $0x68] sm:$0xff]   ;;  %6597 = vmatpush3.bf16.msra.mxu1 %v6902_v10  ;;  %v2316_v8 = vld [vmem:[#allocation2 + $0x10] sm:$0xf] }
 0x1bd   : > { %v2727_v62 = vshll.u32 %v2701_v12, 16  ;;  %v1727_v50 = vmax.f32 %v1702_v41, 0.0  ;;  %v1705_v6 = vadd.f32 %v7816_v34, %v1633_v4  ;;  %v2084_v54 = vor.u32 %v2083_v58, %v2080_v20  ;;  %v6904_v57 = vld [vmem:[%s9940_s3 + $0x28] sm:$0xff]   ;;  %6598 = vmatprep.subr.bf16.mxu1 %v6903_v24  ;;  %v8027_v20 = vpop.permute.xlu0 %1759  ;;  %2325 = vst.msk [vmem:[#allocation3 + $0x28] sm:$0xf] %vm256_vm0, %v2316_v8 }
 0x1be   : > { %v8003_v30 = vrot.slane %v2724_v46, 7  ;;  %2008 = vrot.lane.b32.xlu1 %v1986_v32, %s6996_s12  ;;  %v2644_v43 = vsel %vm7113_vm12, %v2642_v17, %v2643_v13  ;;  %v2721_v34 = vsel %vm7161_vm13, %v6279_v15, %v2720_v37  ;;  %v2088_v4 = vshrl.u32 %v2042_v47, 16  ;;  %v2315_v12 = vld [vmem:[#allocation2 + $0xc] sm:$0xf]  ;;  %v6905_v17 = vld [vmem:[%s9940_s3 + $0x70] sm:$0xff]  }
 0x1bf   : > { %v2091_v41 = vshll.u32 %v2042_v47, 16  ;;  %v1781_v26 = vmul.f32 %v8008_v19, %v1727_v50  ;;  %v1728_v45 = vmax.f32 %v1705_v6, 0.0  ;;  %v2722_v27 = vrot.slane %v2717_v21, 4  ;;  %2803 = vst.msk [vmem:[#allocation3 + $0x8] sm:$0xf] %vm256_vm0, %v2721_v34  ;;  %v6906_v34 = vld [vmem:[%s9940_s3 + $0x30] sm:$0xff]  }
 0x1c0   : > { %v2729_v32 = vor.u32 %v2727_v62, %v8003_v30  ;;  %2324 = vst.msk [vmem:[#allocation3 + $0x1c] sm:$0xf] %vm256_vm0, %v2315_v12  ;;  %2667 = vrot.lane.b32.xlu0 %v2644_v43, %s6997_s15  ;;  %v2508_v21 = vsel %vm7238_vm3, %v2499_v9, %v7995_v25  ;;  %v2086_v58 = vrot.slane %v2084_v54, 4  ;;  %v2090_v46 = vrot.slane %v2088_v4, 5  ;;  %v2334_v15 = vld [vmem:[#allocation2 + $0x10] sm:$0xf]  ;;  %6599 = vmatpush3.bf16.msra.mxu1 %v6904_v57 }
 0x1c1   : > { %v2093_v47 = vrot.slane %v2091_v41, 6  ;;  %v6512_v37 = vpack.c.bf16 %v1781_v26, %v1781_v26  ;;  %v1782_v62 = vmul.f32 %v8027_v20, %v1728_v45  ;;  %v2216_v50 = vshrl.u32 %v2185_v53, 16  ;;  %v2474_v26 = vld [vmem:[#allocation2 + $0x10] sm:$0xf]  ;;  %6600 = vmatprep.subr.bf16.mxu1 %v6905_v17 }
 0x1c2   : > { %v2730_v10 = vsel %vm7161_vm13, %v2722_v27, %v2729_v32  ;;  %2581 = vrot.lane.b32.xlu1 %v2508_v21, %s6998_s10  ;;  %v2085_v9 = vsel %vm7188_vm2, %v2076_v56, %v2084_v54  ;;  %v2219_v24 = vshll.u32 %v2185_v53, 16  ;;  %v2225_v43 = vshrl.u32 %v2186_v49, 16  ;;  %v6907_v56 = vld [vmem:[%s9940_s3 + $0x78] sm:$0xff]  }
 0x1c3   : > { %2804 = vst.msk [vmem:[#allocation3 + $0x14] sm:$0xf] %vm256_vm0, %v2730_v10  ;;  %v8043_v6 = vor.u32 %v2093_v47, %v2090_v46  ;;  %1827 = vst.msk [vmem:[#allocation2 + $0x14] sm:$0xf] %vm256_vm0, %v6512_v37  ;;  %v6513_v4 = vpack.c.bf16 %v1782_v62, %v1782_v62  ;;  %v2218_v41 = vrot.slane %v2216_v50, 7  ;;  %v2365_v38 = vshrl.u32 %v7946_v48, 16 }
 0x1c4   : > { %v2371_v12 = vshll.u32 %v2334_v15, 16  ;;  %2150 = vrot.lane.b32.xlu0 %v2085_v9, %s6998_s10  ;;  %v2214_v54 = vrot.slane %v7894_v44, 4  ;;  %v8058_v57 = vrot.slane %v2225_v43, 7  ;;  %v2228_v45 = vshll.u32 %v2186_v49, 16  ;;  %6601 = vmatpush3.bf16.msra.mxu1 %v6906_v34  ;;  %v6908_v44 = vld [vmem:[%s9940_s3 + $0x38] sm:$0xff]  }
 0x1c5   : > { %v2095_v53 = vsel %vm7188_vm2, %v2086_v58, %v8043_v6  ;;  %1828 = vst.msk [vmem:[#allocation2 + $0x18] sm:$0xf] %vm256_vm0, %v6513_v4  ;;  %v2221_v48 = vor.u32 %v2219_v24, %v2218_v41  ;;  %v2367_v27 = vrot.slane %v2365_v38, 4  ;;  %v2645_v17 = vrot.slane %v2643_v13, 4  ;;  %6602 = vmatprep.subr.bf16.mxu1 %v6907_v56 }
 0x1c6   : > { %v2373_v32 = vrot.slane %v2371_v12, 5  ;;  %2152 = vrot.lane.b32.xlu1 %v2095_v53, %s6998_s10  ;;  %v2230_v8 = vor.u32 %v2228_v45, %v8058_v57  ;;  %v2511_v21 = vshrl.u32 %v2474_v26, 16  ;;  %v2514_v46 = vshll.u32 %v2474_v26, 16 }
 0x1c7   : > { %v2375_v58 = vshrl.u32 %v2334_v15, 16  ;;  %v2222_v49 = vsel %vm7161_vm13, %v2214_v54, %v2221_v48  ;;  %v2223_v47 = vrot.slane %v2218_v41, 4  ;;  %v2368_v37 = vor.u32 %v2367_v27, %v7962_v5 }
 0x1c8   : > { %v2509_v36 = vrot.slane %v7995_v25, 4  ;;  %2281 = vrot.lane.b32.xlu0 %v2222_v49, %s6997_s15  ;;  %v2513_v13 = vrot.slane %v2511_v21, 6  ;;  %v2516_v62 = vrot.slane %v2514_v46, 7  ;;  %v1987_v15 = vrot.slane %v1985_v55, 4  ;;  %6603 = vmatpush3.bf16.msra.mxu1 %v6908_v44 }
 0x1c9   : > { %v2377_v10 = vrot.slane %v2375_v58, 4  ;;  %v2231_v9 = vsel %vm7161_vm13, %v2223_v47, %v2230_v8  ;;  %v2369_v24 = vrot.slane %v2368_v37, 4  ;;  %v2096_v43 = vrot.slane %v8043_v6, 4 }
 0x1ca   : > { %v6888_v50 = vld [vmem:[#allocation3 + $0x8] ss:$12 sps:$4 sm:$0xff]   ;;  %2283 = vrot.lane.b32.xlu1 %v2231_v9, %s6997_s15  ;;  %v8079_v25 = vor.u32 %v2516_v62, %v2513_v13  ;;  %v2731_v48 = vrot.slane %v8003_v30, 4  ;;  %v2702_v13 = vld [vmem:[#allocation2 + $0x10] sm:$0xf] }
 0x1cb   : > { %v2619_v5 = vld [vmem:[#allocation2 + $0x14] sm:$0xf]  ;;  %v2378_v4 = vor.u32 %v2377_v10, %v2373_v32  ;;  %6776 = vmatmul.mubr.msk.bf16.vlgmr.msra.gmra.mrb[20].mxu0 %vm1563_vm5, %v6888_v50  ;;  %v2374_v18 = vsel %vm7179_vm14, %v2369_v24, %v2373_v32 }
 0x1cc   : > { %v8081_v34 = vld [vmem:[#allocation2 + $0x14] sm:$0xf]  ;;  %v2646_v55 = vrot.slane %v2619_v5, 7  ;;  %2439 = vrot.lane.b32.xlu0 %v2374_v18, %s6996_s12  ;;  %v2518_v56 = vsel %vm7238_vm3, %v2509_v36, %v8079_v25  ;;  %v8091_v54 = vld [vmem:[#allocation2 + $0x18] sm:$0xf]  ;;  %6779 = vmatprep.mubr.msk.bf16.mxu0 %vm7000_vm4, %v9944_v59  ;;  %v2519_v46 = vrot.slane %v8079_v25, 4 }
 0x1cd   : > { %v1959_v41 = vld [vmem:[#allocation2 + $0x14] sm:$0xf]  ;;  %v2381_v38 = vshll.u32 %v8081_v34, 16  ;;  %v2379_v53 = vrot.slane %v2378_v4, 4  ;;  %v8093_v45 = vld [vmem:[#allocation2 + $0x18] sm:$0xf] }
 0x1ce   : > { %v1988_v12 = vrot.slane %v1959_v41, 5  ;;  %v2475_v26 = vld [vmem:[#allocation2 + $0x14] sm:$0xf]  ;;  %v6569_v27 = vpop.f32.mrb[12].mxu0  ;;  %v2647_v32 = vsel %vm7113_vm12, %v2645_v17, %v2646_v55  ;;  %v1991_v47 = vrot.slane %v8091_v54, 5  ;;  %v2648_v37 = vrot.slane %v2646_v55, 4 }
 0x1cf   : > { %v8100_v8 = vrot.slane %v2381_v38, 5  ;;  %v2043_v58 = vld [vmem:[#allocation2 + $0x14] sm:$0xf]  ;;  %v6570_v44 = vpop.f32.mrb[13].mxu0  ;;  %2669 = vrot.lane.b32.xlu1 %v2647_v32, %s6997_s15  ;;  %v2521_v36 = vshrl.u32 %v2475_v26, 16  ;;  %v2649_v17 = vrot.slane %v8093_v45, 7 }
 0x1d0   : > { %v1990_v21 = vrot.slane %v1988_v12, 4  ;;  %v1989_v49 = vsel %vm7095_vm7, %v1987_v15, %v1988_v12  ;;  %v6571_v62 = vadd.f32 %v6570_v44, %v6569_v27  ;;  %v6572_v10 = vpop.f32.mrb[14].mxu0  ;;  %v2524_v50 = vshll.u32 %v2475_v26, 16  ;;  %v2703_v24 = vld [vmem:[#allocation2 + $0x14] sm:$0xf]  ;;  %2583 = vrot.lane.b32.xlu0 %v2518_v56, %s6998_s10 }
 0x1d1   : > { %v2098_v9 = vshrl.u32 %v2043_v58, 16  ;;  %v6573_v5 = vpop.f32.mrb[15].mxu0  ;;  %v2384_v25 = vsel %vm7179_vm14, %v2379_v53, %v8100_v8  ;;  %v2523_v4 = vrot.slane %v2521_v36, 6  ;;  %v2101_v41 = vshll.u32 %v2043_v58, 16  ;;  %v2044_v26 = vld [vmem:[#allocation2 + $0x18] sm:$0xf] }
 0x1d2   : > { %v1992_v15 = vsel %vm7095_vm7, %v1990_v21, %v1991_v47  ;;  %v1638_v18 = vadd.f32 %v6571_v62, %v7827_v3  ;;  %v6574_v55 = vadd.f32 %v6573_v5, %v6572_v10  ;;  %v2526_v38 = vrot.slane %v2524_v50, 7  ;;  %v2317_v5 = vld [vmem:[#allocation2 + $0x14] sm:$0xf] }
 0x1d3   : > { %v2100_v12 = vrot.slane %v2098_v9, 5  ;;  %2441 = vrot.lane.b32.xlu1 %v2384_v25, %s6996_s12  ;;  %v2103_v56 = vrot.slane %v2101_v41, 6  ;;  %v2733_v27 = vshrl.u32 %v2702_v13, 16  ;;  %v2736_v32 = vshll.u32 %v2702_v13, 16  ;;  %v8130_v25 = vpop.permute.xlu1 %1764  ;;  %2326 = vst.msk [vmem:[#allocation3 + $0x34] sm:$0xf] %vm256_vm0, %v2317_v5 }
 0x1d4   : > { %v2742_v44 = vshrl.u32 %v2703_v24, 16  ;;  %v1710_v53 = vadd.f32 %v7818_v1, %v1638_v18  ;;  %v1641_v7 = vadd.f32 %v6574_v55, %v7827_v3  ;;  %v8120_v40 = vor.u32 %v2526_v38, %v2523_v4  ;;  %2010 = vrot.lane.b32.xlu0 %v1989_v49, %s6996_s12  ;;  %v2188_v38 = vld [vmem:[#allocation2 + $0x18] sm:$0xf] }
 0x1d5   : > { %v2745_v21 = vshll.u32 %v2703_v24, 16  ;;  %v2104_v58 = vor.u32 %v2103_v56, %v2100_v12  ;;  %v2735_v36 = vrot.slane %v2733_v27, 7  ;;  %v2108_v10 = vshrl.u32 %v2044_v26, 16  ;;  %v2336_v27 = vld [vmem:[#allocation2 + $0x18] sm:$0xf] }
 0x1d6   : > { %v8123_v62 = vrot.slane %v2742_v44, 7  ;;  %v1729_v50 = vmax.f32 %v1710_v53, 0.0  ;;  %v1713_v9 = vadd.f32 %v7820_v28, %v1641_v7  ;;  %v2650_v1 = vsel %vm7113_vm12, %v2648_v37, %v2649_v17  ;;  %v2187_v28 = vld [vmem:[#allocation2 + $0x14] sm:$0xf]  ;;  %v2318_v7 = vld [vmem:[#allocation2 + $0x18] sm:$0xf] }
 0x1d7   : > { %v2111_v13 = vshll.u32 %v2044_v26, 16  ;;  %2012 = vrot.lane.b32.xlu1 %v1992_v15, %s6996_s12  ;;  %v2528_v49 = vsel %vm7238_vm3, %v2519_v46, %v8120_v40  ;;  %v2738_v24 = vor.u32 %v2736_v32, %v2735_v36  ;;  %v2740_v4 = vrot.slane %v2735_v36, 4  ;;  %2327 = vst.msk [vmem:[#allocation3 + $0x40] sm:$0xf] %vm256_vm0, %v2318_v7  ;;  %v8144_v46 = vpop.permute.xlu0 %1769 }
 0x1d8   : > { %v2747_v41 = vor.u32 %v2745_v21, %v8123_v62  ;;  %v1783_v37 = vmul.f32 %v8130_v25, %v1729_v50  ;;  %v1730_v18 = vmax.f32 %v1713_v9, 0.0  ;;  %v2105_v15 = vsel %vm7188_vm2, %v2096_v43, %v2104_v58  ;;  %2671 = vrot.lane.b32.xlu0 %v2650_v1, %s6997_s15 }
 0x1d9   : > { %v2110_v55 = vrot.slane %v2108_v10, 5  ;;  %v2739_v12 = vsel %vm7161_vm13, %v2731_v48, %v2738_v24  ;;  %v2106_v6 = vrot.slane %v2104_v58, 4  ;;  %v2113_v56 = vrot.slane %v2111_v13, 6  ;;  %v6575_v44 = vpop.f32.mrb[16].mxu0  ;;  %v2476_v24 = vld [vmem:[#allocation2 + $0x18] sm:$0xf] }
 0x1da   : > { %v2748_v26 = vsel %vm7161_vm13, %v2740_v4, %v2747_v41  ;;  %v6514_v43 = vpack.c.bf16 %v1783_v37, %v1783_v37  ;;  %v1784_v32 = vmul.f32 %v8144_v46, %v1730_v18  ;;  %2805 = vst.msk [vmem:[#allocation3 + $0x20] sm:$0xf] %vm256_vm0, %v2739_v12  ;;  %v2232_v53 = vrot.slane %v8058_v57, 4  ;;  %v6576_v21 = vpop.f32.mrb[17].mxu0 }
 0x1db   : > { %2806 = vst.msk [vmem:[#allocation3 + $0x2c] sm:$0xf] %vm256_vm0, %v2748_v26  ;;  %v2234_v30 = vshrl.u32 %v2187_v28, 16  ;;  %2585 = vrot.lane.b32.xlu1 %v2528_v49, %s6998_s10  ;;  %v8158_v48 = vor.u32 %v2113_v56, %v2110_v55  ;;  %v2237_v36 = vshll.u32 %v2187_v28, 16  ;;  %v2243_v58 = vshrl.u32 %v2188_v38, 16  ;;  %v6578_v5 = vpop.f32.mrb[18].mxu0 }
 0x1dc   : > { %v2385_v10 = vshrl.u32 %v8081_v34, 16  ;;  %1829 = vst.msk [vmem:[#allocation2 + $0x1c] sm:$0xf] %vm256_vm0, %v6514_v43  ;;  %v6515_v50 = vpack.c.bf16 %v1784_v32, %v1784_v32  ;;  %v6577_v9 = vadd.f32 %v6576_v21, %v6575_v44  ;;  %v2391_v13 = vshll.u32 %v2336_v27, 16  ;;  %2154 = vrot.lane.b32.xlu0 %v2105_v15, %s6998_s10  ;;  %v6579_v28 = vpop.f32.mrb[19].mxu0 }
 0x1dd   : > { %v2236_v1 = vrot.slane %v2234_v30, 7  ;;  %v2115_v57 = vsel %vm7188_vm2, %v2106_v6, %v8158_v48  ;;  %v8166_v49 = vrot.slane %v2243_v58, 7  ;;  %v2246_v4 = vshll.u32 %v2188_v38, 16 }
 0x1de   : > { %v2387_v41 = vrot.slane %v2385_v10, 4  ;;  %1830 = vst.msk [vmem:[#allocation2 + $0x20] sm:$0xf] %vm256_vm0, %v6515_v50  ;;  %v1646_v34 = vadd.f32 %v6577_v9, %v7827_v3  ;;  %v2651_v18 = vrot.slane %v2649_v17, 4  ;;  %v2393_v12 = vrot.slane %v2391_v13, 5 }
 0x1df   : > { %v2239_v7 = vor.u32 %v2237_v36, %v2236_v1  ;;  %v2241_v37 = vrot.slane %v2236_v1, 4  ;;  %2156 = vrot.lane.b32.xlu1 %v2115_v57, %s6998_s10  ;;  %v2248_v15 = vor.u32 %v2246_v4, %v8166_v49  ;;  %v2531_v26 = vshrl.u32 %v2476_v24, 16 }
 0x1e0   : > { %v2388_v55 = vor.u32 %v2387_v41, %v8100_v8  ;;  %v1718_v38 = vadd.f32 %v7822_v29, %v1646_v34  ;;  %v2534_v56 = vshll.u32 %v2476_v24, 16  ;;  %v2395_v3 = vshrl.u32 %v2336_v27, 16  ;;  %v8181_v8 = vpop.permute.xlu1 %1774 }
 0x1e1   : > { %v2240_v6 = vsel %vm7161_vm13, %v2232_v53, %v2239_v7  ;;  %v2249_v45 = vsel %vm7161_vm13, %v2241_v37, %v2248_v15  ;;  %v2533_v44 = vrot.slane %v2531_v26, 6  ;;  %v2529_v53 = vrot.slane %v8120_v40, 4 }
 0x1e2   : > { %v6889_v43 = vld [vmem:[#allocation3 + $0x20] ss:$12 sps:$4 sm:$0xff]   ;;  %2285 = vrot.lane.b32.xlu0 %v2240_v6, %s6997_s15  ;;  %v1731_v17 = vmax.f32 %v1718_v38, 0.0  ;;  %v2389_v32 = vrot.slane %v2388_v55, 4  ;;  %v2536_v30 = vrot.slane %v2534_v56, 7  ;;  %v2397_v21 = vrot.slane %v2395_v3, 4 }
 0x1e3   : > { %6780 = vmatmul.mubr.msk.bf16.gmra.mrb[24].mxu0 %vm1563_vm5, %v6889_v43  ;;  %2287 = vrot.lane.b32.xlu1 %v2249_v45, %s6997_s15  ;;  %v2621_v29 = vld [vmem:[#allocation2 + $0x1c] sm:$0xf]  ;;  %v9959_v7 = vshll.u32 %v7842_v0, 16  ;;  %v2704_v3 = vld [vmem:[#allocation2 + $0x18] sm:$0xf] }
 0x1e4   : > { %v2337_v27 = vld [vmem:[#allocation2 + $0x1c] sm:$0xf]  ;;  %v1785_v36 = vmul.f32 %v8181_v8, %v1731_v17  ;;  %v2394_v58 = vsel %vm7179_vm14, %v2389_v32, %v2393_v12  ;;  %v2652_v10 = vrot.slane %v2621_v29, 7  ;;  %v8189_v50 = vor.u32 %v2536_v30, %v2533_v44  ;;  %6783 = vmatprep.mubr.msk.bf16.mxu0 %vm7000_vm4, %v9944_v59 }
 0x1e5   : > { %v1961_v9 = vld [vmem:[#allocation2 + $0x1c] sm:$0xf]  ;;  %v2398_v1 = vor.u32 %v2397_v21, %v2393_v12  ;;  %v2401_v13 = vshll.u32 %v2337_v27, 16  ;;  %v2405_v5 = vshrl.u32 %v2337_v27, 16  ;;  %v8194_v24 = vld [vmem:[#allocation2 + $0x20] sm:$0xf] }
 0x1e6   : > { %2443 = vrot.lane.b32.xlu0 %v2394_v58, %s6996_s12  ;;  %v1994_v40 = vrot.slane %v1961_v9, 5  ;;  %v6516_v57 = vpack.c.bf16 %v1785_v36, %v1785_v36  ;;  %v2653_v4 = vsel %vm7113_vm12, %v2651_v18, %v2652_v10  ;;  %v1997_v41 = vrot.slane %v8194_v24, 5  ;;  %v8199_v28 = vld [vmem:[#allocation2 + $0x20] sm:$0xf]  ;;  %v2477_v34 = vld [vmem:[#allocation2 + $0x1c] sm:$0xf] }
 0x1e7   : > { %v8203_v37 = vrot.slane %v9959_v7, 7  ;;  %2673 = vrot.lane.b32.xlu1 %v2653_v4, %s6997_s15  ;;  %v2538_v15 = vsel %vm7238_vm3, %v2529_v53, %v8189_v50  ;;  %v8209_v55 = vrot.slane %v2401_v13, 5  ;;  %v8211_v12 = vrot.slane %v2405_v5, 4  ;;  %v2045_v26 = vld [vmem:[#allocation2 + $0x1c] sm:$0xf] }
 0x1e8   : > { %v1993_v18 = vrot.slane %v1991_v47, 4  ;;  %1831 = vst.msk [vmem:[#allocation2 + $0x24] sm:$0xf] %vm256_vm0, %v6516_v57  ;;  %v2399_v38 = vrot.slane %v2398_v1, 4  ;;  %v1996_v0 = vrot.slane %v1994_v40, 4  ;;  %v2654_v6 = vrot.slane %v2652_v10, 4 }
 0x1e9   : > { %v2655_v56 = vrot.slane %v8199_v28, 7  ;;  %v2539_v45 = vrot.slane %v8189_v50, 4  ;;  %v2541_v17 = vshrl.u32 %v2477_v34, 16  ;;  %v2544_v32 = vshll.u32 %v2477_v34, 16  ;;  %v2705_v54 = vld [vmem:[#allocation2 + $0x1c] sm:$0xf] }
 0x1ea   : > { %2587 = vrot.lane.b32.xlu0 %v2538_v15, %s6998_s10  ;;  %v1995_v43 = vsel %vm7095_vm7, %v1993_v18, %v1994_v40  ;;  %v2404_v47 = vsel %vm7179_vm14, %v2399_v38, %v8209_v55  ;;  %v2408_v44 = vor.u32 %v8211_v12, %v8209_v55  ;;  %v1998_v30 = vsel %vm7095_vm7, %v1996_v0, %v1997_v41  ;;  %v2046_v53 = vld [vmem:[#allocation2 + $0x20] sm:$0xf]  ;;  %v2189_v13 = vld [vmem:[#allocation2 + $0x1c] sm:$0xf] }
 0x1eb   : > { %v2118_v29 = vshrl.u32 %v2045_v26, 16  ;;  %2445 = vrot.lane.b32.xlu1 %v2404_v47, %s6996_s12  ;;  %v2656_v27 = vsel %vm7113_vm12, %v2654_v6, %v2655_v56  ;;  %v2543_v21 = vrot.slane %v2541_v17, 6  ;;  %v2546_v36 = vrot.slane %v2544_v32, 7  ;;  %v2319_v38 = vld [vmem:[#allocation2 + $0x1c] sm:$0xf] }
 0x1ec   : > { %v2121_v58 = vshll.u32 %v2045_v26, 16  ;;  %v2116_v10 = vrot.slane %v8158_v48, 4  ;;  %v2751_v9 = vshrl.u32 %v2704_v3, 16  ;;  %v2760_v1 = vshrl.u32 %v2705_v54, 16  ;;  %v2190_v17 = vld [vmem:[#allocation2 + $0x20] sm:$0xf] }
 0x1ed   : > { %v2120_v50 = vrot.slane %v2118_v29, 5  ;;  %v8237_v5 = vor.u32 %v2546_v36, %v2543_v21  ;;  %v2754_v57 = vshll.u32 %v2704_v3, 16  ;;  %v2128_v4 = vshrl.u32 %v2046_v53, 16  ;;  %2328 = vst.msk [vmem:[#allocation3 + $0x4c] sm:$0xf] %vm256_vm0, %v2319_v38 }
 0x1ee   : > { %2014 = vrot.lane.b32.xlu0 %v1995_v43, %s6996_s12  ;;  %v2123_v40 = vrot.slane %v2121_v58, 6  ;;  %v2753_v34 = vrot.slane %v2751_v9, 7  ;;  %v8239_v7 = vrot.slane %v2760_v1, 7  ;;  %v2763_v15 = vshll.u32 %v2705_v54, 16  ;;  %v2478_v9 = vld [vmem:[#allocation2 + $0x20] sm:$0xf] }
 0x1ef   : > { %v2131_v18 = vshll.u32 %v2046_v53, 16  ;;  %2016 = vrot.lane.b32.xlu1 %v1998_v30, %s6996_s12  ;;  %v2749_v26 = vrot.slane %v8123_v62, 4  ;;  %v2130_v0 = vrot.slane %v2128_v4, 5  ;;  %v2252_v6 = vshrl.u32 %v2189_v13, 16  ;;  %v2338_v62 = vld [vmem:[#allocation2 + $0x20] sm:$0xf] }
 0x1f0   : > { %v2124_v48 = vor.u32 %v2123_v40, %v2120_v50  ;;  %v2756_v43 = vor.u32 %v2754_v57, %v2753_v34  ;;  %v2758_v32 = vrot.slane %v2753_v34, 4  ;;  %v2765_v3 = vor.u32 %v2763_v15, %v8239_v7  ;;  %v2706_v1 = vld [vmem:[#allocation2 + $0x20] sm:$0xf] }
 0x1f1   : > { %v2133_v47 = vrot.slane %v2131_v18, 6  ;;  %v2548_v54 = vsel %vm7238_vm3, %v2539_v45, %v8237_v5  ;;  %v2254_v29 = vrot.slane %v2252_v6, 7  ;;  %v2255_v53 = vshll.u32 %v2189_v13, 16  ;;  %v8259_v13 = vld [vmem:[#allocation2 + $0x24] sm:$0xf] }
 0x1f2   : > { %2675 = vrot.lane.b32.xlu0 %v2656_v27, %s6997_s15  ;;  %v2126_v30 = vrot.slane %v2124_v48, 4  ;;  %v2757_v21 = vsel %vm7161_vm13, %v2749_v26, %v2756_v43  ;;  %v2766_v36 = vsel %vm7161_vm13, %v2758_v32, %v2765_v3  ;;  %v2261_v50 = vshrl.u32 %v2190_v17, 16  ;;  %v2320_v15 = vld [vmem:[#allocation2 + $0x20] sm:$0xf]  ;;  %v8286_v3 = vld [vmem:[#allocation2 + $0x24] sm:$0xf] }
 0x1f3   : > { %v8253_v58 = vor.u32 %v2133_v47, %v2130_v0  ;;  %2589 = vrot.lane.b32.xlu1 %v2548_v54, %s6998_s10  ;;  %2807 = vst.msk [vmem:[#allocation3 + $0x38] sm:$0xf] %vm256_vm0, %v2757_v21  ;;  %2808 = vst.msk [vmem:[#allocation3 + $0x44] sm:$0xf] %vm256_vm0, %v2766_v36  ;;  %v2250_v45 = vrot.slane %v8166_v49, 4  ;;  %v2257_v27 = vor.u32 %v2255_v53, %v2254_v29  ;;  %v9960_v40 = vshll.u32 %v7837_v42, 16 }
 0x1f4   : > { %v9961_v4 = vshll.u32 %v7844_v63, 16  ;;  %v2125_v18 = vsel %vm7188_vm2, %v2116_v10, %v2124_v48  ;;  %v8272_v38 = vrot.slane %v2261_v50, 7  ;;  %v2264_v26 = vshll.u32 %v2190_v17, 16  ;;  %v2707_v0 = vld [vmem:[#allocation2 + $0x24] sm:$0xf] }
 0x1f5   : > { %v8264_v57 = vor.u32 %v9960_v40, %v7854_v60  ;;  %v2411_v49 = vshll.u32 %v2338_v62, 16  ;;  %2329 = vst.msk [vmem:[#allocation3 + $0x58] sm:$0xf] %vm256_vm0, %v2320_v15  ;;  %v2135_v42 = vsel %vm7188_vm2, %v2126_v30, %v8253_v58  ;;  %v2259_v63 = vrot.slane %v2254_v29, 4  ;;  %v2321_v10 = vld [vmem:[#allocation2 + $0x24] sm:$0xf] }
 0x1f6   : > { %v8268_v34 = vrot.slane %v9961_v4, 5  ;;  %2158 = vrot.lane.b32.xlu0 %v2125_v18, %s6998_s10  ;;  %v2409_v60 = vrot.slane %v2408_v44, 4  ;;  %v2551_v6 = vshrl.u32 %v2478_v9, 16  ;;  %v2266_v48 = vor.u32 %v2264_v26, %v8272_v38  ;;  %2330 = vst.msk [vmem:[#allocation3 + $0x64] sm:$0xf] %vm256_vm0, %v2321_v10 }
 0x1f7   : > { %v2657_v17 = vrot.slane %v2655_v56, 4  ;;  %v2658_v43 = vrot.slane %v8259_v13, 7  ;;  %v2554_v32 = vshll.u32 %v2478_v9, 16  ;;  %2160 = vrot.lane.b32.xlu1 %v2135_v42, %s6998_s10  ;;  %v2258_v55 = vsel %vm7161_vm13, %v2250_v45, %v2257_v27  ;;  %v1963_v50 = vld [vmem:[#allocation2 + $0x24] sm:$0x1] }
 0x1f8   : > { %v2549_v12 = vrot.slane %v8237_v5, 4  ;;  %v2553_v44 = vrot.slane %v2551_v6, 6  ;;  %v2769_v47 = vshrl.u32 %v2706_v1, 16  ;;  %v2413_v54 = vrot.slane %v2411_v49, 5  ;;  %v2479_v15 = vld [vmem:[#allocation2 + $0x24] sm:$0xf] }
 0x1f9   : > { %v2556_v30 = vrot.slane %v2554_v32, 7  ;;  %v2767_v28 = vrot.slane %v8239_v7, 4  ;;  %v2778_v56 = vshrl.u32 %v2707_v0, 16  ;;  %v2772_v53 = vshll.u32 %v2706_v1, 16 }
 0x1fa   : > { %2289 = vrot.lane.b32.xlu0 %v2258_v55, %s6997_s15  ;;  %v2771_v29 = vrot.slane %v2769_v47, 7  ;;  %v2415_v21 = vshrl.u32 %v2338_v62, 16  ;;  %v2421_v36 = vshll.u32 %v8286_v3, 16  ;;  %v6890_v9 = vld [vmem:[#allocation3 + $0x38] ss:$12 sps:$4 sm:$0xff]   ;;  %v2267_v45 = vsel %vm7161_vm13, %v2259_v63, %v2266_v48 }
 0x1fb   : > { %v2659_v5 = vsel %vm7113_vm12, %v2657_v17, %v2658_v43  ;;  %v2557_v27 = vor.u32 %v2556_v30, %v2553_v44  ;;  %v2577_v7 = vor.u32 %v8203_v37, %v7928_v14  ;;  %2291 = vrot.lane.b32.xlu1 %v2267_v45, %s6997_s15  ;;  %v2780_v62 = vrot.slane %v2778_v56, 7  ;;  %6784 = vmatmul.mubr.msk.bf16.gmra.mrb[28].mxu0 %vm1563_vm5, %v6890_v9  ;;  %v2047_v63 = vld [vmem:[#allocation2 + $0x24] sm:$0x3] }
 0x1fc   : > { %v2774_v1 = vor.u32 %v2772_v53, %v2771_v29  ;;  %v2781_v40 = vshll.u32 %v2707_v0, 16  ;;  %v2417_v4 = vrot.slane %v2415_v21, 4  ;;  %v2414_v18 = vsel %vm7179_vm14, %v2409_v60, %v2413_v54  ;;  %6787 = vmatprep.mubr.msk.bf16.mxu0 %vm7000_vm4, %v9944_v59 }
 0x1fd   : > { %v2558_v26 = vsel %vm7238_vm3, %v2549_v12, %v2557_v27  ;;  %v2776_v49 = vrot.slane %v2771_v29, 4  ;;  %v2423_v42 = vrot.slane %v2421_v36, 5  ;;  %v2000_v48 = vrot.slane %v1963_v50, 5 }
 0x1fe   : > { %2447 = vrot.lane.b32.xlu0 %v2414_v18, %s6996_s12  ;;  %v2775_v0 = vsel %vm7161_vm13, %v2767_v28, %v2774_v1  ;;  %v2783_v6 = vor.u32 %v2781_v40, %v2780_v62  ;;  %v2418_v10 = vor.u32 %v2417_v4, %v2413_v54  ;;  %v1999_v60 = vrot.slane %v1997_v41, 4  ;;  %v2191_v28 = vld [vmem:[#allocation2 + $0x24] sm:$0xf]  ;;  %v1834_v1 = vld [vmem:[#allocation2 + $0x8] sm:$0xf] }
 0x1ff   : > { %2809 = vst.msk [vmem:[#allocation3 + $0x50] sm:$0xf] %vm256_vm0, %v2775_v0  ;;  %v2559_v17 = vrot.slane %v2557_v27, 4  ;;  %v2561_v32 = vshrl.u32 %v2479_v15, 16  ;;  %v2564_v55 = vshll.u32 %v2479_v15, 16  ;;  %2677 = vrot.lane.b32.xlu1 %v2659_v5, %s6997_s15  ;;  %v2138_v47 = vshrl.u32 %v2047_v63, 16 }
 0x200   : > { %v2784_v12 = vsel %vm7161_vm13, %v2776_v49, %v2783_v6  ;;  %v2419_v44 = vrot.slane %v2418_v10, 4  ;;  %v2141_v30 = vshll.u32 %v2047_v63, 16  ;;  %v2785_v29 = vrot.slane %v2780_v62, 4  ;;  %v1833_v41 = vld [vmem:[#allocation2 + $0x4] sm:$0xf] }
 0x201   : > { %2810 = vst.msk [vmem:[#allocation3 + $0x5c] sm:$0xf] %vm256_vm0, %v2784_v12  ;;  %v2563_v54 = vrot.slane %v2561_v32, 6  ;;  %v2566_v56 = vrot.slane %v2564_v55, 7  ;;  %v2425_v24 = vshrl.u32 %v8286_v3, 16  ;;  %v2001_v21 = vsel %vm7095_vm7, %v1999_v60, %v2000_v48 }
 0x202   : > { %2591 = vrot.lane.b32.xlu0 %v2558_v26, %s6998_s10  ;;  %v2424_v53 = vsel %vm7179_vm14, %v2419_v44, %v2423_v42  ;;  %v2140_v36 = vrot.slane %v2138_v47, 5  ;;  %v2143_v50 = vrot.slane %v2141_v30, 6  ;;  %v2793_v45 = vsel %vm7161_vm13, %v2785_v29, %v8264_v57  ;;  %v1835_v63 = vld [vmem:[#allocation2 + $0xc] sm:$0xf]  ;;  %v1837_v60 = vld [vmem:[#allocation2 + $0x14] sm:$0xf] }
 0x203   : > { %v2567_v9 = vor.u32 %v2566_v56, %v2563_v54  ;;  %v2427_v5 = vrot.slane %v2425_v24, 4  ;;  %v2270_v27 = vshrl.u32 %v2191_v28, 16  ;;  %2449 = vrot.lane.b32.xlu1 %v2424_v53, %s6996_s12  ;;  %v2136_v3 = vrot.slane %v8253_v58, 4  ;;  %2811 = vst.msk [vmem:[#allocation3 + $0x68] sm:$0xf] %vm256_vm0, %v2793_v45 }
 0x204   : > { %v2144_v62 = vor.u32 %v2143_v50, %v2140_v36  ;;  %v2660_v40 = vrot.slane %v2658_v43, 4  ;;  %v1852_v4 = vshll.u32 %v1833_v41, 16  ;;  %v2273_v26 = vshll.u32 %v2191_v28, 16  ;;  %v1838_v24 = vld [vmem:[#allocation2 + $0x18] sm:$0xf] }
 0x205   : > { %v2428_v15 = vor.u32 %v2427_v5, %v2423_v42  ;;  %v2272_v18 = vrot.slane %v2270_v27, 7  ;;  %v2569_v49 = vrot.slane %v2567_v9, 4  ;;  %v2568_v57 = vsel %vm7238_vm3, %v2559_v17, %v2567_v9  ;;  %v1836_v42 = vld [vmem:[#allocation2 + $0x10] sm:$0xf]  ;;  %v1839_v50 = vld [vmem:[#allocation2 + $0x1c] sm:$0xf] }
 0x206   : > { %2018 = vrot.lane.b32.xlu0 %v2001_v21, %s6996_s12  ;;  %v2268_v0 = vrot.slane %v8272_v38, 4  ;;  %v1854_v58 = vrot.slane %v1852_v4, 5  ;;  %v1862_v6 = vshll.u32 %v1834_v1, 16  ;;  %v2145_v10 = vsel %vm7188_vm2, %v2136_v3, %v2144_v62  ;;  %v1840_v4 = vld [vmem:[#allocation2 + $0x20] sm:$0xf] }
 0x207   : > { %v2429_v13 = vrot.slane %v2428_v15, 4  ;;  %v2275_v43 = vor.u32 %v2273_v26, %v2272_v18  ;;  %v1856_v48 = vshrl.u32 %v1833_v41, 16  ;;  %2593 = vrot.lane.b32.xlu1 %v2568_v57, %s6998_s10  ;;  %v9962_v55 = vrot.slane %v7850_v23, 7 }
 0x208   : > { %v6891_v32 = vld [vmem:[#allocation3 + $0x50] ss:$12 sps:$4 sm:$0xff]   ;;  %v1855_v38 = vsel %vm7179_vm14, %v7852_v16, %v1854_v58  ;;  %v1864_v12 = vrot.slane %v1862_v6, 5  ;;  %v1866_v44 = vshrl.u32 %v1834_v1, 16  ;;  %v2578_v23 = vsel %vm7238_vm3, %v2569_v49, %v2577_v7 }
 0x209   : > { %v8347_v17 = vsel %vm7113_vm12, %v2660_v40, %v9962_v55  ;;  %v2434_v47 = vsel %vm7179_vm14, %v2429_v13, %v8268_v34  ;;  %1945 = vst.msk [vmem:[#allocation3] sm:$0xf] %vm256_vm0, %v1855_v38  ;;  %v1858_v30 = vrot.slane %v1856_v48, 4  ;;  %v1872_v28 = vshll.u32 %v1835_v63, 16  ;;  %6788 = vmatmul.mubr.msk.bf16.gmra.mrb[32].mxu0 %vm1563_vm5, %v6891_v32 }
 0x20a   : > { %2162 = vrot.lane.b32.xlu0 %v2145_v10, %s6998_s10  ;;  %v1868_v16 = vrot.slane %v1866_v44, 4  ;;  %v1876_v54 = vshrl.u32 %v1835_v63, 16  ;;  %v1882_v56 = vshll.u32 %v1836_v42, 16  ;;  %v1886_v29 = vshrl.u32 %v1836_v42, 16  ;;  %6791 = vmatprep.mubr.msk.bf16.mxu0 %vm7000_vm4, %v9944_v59  ;;  %v1841_v63 = vld [vmem:[#allocation2 + $0x24] sm:$0x1] }
 0x20b   : > { %v2276_v14 = vsel %vm7161_vm13, %v2268_v0, %v2275_v43  ;;  %v1859_v37 = vor.u32 %v1858_v30, %v1854_v58  ;;  %v1874_v34 = vrot.slane %v1872_v28, 5  ;;  %v1892_v7 = vshll.u32 %v1837_v60, 16  ;;  %2451 = vrot.lane.b32.xlu1 %v2434_v47, %s6996_s12  ;;  %v6892_v57 = vld [vmem:[#allocation3 + $0x68] ss:$0 sps:$4 sm:$0xff]  }
 0x20c   : > { %v1869_v41 = vor.u32 %v1868_v16, %v1864_v12  ;;  %v1878_v53 = vrot.slane %v1876_v54, 4  ;;  %v1884_v21 = vrot.slane %v1882_v56, 5  ;;  %v1888_v36 = vrot.slane %v1886_v29, 4 }
 0x20d   : > { %v1860_v9 = vrot.slane %v1859_v37, 4  ;;  %v1894_v45 = vrot.slane %v1892_v7, 5  ;;  %v1896_v5 = vshrl.u32 %v1837_v60, 16  ;;  %v1902_v27 = vshll.u32 %v1838_v24, 16 }
 0x20e   : > { %2293 = vrot.lane.b32.xlu0 %v2276_v14, %s6997_s15  ;;  %v1870_v1 = vrot.slane %v1869_v41, 4  ;;  %v1879_v3 = vor.u32 %v1878_v53, %v1874_v34  ;;  %v1889_v62 = vor.u32 %v1888_v36, %v1884_v21  ;;  %v1906_v40 = vshrl.u32 %v1838_v24, 16 }
 0x20f   : > { %v1865_v15 = vsel %vm7179_vm14, %v1860_v9, %v1864_v12  ;;  %v1898_v18 = vrot.slane %v1896_v5, 4  ;;  %v1904_v26 = vrot.slane %v1902_v27, 5  ;;  %v1912_v49 = vshll.u32 %v1839_v50, 16  ;;  %2595 = vrot.lane.b32.xlu1 %v2578_v23, %s6998_s10 }
 0x210   : > { %1946 = vst.msk [vmem:[#allocation3 + $0xc] sm:$0xf] %vm256_vm0, %v1865_v15  ;;  %v1875_v0 = vsel %vm7179_vm14, %v1870_v1, %v1874_v34  ;;  %v1880_v58 = vrot.slane %v1879_v3, 4  ;;  %v1890_v6 = vrot.slane %v1889_v62, 4  ;;  %v1908_v10 = vrot.slane %v1906_v40, 4 }
 0x211   : > { %1947 = vst.msk [vmem:[#allocation3 + $0x18] sm:$0xf] %vm256_vm0, %v1875_v0  ;;  %v1899_v13 = vor.u32 %v1898_v18, %v1894_v45  ;;  %v1914_v43 = vrot.slane %v1912_v49, 5  ;;  %v1916_v48 = vshrl.u32 %v1839_v50, 16  ;;  %v1922_v42 = vshll.u32 %v1840_v4, 16  ;;  %6792 = vmatmul.mubr.msk.bf16.gmra.mrb[36].mxu0 %vm1563_vm5, %v6892_v57 }
 0x212   : > { %v1885_v60 = vsel %vm7179_vm14, %v1880_v58, %v1884_v21  ;;  %v1895_v32 = vsel %vm7179_vm14, %v1890_v6, %v1894_v45  ;;  %v1909_v55 = vor.u32 %v1908_v10, %v1904_v26  ;;  %v1926_v38 = vshrl.u32 %v1840_v4, 16  ;;  %6799 = vmatprep.mubr.msk.bf16.mxu0 %vm7000_vm4, %v9944_v59 }
 0x213   : > { %1948 = vst.msk [vmem:[#allocation3 + $0x24] sm:$0xf] %vm256_vm0, %v1885_v60  ;;  %1949 = vst.msk [vmem:[#allocation3 + $0x30] sm:$0xf] %vm256_vm0, %v1895_v32  ;;  %v1900_v12 = vrot.slane %v1899_v13, 4  ;;  %v1918_v44 = vrot.slane %v1916_v48, 4  ;;  %2679 = vrot.lane.b32.xlu1 %v8347_v17, %s6997_s15 }
 0x214   : > { %v1924_v47 = vrot.slane %v1922_v42, 5  ;;  %v1932_v23 = vshll.u32 %v1841_v63, 16  ;;  %v1910_v30 = vrot.slane %v1909_v55, 4  ;;  %v1928_v28 = vrot.slane %v1926_v38, 4 }
 0x215   : > { %v1905_v16 = vsel %vm7179_vm14, %v1900_v12, %v1904_v26  ;;  %v1919_v54 = vor.u32 %v1918_v44, %v1914_v43  ;;  %v2003_v14 = vpop.permute.xlu0 %2002 }
 0x216   : > { %1950 = vst.msk [vmem:[#allocation3 + $0x3c] sm:$0xf] %vm256_vm0, %v1905_v16  ;;  %v1915_v56 = vsel %vm7179_vm14, %v1910_v30, %v1914_v43  ;;  %v1929_v29 = vor.u32 %v1928_v28, %v1924_v47  ;;  %v1934_v24 = vrot.slane %v1932_v23, 5 }
 0x217   : > { %1951 = vst.msk [vmem:[#allocation3 + $0x48] sm:$0xf] %vm256_vm0, %v1915_v56  ;;  %v1920_v37 = vrot.slane %v1919_v54, 4  ;;  %v2005_v34 = vpop.permute.xlu1 %2004 }
 0x218   : > { %2029 = vst.msk [vmem:[#allocation3] sm:$0xf] %vm526_vm6, %v2003_v14  ;;  %v1930_v17 = vrot.slane %v1929_v29, 4  ;;  %2030 = vst.msk [vmem:[#allocation3 + $0xc] sm:$0xf] %vm526_vm6, %v2005_v34 }
 0x219   : > { %v1925_v7 = vsel %vm7179_vm14, %v1920_v37, %v1924_v47  ;;  %v2664_v53 = vpop.permute.xlu0 %2663 }
 0x21a   : > { %1952 = vst.msk [vmem:[#allocation3 + $0x54] sm:$0xf] %vm256_vm0, %v1925_v7  ;;  %v1935_v41 = vsel %vm7179_vm14, %v1930_v17, %v1934_v24 }
 0x21b   : > { %1953 = vst.msk [vmem:[#allocation3 + $0x60] sm:$0xf] %vm256_vm0, %v1935_v41 }
 0x21d   : > { %v2147_v21 = vpop.permute.xlu0 %2146 }
 0x21e   : > { %v2149_v36 = vpop.permute.xlu1 %2148  ;;  %2173 = vst.msk [vmem:[#allocation3] sm:$0xf] %vm674_vm8, %v2147_v21 }
 0x21f   : > { %2174 = vst.msk [vmem:[#allocation3 + $0xc] sm:$0xf] %vm674_vm8, %v2149_v36 }
 0x221   : > { %v2278_v50 = vpop.permute.xlu0 %2277 }
 0x222   : > { %v2280_v9 = vpop.permute.xlu1 %2279  ;;  %2304 = vst.msk [vmem:[#allocation3] sm:$0xf] %vm809_vm9, %v2278_v50 }
 0x223   : > { %2305 = vst.msk [vmem:[#allocation3 + $0xc] sm:$0xf] %vm809_vm9, %v2280_v9 }
 0x226   : > { %v2436_v45 = vpop.permute.xlu0 %2435 }
 0x227   : > { %2462 = vst.msk [vmem:[#allocation3 + $0x4] sm:$0xf] %vm526_vm6, %v2436_v45 }
 0x228   : > { %v2666_v5 = vpop.permute.xlu1 %2665 }
 0x22a   : > { %v2580_v27 = vpop.permute.xlu0 %2579 }
 0x22b   : > { %2606 = vst.msk [vmem:[#allocation3 + $0x4] sm:$0xf] %vm674_vm8, %v2580_v27 }
 0x22c   : > { %2690 = vst.msk [vmem:[#allocation3 + $0x4] sm:$0xf] %vm809_vm9, %v2664_v53  ;;  %v2438_v1 = vpop.permute.xlu1 %2437 }
 0x22d   : > { %2463 = vst.msk [vmem:[#allocation3 + $0x10] sm:$0xf] %vm526_vm6, %v2438_v1 }
 0x22e   : > { %v2007_v3 = vpop.permute.xlu0 %2006 }
 0x22f   : > { %2031 = vst.msk [vmem:[#allocation3 + $0x18] sm:$0xf] %vm526_vm6, %v2007_v3 }
 0x230   : > { %v2009_v62 = vpop.permute.xlu1 %2008 }
 0x231   : > { %2032 = vst.msk [vmem:[#allocation3 + $0x24] sm:$0xf] %vm526_vm6, %v2009_v62 }
 0x232   : > { %v2668_v40 = vpop.permute.xlu0 %2667 }
 0x233   : > { %v2812_v63 = vld [vmem:[#allocation3] sm:$0xff] }
 0x234   : > { %v2582_v4 = vpop.permute.xlu1 %2581 }
 0x235   : > { %2607 = vst.msk [vmem:[#allocation3 + $0x10] sm:$0xf] %vm674_vm8, %v2582_v4 }
 0x236   : > { %2691 = vst.msk [vmem:[#allocation3 + $0x10] sm:$0xf] %vm809_vm9, %v2666_v5  ;;  %v2151_v15 = vpop.permute.xlu0 %2150 }
 0x237   : > { %2175 = vst.msk [vmem:[#allocation3 + $0x18] sm:$0xf] %vm674_vm8, %v2151_v15 }
 0x238   : > { %v2153_v18 = vpop.permute.xlu1 %2152 }
 0x239   : > { %2176 = vst.msk [vmem:[#allocation3 + $0x24] sm:$0xf] %vm674_vm8, %v2153_v18 }
 0x23a   : > { %v2282_v26 = vpop.permute.xlu0 %2281 }
 0x23b   : > { %2306 = vst.msk [vmem:[#allocation3 + $0x18] sm:$0xf] %vm809_vm9, %v2282_v26 }
 0x23c   : > { %v2284_v49 = vpop.permute.xlu1 %2283 }
 0x23d   : > { %v2814_v57 = vld [vmem:[#allocation3 + $0xc] sm:$0xff]  ;;  %2307 = vst.msk [vmem:[#allocation3 + $0x24] sm:$0xf] %vm809_vm9, %v2284_v49 }
 0x23e   : > { %v2440_v0 = vpop.permute.xlu0 %2439  ;;  %v6282_v58 = vcombine.high %v2812_v63, %v2814_v57  ;;  %v6281_v6 = vcombine.low %v2812_v63, %v2814_v57 }
 0x23f   : > { %2464 = vst.msk [vmem:[#allocation3 + $0x1c] sm:$0xf] %vm526_vm6, %v2440_v0 }
 0x240   : > { %3098 = vmatprep.mubr.bf16.mxu1 %v6282_v58 }
 0x241   : > { %v2670_v10 = vpop.permute.xlu1 %2669  ;;  %3099 = vmatmul.mubr.bf16.vlgmr.msra.gmra.mrb[20].mxu1 %v6281_v6 }
 0x242   : > { %v2584_v13 = vpop.permute.xlu0 %2583 }
 0x243   : > { %2608 = vst.msk [vmem:[#allocation3 + $0x1c] sm:$0xf] %vm674_vm8, %v2584_v13 }
 0x244   : > { %2692 = vst.msk [vmem:[#allocation3 + $0x1c] sm:$0xf] %vm809_vm9, %v2668_v40 }
 0x245   : > { %v2442_v43 = vpop.permute.xlu1 %2441 }
 0x246   : > { %2465 = vst.msk [vmem:[#allocation3 + $0x28] sm:$0xf] %vm526_vm6, %v2442_v43  ;;  %v2011_v48 = vpop.permute.xlu0 %2010 }
 0x247   : > { %2033 = vst.msk [vmem:[#allocation3 + $0x30] sm:$0xf] %vm526_vm6, %v2011_v48 }
 0x249   : > { %v2013_v42 = vpop.permute.xlu1 %2012 }
 0x24a   : > { %2034 = vst.msk [vmem:[#allocation3 + $0x3c] sm:$0xf] %vm526_vm6, %v2013_v42  ;;  %v2672_v60 = vpop.permute.xlu0 %2671 }
 0x24b   : > { %v2816_v47 = vld [vmem:[#allocation3 + $0x18] sm:$0xff] }
 0x24d   : > { %v2586_v32 = vpop.permute.xlu1 %2585 }
 0x24e   : > { %2609 = vst.msk [vmem:[#allocation3 + $0x28] sm:$0xf] %vm674_vm8, %v2586_v32  ;;  %v2155_v55 = vpop.permute.xlu0 %2154 }
 0x24f   : > { %2693 = vst.msk [vmem:[#allocation3 + $0x28] sm:$0xf] %vm809_vm9, %v2670_v10 }
 0x250   : > { %2177 = vst.msk [vmem:[#allocation3 + $0x30] sm:$0xf] %vm674_vm8, %v2155_v55 }
 0x251   : > { %v2157_v38 = vpop.permute.xlu1 %2156 }
 0x252   : > { %2178 = vst.msk [vmem:[#allocation3 + $0x3c] sm:$0xf] %vm674_vm8, %v2157_v38 }
 0x254   : > { %v2286_v12 = vpop.permute.xlu0 %2285 }
 0x255   : > { %2308 = vst.msk [vmem:[#allocation3 + $0x30] sm:$0xf] %vm809_vm9, %v2286_v12  ;;  %v2288_v44 = vpop.permute.xlu1 %2287 }
 0x256   : > { %v2818_v23 = vld [vmem:[#allocation3 + $0x24] sm:$0xff]  ;;  %2309 = vst.msk [vmem:[#allocation3 + $0x3c] sm:$0xf] %vm809_vm9, %v2288_v44 }
 0x257   : > { %v6285_v28 = vcombine.high %v2816_v47, %v2818_v23  ;;  %v6284_v16 = vcombine.low %v2816_v47, %v2818_v23 }
 0x258   : > { %v2444_v30 = vpop.permute.xlu0 %2443 }
 0x259   : > { %2466 = vst.msk [vmem:[#allocation3 + $0x34] sm:$0xf] %vm526_vm6, %v2444_v30  ;;  %v2674_v54 = vpop.permute.xlu1 %2673  ;;  %3106 = vmatprep.mubr.bf16.mxu1 %v6285_v28  ;;  %v6911_v30 = vld [vmem:[%s9938_s1 + $0x110] sm:$0xff]   ;;  %v6912_v28 = vld [vmem:[%s9938_s1 + $0x118] sm:$0xff]  }
 0x25a   : > { %3107 = vmatmul.mubr.bf16.gmra.mrb[24].mxu1 %v6284_v16  ;;  %6796 = vmatpush3.bf16.msra.mxu0 %v6911_v30 }
 0x25b   : > { %6797 = vmatprep.subr.bf16.mxu0 %v9944_v59 }
 0x25c   : > { %v2588_v56 = vpop.permute.xlu0 %2587 }
 0x25d   : > { %2610 = vst.msk [vmem:[#allocation3 + $0x34] sm:$0xf] %vm674_vm8, %v2588_v56  ;;  %v2446_v29 = vpop.permute.xlu1 %2445 }
 0x25e   : > { %2694 = vst.msk [vmem:[#allocation3 + $0x34] sm:$0xf] %vm809_vm9, %v2672_v60  ;;  %6798 = vmatpush3.bf16.msra.mxu0 %v6912_v28 }
 0x25f   : > { %2467 = vst.msk [vmem:[#allocation3 + $0x40] sm:$0xf] %vm526_vm6, %v2446_v29  ;;  %6819 = vmatprep.subr.bf16.mxu0 %v9944_v59  ;;  %v3214_v59 = vld [vmem:[%s7054_s27 + $0x20] sm:$0xff] }
 0x260   : > { %v2015_v24 = vpop.permute.xlu0 %2014 }
 0x261   : > { %2035 = vst.msk [vmem:[#allocation3 + $0x48] sm:$0xf] %vm526_vm6, %v2015_v24  ;;  %v2017_v14 = vpop.permute.xlu1 %2016 }
 0x262   : > { %2036 = vst.msk [vmem:[#allocation3 + $0x54] sm:$0xf] %vm526_vm6, %v2017_v14 }
 0x264   : > { %v2676_v37 = vpop.permute.xlu0 %2675 }
 0x265   : > { %v2590_v17 = vpop.permute.xlu1 %2589  ;;  %v2820_v21 = vld [vmem:[#allocation3 + $0x30] sm:$0xff] }
 0x266   : > { %2611 = vst.msk [vmem:[#allocation3 + $0x40] sm:$0xf] %vm674_vm8, %v2590_v17 }
 0x267   : > { %2695 = vst.msk [vmem:[#allocation3 + $0x40] sm:$0xf] %vm809_vm9, %v2674_v54 }
 0x268   : > { %v2159_v34 = vpop.permute.xlu0 %2158 }
 0x269   : > { %2179 = vst.msk [vmem:[#allocation3 + $0x48] sm:$0xf] %vm674_vm8, %v2159_v34  ;;  %v2161_v7 = vpop.permute.xlu1 %2160 }
 0x26a   : > { %2180 = vst.msk [vmem:[#allocation3 + $0x54] sm:$0xf] %vm674_vm8, %v2161_v7  ;;  %v8478_v7 = vld [vmem:[%s9941_s4] ss:$0 sm:$0xff] }
 0x26c   : > { %v2290_v41 = vpop.permute.xlu0 %2289 }
 0x26d   : > { %2310 = vst.msk [vmem:[#allocation3 + $0x48] sm:$0xf] %vm809_vm9, %v2290_v41  ;;  %v2292_v53 = vpop.permute.xlu1 %2291 }
 0x26e   : > { %v2822_v36 = vld [vmem:[#allocation3 + $0x3c] sm:$0xff]  ;;  %2311 = vst.msk [vmem:[#allocation3 + $0x54] sm:$0xf] %vm809_vm9, %v2292_v53 }
 0x26f   : > { %v6288_v9 = vcombine.high %v2820_v21, %v2822_v36  ;;  %v6287_v45 = vcombine.low %v2820_v21, %v2822_v36 }
 0x270   : > { %v2448_v50 = vpop.permute.xlu0 %2447 }
 0x271   : > { %2468 = vst.msk [vmem:[#allocation3 + $0x4c] sm:$0xf] %vm526_vm6, %v2448_v50  ;;  %v2678_v5 = vpop.permute.xlu1 %2677  ;;  %3114 = vmatprep.mubr.bf16.mxu1 %v6288_v9 }
 0x272   : > { %3115 = vmatmul.mubr.bf16.gmra.mrb[28].mxu1 %v6287_v45  ;;  %v3498_v45 = vld [vmem:[#allocation2] sm:$0xe] }
 0x274   : > { %v2592_v27 = vpop.permute.xlu0 %2591 }
 0x275   : > { %2612 = vst.msk [vmem:[#allocation3 + $0x4c] sm:$0xf] %vm674_vm8, %v2592_v27  ;;  %v2450_v1 = vpop.permute.xlu1 %2449  ;;  %v3210_v27 = vld [vmem:[%s7054_s27] sm:$0xff] }
 0x276   : > { %2696 = vst.msk [vmem:[#allocation3 + $0x4c] sm:$0xf] %vm809_vm9, %v2676_v37 }
 0x277   : > { %2469 = vst.msk [vmem:[#allocation3 + $0x58] sm:$0xf] %vm526_vm6, %v2450_v1 }
 0x278   : > { %v2019_v3 = vpop.permute.xlu0 %2018 }
 0x279   : > { %2037 = vst.msk [vmem:[#allocation3 + $0x60] sm:$0xf] %vm526_vm6, %v2019_v3  ;;  %v2594_v62 = vpop.permute.xlu1 %2593 }
 0x27a   : > { %2613 = vst.msk [vmem:[#allocation3 + $0x58] sm:$0xf] %vm674_vm8, %v2594_v62  ;;  %v3211_v62 = vld [vmem:[%s7054_s27 + $0x8] sm:$0xff] }
 0x27b   : > { %2697 = vst.msk [vmem:[#allocation3 + $0x58] sm:$0xf] %vm809_vm9, %v2678_v5  ;;  %v3292_v5 = vld [vmem:[#allocation2] sm:$0xf] }
 0x27c   : > { %v2163_v40 = vpop.permute.xlu0 %2162 }
 0x27d   : > { %2181 = vst.msk [vmem:[#allocation3 + $0x60] sm:$0xf] %vm674_vm8, %v2163_v40  ;;  %v2452_v4 = vpop.permute.xlu1 %2451  ;;  %v2824_v26 = vld [vmem:[#allocation3 + $0x48] sm:$0xff]  ;;  %v3509_v40 = vshrl.u32 %v3498_v45, 16 }
 0x27e   : > { %2470 = vst.msk [vmem:[#allocation3 + $0x64] sm:$0xf] %vm526_vm6, %v2452_v4  ;;  %v3512_v4 = vshll.u32 %v3498_v45, 16 }
 0x280   : > { %v2294_v15 = vpop.permute.xlu0 %2293 }
 0x281   : > { %2312 = vst.msk [vmem:[#allocation3 + $0x60] sm:$0xf] %vm809_vm9, %v2294_v15  ;;  %v2596_v18 = vpop.permute.xlu1 %2595  ;;  %v3303_v15 = vshrl.u32 %v3292_v5, 16 }
 0x282   : > { %v2826_v49 = vld [vmem:[#allocation3 + $0x54] sm:$0xff]  ;;  %2614 = vst.msk [vmem:[#allocation3 + $0x64] sm:$0xf] %vm674_vm8, %v2596_v18  ;;  %v3306_v18 = vshll.u32 %v3292_v5, 16 }
 0x283   : > { %v6291_v63 = vcombine.high %v2824_v26, %v2826_v49  ;;  %v6290_v57 = vcombine.low %v2824_v26, %v2826_v49 }
 0x285   : > { %v2680_v0 = vpop.permute.xlu1 %2679  ;;  %3122 = vmatprep.mubr.bf16.mxu1 %v6291_v63 }
 0x286   : > { %2698 = vst.msk [vmem:[#allocation3 + $0x64] sm:$0xf] %vm809_vm9, %v2680_v0  ;;  %3123 = vmatmul.mubr.bf16.gmra.mrb[32].mxu1 %v6290_v57  ;;  %v3511_v0 = vrot.slane %v3509_v40, 5 }
 0x28d   : > { %v2828_v58 = vld [vmem:[#allocation3 + $0x60] sm:$0xff] }
 0x28e   : > { %v6294_v6 = vcombine.high %v2828_v58, %v2828_v58  ;;  %v6293_v10 = vcombine.low %v2828_v58, %v2828_v58  ;;  %v3514_v58 = vrot.slane %v3512_v4, 6 }
 0x290   : > { %3130 = vmatprep.mubr.bf16.mxu1 %v6294_v6  ;;  %v3305_v6 = vrot.slane %v3303_v15, 4  ;;  %v3515_v30 = vor.u32 %v3514_v58, %v3511_v0 }
 0x291   : > { %3131 = vmatmul.mubr.bf16.gmra.mrb[36].mxu1 %v6293_v10  ;;  %v3308_v10 = vrot.slane %v3306_v18, 5 }
 0x29e   : > { %v3172_v13 = vpop.f32.mrb[20].mxu0 }
 0x29f   : > { %v6777_v43 = vpop.f32.mrb[21].mxu0 }
 0x2a0   : > { %v3175_v48 = vpop.f32.mrb[22].mxu0 }
 0x2a1   : > { %v6778_v42 = vpop.f32.mrb[23].mxu0 }
 0x2a2   : > { %v8495_v42 = vld [vmem:[#allocation2 + $0x28] sm:$0xf] }
 0x2b6   : > { %v8453_v60 = vpop.f32.mrb[24].mxu0 }
 0x2b7   : > { %v6781_v32 = vpop.f32.mrb[25].mxu0 }
 0x2b8   : > { %v8455_v55 = vpop.f32.mrb[26].mxu0  ;;  %v3800_v32 = vld [vmem:[#allocation2 + $0x28] sm:$0x1] }
 0x2b9   : > { %v6782_v38 = vpop.f32.mrb[27].mxu0 }
 0x2ba   : > { %v8497_v38 = vld [vmem:[#allocation2 + $0x28] sm:$0x7] }
 0x2bb   : > { %v4034_v45 = vshll.u32 %v8497_v38, 16 }
 0x2ce   : > { %v8457_v12 = vpop.f32.mrb[28].mxu0 }
 0x2cf   : > { %v6785_v44 = vpop.f32.mrb[29].mxu0 }
 0x2d0   : > { %v8459_v47 = vpop.f32.mrb[30].mxu0 }
 0x2d1   : > { %v6786_v23 = vpop.f32.mrb[31].mxu0 }
 0x2d2   : > { %v3414_v23 = vld [vmem:[#allocation2] sm:$0xe] }
 0x2dc   : > { %v8468_v16 = vpop.f32.mrb[32].mxu0 }
 0x2dd   : > { %v6789_v54 = vpop.f32.mrb[33].mxu0 }
 0x2de   : > { %v8471_v56 = vpop.f32.mrb[34].mxu0  ;;  %v3309_v54 = vor.u32 %v3308_v10, %v3305_v6 }
 0x2df   : > { %v6790_v29 = vpop.f32.mrb[35].mxu0 }
 0x2e0   : > { %v4247_v29 = vshrl.u32 %v8495_v42, 16 }
 0x2e4   : > { %v8473_v24 = vpop.f32.mrb[36].mxu0 }
 0x2e5   : > { %v6793_v14 = vpop.f32.mrb[37].mxu0 }
 0x2e6   : > { %v3207_v37 = vpop.f32.mrb[38].mxu0  ;;  %v3891_v14 = vshll.u32 %v3800_v32, 16 }
 0x2e7   : > { %v6794_v17 = vpop.f32.mrb[39].mxu0  ;;  %v4031_v37 = vshrl.u32 %v8497_v38, 16  ;;  %v6921_v38 = vld [vmem:[%s9938_s1 + $0x98] sm:$0xff]  }
 0x2e8   : > { %v6328_v17 = vrot.slane %v3414_v23, 9 }
 0x314   : > { %v6604_v34 = vpop.f32.mrb[20].mxu1 }
 0x315   : > { %v6605_v41 = vpop.f32.mrb[21].mxu1 }
 0x316   : > { %v6606_v53 = vadd.f32 %v6605_v41, %v6604_v34  ;;  %v6607_v21 = vpop.f32.mrb[22].mxu1  ;;  %v8505_v34 = vrot.slane %v3515_v30, 4 }
 0x317   : > { %v6608_v36 = vpop.f32.mrb[23].mxu1 }
 0x318   : > { %v3101_v50 = vadd.f32 %v6606_v53, %v8478_v7  ;;  %v6609_v9 = vadd.f32 %v6608_v36, %v6607_v21  ;;  %v8510_v21 = vrot.slane %v3309_v54, 4  ;;  %v8512_v36 = vrot.slane %v4247_v29, 7 }
 0x31a   : > { %v3173_v1 = vadd.f32 %v3172_v13, %v3101_v50  ;;  %v3104_v3 = vadd.f32 %v6609_v9, %v8478_v7  ;;  %v8514_v50 = vrot.slane %v3891_v14, 5  ;;  %v8516_v9 = vrot.slane %v4031_v37, 6 }
 0x31c   : > { %v3219_v26 = vadd.f32 %v3210_v27, %v3173_v1  ;;  %v3176_v49 = vadd.f32 %v3175_v48, %v3104_v3  ;;  %v3642_v48 = vld [vmem:[#allocation2] sm:$0x8] }
 0x31d   : > { %v3653_v28 = vshrl.u32 %v3642_v48, 16 }
 0x31e   : > { %v3228_v63 = vmul.f32 %v3219_v26, %v7831_v33  ;;  %v3220_v57 = vadd.f32 %v3211_v62, %v3176_v49 }
 0x31f   : > { %v8507_v41 = vrot.slane %v3653_v28, 11 }
 0x320   : > { %3237 = vst.msk [vmem:[%s8489_s22] sm:$0xff] %vm1563_vm5, %v3228_v63  ;;  %v6517_v13 = vpack.c.bf16 %v3228_v63, %v3228_v63  ;;  %v3229_v43 = vmul.f32 %v3220_v57, %v7834_v11 }
 0x322   : > { %3283 = vst.msk [vmem:[#allocation2 + $0x4] sm:$0xf] %vm256_vm0, %v6517_v13  ;;  %v6518_v44 = vpack.c.bf16 %v3229_v43, %v3229_v43 }
 0x323   : > { %3238 = vst.msk [vmem:[%s8489_s22 + $0x8] sm:$0xff] %vm1563_vm5, %v3229_v43 }
 0x324   : > { %3284 = vst.msk [vmem:[#allocation2 + $0x8] sm:$0xf] %vm256_vm0, %v6518_v44 }
 0x329   : > { %v3415_v5 = vld [vmem:[#allocation2 + $0x4] sm:$0xf] }
 0x32a   : > { %v4075_v27 = vld [vmem:[#allocation2 + $0x4] sm:$0x8]  ;;  %v3436_v3 = vrot.slane %v3415_v5, 5 }
 0x32b   : > { %v3499_v1 = vld [vmem:[#allocation2 + $0x4] sm:$0xf]  ;;  %v6330_v62 = vrot.slane %v4075_v27, 11  ;;  %v8519_v18 = vld [vmem:[#allocation2 + $0x8] sm:$0xf] }
 0x32c   : > { %v3518_v40 = vshrl.u32 %v3499_v1, 16  ;;  %v3521_v4 = vshll.u32 %v3499_v1, 16  ;;  %v3643_v15 = vld [vmem:[#allocation2 + $0x4] sm:$0xf]  ;;  %v8521_v26 = vld [vmem:[#allocation2 + $0x8] sm:$0xf]  ;;  %v3437_v57 = vsel %vm7095_vm7, %v6328_v17, %v3436_v3 }
 0x32d   : > { %v3500_v49 = vld [vmem:[#allocation2 + $0x8] sm:$0xf]  ;;  %v6610_v63 = vpop.f32.mrb[24].mxu1  ;;  %v3438_v0 = vrot.slane %v3436_v3, 4  ;;  %v3439_v58 = vrot.slane %v8519_v18, 5  ;;  %v4097_v6 = vrot.slane %v8521_v26, 7  ;;  %3462 = vrot.lane.b32.xlu0 %v3437_v57, %s6996_s12 }
 0x32e   : > { %v3644_v10 = vld [vmem:[#allocation2 + $0x8] sm:$0xf]  ;;  %v6611_v13 = vpop.f32.mrb[25].mxu1  ;;  %v3520_v43 = vrot.slane %v3518_v40, 5  ;;  %v3523_v48 = vrot.slane %v3521_v4, 6  ;;  %v3528_v32 = vshrl.u32 %v3500_v49, 16 }
 0x32f   : > { %v3531_v44 = vshll.u32 %v3500_v49, 16  ;;  %v6612_v23 = vadd.f32 %v6611_v13, %v6610_v63  ;;  %v6613_v30 = vpop.f32.mrb[26].mxu1  ;;  %v3440_v28 = vsel %vm7095_vm7, %v3438_v0, %v3439_v58  ;;  %v4098_v54 = vsel %vm7113_vm12, %v6330_v62, %v4097_v6  ;;  %v3791_v49 = vld [vmem:[#allocation2 + $0x4] sm:$0xf]  ;;  %v3212_v63 = vld [vmem:[%s7054_s27 + $0x10] sm:$0xff]  ;;  %v3213_v57 = vld [vmem:[%s7054_s27 + $0x18] sm:$0xff] }
 0x330   : > { %v3658_v29 = vshrl.u32 %v3643_v15, 16  ;;  %v6614_v14 = vpop.f32.mrb[27].mxu1  ;;  %3464 = vrot.lane.b32.xlu1 %v3440_v28, %s6996_s12  ;;  %v3524_v37 = vor.u32 %v3523_v48, %v3520_v43  ;;  %v3530_v17 = vrot.slane %v3528_v32, 5  ;;  %v3667_v27 = vshrl.u32 %v3644_v10, 16  ;;  %v8548_v48 = vld [vmem:[#allocation2 + $0x8] sm:$0xf] }
 0x331   : > { %v3533_v5 = vrot.slane %v3531_v44, 6  ;;  %v3109_v1 = vadd.f32 %v6612_v23, %v8478_v7  ;;  %v6615_v3 = vadd.f32 %v6614_v14, %v6613_v30  ;;  %v3670_v4 = vshll.u32 %v3644_v10, 16  ;;  %4123 = vrot.lane.b32.xlu0 %v4098_v54, %s6997_s15  ;;  %v3931_v30 = vld [vmem:[#allocation2 + $0x4] sm:$0xc] }
 0x332   : > { %v3660_v40 = vrot.slane %v3658_v29, 7  ;;  %v3526_v0 = vrot.slane %v3524_v37, 4  ;;  %v3525_v13 = vsel %vm7188_vm2, %v8505_v34, %v3524_v37  ;;  %v8546_v43 = vrot.slane %v3667_v27, 7  ;;  %v3773_v28 = vld [vmem:[#allocation2 + $0x4] sm:$0xf] }
 0x333   : > { %v8541_v62 = vor.u32 %v3533_v5, %v3530_v17  ;;  %v3181_v32 = vadd.f32 %v8453_v60, %v3109_v1  ;;  %v3112_v10 = vadd.f32 %v6615_v3, %v8478_v7  ;;  %v3661_v23 = vshll.u32 %v3643_v15, 16  ;;  %3782 = vst.msk [vmem:[#allocation3 + $0x4] sm:$0xf] %vm256_vm0, %v3773_v28  ;;  %v6918_v60 = vld [vmem:[%s9938_s1 + $0xd0] sm:$0xff]   ;;  %v3774_v37 = vld [vmem:[#allocation2 + $0x8] sm:$0xf] }
 0x334   : > { %v3665_v44 = vrot.slane %v3660_v40, 4  ;;  %v3672_v29 = vor.u32 %v3670_v4, %v8546_v43  ;;  %v3802_v14 = vshrl.u32 %v3791_v49, 16  ;;  %v3805_v34 = vshll.u32 %v3791_v49, 16  ;;  %v6919_v15 = vld [vmem:[%s9938_s1 + $0x90] sm:$0xff]   ;;  %v3932_v3 = vld [vmem:[#allocation2 + $0x8] sm:$0xf]  ;;  %6641 = vmatprep.subr.bf16.mxu1 %v6918_v60 }
 0x335   : > { %v3535_v54 = vsel %vm7188_vm2, %v3526_v0, %v8541_v62  ;;  %v3221_v17 = vadd.f32 %v3212_v63, %v3181_v32  ;;  %v3184_v5 = vadd.f32 %v8455_v55, %v3112_v10  ;;  %v3663_v27 = vor.u32 %v3661_v23, %v3660_v40  ;;  %3783 = vst.msk [vmem:[#allocation3 + $0x10] sm:$0xf] %vm256_vm0, %v3774_v37  ;;  %v6920_v55 = vld [vmem:[%s9938_s1 + $0xd8] sm:$0xff]   ;;  %v6922_v60 = vld [vmem:[%s9938_s1 + $0xe0] sm:$0xff]  }
 0x336   : > { %3608 = vrot.lane.b32.xlu1 %v3535_v54, %s6998_s10  ;;  %v3811_v1 = vshll.u32 %v8548_v48, 16  ;;  %3606 = vrot.lane.b32.xlu0 %v3525_v13, %s6998_s10  ;;  %v3804_v4 = vrot.slane %v3802_v14, 4  ;;  %v3807_v49 = vrot.slane %v3805_v34, 5  ;;  %v3942_v0 = vshrl.u32 %v3931_v30, 16  ;;  %v4159_v14 = vld [vmem:[#allocation2 + $0x4] sm:$0x8] }
 0x337   : > { %v8570_v28 = vrot.slane %v4034_v45, 7  ;;  %v3230_v40 = vmul.f32 %v3221_v17, %v7886_v2  ;;  %v3222_v63 = vadd.f32 %v3213_v57, %v3184_v5  ;;  %v3673_v32 = vsel %vm7161_vm13, %v3665_v44, %v3672_v29  ;;  %6642 = vmatpush3.bf16.msra.mxu1 %v6919_v15  ;;  %v4160_v34 = vld [vmem:[#allocation2 + $0x8] sm:$0xf]  ;;  %v3293_v5 = vld [vmem:[#allocation2 + $0x4] sm:$0xf] }
 0x338   : > { %v3664_v13 = vsel %vm7161_vm13, %v8507_v41, %v3663_v27  ;;  %v3808_v45 = vor.u32 %v3807_v49, %v3804_v4  ;;  %v3944_v10 = vrot.slane %v3942_v0, 6  ;;  %v3945_v23 = vshll.u32 %v3931_v30, 16  ;;  %6643 = vmatprep.subr.bf16.mxu1 %v6920_v55  ;;  %v8602_v49 = vld [vmem:[#allocation2 + $0x8] sm:$0xf]  ;;  %v6923_v26 = vld [vmem:[%s9938_s1 + $0xa0] sm:$0xff]  }
 0x339   : > { %v3951_v54 = vshrl.u32 %v3932_v3, 16  ;;  %3239 = vst.msk [vmem:[%s8489_s22 + $0x10] sm:$0xff] %vm1563_vm5, %v3230_v40  ;;  %v6519_v57 = vpack.c.bf16 %v3230_v40, %v3230_v40  ;;  %v3231_v44 = vmul.f32 %v3222_v63, %v7890_v31  ;;  %v3813_v41 = vrot.slane %v3811_v1, 5 }
 0x33a   : > { %3739 = vrot.lane.b32.xlu1 %v3673_v32, %s6997_s15  ;;  %v3954_v29 = vshll.u32 %v3932_v3, 16  ;;  %3737 = vrot.lane.b32.xlu0 %v3664_v13, %s6997_s15  ;;  %v3809_v30 = vrot.slane %v3808_v45, 4  ;;  %v3947_v15 = vrot.slane %v3945_v23, 7  ;;  %v8594_v17 = vrot.slane %v4097_v6, 4  ;;  %v6924_v32 = vld [vmem:[%s9938_s1 + $0xe8] sm:$0xff]  }
 0x33b   : > { %v3953_v37 = vrot.slane %v3951_v54, 6  ;;  %3285 = vst.msk [vmem:[#allocation2 + $0xc] sm:$0xf] %vm256_vm0, %v6519_v57  ;;  %v6520_v27 = vpack.c.bf16 %v3231_v44, %v3231_v44  ;;  %v3441_v3 = vrot.slane %v3439_v58, 4  ;;  %v3815_v4 = vshrl.u32 %v8548_v48, 16  ;;  %6644 = vmatpush3.bf16.msra.mxu1 %v6921_v38 }
 0x33c   : > { %3240 = vst.msk [vmem:[%s8489_s22 + $0x18] sm:$0xff] %vm1563_vm5, %v3231_v44  ;;  %v3956_v1 = vrot.slane %v3954_v29, 7  ;;  %v3814_v6 = vsel %vm7179_vm14, %v3809_v30, %v3813_v41  ;;  %v3948_v0 = vor.u32 %v3947_v15, %v3944_v10  ;;  %v4170_v40 = vshrl.u32 %v4159_v14, 16  ;;  %6645 = vmatprep.subr.bf16.mxu1 %v6922_v60  ;;  %v6925_v44 = vld [vmem:[%s9938_s1 + $0xa8] sm:$0xff]  }
 0x33d   : > { %3286 = vst.msk [vmem:[#allocation2 + $0x10] sm:$0xf] %vm256_vm0, %v6520_v27  ;;  %v3817_v58 = vrot.slane %v3815_v4, 4  ;;  %v4175_v63 = vshrl.u32 %v4160_v34, 16  ;;  %v4178_v38 = vshll.u32 %v4160_v34, 16  ;;  %v3312_v45 = vshll.u32 %v3293_v5, 16 }
 0x33e   : > { %v8611_v18 = vor.u32 %v3956_v1, %v3953_v37  ;;  %3895 = vrot.lane.b32.xlu0 %v3814_v6, %s6996_s12  ;;  %v3949_v13 = vrot.slane %v3948_v0, 4  ;;  %v3322_v10 = vshll.u32 %v8602_v49, 16  ;;  %v6331_v54 = vrot.slane %v4170_v40, 11  ;;  %v6926_v27 = vld [vmem:[%s9938_s1 + $0xf0] sm:$0xff]  }
 0x33f   : > { %v3818_v23 = vor.u32 %v3817_v58, %v3813_v41  ;;  %v8619_v14 = vrot.slane %v4175_v63, 7  ;;  %v3316_v57 = vshrl.u32 %v3293_v5, 16  ;;  %6646 = vmatpush3.bf16.msra.mxu1 %v6923_v26  ;;  %v8628_v34 = vrot.slane %v3312_v45, 5 }
 0x340   : > { %v3958_v29 = vsel %vm7238_vm3, %v3949_v13, %v8611_v18  ;;  %v8630_v30 = vrot.slane %v3322_v10, 5  ;;  %6647 = vmatprep.subr.bf16.mxu1 %v6924_v32  ;;  %v6927_v13 = vld [vmem:[%s9938_s1 + $0xb0] sm:$0xff]  }
 0x341   : > { %v3819_v41 = vrot.slane %v3818_v23, 4  ;;  %v4180_v15 = vor.u32 %v4178_v38, %v8619_v14  ;;  %v8634_v5 = vrot.slane %v3316_v57, 4  ;;  %v3315_v6 = vsel %vm7179_vm14, %v8510_v21, %v8628_v34 }
 0x342   : > { %4039 = vrot.lane.b32.xlu0 %v3958_v29, %s6998_s10  ;;  %v4077_v1 = vld [vmem:[#allocation2 + $0xc] sm:$0xf]  ;;  %3405 = vst.msk [vmem:[#allocation3] sm:$0xf] %vm256_vm0, %v3315_v6 }
 0x343   : > { %v3417_v4 = vld [vmem:[#allocation2 + $0xc] sm:$0xf]  ;;  %v4100_v0 = vrot.slane %v4077_v1, 7  ;;  %v4181_v32 = vsel %vm7161_vm13, %v6331_v54, %v4180_v15  ;;  %6648 = vmatpush3.bf16.msra.mxu1 %v6925_v44 }
 0x344   : > { %v8640_v26 = vld [vmem:[#allocation2 + $0xc] sm:$0xf]  ;;  %v3442_v40 = vrot.slane %v3417_v4, 5  ;;  %v8653_v38 = vld [vmem:[#allocation2 + $0x10] sm:$0xf]  ;;  %6649 = vmatprep.subr.bf16.mxu1 %v6926_v27 }
 0x345   : > { %v3821_v58 = vshll.u32 %v8640_v26, 16  ;;  %v3501_v63 = vld [vmem:[#allocation2 + $0xc] sm:$0xf]  ;;  %v8655_v45 = vld [vmem:[#allocation2 + $0x10] sm:$0xf]  ;;  %v6616_v23 = vpop.f32.mrb[28].mxu1  ;;  %v4101_v54 = vsel %vm7113_vm12, %v8594_v17, %v4100_v0 }
 0x346   : > { %v3538_v21 = vshrl.u32 %v3501_v63, 16  ;;  %v3541_v10 = vshll.u32 %v3501_v63, 16  ;;  %4263 = vst.msk [vmem:[#allocation3 + $0x8] sm:$0xf] %vm256_vm0, %v4181_v32  ;;  %v3443_v57 = vsel %vm7095_vm7, %v3441_v3, %v3442_v40  ;;  %v4102_v29 = vrot.slane %v4100_v0, 4  ;;  %v6617_v1 = vpop.f32.mrb[29].mxu1  ;;  %4125 = vrot.lane.b32.xlu1 %v4101_v54, %s6997_s15 }
 0x347   : > { %v8663_v44 = vrot.slane %v3821_v58, 5  ;;  %v3933_v15 = vld [vmem:[#allocation2 + $0xc] sm:$0xf]  ;;  %3466 = vrot.lane.b32.xlu0 %v3443_v57, %s6996_s12  ;;  %v9946_v4 = vrot.slane %v8653_v38, 7  ;;  %v3444_v27 = vrot.slane %v3442_v40, 4  ;;  %v3445_v6 = vrot.slane %v8655_v45, 5  ;;  %6650 = vmatpush3.bf16.msra.mxu1 %v6927_v13 }
 0x348   : > { %v3540_v63 = vrot.slane %v3538_v21, 5  ;;  %v6928_v17 = vld [vmem:[%s9938_s1 + $0xf8] sm:$0xff]   ;;  %v6618_v3 = vadd.f32 %v6617_v1, %v6616_v23  ;;  %v6619_v58 = vpop.f32.mrb[30].mxu1  ;;  %v3543_v0 = vrot.slane %v3541_v10, 6  ;;  %v3961_v32 = vshrl.u32 %v3933_v15, 16 }
 0x349   : > { %v3645_v53 = vld [vmem:[#allocation2 + $0xc] sm:$0xf]  ;;  %v6929_v54 = vld [vmem:[%s9938_s1 + $0xb8] sm:$0xff]   ;;  %v6620_v57 = vpop.f32.mrb[31].mxu1  ;;  %v3824_v40 = vsel %vm7179_vm14, %v3819_v41, %v8663_v44  ;;  %v4104_v21 = vsel %vm7113_vm12, %v4102_v29, %v9946_v4  ;;  %v3964_v23 = vshll.u32 %v3933_v15, 16  ;;  %6651 = vmatprep.subr.bf16.mxu1 %v6928_v17 }
 0x34a   : > { %v3676_v1 = vshrl.u32 %v3645_v53, 16  ;;  %v4161_v10 = vld [vmem:[#allocation2 + $0xc] sm:$0xf]  ;;  %v3117_v13 = vadd.f32 %v6618_v3, %v8478_v7  ;;  %v6621_v37 = vadd.f32 %v6620_v57, %v6619_v58  ;;  %v8684_v48 = vor.u32 %v3543_v0, %v3540_v63  ;;  %3897 = vrot.lane.b32.xlu1 %v3824_v40, %s6996_s12  ;;  %v3502_v4 = vld [vmem:[#allocation2 + $0x10] sm:$0xf] }
 0x34b   : > { %v3963_v60 = vrot.slane %v3961_v32, 6  ;;  %4127 = vrot.lane.b32.xlu0 %v4104_v21, %s6997_s15  ;;  %v3966_v41 = vrot.slane %v3964_v23, 7  ;;  %v3679_v29 = vshll.u32 %v3645_v53, 16  ;;  %v4184_v15 = vshrl.u32 %v4161_v10, 16  ;;  %6652 = vmatpush3.bf16.msra.mxu1 %v6929_v54  ;;  %v6930_v53 = vld [vmem:[%s9938_s1 + $0x100] sm:$0xff]   ;;  %v3215_v32 = vld [vmem:[%s7054_s27 + $0x28] sm:$0xff] }
 0x34c   : > { %v8688_v55 = vrot.slane %v3676_v1, 7  ;;  %v3189_v17 = vadd.f32 %v8457_v12, %v3117_v13  ;;  %v3120_v3 = vadd.f32 %v6621_v37, %v8478_v7  ;;  %v3446_v63 = vsel %vm7095_vm7, %v3444_v27, %v3445_v6  ;;  %v8710_v27 = vld [vmem:[#allocation2 + $0x10] sm:$0xf]  ;;  %v3775_v13 = vld [vmem:[#allocation2 + $0xc] sm:$0xf]  ;;  %6653 = vmatprep.subr.bf16.mxu1 %v6930_v53 }
 0x34d   : > { %v9963_v58 = vrot.slane %v8541_v62, 4  ;;  %v8705_v12 = vor.u32 %v3966_v41, %v3963_v60  ;;  %v8708_v57 = vrot.slane %v4184_v15, 7  ;;  %v4187_v40 = vshll.u32 %v4161_v10, 16  ;;  %v3646_v54 = vld [vmem:[#allocation2 + $0x10] sm:$0xf] }
 0x34e   : > { %v3681_v37 = vor.u32 %v3679_v29, %v8688_v55  ;;  %v3223_v21 = vadd.f32 %v3214_v59, %v3189_v17  ;;  %v3192_v62 = vadd.f32 %v8459_v47, %v3120_v3  ;;  %v3548_v23 = vshrl.u32 %v3502_v4, 16  ;;  %3468 = vrot.lane.b32.xlu1 %v3446_v63, %s6996_s12  ;;  %3784 = vst.msk [vmem:[#allocation3 + $0x1c] sm:$0xf] %vm256_vm0, %v3775_v13  ;;  %v3776_v29 = vld [vmem:[#allocation2 + $0x10] sm:$0xf]  ;;  %v6932_v63 = vld [vmem:[%s9938_s1 + $0x108] sm:$0xff]  }
 0x34f   : > { %v3545_v0 = vsel %vm7188_vm2, %v9963_v58, %v8684_v48  ;;  %v3551_v1 = vshll.u32 %v3502_v4, 16  ;;  %v9964_v60 = vrot.slane %v8611_v18, 4  ;;  %v4189_v41 = vor.u32 %v4187_v40, %v8708_v57  ;;  %v6931_v4 = vld [vmem:[%s9938_s1 + $0xc0] sm:$0xff]   ;;  %3785 = vst.msk [vmem:[#allocation3 + $0x28] sm:$0xf] %vm256_vm0, %v3776_v29 }
 0x350   : > { %3610 = vrot.lane.b32.xlu0 %v3545_v0, %s6998_s10  ;;  %v3546_v59 = vrot.slane %v8684_v48, 4  ;;  %v3825_v47 = vshrl.u32 %v8640_v26, 16  ;;  %v3232_v15 = vmul.f32 %v3223_v21, %v8008_v19  ;;  %v3224_v18 = vadd.f32 %v3215_v32, %v3192_v62  ;;  %v3934_v40 = vld [vmem:[#allocation2 + $0x10] sm:$0xf]  ;;  %6654 = vmatpush3.bf16.msra.mxu1 %v6931_v4  ;;  %v6933_v21 = vld [vmem:[%s9938_s1 + $0xc8] sm:$0xff]  }
 0x351   : > { %v3968_v10 = vsel %vm7238_vm3, %v9964_v60, %v8705_v12  ;;  %v3550_v17 = vrot.slane %v3548_v23, 5  ;;  %v3553_v3 = vrot.slane %v3551_v1, 6  ;;  %v9965_v48 = vrot.slane %v8546_v43, 4  ;;  %6655 = vmatprep.subr.bf16.mxu1 %v6932_v63 }
 0x352   : > { %v9966_v58 = vrot.slane %v8619_v14, 4  ;;  %v3827_v53 = vrot.slane %v3825_v47, 4  ;;  %v3831_v32 = vshll.u32 %v8710_v27, 16  ;;  %3241 = vst.msk [vmem:[%s8489_s22 + $0x20] sm:$0xff] %vm1563_vm5, %v3232_v15  ;;  %v6521_v43 = vpack.c.bf16 %v3232_v15, %v3232_v15  ;;  %4041 = vrot.lane.b32.xlu1 %v3968_v10, %s6998_s10 }
 0x353   : > { %v3682_v26 = vsel %vm7161_vm13, %v9965_v48, %v3681_v37  ;;  %v3233_v37 = vmul.f32 %v3224_v18, %v8027_v20  ;;  %v8748_v14 = vor.u32 %v3553_v3, %v3550_v17  ;;  %v3685_v62 = vshrl.u32 %v3646_v54, 16 }
 0x354   : > { %v4190_v0 = vsel %vm7161_vm13, %v9966_v58, %v4189_v41  ;;  %3741 = vrot.lane.b32.xlu0 %v3682_v26, %s6997_s15  ;;  %v3828_v23 = vor.u32 %v3827_v53, %v8663_v44  ;;  %v3683_v1 = vrot.slane %v8688_v55, 4  ;;  %v3319_v13 = vor.u32 %v8634_v5, %v8628_v34  ;;  %3287 = vst.msk [vmem:[#allocation2 + $0x14] sm:$0xf] %vm256_vm0, %v6521_v43  ;;  %v4162_v55 = vld [vmem:[#allocation2 + $0x10] sm:$0xf] }
 0x355   : > { %4264 = vst.msk [vmem:[#allocation3 + $0x14] sm:$0xf] %vm256_vm0, %v4190_v0  ;;  %v3326_v60 = vshrl.u32 %v8602_v49, 16  ;;  %v6522_v41 = vpack.c.bf16 %v3233_v37, %v3233_v37  ;;  %v8760_v47 = vrot.slane %v3685_v62, 7  ;;  %v3688_v4 = vshll.u32 %v3646_v54, 16  ;;  %6656 = vmatpush3.bf16.msra.mxu1 %v6933_v21 }
 0x356   : > { %3242 = vst.msk [vmem:[%s8489_s22 + $0x28] sm:$0xff] %vm1563_vm5, %v3233_v37  ;;  %v3971_v10 = vshrl.u32 %v3934_v40, 16  ;;  %v3829_v29 = vrot.slane %v3828_v23, 4  ;;  %v3833_v15 = vrot.slane %v3831_v32, 5  ;;  %v3969_v44 = vrot.slane %v8705_v12, 4 }
 0x357   : > { %v3974_v18 = vshll.u32 %v3934_v40, 16  ;;  %3288 = vst.msk [vmem:[#allocation2 + $0x18] sm:$0xf] %vm256_vm0, %v6522_v41  ;;  %v3555_v49 = vsel %vm7188_vm2, %v3546_v59, %v8748_v14  ;;  %v3690_v34 = vor.u32 %v3688_v4, %v8760_v47  ;;  %v3835_v17 = vshrl.u32 %v8710_v27, 16  ;;  %v8779_v0 = vld [vmem:[#allocation2 + $0xc] sm:$0xf] }
 0x358   : > { %v3973_v5 = vrot.slane %v3971_v10, 6  ;;  %3612 = vrot.lane.b32.xlu1 %v3555_v49, %s6998_s10  ;;  %v3834_v54 = vsel %vm7179_vm14, %v3829_v29, %v3833_v15  ;;  %v9967_v3 = vrot.slane %v8653_v38, 7  ;;  %v3447_v48 = vrot.slane %v3445_v6, 4 }
 0x359   : > { %v3976_v12 = vrot.slane %v3974_v18, 7  ;;  %3899 = vrot.lane.b32.xlu0 %v3834_v54, %s6996_s12  ;;  %v3837_v59 = vrot.slane %v3835_v17, 4  ;;  %v3556_v26 = vrot.slane %v8748_v14, 4  ;;  %v4193_v27 = vshrl.u32 %v4162_v55, 16  ;;  %v6622_v6 = vpop.f32.mrb[32].mxu1 }
 0x35a   : > { %v4105_v63 = vrot.slane %v9967_v3, 4  ;;  %v3691_v32 = vsel %vm7161_vm13, %v3683_v1, %v3690_v34  ;;  %v4191_v38 = vrot.slane %v8708_v57, 4  ;;  %v3320_v45 = vrot.slane %v3319_v13, 4  ;;  %v6623_v23 = vpop.f32.mrb[33].mxu1 }
 0x35b   : > { %v8783_v40 = vor.u32 %v3976_v12, %v3973_v5  ;;  %v3838_v21 = vor.u32 %v3837_v59, %v3833_v15  ;;  %v8786_v43 = vrot.slane %v4193_v27, 7  ;;  %v4196_v37 = vshll.u32 %v4162_v55, 16  ;;  %v4079_v41 = vld [vmem:[#allocation2 + $0x14] sm:$0xf] }
 0x35c   : > { %v6913_v53 = vld [vmem:[#allocation3 + $0x8] ss:$12 sps:$4 sm:$0xff]   ;;  %v8788_v62 = vrot.slane %v3326_v60, 4  ;;  %3743 = vrot.lane.b32.xlu1 %v3691_v32, %s6997_s15  ;;  %v3325_v13 = vsel %vm7179_vm14, %v3320_v45, %v8630_v30  ;;  %v6624_v29 = vadd.f32 %v6623_v23, %v6622_v6  ;;  %v6625_v60 = vpop.f32.mrb[34].mxu1  ;;  %v4106_v15 = vrot.slane %v4079_v41, 7 }
 0x35d   : > { %6800 = vmatmul.mubr.msk.bf16.vlgmr.msra.gmra.mrb[40].mxu0 %vm1563_vm5, %v6913_v53  ;;  %v3978_v1 = vsel %vm7238_vm3, %v3969_v44, %v8783_v40  ;;  %v3419_v4 = vld [vmem:[#allocation2 + $0x14] sm:$0xf]  ;;  %v3839_v49 = vrot.slane %v3838_v21, 4  ;;  %v9968_v34 = vmov 0.0   ;;  %3406 = vst.msk [vmem:[#allocation3 + $0xc] sm:$0xf] %vm256_vm0, %v3325_v13  ;;  %v4198_v12 = vor.u32 %v4196_v37, %v8786_v43 }
 0x35e   : > { %4043 = vrot.lane.b32.xlu0 %v3978_v1, %s6998_s10  ;;  %v3448_v18 = vrot.slane %v3419_v4, 5  ;;  %v8800_v55 = vld [vmem:[#allocation2 + $0x14] sm:$0xf]  ;;  %6803 = vmatprep.mubr.msk.bf16.mxu0 %vm7000_vm4, %v9968_v34  ;;  %v6626_v44 = vpop.f32.mrb[35].mxu1  ;;  %v8806_v17 = vld [vmem:[#allocation2 + $0x18] sm:$0xf]  ;;  %v3125_v3 = vadd.f32 %v6624_v29, %v8478_v7  ;;  %v4107_v27 = vsel %vm7113_vm12, %v4105_v63, %v4106_v15 }
 0x35f   : > { %v3841_v5 = vshll.u32 %v8800_v55, 16  ;;  %v8808_v54 = vld [vmem:[#allocation2 + $0x18] sm:$0xf]  ;;  %v6627_v59 = vadd.f32 %v6626_v44, %v6625_v60  ;;  %v3503_v32 = vld [vmem:[#allocation2 + $0x14] sm:$0xf]  ;;  %v4108_v23 = vrot.slane %v4106_v15, 4 }
 0x360   : > { %v3449_v53 = vsel %vm7095_vm7, %v3447_v48, %v3448_v18  ;;  %v3935_v45 = vld [vmem:[#allocation2 + $0x14] sm:$0xf]  ;;  %4129 = vrot.lane.b32.xlu1 %v4107_v27, %s6997_s15  ;;  %v4109_v37 = vrot.slane %v8806_v17, 7  ;;  %v3450_v1 = vrot.slane %v3448_v18, 4  ;;  %v3197_v41 = vadd.f32 %v8468_v16, %v3125_v3  ;;  %v3217_v29 = vld [vmem:[%s7054_s27 + $0x38] sm:$0xff] }
 0x361   : > { %v3216_v6 = vld [vmem:[%s7054_s27 + $0x30] sm:$0xff]  ;;  %v8818_v21 = vrot.slane %v3841_v5, 5  ;;  %v3128_v4 = vadd.f32 %v6627_v59, %v8478_v7  ;;  %v3451_v63 = vrot.slane %v8808_v54, 5  ;;  %v3558_v48 = vshrl.u32 %v3503_v32, 16 }
 0x362   : > { %3470 = vrot.lane.b32.xlu0 %v3449_v53, %s6996_s12  ;;  %v3647_v13 = vld [vmem:[#allocation2 + $0x14] sm:$0xf]  ;;  %v3561_v44 = vshll.u32 %v3503_v32, 16  ;;  %v3979_v15 = vrot.slane %v8783_v40, 4  ;;  %v3981_v5 = vshrl.u32 %v3935_v45, 16  ;;  %v3225_v18 = vadd.f32 %v3216_v6, %v3197_v41 }
 0x363   : > { %v3844_v60 = vsel %vm7179_vm14, %v3839_v49, %v8818_v21  ;;  %v3200_v16 = vadd.f32 %v8471_v56, %v3128_v4  ;;  %v4110_v3 = vsel %vm7113_vm12, %v4108_v23, %v4109_v37  ;;  %v3560_v59 = vrot.slane %v3558_v48, 5  ;;  %v4163_v49 = vld [vmem:[#allocation2 + $0x14] sm:$0xf] }
 0x364   : > { %3901 = vrot.lane.b32.xlu1 %v3844_v60, %s6996_s12  ;;  %v3563_v27 = vrot.slane %v3561_v44, 6  ;;  %v3983_v53 = vrot.slane %v3981_v5, 6  ;;  %v3984_v10 = vshll.u32 %v3935_v45, 16  ;;  %v3694_v58 = vshrl.u32 %v3647_v13, 16  ;;  %v3777_v23 = vld [vmem:[#allocation2 + $0x14] sm:$0xf] }
 0x365   : > { %v3234_v32 = vmul.f32 %v3225_v18, %v8130_v25  ;;  %v3226_v40 = vadd.f32 %v3217_v29, %v3200_v16  ;;  %v3452_v56 = vsel %vm7095_vm7, %v3450_v1, %v3451_v63  ;;  %v4199_v6 = vsel %vm7161_vm13, %v4191_v38, %v4198_v12  ;;  %v3778_v45 = vld [vmem:[#allocation2 + $0x18] sm:$0xf]  ;;  %v6628_v41 = vpop.f32.mrb[36].mxu1  ;;  %3786 = vst.msk [vmem:[#allocation3 + $0x34] sm:$0xf] %vm256_vm0, %v3777_v23  ;;  %v3218_v23 = vld [vmem:[%s7054_s27 + $0x40] sm:$0xff] }
 0x366   : > { %4131 = vrot.lane.b32.xlu0 %v4110_v3, %s6997_s15  ;;  %v8846_v4 = vor.u32 %v3563_v27, %v3560_v59  ;;  %v3986_v48 = vrot.slane %v3984_v10, 7  ;;  %v8848_v60 = vrot.slane %v3694_v58, 7  ;;  %v3697_v29 = vshll.u32 %v3647_v13, 16  ;;  %4265 = vst.msk [vmem:[#allocation3 + $0x20] sm:$0xf] %vm256_vm0, %v4199_v6  ;;  %v6629_v12 = vpop.f32.mrb[37].mxu1 }
 0x367   : > { %v3504_v44 = vld [vmem:[#allocation2 + $0x18] sm:$0xf]  ;;  %3787 = vst.msk [vmem:[#allocation3 + $0x40] sm:$0xf] %vm256_vm0, %v3778_v45  ;;  %v6523_v57 = vpack.c.bf16 %v3234_v32, %v3234_v32  ;;  %v3235_v38 = vmul.f32 %v3226_v40, %v8144_v46  ;;  %v4200_v1 = vrot.slane %v8786_v43, 4  ;;  %v4202_v10 = vshrl.u32 %v4163_v49, 16 }
 0x368   : > { %3243 = vst.msk [vmem:[%s8489_s22 + $0x30] sm:$0xff] %vm1563_vm5, %v3234_v32  ;;  %v6630_v58 = vadd.f32 %v6629_v12, %v6628_v41  ;;  %v6631_v5 = vpop.f32.mrb[38].mxu1  ;;  %3472 = vrot.lane.b32.xlu1 %v3452_v56, %s6996_s12  ;;  %v3565_v13 = vsel %vm7188_vm2, %v3556_v26, %v8846_v4  ;;  %v8863_v18 = vor.u32 %v3986_v48, %v3983_v53  ;;  %v8866_v3 = vld [vmem:[#allocation2 + $0x18] sm:$0xf]  ;;  %v4205_v14 = vshll.u32 %v4163_v49, 16 }
 0x369   : > { %v3699_v16 = vor.u32 %v3697_v29, %v8848_v60  ;;  %3289 = vst.msk [vmem:[#allocation2 + $0x1c] sm:$0xf] %vm256_vm0, %v6523_v57  ;;  %v6524_v43 = vpack.c.bf16 %v3235_v38, %v3235_v38  ;;  %v6632_v59 = vpop.f32.mrb[39].mxu1  ;;  %v8872_v27 = vrot.slane %v4202_v10, 7  ;;  %v3568_v32 = vshrl.u32 %v3504_v44, 16 }
 0x36a   : > { %3244 = vst.msk [vmem:[%s8489_s22 + $0x38] sm:$0xff] %vm1563_vm5, %v3235_v38  ;;  %3614 = vrot.lane.b32.xlu0 %v3565_v13, %s6998_s10  ;;  %v3648_v26 = vld [vmem:[#allocation2 + $0x18] sm:$0xf]  ;;  %v3133_v53 = vadd.f32 %v6630_v58, %v8478_v7  ;;  %v3988_v40 = vsel %vm7238_vm3, %v3979_v15, %v8863_v18  ;;  %v3566_v56 = vrot.slane %v8846_v4, 4  ;;  %v3571_v6 = vshll.u32 %v3504_v44, 16 }
 0x36b   : > { %3290 = vst.msk [vmem:[#allocation2 + $0x20] sm:$0xf] %vm256_vm0, %v6524_v43  ;;  %v4207_v45 = vor.u32 %v4205_v14, %v8872_v27  ;;  %v3570_v41 = vrot.slane %v3568_v32, 5  ;;  %v3845_v48 = vshrl.u32 %v8800_v55, 16  ;;  %v3851_v49 = vshll.u32 %v8866_v3, 16 }
 0x36c   : > { %v3205_v29 = vadd.f32 %v8473_v24, %v3133_v53  ;;  %4045 = vrot.lane.b32.xlu1 %v3988_v40, %s6998_s10  ;;  %v9969_v7 = vrot.slane %v8760_v47, 4  ;;  %v3573_v4 = vrot.slane %v3571_v6, 6  ;;  %v3703_v44 = vshrl.u32 %v3648_v26, 16  ;;  %v3936_v57 = vld [vmem:[#allocation2 + $0x18] sm:$0xf] }
 0x36d   : > { %v4208_v38 = vsel %vm7161_vm13, %v4200_v1, %v4207_v45  ;;  %v3847_v55 = vrot.slane %v3845_v48, 4  ;;  %v3701_v12 = vrot.slane %v8848_v60, 4  ;;  %v3336_v24 = vshrl.u32 %v8779_v0, 16 }
 0x36e   : > { %v3700_v15 = vsel %vm7161_vm13, %v9969_v7, %v3699_v16  ;;  %v3227_v10 = vadd.f32 %v3218_v23, %v3205_v29  ;;  %4266 = vst.msk [vmem:[#allocation3 + $0x2c] sm:$0xf] %vm256_vm0, %v4208_v38  ;;  %v8896_v47 = vor.u32 %v3573_v4, %v3570_v41  ;;  %v8898_v58 = vrot.slane %v3703_v44, 7 }
 0x36f   : > { %3745 = vrot.lane.b32.xlu0 %v3700_v15, %s6997_s15  ;;  %v3706_v5 = vshll.u32 %v3648_v26, 16  ;;  %v3848_v13 = vor.u32 %v3847_v55, %v8818_v21  ;;  %v3853_v16 = vrot.slane %v3851_v49, 5  ;;  %v3991_v43 = vshrl.u32 %v3936_v57, 16 }
 0x370   : > { %v3994_v59 = vshll.u32 %v3936_v57, 16  ;;  %v3236_v1 = vmul.f32 %v3227_v10, %v8181_v8  ;;  %v3575_v60 = vsel %vm7188_vm2, %v3566_v56, %v8896_v47  ;;  %v3989_v32 = vrot.slane %v8863_v18, 4  ;;  %v4081_v53 = vld [vmem:[#allocation2 + $0x1c] sm:$0xf]  ;;  %v4164_v57 = vld [vmem:[#allocation2 + $0x18] sm:$0xf] }
 0x371   : > { %v3708_v14 = vor.u32 %v3706_v5, %v8898_v58  ;;  %v3421_v40 = vld [vmem:[#allocation2 + $0x1c] sm:$0xf]  ;;  %3616 = vrot.lane.b32.xlu1 %v3575_v60, %s6998_s10  ;;  %v3849_v26 = vrot.slane %v3848_v13, 4  ;;  %v3993_v21 = vrot.slane %v3991_v43, 6  ;;  %v4112_v23 = vrot.slane %v4081_v53, 7 }
 0x372   : > { %v3996_v6 = vrot.slane %v3994_v59, 7  ;;  %v8908_v45 = vld [vmem:[#allocation2 + $0x1c] sm:$0xf]  ;;  %3245 = vst.msk [vmem:[%s8489_s22 + $0x40] sm:$0xff] %vm1563_vm5, %v3236_v1  ;;  %v6525_v41 = vpack.c.bf16 %v3236_v1, %v3236_v1  ;;  %v4111_v56 = vrot.slane %v4109_v37, 4  ;;  %v3454_v48 = vrot.slane %v3421_v40, 5 }
 0x373   : > { %v3855_v49 = vshrl.u32 %v8866_v3, 16  ;;  %v8915_v18 = vld [vmem:[#allocation2 + $0x20] sm:$0xf]  ;;  %v3854_v29 = vsel %vm7179_vm14, %v3849_v26, %v3853_v16  ;;  %v3453_v15 = vrot.slane %v3451_v63, 4  ;;  %v3861_v4 = vshll.u32 %v8908_v45, 16 }
 0x374   : > { %v8919_v7 = vor.u32 %v3996_v6, %v3993_v21  ;;  %v8924_v44 = vld [vmem:[#allocation2 + $0x20] sm:$0xf]  ;;  %3291 = vst.msk [vmem:[#allocation2 + $0x24] sm:$0xf] %vm256_vm0, %v6525_v41  ;;  %3903 = vrot.lane.b32.xlu0 %v3854_v29, %s6996_s12  ;;  %v3709_v17 = vsel %vm7161_vm13, %v3701_v12, %v3708_v14  ;;  %v4114_v3 = vrot.slane %v4112_v23, 4  ;;  %v4115_v38 = vrot.slane %v8915_v18, 7 }
 0x375   : > { %v3857_v37 = vrot.slane %v3855_v49, 4  ;;  %v3505_v55 = vld [vmem:[#allocation2 + $0x1c] sm:$0xf]  ;;  %v6914_v10 = vld [vmem:[#allocation3 + $0x20] ss:$12 sps:$4 sm:$0xff]   ;;  %3747 = vrot.lane.b32.xlu1 %v3709_v17, %s6997_s15  ;;  %v4113_v54 = vsel %vm7113_vm12, %v4111_v56, %v4112_v23  ;;  %v9970_v5 = vshll.u32 %v8495_v42, 16  ;;  %v3455_v43 = vsel %vm7095_vm7, %v3453_v15, %v3454_v48 }
 0x376   : > { %v4165_v63 = vld [vmem:[#allocation2 + $0x1c] sm:$0xf]  ;;  %v3998_v12 = vsel %vm7238_vm3, %v3989_v32, %v8919_v7  ;;  %v8944_v1 = vrot.slane %v3861_v4, 5  ;;  %6804 = vmatmul.mubr.msk.bf16.gmra.mrb[44].mxu0 %vm1563_vm5, %v6914_v10  ;;  %v3456_v60 = vrot.slane %v3454_v48, 4  ;;  %v3578_v14 = vshrl.u32 %v3505_v55, 16 }
 0x377   : > { %v8937_v13 = vor.u32 %v9970_v5, %v8512_v36  ;;  %v3858_v59 = vor.u32 %v3857_v37, %v3853_v16  ;;  %v3581_v53 = vshll.u32 %v3505_v55, 16  ;;  %v4211_v40 = vshrl.u32 %v4164_v57, 16  ;;  %v3937_v26 = vld [vmem:[#allocation2 + $0x1c] sm:$0xf]  ;;  %6807 = vmatprep.mubr.msk.bf16.mxu0 %vm7000_vm4, %v9968_v34  ;;  %v3506_v55 = vld [vmem:[#allocation2 + $0x20] sm:$0xf] }
 0x378   : > { %4047 = vrot.lane.b32.xlu0 %v3998_v12, %s6998_s10  ;;  %v4116_v36 = vsel %vm7113_vm12, %v4114_v3, %v4115_v38  ;;  %v3457_v32 = vrot.slane %v8924_v44, 5  ;;  %v4220_v16 = vshrl.u32 %v4165_v63, 16  ;;  %v3580_v21 = vrot.slane %v3578_v14, 5  ;;  %v3649_v56 = vld [vmem:[#allocation2 + $0x1c] sm:$0xf] }
 0x379   : > { %v3859_v42 = vrot.slane %v3858_v59, 4  ;;  %4133 = vrot.lane.b32.xlu1 %v4113_v54, %s6997_s15  ;;  %v3583_v6 = vrot.slane %v3581_v53, 6  ;;  %v4213_v23 = vrot.slane %v4211_v40, 7  ;;  %v4214_v41 = vshll.u32 %v4164_v57, 16  ;;  %v8974_v59 = vld [vmem:[#allocation2 + $0x20] sm:$0xf] }
 0x37a   : > { %v3576_v48 = vrot.slane %v8896_v47, 4  ;;  %v8957_v49 = vrot.slane %v4220_v16, 7  ;;  %v4223_v29 = vshll.u32 %v4165_v63, 16  ;;  %v4001_v15 = vshrl.u32 %v3937_v26, 16 }
 0x37b   : > { %v3864_v4 = vsel %vm7179_vm14, %v3859_v42, %v8944_v1  ;;  %v4209_v17 = vrot.slane %v8872_v27, 4  ;;  %v4216_v37 = vor.u32 %v4214_v41, %v4213_v23  ;;  %v4004_v3 = vshll.u32 %v3937_v26, 16  ;;  %v3651_v18 = vld [vmem:[#allocation2 + $0x24] sm:$0xf] }
 0x37c   : > { %3474 = vrot.lane.b32.xlu0 %v3455_v43, %s6996_s12  ;;  %v4218_v10 = vrot.slane %v4213_v23, 4  ;;  %v4225_v57 = vor.u32 %v4223_v29, %v8957_v49  ;;  %v4003_v54 = vrot.slane %v4001_v15, 6  ;;  %v3712_v47 = vshrl.u32 %v3649_v56, 16  ;;  %v3650_v43 = vld [vmem:[#allocation2 + $0x20] sm:$0xf] }
 0x37d   : > { %3905 = vrot.lane.b32.xlu1 %v3864_v4, %s6996_s12  ;;  %v3458_v63 = vsel %vm7095_vm7, %v3456_v60, %v3457_v32  ;;  %v8970_v5 = vor.u32 %v3583_v6, %v3580_v21  ;;  %v4217_v27 = vsel %vm7161_vm13, %v4209_v17, %v4216_v37  ;;  %v4006_v12 = vrot.slane %v4004_v3, 7  ;;  %v4166_v37 = vld [vmem:[#allocation2 + $0x20] sm:$0xf] }
 0x37e   : > { %v4226_v14 = vsel %vm7161_vm13, %v4218_v10, %v4225_v57  ;;  %4267 = vst.msk [vmem:[#allocation3 + $0x38] sm:$0xf] %vm256_vm0, %v4217_v27  ;;  %v3999_v53 = vrot.slane %v8919_v7, 4  ;;  %v8980_v40 = vrot.slane %v3712_v47, 7  ;;  %v3588_v26 = vshrl.u32 %v3506_v55, 16 }
 0x37f   : > { %4268 = vst.msk [vmem:[#allocation3 + $0x44] sm:$0xf] %vm256_vm0, %v4226_v14  ;;  %v8983_v60 = vor.u32 %v4006_v12, %v4003_v54  ;;  %v3710_v42 = vrot.slane %v8898_v58, 4  ;;  %v3591_v16 = vshll.u32 %v3506_v55, 16  ;;  %v3865_v21 = vshrl.u32 %v8908_v45, 16 }
 0x380   : > { %4135 = vrot.lane.b32.xlu0 %v4116_v36, %s6997_s15  ;;  %v3715_v6 = vshll.u32 %v3649_v56, 16  ;;  %v3590_v23 = vrot.slane %v3588_v26, 5  ;;  %v3871_v41 = vshll.u32 %v8974_v59, 16  ;;  %v3721_v29 = vshrl.u32 %v3650_v43, 16  ;;  %v3938_v7 = vld [vmem:[#allocation2 + $0x20] sm:$0xf] }
 0x381   : > { %3476 = vrot.lane.b32.xlu1 %v3458_v63, %s6996_s12  ;;  %v3585_v15 = vsel %vm7188_vm2, %v3576_v48, %v8970_v5  ;;  %v3586_v4 = vrot.slane %v8970_v5, 4  ;;  %v3593_v58 = vrot.slane %v3591_v16, 6  ;;  %v3867_v17 = vrot.slane %v3865_v21, 4  ;;  %v3779_v55 = vld [vmem:[#allocation2 + $0x1c] sm:$0xf] }
 0x382   : > { %v3717_v45 = vor.u32 %v3715_v6, %v8980_v40  ;;  %v3719_v36 = vrot.slane %v8980_v40, 4  ;;  %v8996_v56 = vrot.slane %v3721_v29, 7  ;;  %v3724_v3 = vshll.u32 %v3650_v43, 16  ;;  %v4167_v47 = vld [vmem:[#allocation2 + $0x24] sm:$0xf] }
 0x383   : > { %v4008_v10 = vsel %vm7238_vm3, %v3999_v53, %v8983_v60  ;;  %v3868_v57 = vor.u32 %v3867_v17, %v8944_v1  ;;  %v4011_v48 = vshrl.u32 %v3938_v7, 16  ;;  %v4014_v54 = vshll.u32 %v3938_v7, 16  ;;  %3788 = vst.msk [vmem:[#allocation3 + $0x4c] sm:$0xf] %vm256_vm0, %v3779_v55  ;;  %v3780_v63 = vld [vmem:[#allocation2 + $0x20] sm:$0xf] }
 0x384   : > { %3618 = vrot.lane.b32.xlu0 %v3585_v15, %s6998_s10  ;;  %v9004_v5 = vor.u32 %v3593_v58, %v3590_v23  ;;  %v9006_v27 = vrot.slane %v3871_v41, 5  ;;  %v3726_v12 = vor.u32 %v3724_v3, %v8996_v56  ;;  %v4229_v43 = vshrl.u32 %v4166_v37, 16  ;;  %v9009_v14 = vld [vmem:[#allocation2 + $0x24] sm:$0xf]  ;;  %3789 = vst.msk [vmem:[#allocation3 + $0x58] sm:$0xf] %vm256_vm0, %v3780_v63 }
 0x385   : > { %v3781_v1 = vld [vmem:[#allocation2 + $0x24] sm:$0xf]  ;;  %4049 = vrot.lane.b32.xlu1 %v4008_v10, %s6998_s10  ;;  %v3869_v53 = vrot.slane %v3868_v57, 4  ;;  %v4013_v40 = vrot.slane %v4011_v48, 6  ;;  %v4016_v26 = vrot.slane %v4014_v54, 7  ;;  %v4232_v16 = vshll.u32 %v4166_v37, 16 }
 0x386   : > { %3790 = vst.msk [vmem:[#allocation3 + $0x64] sm:$0xf] %vm256_vm0, %v3781_v1  ;;  %v6915_v21 = vld [vmem:[#allocation3 + $0x38] ss:$12 sps:$4 sm:$0xff]   ;;  %v4231_v6 = vrot.slane %v4229_v43, 7  ;;  %v4238_v23 = vshrl.u32 %v4167_v47, 16  ;;  %v4037_v41 = vor.u32 %v8570_v28, %v8516_v9  ;;  %v3329_v29 = vor.u32 %v8788_v62, %v8630_v30 }
 0x387   : > { %v3718_v7 = vsel %vm7161_vm13, %v3710_v42, %v3717_v45  ;;  %v4009_v15 = vrot.slane %v8983_v60, 4  ;;  %v9021_v58 = vor.u32 %v4016_v26, %v4013_v40  ;;  %v4227_v17 = vrot.slane %v8957_v49, 4  ;;  %6808 = vmatmul.mubr.msk.bf16.gmra.mrb[48].mxu0 %vm1563_vm5, %v6915_v21  ;;  %v3423_v62 = vld [vmem:[#allocation2 + $0x24] sm:$0x1] }
 0x388   : > { %3749 = vrot.lane.b32.xlu0 %v3718_v7, %s6997_s15  ;;  %v3595_v37 = vsel %vm7188_vm2, %v3586_v4, %v9004_v5  ;;  %v4234_v3 = vor.u32 %v4232_v16, %v4231_v6  ;;  %v4240_v55 = vrot.slane %v4238_v23, 7  ;;  %v4241_v30 = vshll.u32 %v4167_v47, 16  ;;  %v3507_v10 = vld [vmem:[#allocation2 + $0x24] sm:$0x3]  ;;  %6811 = vmatprep.mubr.msk.bf16.mxu0 %vm7000_vm4, %v9968_v34 }
 0x389   : > { %3620 = vrot.lane.b32.xlu1 %v3595_v37, %s6998_s10  ;;  %v3874_v60 = vsel %vm7179_vm14, %v3869_v53, %v9006_v27  ;;  %v3727_v49 = vsel %vm7161_vm13, %v3719_v36, %v3726_v12  ;;  %v4118_v42 = vrot.slane %v9009_v14, 7  ;;  %v3799_v4 = vld [vmem:[#allocation2 + $0x24] sm:$0xf]  ;;  %v3875_v45 = vshrl.u32 %v8974_v59, 16 }
 0x38a   : > { %v4235_v57 = vsel %vm7161_vm13, %v4227_v17, %v4234_v3  ;;  %v4236_v48 = vrot.slane %v4231_v6, 4  ;;  %v4243_v54 = vor.u32 %v4241_v30, %v4240_v55  ;;  %v4117_v47 = vrot.slane %v4115_v38, 4  ;;  %v3939_v63 = vld [vmem:[#allocation2 + $0x24] sm:$0xf] }
 0x38b   : > { %v4018_v43 = vsel %vm7238_vm3, %v4009_v15, %v9021_v58  ;;  %4269 = vst.msk [vmem:[#allocation3 + $0x50] sm:$0xf] %vm256_vm0, %v4235_v57  ;;  %v3460_v36 = vrot.slane %v3423_v62, 5  ;;  %v3877_v12 = vrot.slane %v3875_v45, 4  ;;  %v3598_v1 = vshrl.u32 %v3507_v10, 16 }
 0x38c   : > { %3907 = vrot.lane.b32.xlu0 %v3874_v60, %s6996_s12  ;;  %v4244_v59 = vsel %vm7161_vm13, %v4236_v48, %v4243_v54  ;;  %v3881_v53 = vshll.u32 %v3799_v4, 16  ;;  %v3601_v40 = vshll.u32 %v3507_v10, 16  ;;  %v4245_v26 = vrot.slane %v4240_v55, 4  ;;  %v3296_v10 = vld [vmem:[#allocation2 + $0x10] sm:$0xf] }
 0x38d   : > { %3751 = vrot.lane.b32.xlu1 %v3727_v49, %s6997_s15  ;;  %4270 = vst.msk [vmem:[#allocation3 + $0x5c] sm:$0xf] %vm256_vm0, %v4244_v59  ;;  %v4119_v38 = vsel %vm7113_vm12, %v4117_v47, %v4118_v42  ;;  %v3459_v16 = vrot.slane %v3457_v32, 4  ;;  %v3600_v21 = vrot.slane %v3598_v1, 5  ;;  %v4021_v6 = vshrl.u32 %v3939_v63, 16 }
 0x38e   : > { %v3878_v23 = vor.u32 %v3877_v12, %v9006_v27  ;;  %v3603_v7 = vrot.slane %v3601_v40, 6  ;;  %v4253_v15 = vsel %vm7161_vm13, %v4245_v26, %v8937_v13  ;;  %v4024_v17 = vshll.u32 %v3939_v63, 16  ;;  %v3298_v1 = vld [vmem:[#allocation2 + $0x18] sm:$0xf] }
 0x38f   : > { %v3461_v37 = vsel %vm7095_vm7, %v3459_v16, %v3460_v36  ;;  %v3596_v3 = vrot.slane %v9004_v5, 4  ;;  %4271 = vst.msk [vmem:[#allocation3 + $0x68] sm:$0xf] %vm256_vm0, %v4253_v15  ;;  %v4023_v55 = vrot.slane %v4021_v6, 6  ;;  %v3730_v44 = vshrl.u32 %v3651_v18, 16 }
 0x390   : > { %4051 = vrot.lane.b32.xlu0 %v4018_v43, %s6998_s10  ;;  %v3883_v32 = vrot.slane %v3881_v53, 5  ;;  %v4026_v30 = vrot.slane %v4024_v17, 7  ;;  %v3733_v27 = vshll.u32 %v3651_v18, 16  ;;  %v3885_v62 = vshrl.u32 %v3799_v4, 16  ;;  %v3297_v5 = vld [vmem:[#allocation2 + $0x14] sm:$0xf] }
 0x391   : > { %4137 = vrot.lane.b32.xlu1 %v4119_v38, %s6997_s15  ;;  %v3604_v13 = vor.u32 %v3603_v7, %v3600_v21  ;;  %v3732_v60 = vrot.slane %v3730_v44, 7  ;;  %v3330_v49 = vrot.slane %v3329_v29, 4  ;;  %v9971_v45 = vshll.u32 %v8779_v0, 16  ;;  %v3299_v38 = vld [vmem:[#allocation2 + $0x1c] sm:$0xf] }
 0x392   : > { %v3879_v48 = vrot.slane %v3878_v23, 4  ;;  %v4019_v54 = vrot.slane %v9021_v58, 4  ;;  %v9071_v47 = vor.u32 %v4026_v30, %v4023_v55  ;;  %v3887_v63 = vrot.slane %v3885_v62, 4  ;;  %v3301_v30 = vld [vmem:[#allocation2 + $0x24] sm:$0x1] }
 0x393   : > { %v3334_v57 = vrot.slane %v9971_v45, 5  ;;  %v3735_v43 = vor.u32 %v3733_v27, %v3732_v60  ;;  %v3338_v36 = vrot.slane %v3336_v24, 4  ;;  %v3342_v12 = vshll.u32 %v3296_v10, 16 }
 0x394   : > { %v6916_v29 = vld [vmem:[#allocation3 + $0x50] ss:$12 sps:$4 sm:$0xff]   ;;  %3478 = vrot.lane.b32.xlu0 %v3461_v37, %s6996_s12  ;;  %v3884_v59 = vsel %vm7179_vm14, %v3879_v48, %v3883_v32  ;;  %v3728_v58 = vrot.slane %v8996_v56, 4  ;;  %v3888_v53 = vor.u32 %v3887_v63, %v3883_v32  ;;  %v3346_v40 = vshrl.u32 %v3296_v10, 16  ;;  %v3300_v37 = vld [vmem:[#allocation2 + $0x20] sm:$0xf] }
 0x395   : > { %v3335_v4 = vsel %vm7179_vm14, %v3330_v49, %v3334_v57  ;;  %3909 = vrot.lane.b32.xlu1 %v3884_v59, %s6996_s12  ;;  %v3605_v0 = vsel %vm7188_vm2, %v3596_v3, %v3604_v13  ;;  %v3339_v24 = vor.u32 %v3338_v36, %v3334_v57  ;;  %v3344_v26 = vrot.slane %v3342_v12, 5  ;;  %6812 = vmatmul.mubr.msk.bf16.gmra.mrb[52].mxu0 %vm1563_vm5, %v6916_v29 }
 0x396   : > { %3407 = vst.msk [vmem:[#allocation3 + $0x18] sm:$0xf] %vm256_vm0, %v3335_v4  ;;  %v3352_v18 = vshll.u32 %v3297_v5, 16  ;;  %v4028_v16 = vsel %vm7238_vm3, %v4019_v54, %v9071_v47  ;;  %v3736_v56 = vsel %vm7161_vm13, %v3728_v58, %v3735_v43  ;;  %v4029_v21 = vrot.slane %v9071_v47, 4  ;;  %6815 = vmatprep.mubr.msk.bf16.mxu0 %vm7000_vm4, %v9968_v34  ;;  %v6917_v63 = vld [vmem:[#allocation3 + $0x68] ss:$0 sps:$4 sm:$0xff]  }
 0x397   : > { %v3348_v6 = vrot.slane %v3346_v40, 4  ;;  %v3340_v23 = vrot.slane %v3339_v24, 4  ;;  %v3356_v15 = vshrl.u32 %v3297_v5, 16  ;;  %v3362_v17 = vshll.u32 %v3298_v1, 16 }
 0x398   : > { %v3354_v7 = vrot.slane %v3352_v18, 5  ;;  %3622 = vrot.lane.b32.xlu0 %v3605_v0, %s6998_s10  ;;  %v3889_v3 = vrot.slane %v3888_v53, 4  ;;  %v3366_v44 = vshrl.u32 %v3298_v1, 16  ;;  %v3372_v32 = vshll.u32 %v3299_v38, 16  ;;  %v4084_v1 = vld [vmem:[#allocation2 + $0x28] sm:$0x7] }
 0x399   : > { %v3349_v55 = vor.u32 %v3348_v6, %v3344_v26  ;;  %4053 = vrot.lane.b32.xlu1 %v4028_v16, %s6998_s10  ;;  %v3345_v27 = vsel %vm7179_vm14, %v3340_v23, %v3344_v26  ;;  %v3358_v62 = vrot.slane %v3356_v15, 4  ;;  %v3364_v10 = vrot.slane %v3362_v17, 5 }
 0x39a   : > { %v3376_v13 = vshrl.u32 %v3299_v38, 16  ;;  %3408 = vst.msk [vmem:[#allocation3 + $0x24] sm:$0xf] %vm256_vm0, %v3345_v27  ;;  %v3368_v49 = vrot.slane %v3366_v44, 4  ;;  %v3374_v45 = vrot.slane %v3372_v32, 5  ;;  %v3382_v57 = vshll.u32 %v3300_v37, 16 }
 0x39b   : > { %v3350_v60 = vrot.slane %v3349_v55, 4  ;;  %v3359_v5 = vor.u32 %v3358_v62, %v3354_v7  ;;  %v3386_v54 = vshrl.u32 %v3300_v37, 16  ;;  %v3392_v47 = vshll.u32 %v3301_v30, 16 }
 0x39c   : > { %v3378_v48 = vrot.slane %v3376_v13, 4  ;;  %3753 = vrot.lane.b32.xlu0 %v3736_v56, %s6997_s15  ;;  %v3894_v43 = vsel %vm7179_vm14, %v3889_v3, %v8514_v50  ;;  %v3369_v36 = vor.u32 %v3368_v49, %v3364_v10  ;;  %v3384_v12 = vrot.slane %v3382_v57, 5 }
 0x39d   : > { %v3355_v4 = vsel %vm7179_vm14, %v3350_v60, %v3354_v7  ;;  %3911 = vrot.lane.b32.xlu1 %v3894_v43, %s6996_s12  ;;  %v3360_v29 = vrot.slane %v3359_v5, 4  ;;  %v3388_v58 = vrot.slane %v3386_v54, 4  ;;  %6816 = vmatmul.mubr.msk.bf16.gmra.mrb[56].mxu0 %vm1563_vm5, %v6917_v63  ;;  %v3394_v24 = vrot.slane %v3392_v47, 5 }
 0x39e   : > { %3409 = vst.msk [vmem:[#allocation3 + $0x30] sm:$0xf] %vm256_vm0, %v3355_v4  ;;  %v3379_v59 = vor.u32 %v3378_v48, %v3374_v45  ;;  %v3370_v53 = vrot.slane %v3369_v36, 4  ;;  %6823 = vmatprep.mubr.msk.bf16.mxu0 %vm7000_vm4, %v9968_v34  ;;  %v4038_v26 = vsel %vm7238_vm3, %v4029_v21, %v4037_v41  ;;  %v4120_v18 = vrot.slane %v4118_v42, 4 }
 0x39f   : > { %v3365_v40 = vsel %vm7179_vm14, %v3360_v29, %v3364_v10  ;;  %v3389_v0 = vor.u32 %v3388_v58, %v3384_v12  ;;  %v4121_v38 = vrot.slane %v4084_v1, 7  ;;  %v3463_v28 = vpop.permute.xlu0 %3462 }
 0x3a0   : > { %v3380_v50 = vrot.slane %v3379_v59, 4  ;;  %3410 = vst.msk [vmem:[#allocation3 + $0x3c] sm:$0xf] %vm256_vm0, %v3365_v40  ;;  %v3375_v16 = vsel %vm7179_vm14, %v3370_v53, %v3374_v45 }
 0x3a1   : > { %4055 = vrot.lane.b32.xlu1 %v4038_v26, %s6998_s10  ;;  %3411 = vst.msk [vmem:[#allocation3 + $0x48] sm:$0xf] %vm256_vm0, %v3375_v16  ;;  %v3390_v9 = vrot.slane %v3389_v0, 4  ;;  %v4122_v41 = vsel %vm7113_vm12, %v4120_v18, %v4121_v38 }
 0x3a2   : > { %v3385_v56 = vsel %vm7179_vm14, %v3380_v50, %v3384_v12  ;;  %3489 = vst.msk [vmem:[#allocation3] sm:$0xf] %vm526_vm6, %v3463_v28  ;;  %v3465_v42 = vpop.permute.xlu1 %3464 }
 0x3a3   : > { %3412 = vst.msk [vmem:[#allocation3 + $0x54] sm:$0xf] %vm256_vm0, %v3385_v56  ;;  %v3395_v14 = vsel %vm7179_vm14, %v3390_v9, %v3394_v24  ;;  %v4124_v21 = vpop.permute.xlu0 %4123 }
 0x3a4   : > { %3413 = vst.msk [vmem:[#allocation3 + $0x60] sm:$0xf] %vm256_vm0, %v3395_v14 }
 0x3a5   : > { %4139 = vrot.lane.b32.xlu1 %v4122_v41, %s6997_s15  ;;  %3490 = vst.msk [vmem:[#allocation3 + $0xc] sm:$0xf] %vm526_vm6, %v3465_v42 }
 0x3a8   : > { %v3609_v6 = vpop.permute.xlu1 %3608  ;;  %v3607_v23 = vpop.permute.xlu0 %3606 }
 0x3a9   : > { %3634 = vst.msk [vmem:[#allocation3 + $0xc] sm:$0xf] %vm674_vm8, %v3609_v6  ;;  %3633 = vst.msk [vmem:[#allocation3] sm:$0xf] %vm674_vm8, %v3607_v23 }
 0x3ac   : > { %v3740_v7 = vpop.permute.xlu1 %3739  ;;  %v3738_v15 = vpop.permute.xlu0 %3737 }
 0x3ad   : > { %3765 = vst.msk [vmem:[#allocation3 + $0xc] sm:$0xf] %vm809_vm9, %v3740_v7  ;;  %3764 = vst.msk [vmem:[#allocation3] sm:$0xf] %vm809_vm9, %v3738_v15 }
 0x3b0   : > { %v3896_v17 = vpop.permute.xlu0 %3895 }
 0x3b1   : > { %3922 = vst.msk [vmem:[#allocation3 + $0x4] sm:$0xf] %vm526_vm6, %v3896_v17 }
 0x3b4   : > { %v4040_v37 = vpop.permute.xlu0 %4039  ;;  %v6936_v5 = vld [vmem:[#allocation3] ss:$12 sps:$4 sm:$0xff]  }
 0x3b5   : > { %4066 = vst.msk [vmem:[#allocation3 + $0x4] sm:$0xf] %vm674_vm8, %v4040_v37 }
 0x3b6   : > { %4150 = vst.msk [vmem:[#allocation3 + $0x4] sm:$0xf] %vm809_vm9, %v4124_v21 }
 0x3b8   : > { %v4126_v3 = vpop.permute.xlu1 %4125 }
 0x3b9   : > { %v3467_v55 = vpop.permute.xlu0 %3466 }
 0x3ba   : > { %3491 = vst.msk [vmem:[#allocation3 + $0x18] sm:$0xf] %vm526_vm6, %v3467_v55 }
 0x3bc   : > { %v3898_v44 = vpop.permute.xlu1 %3897 }
 0x3bd   : > { %v4128_v32 = vpop.permute.xlu0 %4127  ;;  %3923 = vst.msk [vmem:[#allocation3 + $0x10] sm:$0xf] %vm526_vm6, %v3898_v44 }
 0x3c0   : > { %v3469_v30 = vpop.permute.xlu1 %3468 }
 0x3c1   : > { %3492 = vst.msk [vmem:[#allocation3 + $0x24] sm:$0xf] %vm526_vm6, %v3469_v30 }
 0x3c2   : > { %v3611_v27 = vpop.permute.xlu0 %3610 }
 0x3c3   : > { %3635 = vst.msk [vmem:[#allocation3 + $0x18] sm:$0xf] %vm674_vm8, %v3611_v27 }
 0x3c4   : > { %v4042_v62 = vpop.permute.xlu1 %4041 }
 0x3c5   : > { %4067 = vst.msk [vmem:[#allocation3 + $0x10] sm:$0xf] %vm674_vm8, %v4042_v62 }
 0x3c6   : > { %v3742_v10 = vpop.permute.xlu0 %3741  ;;  %4151 = vst.msk [vmem:[#allocation3 + $0x10] sm:$0xf] %vm809_vm9, %v4126_v3 }
 0x3c7   : > { %3766 = vst.msk [vmem:[#allocation3 + $0x18] sm:$0xf] %vm809_vm9, %v3742_v10 }
 0x3ca   : > { %v3613_v13 = vpop.permute.xlu1 %3612 }
 0x3cb   : > { %3636 = vst.msk [vmem:[#allocation3 + $0x24] sm:$0xf] %vm674_vm8, %v3613_v13  ;;  %v3900_v60 = vpop.permute.xlu0 %3899 }
 0x3cc   : > { %3924 = vst.msk [vmem:[#allocation3 + $0x1c] sm:$0xf] %vm526_vm6, %v3900_v60 }
 0x3cd   : > { %v6934_v57 = vld [vmem:[#allocation3 + $0x4] ss:$12 sps:$4 sm:$0xff]  }
 0x3ce   : > { %v3744_v49 = vpop.permute.xlu1 %3743  ;;  %4560 = vmatprep.mubr.bf16.mxu1 %v6934_v57 }
 0x3cf   : > { %3767 = vst.msk [vmem:[#allocation3 + $0x24] sm:$0xf] %vm809_vm9, %v3744_v49  ;;  %4561 = vmatmul.mubr.bf16.vlgmr.msra.gmra.mrb[40].mxu1 %v6936_v5 }
 0x3d0   : > { %v4044_v45 = vpop.permute.xlu0 %4043 }
 0x3d1   : > { %4068 = vst.msk [vmem:[#allocation3 + $0x1c] sm:$0xf] %vm674_vm8, %v4044_v45 }
 0x3d2   : > { %4152 = vst.msk [vmem:[#allocation3 + $0x1c] sm:$0xf] %vm809_vm9, %v4128_v32  ;;  %v4130_v48 = vpop.permute.xlu1 %4129 }
 0x3d4   : > { %v3471_v54 = vpop.permute.xlu0 %3470 }
 0x3d5   : > { %3493 = vst.msk [vmem:[#allocation3 + $0x30] sm:$0xf] %vm526_vm6, %v3471_v54 }
 0x3d6   : > { %v3902_v47 = vpop.permute.xlu1 %3901  ;;  %v6939_v53 = vld [vmem:[#allocation3 + $0x18] ss:$12 sps:$4 sm:$0xff]  }
 0x3d7   : > { %3925 = vst.msk [vmem:[#allocation3 + $0x28] sm:$0xf] %vm526_vm6, %v3902_v47 }
 0x3d8   : > { %v4132_v63 = vpop.permute.xlu0 %4131 }
 0x3da   : > { %v3473_v43 = vpop.permute.xlu1 %3472 }
 0x3db   : > { %3494 = vst.msk [vmem:[#allocation3 + $0x3c] sm:$0xf] %vm526_vm6, %v3473_v43 }
 0x3dc   : > { %v3615_v4 = vpop.permute.xlu0 %3614 }
 0x3dd   : > { %3637 = vst.msk [vmem:[#allocation3 + $0x30] sm:$0xf] %vm674_vm8, %v3615_v4 }
 0x3de   : > { %v4046_v36 = vpop.permute.xlu1 %4045 }
 0x3df   : > { %4069 = vst.msk [vmem:[#allocation3 + $0x28] sm:$0xf] %vm674_vm8, %v4046_v36  ;;  %v6948_v36 = vld [vmem:[%s9940_s3 + $0x110] sm:$0xff]  }
 0x3e0   : > { %4153 = vst.msk [vmem:[#allocation3 + $0x28] sm:$0xf] %vm809_vm9, %v4130_v48  ;;  %6820 = vmatpush3.bf16.msra.mxu0 %v6948_v36 }
 0x3e1   : > { %v3746_v12 = vpop.permute.xlu0 %3745  ;;  %6821 = vmatprep.subr.bf16.mxu0 %v9968_v34 }
 0x3e2   : > { %3768 = vst.msk [vmem:[#allocation3 + $0x30] sm:$0xf] %vm809_vm9, %v3746_v12  ;;  %v6949_v12 = vld [vmem:[%s9940_s3 + $0x118] sm:$0xff]  }
 0x3e3   : > { %v3617_v1 = vpop.permute.xlu1 %3616 }
 0x3e4   : > { %3638 = vst.msk [vmem:[#allocation3 + $0x3c] sm:$0xf] %vm674_vm8, %v3617_v1  ;;  %6822 = vmatpush3.bf16.msra.mxu0 %v6949_v12 }
 0x3e6   : > { %v3904_v29 = vpop.permute.xlu0 %3903 }
 0x3e7   : > { %3926 = vst.msk [vmem:[#allocation3 + $0x34] sm:$0xf] %vm526_vm6, %v3904_v29  ;;  %v3748_v59 = vpop.permute.xlu1 %3747  ;;  %v6937_v58 = vld [vmem:[#allocation3 + $0x1c] ss:$12 sps:$4 sm:$0xff]  }
 0x3e8   : > { %3769 = vst.msk [vmem:[#allocation3 + $0x3c] sm:$0xf] %vm809_vm9, %v3748_v59  ;;  %4568 = vmatprep.mubr.bf16.mxu1 %v6937_v58 }
 0x3e9   : > { %4569 = vmatmul.mubr.bf16.gmra.mrb[44].mxu1 %v6939_v53 }
 0x3ea   : > { %v4048_v40 = vpop.permute.xlu0 %4047 }
 0x3eb   : > { %4070 = vst.msk [vmem:[#allocation3 + $0x34] sm:$0xf] %vm674_vm8, %v4048_v40  ;;  %v4134_v50 = vpop.permute.xlu1 %4133 }
 0x3ec   : > { %4154 = vst.msk [vmem:[#allocation3 + $0x34] sm:$0xf] %vm809_vm9, %v4132_v63 }
 0x3ee   : > { %v3475_v0 = vpop.permute.xlu0 %3474 }
 0x3ef   : > { %3495 = vst.msk [vmem:[#allocation3 + $0x48] sm:$0xf] %vm526_vm6, %v3475_v0  ;;  %v3906_v24 = vpop.permute.xlu1 %3905  ;;  %v6942_v42 = vld [vmem:[#allocation3 + $0x30] ss:$12 sps:$4 sm:$0xff]  }
 0x3f0   : > { %3927 = vst.msk [vmem:[#allocation3 + $0x40] sm:$0xf] %vm526_vm6, %v3906_v24 }
 0x3f2   : > { %v4136_v26 = vpop.permute.xlu0 %4135 }
 0x3f3   : > { %v3477_v18 = vpop.permute.xlu1 %3476 }
 0x3f4   : > { %3496 = vst.msk [vmem:[#allocation3 + $0x54] sm:$0xf] %vm526_vm6, %v3477_v18 }
 0x3f6   : > { %v3619_v38 = vpop.permute.xlu0 %3618 }
 0x3f7   : > { %3639 = vst.msk [vmem:[#allocation3 + $0x48] sm:$0xf] %vm674_vm8, %v3619_v38  ;;  %v4050_v16 = vpop.permute.xlu1 %4049 }
 0x3f8   : > { %4071 = vst.msk [vmem:[#allocation3 + $0x40] sm:$0xf] %vm674_vm8, %v4050_v16 }
 0x3f9   : > { %4155 = vst.msk [vmem:[#allocation3 + $0x40] sm:$0xf] %vm809_vm9, %v4134_v50 }
 0x3fa   : > { %v3750_v56 = vpop.permute.xlu0 %3749 }
 0x3fb   : > { %3770 = vst.msk [vmem:[#allocation3 + $0x48] sm:$0xf] %vm809_vm9, %v3750_v56  ;;  %v3621_v9 = vpop.permute.xlu1 %3620 }
 0x3fc   : > { %3640 = vst.msk [vmem:[#allocation3 + $0x54] sm:$0xf] %vm674_vm8, %v3621_v9 }
 0x3fe   : > { %v3908_v28 = vpop.permute.xlu0 %3907 }
 0x3ff   : > { %3928 = vst.msk [vmem:[#allocation3 + $0x4c] sm:$0xf] %vm526_vm6, %v3908_v28  ;;  %v3752_v14 = vpop.permute.xlu1 %3751 }
 0x400   : > { %3771 = vst.msk [vmem:[#allocation3 + $0x54] sm:$0xf] %vm809_vm9, %v3752_v14  ;;  %v6940_v41 = vld [vmem:[#allocation3 + $0x34] ss:$12 sps:$4 sm:$0xff]  }
 0x401   : > { %4576 = vmatprep.mubr.bf16.mxu1 %v6940_v41  ;;  %v4942_v14 = vld [vmem:[#allocation2] sm:$0xe] }
 0x402   : > { %v4052_v21 = vpop.permute.xlu0 %4051  ;;  %4577 = vmatmul.mubr.bf16.gmra.mrb[48].mxu1 %v6942_v42  ;;  %v4736_v41 = vld [vmem:[#allocation2] sm:$0xf] }
 0x403   : > { %4072 = vst.msk [vmem:[#allocation3 + $0x4c] sm:$0xf] %vm674_vm8, %v4052_v21  ;;  %v4138_v6 = vpop.permute.xlu1 %4137 }
 0x404   : > { %4156 = vst.msk [vmem:[#allocation3 + $0x4c] sm:$0xf] %vm809_vm9, %v4136_v26  ;;  %v9211_v26 = vld [vmem:[%s9939_s2 + $0x1] ss:$0 sm:$0xff] }
 0x406   : > { %v3479_v23 = vpop.permute.xlu0 %3478 }
 0x407   : > { %3497 = vst.msk [vmem:[#allocation3 + $0x60] sm:$0xf] %vm526_vm6, %v3479_v23  ;;  %v3910_v7 = vpop.permute.xlu1 %3909  ;;  %v6945_v32 = vld [vmem:[#allocation3 + $0x48] ss:$12 sps:$4 sm:$0xff]   ;;  %v4956_v23 = vshll.u32 %v4942_v14, 16 }
 0x408   : > { %3929 = vst.msk [vmem:[#allocation3 + $0x58] sm:$0xf] %vm526_vm6, %v3910_v7 }
 0x40a   : > { %v3623_v15 = vpop.permute.xlu0 %3622 }
 0x40b   : > { %3641 = vst.msk [vmem:[#allocation3 + $0x60] sm:$0xf] %vm674_vm8, %v3623_v15  ;;  %v4054_v17 = vpop.permute.xlu1 %4053 }
 0x40c   : > { %4073 = vst.msk [vmem:[#allocation3 + $0x58] sm:$0xf] %vm674_vm8, %v4054_v17  ;;  %v4747_v17 = vshrl.u32 %v4736_v41, 16 }
 0x40d   : > { %4157 = vst.msk [vmem:[#allocation3 + $0x58] sm:$0xf] %vm809_vm9, %v4138_v6  ;;  %v4953_v6 = vshrl.u32 %v4942_v14, 16 }
 0x40e   : > { %v3754_v37 = vpop.permute.xlu0 %3753 }
 0x40f   : > { %3772 = vst.msk [vmem:[#allocation3 + $0x60] sm:$0xf] %vm809_vm9, %v3754_v37  ;;  %v3912_v3 = vpop.permute.xlu1 %3911  ;;  %v4750_v37 = vshll.u32 %v4736_v41, 16 }
 0x410   : > { %3930 = vst.msk [vmem:[#allocation3 + $0x64] sm:$0xf] %vm526_vm6, %v3912_v3 }
 0x413   : > { %v4056_v55 = vpop.permute.xlu1 %4055 }
 0x414   : > { %4074 = vst.msk [vmem:[#allocation3 + $0x64] sm:$0xf] %vm674_vm8, %v4056_v55  ;;  %v6943_v44 = vld [vmem:[#allocation3 + $0x4c] ss:$12 sps:$4 sm:$0xff]  }
 0x415   : > { %4584 = vmatprep.mubr.bf16.mxu1 %v6943_v44  ;;  %v4955_v44 = vrot.slane %v4953_v6, 5 }
 0x416   : > { %4585 = vmatmul.mubr.bf16.gmra.mrb[52].mxu1 %v6945_v32  ;;  %v4958_v32 = vrot.slane %v4956_v23, 6 }
 0x417   : > { %v4140_v30 = vpop.permute.xlu1 %4139 }
 0x418   : > { %4158 = vst.msk [vmem:[#allocation3 + $0x64] sm:$0xf] %vm809_vm9, %v4140_v30 }
 0x41f   : > { %v4288_v27 = vld [vmem:[#allocation3 + $0x60] sm:$0xff] }
 0x420   : > { %v6383_v62 = vcombine.high %v4288_v27, %v4288_v27  ;;  %v6382_v10 = vcombine.low %v4288_v27, %v4288_v27 }
 0x422   : > { %4592 = vmatprep.mubr.bf16.mxu1 %v6383_v62  ;;  %v4749_v62 = vrot.slane %v4747_v17, 4 }
 0x423   : > { %4593 = vmatmul.mubr.bf16.gmra.mrb[56].mxu1 %v6382_v10  ;;  %v4752_v10 = vrot.slane %v4750_v37, 5 }
 0x430   : > { %v4634_v13 = vpop.f32.mrb[40].mxu0 }
 0x431   : > { %v6801_v60 = vpop.f32.mrb[41].mxu0 }
 0x432   : > { %v4637_v49 = vpop.f32.mrb[42].mxu0  ;;  %v5086_v60 = vld [vmem:[#allocation2] sm:$0x8] }
 0x433   : > { %v6802_v45 = vpop.f32.mrb[43].mxu0 }
 0x449   : > { %v9187_v57 = vpop.f32.mrb[44].mxu0 }
 0x44a   : > { %v6805_v5 = vpop.f32.mrb[45].mxu0 }
 0x44b   : > { %v9189_v48 = vpop.f32.mrb[46].mxu0  ;;  %v4959_v5 = vor.u32 %v4958_v32, %v4955_v44 }
 0x44c   : > { %v6806_v54 = vpop.f32.mrb[47].mxu0 }
 0x44d   : > { %v5097_v54 = vshrl.u32 %v5086_v60, 16  ;;  %v9219_v12 = vrot.slane %v4959_v5, 4 }
 0x45a   : > { %v9191_v47 = vpop.f32.mrb[48].mxu0 }
 0x45b   : > { %v6809_v63 = vpop.f32.mrb[49].mxu0 }
 0x45c   : > { %v9193_v43 = vpop.f32.mrb[50].mxu0 }
 0x45d   : > { %v6810_v4 = vpop.f32.mrb[51].mxu0 }
 0x45e   : > { %v4753_v4 = vor.u32 %v4752_v10, %v4749_v62 }
 0x468   : > { %v9201_v1 = vpop.f32.mrb[52].mxu0 }
 0x469   : > { %v6813_v29 = vpop.f32.mrb[53].mxu0 }
 0x46a   : > { %v9204_v59 = vpop.f32.mrb[54].mxu0  ;;  %v9221_v29 = vrot.slane %v5097_v54, 11 }
 0x46b   : > { %v6814_v58 = vpop.f32.mrb[55].mxu0 }
 0x470   : > { %v9206_v53 = vpop.f32.mrb[56].mxu0 }
 0x471   : > { %v6817_v40 = vpop.f32.mrb[57].mxu0 }
 0x472   : > { %v4669_v50 = vpop.f32.mrb[58].mxu0  ;;  %v9225_v40 = vrot.slane %v4753_v4, 4 }
 0x473   : > { %v6818_v0 = vpop.f32.mrb[59].mxu0 }
 0x4a2   : > { %v6657_v24 = vpop.f32.mrb[40].mxu1 }
 0x4a3   : > { %v6658_v18 = vpop.f32.mrb[41].mxu1 }
 0x4a4   : > { %v6659_v38 = vadd.f32 %v6658_v18, %v6657_v24  ;;  %v6660_v16 = vpop.f32.mrb[42].mxu1 }
 0x4a5   : > { %v6661_v56 = vpop.f32.mrb[43].mxu1 }
 0x4a6   : > { %v4563_v9 = vadd.f32 %v6659_v38, %v9211_v26  ;;  %v6662_v28 = vadd.f32 %v6661_v56, %v6660_v16 }
 0x4a8   : > { %v4635_v42 = vadd.f32 %v4634_v13, %v4563_v9  ;;  %v4566_v21 = vadd.f32 %v6662_v28, %v9211_v26  ;;  %v5244_v13 = vld [vmem:[#allocation2 + $0x28] sm:$0x1] }
 0x4a9   : > { %v5335_v63 = vshll.u32 %v5244_v13, 16 }
 0x4aa   : > { %v4672_v7 = vmax.f32 %v4635_v42, 0.0  ;;  %v4638_v15 = vadd.f32 %v4637_v49, %v4566_v21  ;;  %v4858_v49 = vld [vmem:[#allocation2] sm:$0xe] }
 0x4ab   : > { %v6417_v36 = vrot.slane %v4858_v49, 9  ;;  %v9223_v58 = vrot.slane %v5335_v63, 5 }
 0x4ac   : > { %v4681_v3 = vmul.f32 %v4672_v7, %v7831_v33  ;;  %v4673_v55 = vmax.f32 %v4638_v15, 0.0 }
 0x4ae   : > { %v6526_v30 = vpack.c.bf16 %v4681_v3, %v4681_v3  ;;  %v4682_v27 = vmul.f32 %v4673_v55, %v7834_v11 }
 0x4b0   : > { %4727 = vst.msk [vmem:[#allocation2 + $0x4] sm:$0xf] %vm256_vm0, %v6526_v30  ;;  %v6527_v45 = vpack.c.bf16 %v4682_v27, %v4682_v27 }
 0x4b2   : > { %4728 = vst.msk [vmem:[#allocation2 + $0x8] sm:$0xf] %vm256_vm0, %v6527_v45 }
 0x4b7   : > { %v4859_v50 = vld [vmem:[#allocation2 + $0x4] sm:$0xf] }
 0x4b8   : > { %v5519_v0 = vld [vmem:[#allocation2 + $0x4] sm:$0x8]  ;;  %v4880_v18 = vrot.slane %v4859_v50, 5 }
 0x4b9   : > { %v4943_v24 = vld [vmem:[#allocation2 + $0x4] sm:$0xf]  ;;  %v6419_v38 = vrot.slane %v5519_v0, 11  ;;  %v9227_v28 = vld [vmem:[#allocation2 + $0x8] sm:$0xf] }
 0x4ba   : > { %v4962_v16 = vshrl.u32 %v4943_v24, 16  ;;  %v4965_v56 = vshll.u32 %v4943_v24, 16  ;;  %v5087_v9 = vld [vmem:[#allocation2 + $0x4] sm:$0xf]  ;;  %v9229_v14 = vld [vmem:[#allocation2 + $0x8] sm:$0xf]  ;;  %v4881_v21 = vsel %vm7095_vm7, %v6417_v36, %v4880_v18 }
 0x4bb   : > { %v4944_v41 = vld [vmem:[#allocation2 + $0x8] sm:$0xf]  ;;  %v4882_v6 = vrot.slane %v4880_v18, 4  ;;  %v4883_v23 = vrot.slane %v9227_v28, 5  ;;  %v5541_v7 = vrot.slane %v9229_v14, 7  ;;  %4906 = vrot.lane.b32.xlu0 %v4881_v21, %s6996_s12  ;;  %v5102_v10 = vshrl.u32 %v5087_v9, 16 }
 0x4bc   : > { %v6663_v42 = vpop.f32.mrb[44].mxu1  ;;  %v5088_v15 = vld [vmem:[#allocation2 + $0x8] sm:$0xf]  ;;  %v4964_v37 = vrot.slane %v4962_v16, 5  ;;  %v4967_v3 = vrot.slane %v4965_v56, 6  ;;  %v4972_v55 = vshrl.u32 %v4944_v41, 16 }
 0x4bd   : > { %v6664_v17 = vpop.f32.mrb[45].mxu1  ;;  %v4975_v44 = vshll.u32 %v4944_v41, 16  ;;  %v4884_v27 = vsel %vm7095_vm7, %v4882_v6, %v4883_v23  ;;  %v5542_v62 = vsel %vm7113_vm12, %v6419_v38, %v5541_v7  ;;  %v5111_v5 = vshrl.u32 %v5088_v15, 16  ;;  %v5235_v50 = vld [vmem:[#allocation2 + $0x4] sm:$0xf] }
 0x4be   : > { %v6665_v32 = vadd.f32 %v6664_v17, %v6663_v42  ;;  %v6666_v30 = vpop.f32.mrb[46].mxu1  ;;  %4908 = vrot.lane.b32.xlu1 %v4884_v27, %s6996_s12  ;;  %v4968_v13 = vor.u32 %v4967_v3, %v4964_v37  ;;  %v4974_v45 = vrot.slane %v4972_v55, 5  ;;  %v5104_v4 = vrot.slane %v5102_v10, 7  ;;  %v5236_v16 = vld [vmem:[#allocation2 + $0x8] sm:$0xf] }
 0x4bf   : > { %v6667_v60 = vpop.f32.mrb[47].mxu1  ;;  %v4977_v49 = vrot.slane %v4975_v44, 6  ;;  %v5114_v36 = vshll.u32 %v5088_v15, 16  ;;  %5567 = vrot.lane.b32.xlu0 %v5542_v62, %s6997_s15  ;;  %v9252_v38 = vrot.slane %v5111_v5, 7  ;;  %v5105_v21 = vshll.u32 %v5087_v9, 16  ;;  %v6955_v9 = vld [vmem:[%s9940_s3 + $0x90] sm:$0xff]  }
 0x4c0   : > { %v4571_v54 = vadd.f32 %v6665_v32, %v9211_v26  ;;  %v6668_v63 = vadd.f32 %v6667_v60, %v6666_v30  ;;  %v4970_v0 = vrot.slane %v4968_v13, 4  ;;  %v4969_v18 = vsel %vm7188_vm2, %v9219_v12, %v4968_v13  ;;  %v9256_v6 = vld [vmem:[#allocation2 + $0x28] sm:$0x7]  ;;  %v5217_v15 = vld [vmem:[#allocation2 + $0x4] sm:$0xf] }
 0x4c1   : > { %v9247_v24 = vor.u32 %v4977_v49, %v4974_v45  ;;  %v5109_v42 = vrot.slane %v5104_v4, 4  ;;  %v5116_v37 = vor.u32 %v5114_v36, %v9252_v38  ;;  %v5246_v3 = vshrl.u32 %v5235_v50, 16  ;;  %5226 = vst.msk [vmem:[#allocation3 + $0x4] sm:$0xf] %vm256_vm0, %v5217_v15  ;;  %v5218_v55 = vld [vmem:[#allocation2 + $0x8] sm:$0xf] }
 0x4c2   : > { %v4643_v56 = vadd.f32 %v9187_v57, %v4571_v54  ;;  %v4574_v41 = vadd.f32 %v6668_v63, %v9211_v26  ;;  %v5249_v12 = vshll.u32 %v5235_v50, 16  ;;  %v6954_v57 = vld [vmem:[%s9940_s3 + $0xd0] sm:$0xff]   ;;  %v5107_v30 = vor.u32 %v5105_v21, %v5104_v4  ;;  %v5375_v62 = vld [vmem:[#allocation2 + $0x4] sm:$0xc]  ;;  %v5376_v10 = vld [vmem:[#allocation2 + $0x8] sm:$0xf] }
 0x4c3   : > { %v4979_v17 = vsel %vm7188_vm2, %v4970_v0, %v9247_v24  ;;  %v5255_v27 = vshll.u32 %v5236_v16, 16  ;;  %5227 = vst.msk [vmem:[#allocation3 + $0x10] sm:$0xf] %vm256_vm0, %v5218_v55  ;;  %5050 = vrot.lane.b32.xlu0 %v4969_v18, %s6998_s10  ;;  %v5117_v60 = vsel %vm7161_vm13, %v5109_v42, %v5116_v37  ;;  %v5248_v13 = vrot.slane %v5246_v3, 4  ;;  %6694 = vmatprep.subr.bf16.mxu1 %v6954_v57  ;;  %v6957_v36 = vld [vmem:[%s9940_s3 + $0x98] sm:$0xff]  }
 0x4c4   : > { %v4674_v44 = vmax.f32 %v4643_v56, 0.0  ;;  %v4646_v32 = vadd.f32 %v9189_v48, %v4574_v41  ;;  %5052 = vrot.lane.b32.xlu1 %v4979_v17, %s6998_s10  ;;  %v5251_v45 = vrot.slane %v5249_v12, 5  ;;  %v5475_v49 = vshrl.u32 %v9256_v6, 16  ;;  %v6956_v48 = vld [vmem:[%s9940_s3 + $0xd8] sm:$0xff]   ;;  %6695 = vmatpush3.bf16.msra.mxu1 %v6955_v9  ;;  %v5603_v17 = vld [vmem:[#allocation2 + $0x4] sm:$0x8] }
 0x4c5   : > { %v5108_v63 = vsel %vm7161_vm13, %v9221_v29, %v5107_v30  ;;  %v5259_v4 = vshrl.u32 %v5236_v16, 16  ;;  %v5386_v0 = vshrl.u32 %v5375_v62, 16  ;;  %v5389_v18 = vshll.u32 %v5375_v62, 16  ;;  %6696 = vmatprep.subr.bf16.mxu1 %v6956_v48  ;;  %v6958_v29 = vld [vmem:[%s9940_s3 + $0xe0] sm:$0xff]   ;;  %v5604_v57 = vld [vmem:[#allocation2 + $0x8] sm:$0xf] }
 0x4c6   : > { %v4683_v5 = vmul.f32 %v4674_v44, %v7886_v2  ;;  %v4675_v54 = vmax.f32 %v4646_v32, 0.0  ;;  %v5252_v50 = vor.u32 %v5251_v45, %v5248_v13  ;;  %v5395_v56 = vshrl.u32 %v5376_v10, 16  ;;  %v4737_v30 = vld [vmem:[#allocation2 + $0x4] sm:$0xf] }
 0x4c7   : > { %v5257_v21 = vrot.slane %v5255_v27, 5  ;;  %v5398_v15 = vshll.u32 %v5376_v10, 16  ;;  %5181 = vrot.lane.b32.xlu0 %v5108_v63, %s6997_s15  ;;  %v5388_v37 = vrot.slane %v5386_v0, 6  ;;  %v5391_v3 = vrot.slane %v5389_v18, 7  ;;  %v6959_v27 = vld [vmem:[%s9940_s3 + $0xa0] sm:$0xff]   ;;  %v6960_v63 = vld [vmem:[%s9940_s3 + $0xe8] sm:$0xff]  }
 0x4c8   : > { %v6528_v41 = vpack.c.bf16 %v4683_v5, %v4683_v5  ;;  %v4684_v42 = vmul.f32 %v4675_v54, %v7890_v31  ;;  %5183 = vrot.lane.b32.xlu1 %v5117_v60, %s6997_s15  ;;  %v5253_v16 = vrot.slane %v5252_v50, 4  ;;  %v5397_v12 = vrot.slane %v5395_v56, 6  ;;  %6697 = vmatpush3.bf16.msra.mxu1 %v6957_v36  ;;  %v6961_v56 = vld [vmem:[%s9940_s3 + $0xa8] sm:$0xff]  }
 0x4c9   : > { %v5400_v55 = vrot.slane %v5398_v15, 7  ;;  %v5261_v44 = vrot.slane %v5259_v4, 4  ;;  %v5478_v32 = vshll.u32 %v9256_v6, 16  ;;  %v5392_v10 = vor.u32 %v5391_v3, %v5388_v37  ;;  %6698 = vmatprep.subr.bf16.mxu1 %v6958_v29 }
 0x4ca   : > { %4729 = vst.msk [vmem:[#allocation2 + $0xc] sm:$0xf] %vm256_vm0, %v6528_v41  ;;  %v6529_v9 = vpack.c.bf16 %v4684_v42, %v4684_v42  ;;  %v5258_v62 = vsel %vm7179_vm14, %v5253_v16, %v5257_v21  ;;  %v5543_v60 = vrot.slane %v5541_v7, 4  ;;  %v9301_v13 = vrot.slane %v5475_v49, 6  ;;  %v6962_v16 = vld [vmem:[%s9940_s3 + $0xf0] sm:$0xff]  }
 0x4cb   : > { %v9304_v45 = vor.u32 %v5400_v55, %v5397_v12  ;;  %v5262_v48 = vor.u32 %v5261_v44, %v5257_v21  ;;  %v5614_v5 = vshrl.u32 %v5603_v17, 16  ;;  %v5619_v54 = vshrl.u32 %v5604_v57, 16  ;;  %5339 = vrot.lane.b32.xlu0 %v5258_v62, %s6996_s12 }
 0x4cc   : > { %4730 = vst.msk [vmem:[#allocation2 + $0x10] sm:$0xf] %vm256_vm0, %v6529_v9  ;;  %v5393_v4 = vrot.slane %v5392_v10, 4  ;;  %v4885_v14 = vrot.slane %v4883_v23, 4  ;;  %v4756_v7 = vshll.u32 %v4737_v30, 16  ;;  %v4760_v49 = vshrl.u32 %v4737_v30, 16  ;;  %6699 = vmatpush3.bf16.msra.mxu1 %v6959_v27 }
 0x4cd   : > { %v4980_v36 = vrot.slane %v9247_v24, 4  ;;  %v5118_v50 = vrot.slane %v9252_v38, 4  ;;  %v9314_v0 = vrot.slane %v5619_v54, 7  ;;  %v5622_v18 = vshll.u32 %v5604_v57, 16  ;;  %6700 = vmatprep.subr.bf16.mxu1 %v6960_v63  ;;  %v6963_v27 = vld [vmem:[%s9940_s3 + $0xb0] sm:$0xff]  }
 0x4ce   : > { %v5263_v41 = vrot.slane %v5262_v48, 4  ;;  %v5403_v42 = vrot.slane %v9304_v45, 4  ;;  %v6420_v21 = vrot.slane %v5614_v5, 11  ;;  %v9320_v28 = vrot.slane %v4756_v7, 5 }
 0x4cf   : > { %v5402_v23 = vsel %vm7238_vm3, %v5393_v4, %v9304_v45  ;;  %v5624_v15 = vor.u32 %v5622_v18, %v9314_v0  ;;  %v5626_v17 = vrot.slane %v9314_v0, 4  ;;  %v9327_v29 = vrot.slane %v4760_v49, 4 }
 0x4d0   : > { %5483 = vrot.lane.b32.xlu0 %v5402_v23, %s6998_s10  ;;  %v4759_v57 = vsel %vm7179_vm14, %v9225_v40, %v9320_v28  ;;  %6701 = vmatpush3.bf16.msra.mxu1 %v6961_v56  ;;  %v9443_v38 = vrot.slane %v5478_v32, 7 }
 0x4d1   : > { %v5521_v37 = vld [vmem:[#allocation2 + $0xc] sm:$0xf]  ;;  %4849 = vst.msk [vmem:[#allocation3] sm:$0xf] %vm256_vm0, %v4759_v57  ;;  %v5625_v40 = vsel %vm7161_vm13, %v6420_v21, %v5624_v15  ;;  %6702 = vmatprep.subr.bf16.mxu1 %v6962_v16 }
 0x4d2   : > { %v4861_v3 = vld [vmem:[#allocation2 + $0xc] sm:$0xf]  ;;  %v5544_v9 = vrot.slane %v5521_v37, 7  ;;  %5707 = vst.msk [vmem:[#allocation3 + $0x8] sm:$0xf] %vm256_vm0, %v5625_v40 }
 0x4d3   : > { %v9333_v12 = vld [vmem:[#allocation2 + $0xc] sm:$0xf]  ;;  %v4886_v55 = vrot.slane %v4861_v3, 5  ;;  %v9344_v62 = vld [vmem:[#allocation2 + $0x10] sm:$0xf] }
 0x4d4   : > { %v5265_v44 = vshll.u32 %v9333_v12, 16  ;;  %v4945_v30 = vld [vmem:[#allocation2 + $0xc] sm:$0xf]  ;;  %v9346_v10 = vld [vmem:[#allocation2 + $0x10] sm:$0xf]  ;;  %v5545_v54 = vsel %vm7113_vm12, %v5543_v60, %v5544_v9  ;;  %v5546_v7 = vrot.slane %v5544_v9, 4  ;;  %6703 = vmatpush3.bf16.msra.mxu1 %v6963_v27 }
 0x4d5   : > { %v4982_v48 = vshrl.u32 %v4945_v30, 16  ;;  %v4985_v5 = vshll.u32 %v4945_v30, 16  ;;  %v4887_v63 = vsel %vm7095_vm7, %v4885_v14, %v4886_v55  ;;  %v5377_v49 = vld [vmem:[#allocation2 + $0xc] sm:$0xf]  ;;  %v6669_v56 = vpop.f32.mrb[48].mxu1  ;;  %5569 = vrot.lane.b32.xlu1 %v5545_v54, %s6997_s15  ;;  %v5547_v21 = vrot.slane %v9344_v62, 7 }
 0x4d6   : > { %v9354_v4 = vrot.slane %v5265_v44, 5  ;;  %v5089_v18 = vld [vmem:[#allocation2 + $0xc] sm:$0xf]  ;;  %4910 = vrot.lane.b32.xlu0 %v4887_v63, %s6996_s12  ;;  %v4888_v23 = vrot.slane %v4886_v55, 4  ;;  %v4889_v60 = vrot.slane %v9346_v10, 5  ;;  %v6964_v14 = vld [vmem:[%s9940_s3 + $0xf8] sm:$0xff]  }
 0x4d7   : > { %v4984_v15 = vrot.slane %v4982_v48, 5  ;;  %v6670_v16 = vpop.f32.mrb[49].mxu1  ;;  %v4987_v37 = vrot.slane %v4985_v5, 6  ;;  %v5405_v3 = vshrl.u32 %v5377_v49, 16  ;;  %v5408_v57 = vshll.u32 %v5377_v49, 16  ;;  %6704 = vmatprep.subr.bf16.mxu1 %v6964_v14 }
 0x4d8   : > { %v5605_v9 = vld [vmem:[#allocation2 + $0xc] sm:$0xf]  ;;  %v6671_v44 = vadd.f32 %v6670_v16, %v6669_v56  ;;  %v6672_v30 = vpop.f32.mrb[50].mxu1  ;;  %v5268_v40 = vsel %vm7179_vm14, %v5263_v41, %v9354_v4  ;;  %v5269_v55 = vshrl.u32 %v9333_v12, 16  ;;  %v5120_v54 = vshrl.u32 %v5089_v18, 16 }
 0x4d9   : > { %v6673_v48 = vpop.f32.mrb[51].mxu1  ;;  %v5548_v5 = vsel %vm7113_vm12, %v5546_v7, %v5547_v21  ;;  %v9372_v63 = vor.u32 %v4987_v37, %v4984_v15  ;;  %v5407_v49 = vrot.slane %v5405_v3, 6  ;;  %v5410_v27 = vrot.slane %v5408_v57, 7  ;;  %5341 = vrot.lane.b32.xlu1 %v5268_v40, %s6996_s12  ;;  %v4946_v14 = vld [vmem:[#allocation2 + $0x10] sm:$0xf] }
 0x4da   : > { %v4579_v56 = vadd.f32 %v6671_v44, %v9211_v26  ;;  %v6674_v16 = vadd.f32 %v6673_v48, %v6672_v30  ;;  %5571 = vrot.lane.b32.xlu0 %v5548_v5, %s6997_s15  ;;  %v9377_v41 = vrot.slane %v5120_v54, 7  ;;  %v5628_v12 = vshrl.u32 %v5605_v9, 16  ;;  %v9388_v57 = vld [vmem:[#allocation2 + $0x10] sm:$0xf]  ;;  %v5219_v24 = vld [vmem:[#allocation2 + $0xc] sm:$0xf] }
 0x4db   : > { %v4890_v7 = vsel %vm7095_vm7, %v4888_v23, %v4889_v60  ;;  %v4989_v15 = vsel %vm7188_vm2, %v4980_v36, %v9372_v63  ;;  %v5123_v37 = vshll.u32 %v5089_v18, 16  ;;  %v5631_v3 = vshll.u32 %v5605_v9, 16  ;;  %v6965_v23 = vld [vmem:[%s9940_s3 + $0xb8] sm:$0xff]   ;;  %5228 = vst.msk [vmem:[#allocation3 + $0x1c] sm:$0xf] %vm256_vm0, %v5219_v24 }
 0x4dc   : > { %v4651_v44 = vadd.f32 %v9191_v47, %v4579_v56  ;;  %v4582_v30 = vadd.f32 %v6674_v16, %v9211_v26  ;;  %v9392_v40 = vor.u32 %v5410_v27, %v5407_v49  ;;  %v9394_v54 = vrot.slane %v5628_v12, 7  ;;  %v6966_v47 = vld [vmem:[%s9940_s3 + $0x100] sm:$0xff]   ;;  %v5220_v16 = vld [vmem:[#allocation2 + $0x10] sm:$0xf]  ;;  %6705 = vmatpush3.bf16.msra.mxu1 %v6965_v23 }
 0x4dd   : > { %v5125_v48 = vor.u32 %v5123_v37, %v9377_v41  ;;  %v4992_v36 = vshrl.u32 %v4946_v14, 16  ;;  %v4995_v18 = vshll.u32 %v4946_v14, 16  ;;  %v5271_v9 = vrot.slane %v5269_v55, 4  ;;  %4912 = vrot.lane.b32.xlu1 %v4890_v7, %s6996_s12  ;;  %v5090_v24 = vld [vmem:[#allocation2 + $0x10] sm:$0xf]  ;;  %6706 = vmatprep.subr.bf16.mxu1 %v6966_v47 }
 0x4de   : > { %v4676_v5 = vmax.f32 %v4651_v44, 0.0  ;;  %v4654_v49 = vadd.f32 %v9193_v43, %v4582_v30  ;;  %5054 = vrot.lane.b32.xlu0 %v4989_v15, %s6998_s10  ;;  %v5633_v27 = vor.u32 %v5631_v3, %v9394_v54  ;;  %v4990_v56 = vrot.slane %v9372_v63, 4  ;;  %v6967_v43 = vld [vmem:[%s9940_s3 + $0xc0] sm:$0xff]   ;;  %5229 = vst.msk [vmem:[#allocation3 + $0x28] sm:$0xf] %vm256_vm0, %v5220_v16  ;;  %v6968_v30 = vld [vmem:[%s9940_s3 + $0x108] sm:$0xff]  }
 0x4df   : > { %v4994_v12 = vrot.slane %v4992_v36, 5  ;;  %v4997_v55 = vrot.slane %v4995_v18, 6  ;;  %v5272_v14 = vor.u32 %v5271_v9, %v9354_v4  ;;  %v5275_v37 = vshll.u32 %v9388_v57, 16  ;;  %v5378_v3 = vld [vmem:[#allocation2 + $0x10] sm:$0xf] }
 0x4e0   : > { %v4685_v7 = vmul.f32 %v4676_v5, %v8008_v19  ;;  %v4677_v15 = vmax.f32 %v4654_v49, 0.0  ;;  %v5412_v63 = vsel %vm7238_vm3, %v5403_v42, %v9392_v40  ;;  %v5634_v4 = vsel %vm7161_vm13, %v5626_v17, %v5633_v27  ;;  %v9425_v44 = vld [vmem:[#allocation2 + $0x8] sm:$0xf]  ;;  %6707 = vmatpush3.bf16.msra.mxu1 %v6967_v43  ;;  %v5606_v27 = vld [vmem:[#allocation2 + $0x10] sm:$0xf] }
 0x4e1   : > { %v5126_v45 = vsel %vm7161_vm13, %v5118_v50, %v5125_v48  ;;  %5708 = vst.msk [vmem:[#allocation3 + $0x14] sm:$0xf] %vm256_vm0, %v5634_v4  ;;  %v9435_v42 = vor.u32 %v4997_v55, %v4994_v12  ;;  %v5273_v0 = vrot.slane %v5272_v14, 4  ;;  %v5279_v17 = vshrl.u32 %v9388_v57, 16  ;;  %5485 = vrot.lane.b32.xlu1 %v5412_v63, %s6998_s10  ;;  %v6969_v57 = vld [vmem:[%s9940_s3 + $0xc8] sm:$0xff]   ;;  %6708 = vmatprep.subr.bf16.mxu1 %v6968_v30 }
 0x4e2   : > { %v6530_v23 = vpack.c.bf16 %v4685_v7, %v4685_v7  ;;  %v4686_v36 = vmul.f32 %v4677_v15, %v8027_v20  ;;  %5185 = vrot.lane.b32.xlu0 %v5126_v45, %s6997_s15  ;;  %v5129_v18 = vshrl.u32 %v5090_v24, 16  ;;  %v5277_v50 = vrot.slane %v5275_v37, 5 }
 0x4e3   : > { %v5415_v48 = vshrl.u32 %v5378_v3, 16  ;;  %v4766_v9 = vshll.u32 %v9425_v44, 16  ;;  %v4763_v47 = vor.u32 %v9327_v29, %v9320_v28  ;;  %v5132_v6 = vshll.u32 %v5090_v24, 16 }
 0x4e4   : > { %4731 = vst.msk [vmem:[#allocation2 + $0x14] sm:$0xf] %vm256_vm0, %v6530_v23  ;;  %v6531_v5 = vpack.c.bf16 %v4686_v36, %v4686_v36  ;;  %v9452_v49 = vrot.slane %v5129_v18, 7  ;;  %v5418_v32 = vshll.u32 %v5378_v3, 16  ;;  %v4999_v16 = vsel %vm7188_vm2, %v4990_v56, %v9435_v42  ;;  %6709 = vmatpush3.bf16.msra.mxu1 %v6969_v57 }
 0x4e5   : > { %v5278_v28 = vsel %vm7179_vm14, %v5273_v0, %v5277_v50  ;;  %v5417_v29 = vrot.slane %v5415_v48, 6  ;;  %v5281_v12 = vrot.slane %v5279_v17, 4  ;;  %5056 = vrot.lane.b32.xlu1 %v4999_v16, %s6998_s10  ;;  %v5413_v14 = vrot.slane %v9392_v40, 4  ;;  %6843 = vmatprep.subr.bf16.mxu1 %v9968_v34 }
 0x4e6   : > { %4732 = vst.msk [vmem:[#allocation2 + $0x18] sm:$0xf] %vm256_vm0, %v6531_v5  ;;  %5343 = vrot.lane.b32.xlu0 %v5278_v28, %s6996_s12  ;;  %v5134_v55 = vor.u32 %v5132_v6, %v9452_v49  ;;  %v5420_v37 = vrot.slane %v5418_v32, 7  ;;  %v4770_v24 = vshrl.u32 %v9425_v44, 16  ;;  %v5127_v56 = vrot.slane %v9377_v41, 4 }
 0x4e7   : > { %v5549_v43 = vrot.slane %v5547_v21, 4  ;;  %v4891_v7 = vrot.slane %v4889_v60, 4  ;;  %v5637_v15 = vshrl.u32 %v5606_v27, 16  ;;  %v5282_v3 = vor.u32 %v5281_v12, %v5277_v50 }
 0x4e8   : > { %v6950_v63 = vld [vmem:[#allocation3 + $0x8] ss:$12 sps:$4 sm:$0xff]   ;;  %v9470_v4 = vor.u32 %v5420_v37, %v5417_v29  ;;  %v9472_v30 = vrot.slane %v4766_v9, 5  ;;  %v4764_v40 = vrot.slane %v4763_v47, 4  ;;  %v5135_v41 = vsel %vm7161_vm13, %v5127_v56, %v5134_v55 }
 0x4e9   : > { %v5000_v62 = vrot.slane %v9435_v42, 4  ;;  %v9478_v21 = vrot.slane %v5637_v15, 7  ;;  %v5640_v10 = vshll.u32 %v5606_v27, 16  ;;  %6824 = vmatmul.mubr.msk.bf16.vlgmr.msra.gmra.mrb[60].mxu0 %vm1563_vm5, %v6950_v63  ;;  %v6675_v60 = vpop.f32.mrb[52].mxu1  ;;  %5187 = vrot.lane.b32.xlu1 %v5135_v41, %s6997_s15  ;;  %v5136_v45 = vrot.slane %v9452_v49, 4 }
 0x4ea   : > { %v5422_v44 = vsel %vm7238_vm3, %v5413_v14, %v9470_v4  ;;  %v5635_v0 = vrot.slane %v9394_v54, 4  ;;  %v4769_v17 = vsel %vm7179_vm14, %v4764_v40, %v9472_v30  ;;  %v6676_v23 = vpop.f32.mrb[53].mxu1  ;;  %6827 = vmatprep.mubr.msk.bf16.mxu0 %vm7000_vm4, %v9968_v34  ;;  %v5481_v48 = vor.u32 %v9443_v38, %v9301_v13 }
 0x4eb   : > { %5487 = vrot.lane.b32.xlu0 %v5422_v44, %s6998_s10  ;;  %v5523_v36 = vld [vmem:[#allocation2 + $0x14] sm:$0xf]  ;;  %v5642_v50 = vor.u32 %v5640_v10, %v9478_v21  ;;  %4850 = vst.msk [vmem:[#allocation3 + $0xc] sm:$0xf] %vm256_vm0, %v4769_v17  ;;  %v9497_v54 = vrot.slane %v4770_v24, 4  ;;  %v6677_v9 = vadd.f32 %v6676_v23, %v6675_v60  ;;  %v6678_v47 = vpop.f32.mrb[54].mxu1 }
 0x4ec   : > { %v4863_v18 = vld [vmem:[#allocation2 + $0x14] sm:$0xf]  ;;  %v5550_v57 = vrot.slane %v5523_v36, 7  ;;  %v5283_v32 = vrot.slane %v5282_v3, 4  ;;  %v6679_v27 = vpop.f32.mrb[55].mxu1  ;;  %v5423_v12 = vrot.slane %v9470_v4, 4 }
 0x4ed   : > { %v4892_v5 = vrot.slane %v4863_v18, 5  ;;  %v9499_v6 = vld [vmem:[#allocation2 + $0x14] sm:$0xf]  ;;  %v9503_v29 = vld [vmem:[#allocation2 + $0x18] sm:$0xf]  ;;  %v5643_v55 = vsel %vm7161_vm13, %v5635_v0, %v5642_v50  ;;  %v4587_v14 = vadd.f32 %v6677_v9, %v9211_v26  ;;  %v6680_v37 = vadd.f32 %v6679_v27, %v6678_v47 }
 0x4ee   : > { %v5285_v16 = vshll.u32 %v9499_v6, 16  ;;  %v5289_v28 = vshrl.u32 %v9499_v6, 16  ;;  %v5551_v24 = vsel %vm7113_vm12, %v5549_v43, %v5550_v57  ;;  %v9513_v15 = vld [vmem:[#allocation2 + $0x18] sm:$0xf]  ;;  %v4947_v63 = vld [vmem:[#allocation2 + $0x14] sm:$0xf] }
 0x4ef   : > { %v4893_v56 = vsel %vm7095_vm7, %v4891_v7, %v4892_v5  ;;  %v5379_v3 = vld [vmem:[#allocation2 + $0x14] sm:$0xf]  ;;  %5709 = vst.msk [vmem:[#allocation3 + $0x20] sm:$0xf] %vm256_vm0, %v5643_v55  ;;  %5573 = vrot.lane.b32.xlu1 %v5551_v24, %s6997_s15  ;;  %v5552_v41 = vrot.slane %v5550_v57, 4  ;;  %v5553_v10 = vrot.slane %v9503_v29, 7  ;;  %v4659_v43 = vadd.f32 %v9201_v1, %v4587_v14 }
 0x4f0   : > { %4914 = vrot.lane.b32.xlu0 %v4893_v56, %s6996_s12  ;;  %v9518_v40 = vrot.slane %v5285_v16, 5  ;;  %v4894_v60 = vrot.slane %v4892_v5, 4  ;;  %v4590_v7 = vadd.f32 %v6680_v37, %v9211_v26  ;;  %v4895_v44 = vrot.slane %v9513_v15, 5  ;;  %v5091_v17 = vld [vmem:[#allocation2 + $0x14] sm:$0xf] }
 0x4f1   : > { %v5002_v0 = vshrl.u32 %v4947_v63, 16  ;;  %v5554_v36 = vsel %vm7113_vm12, %v5552_v41, %v5553_v10  ;;  %v5005_v18 = vshll.u32 %v4947_v63, 16  ;;  %v5425_v50 = vshrl.u32 %v5379_v3, 16  ;;  %v5607_v9 = vld [vmem:[#allocation2 + $0x14] sm:$0xf] }
 0x4f2   : > { %v5288_v23 = vsel %vm7179_vm14, %v5283_v32, %v9518_v40  ;;  %v4678_v47 = vmax.f32 %v4659_v43, 0.0  ;;  %v4662_v1 = vadd.f32 %v9204_v59, %v4590_v7  ;;  %v4896_v57 = vsel %vm7095_vm7, %v4894_v60, %v4895_v44  ;;  %v4948_v14 = vld [vmem:[#allocation2 + $0x18] sm:$0xf] }
 0x4f3   : > { %v5004_v5 = vrot.slane %v5002_v0, 5  ;;  %5345 = vrot.lane.b32.xlu1 %v5288_v23, %s6996_s12  ;;  %v5007_v32 = vrot.slane %v5005_v18, 6  ;;  %v5427_v27 = vrot.slane %v5425_v50, 6  ;;  %v5428_v16 = vshll.u32 %v5379_v3, 16  ;;  %v5221_v3 = vld [vmem:[#allocation2 + $0x14] sm:$0xf] }
 0x4f4   : > { %5575 = vrot.lane.b32.xlu0 %v5554_v36, %s6997_s15  ;;  %v5138_v55 = vshrl.u32 %v5091_v17, 16  ;;  %v4687_v37 = vmul.f32 %v4678_v47, %v8130_v25  ;;  %v4679_v24 = vmax.f32 %v4662_v1, 0.0  ;;  %v5141_v56 = vshll.u32 %v5091_v17, 16  ;;  %v5240_v1 = vld [vmem:[#allocation2 + $0x18] sm:$0xf] }
 0x4f5   : > { %v5646_v59 = vshrl.u32 %v5607_v9, 16  ;;  %v5008_v63 = vor.u32 %v5007_v32, %v5004_v5  ;;  %v5430_v41 = vrot.slane %v5428_v16, 7  ;;  %v5649_v60 = vshll.u32 %v5607_v9, 16  ;;  %5230 = vst.msk [vmem:[#allocation3 + $0x34] sm:$0xf] %vm256_vm0, %v5221_v3 }
 0x4f6   : > { %v9539_v43 = vrot.slane %v5138_v55, 7  ;;  %v6532_v7 = vpack.c.bf16 %v4687_v37, %v4687_v37  ;;  %v4688_v0 = vmul.f32 %v4679_v24, %v8144_v46  ;;  %v6681_v23 = vpop.f32.mrb[56].mxu1  ;;  %v5012_v18 = vshrl.u32 %v4948_v14, 16  ;;  %v5222_v32 = vld [vmem:[#allocation2 + $0x18] sm:$0xf] }
 0x4f7   : > { %v9542_v36 = vrot.slane %v5646_v59, 7  ;;  %v6682_v50 = vpop.f32.mrb[57].mxu1  ;;  %4916 = vrot.lane.b32.xlu1 %v4896_v57, %s6996_s12  ;;  %v5009_v17 = vsel %vm7188_vm2, %v5000_v62, %v5008_v63  ;;  %v9549_v47 = vor.u32 %v5430_v41, %v5427_v27  ;;  %v4773_v5 = vor.u32 %v9497_v54, %v9472_v30  ;;  %v5092_v27 = vld [vmem:[#allocation2 + $0x18] sm:$0xf]  ;;  %5231 = vst.msk [vmem:[#allocation3 + $0x40] sm:$0xf] %vm256_vm0, %v5222_v32 }
 0x4f8   : > { %v5143_v9 = vor.u32 %v5141_v56, %v9539_v43  ;;  %4733 = vst.msk [vmem:[#allocation2 + $0x1c] sm:$0xf] %vm256_vm0, %v6532_v7  ;;  %v6533_v16 = vpack.c.bf16 %v4688_v0, %v4688_v0  ;;  %v6683_v57 = vadd.f32 %v6682_v50, %v6681_v23  ;;  %v6684_v55 = vpop.f32.mrb[58].mxu1  ;;  %5058 = vrot.lane.b32.xlu0 %v5009_v17, %s6998_s10  ;;  %v5644_v42 = vrot.slane %v9478_v21, 4 }
 0x4f9   : > { %v5651_v62 = vor.u32 %v5649_v60, %v9542_v36  ;;  %v6685_v37 = vpop.f32.mrb[59].mxu1  ;;  %v5010_v24 = vrot.slane %v5008_v63, 4  ;;  %v5014_v30 = vrot.slane %v5012_v18, 5  ;;  %v5015_v54 = vshll.u32 %v4948_v14, 16  ;;  %v5380_v63 = vld [vmem:[#allocation2 + $0x18] sm:$0xf] }
 0x4fa   : > { %v5291_v56 = vrot.slane %v5289_v28, 4  ;;  %4734 = vst.msk [vmem:[#allocation2 + $0x20] sm:$0xf] %vm256_vm0, %v6533_v16  ;;  %v4595_v59 = vadd.f32 %v6683_v57, %v9211_v26  ;;  %v5432_v21 = vsel %vm7238_vm3, %v5423_v12, %v9549_v47  ;;  %v5295_v60 = vshll.u32 %v5240_v1, 16  ;;  %v9578_v14 = vld [vmem:[#allocation2 + $0xc] sm:$0xf] }
 0x4fb   : > { %v5652_v41 = vsel %vm7161_vm13, %v5644_v42, %v5651_v62  ;;  %5489 = vrot.lane.b32.xlu1 %v5432_v21, %s6998_s10  ;;  %v5144_v6 = vsel %vm7161_vm13, %v5136_v45, %v5143_v9  ;;  %v5017_v26 = vrot.slane %v5015_v54, 6  ;;  %v5147_v28 = vshrl.u32 %v5092_v27, 16  ;;  %v5608_v21 = vld [vmem:[#allocation2 + $0x18] sm:$0xf] }
 0x4fc   : > { %5710 = vst.msk [vmem:[#allocation3 + $0x2c] sm:$0xf] %vm256_vm0, %v5652_v41  ;;  %v5292_v4 = vor.u32 %v5291_v56, %v9518_v40  ;;  %v4667_v12 = vadd.f32 %v9206_v53, %v4595_v59  ;;  %5189 = vrot.lane.b32.xlu0 %v5144_v6, %s6997_s15  ;;  %v5297_v7 = vrot.slane %v5295_v60, 5  ;;  %v5299_v0 = vshrl.u32 %v5240_v1, 16 }
 0x4fd   : > { %v5150_v23 = vshll.u32 %v5092_v27, 16  ;;  %v9582_v18 = vor.u32 %v5017_v26, %v5014_v30  ;;  %v9584_v3 = vrot.slane %v5147_v28, 7  ;;  %v5435_v45 = vshrl.u32 %v5380_v63, 16 }
 0x4fe   : > { %v5293_v49 = vrot.slane %v5292_v4, 4  ;;  %v4680_v50 = vmax.f32 %v4667_v12, 0.0  ;;  %v5438_v17 = vshll.u32 %v5380_v63, 16  ;;  %v4776_v40 = vshll.u32 %v9578_v14, 16 }
 0x4ff   : > { %v4780_v9 = vshrl.u32 %v9578_v14, 16  ;;  %v5019_v53 = vsel %vm7188_vm2, %v5010_v24, %v9582_v18  ;;  %v5152_v32 = vor.u32 %v5150_v23, %v9584_v3  ;;  %v5437_v16 = vrot.slane %v5435_v45, 6  ;;  %v5525_v57 = vld [vmem:[#allocation2 + $0x1c] sm:$0xf] }
 0x500   : > { %v5298_v1 = vsel %vm7179_vm14, %v5293_v49, %v5297_v7  ;;  %v4865_v55 = vld [vmem:[#allocation2 + $0x1c] sm:$0xf]  ;;  %v4689_v42 = vmul.f32 %v4680_v50, %v8181_v8  ;;  %5060 = vrot.lane.b32.xlu1 %v5019_v53, %s6998_s10  ;;  %v5433_v62 = vrot.slane %v9549_v47, 4  ;;  %v5440_v27 = vrot.slane %v5438_v17, 7 }
 0x501   : > { %5347 = vrot.lane.b32.xlu0 %v5298_v1, %s6996_s12  ;;  %v5556_v37 = vrot.slane %v5525_v57, 7  ;;  %v9598_v30 = vld [vmem:[#allocation2 + $0x1c] sm:$0xf]  ;;  %v5145_v24 = vrot.slane %v9539_v43, 4  ;;  %v4898_v54 = vrot.slane %v4865_v55, 5  ;;  %v5301_v56 = vrot.slane %v5299_v0, 4 }
 0x502   : > { %v9601_v59 = vld [vmem:[#allocation2 + $0x20] sm:$0xf]  ;;  %v9603_v41 = vrot.slane %v4773_v5, 4  ;;  %v6534_v60 = vpack.c.bf16 %v4689_v42, %v4689_v42  ;;  %v9605_v6 = vor.u32 %v5440_v27, %v5437_v16  ;;  %v5305_v26 = vshll.u32 %v9598_v30, 16  ;;  %v4949_v0 = vld [vmem:[#allocation2 + $0x1c] sm:$0xf] }
 0x503   : > { %v6951_v63 = vld [vmem:[#allocation3 + $0x20] ss:$12 sps:$4 sm:$0xff]   ;;  %v9608_v47 = vrot.slane %v4776_v40, 5  ;;  %v5153_v4 = vsel %vm7161_vm13, %v5145_v24, %v5152_v32  ;;  %v5555_v43 = vrot.slane %v5553_v10, 4  ;;  %v4897_v28 = vrot.slane %v4895_v44, 4 }
 0x504   : > { %v5302_v12 = vor.u32 %v5301_v56, %v5297_v7  ;;  %v9616_v5 = vld [vmem:[#allocation2 + $0x20] sm:$0xf]  ;;  %4735 = vst.msk [vmem:[#allocation2 + $0x24] sm:$0xf] %vm256_vm0, %v6534_v60  ;;  %6828 = vmatmul.mubr.msk.bf16.gmra.mrb[64].mxu0 %vm1563_vm5, %v6951_v63  ;;  %5191 = vrot.lane.b32.xlu1 %v5153_v4, %s6997_s15  ;;  %v5442_v23 = vsel %vm7238_vm3, %v5433_v62, %v9605_v6  ;;  %v5309_v29 = vshrl.u32 %v9598_v30, 16  ;;  %v5558_v10 = vrot.slane %v5556_v37, 4 }
 0x505   : > { %v5559_v15 = vrot.slane %v9601_v59, 7  ;;  %v5609_v44 = vld [vmem:[#allocation2 + $0x1c] sm:$0xf]  ;;  %5491 = vrot.lane.b32.xlu0 %v5442_v23, %s6998_s10  ;;  %v5557_v7 = vsel %vm7113_vm12, %v5555_v43, %v5556_v37  ;;  %v4899_v49 = vsel %vm7095_vm7, %v4897_v28, %v4898_v54  ;;  %v5022_v45 = vshrl.u32 %v4949_v0, 16  ;;  %6831 = vmatprep.mubr.msk.bf16.mxu0 %vm7000_vm4, %v9968_v34 }
 0x506   : > { %v5025_v50 = vshll.u32 %v4949_v0, 16  ;;  %v5381_v17 = vld [vmem:[#allocation2 + $0x1c] sm:$0xf]  ;;  %v9633_v40 = vrot.slane %v5305_v26, 5  ;;  %v4900_v53 = vrot.slane %v4898_v54, 4  ;;  %v4901_v1 = vrot.slane %v9616_v5, 5 }
 0x507   : > { %v5655_v32 = vshrl.u32 %v5608_v21, 16  ;;  %v5303_v16 = vrot.slane %v5302_v12, 4  ;;  %v5024_v57 = vrot.slane %v5022_v45, 5  ;;  %v5664_v42 = vshrl.u32 %v5609_v44, 16  ;;  %v5093_v62 = vld [vmem:[#allocation2 + $0x1c] sm:$0xf] }
 0x508   : > { %v5027_v55 = vrot.slane %v5025_v50, 6  ;;  %5577 = vrot.lane.b32.xlu1 %v5557_v7, %s6997_s15  ;;  %v5560_v27 = vsel %vm7113_vm12, %v5558_v10, %v5559_v15  ;;  %v5658_v30 = vshll.u32 %v5608_v21, 16  ;;  %v5445_v24 = vshrl.u32 %v5381_v17, 16  ;;  %v4950_v26 = vld [vmem:[#allocation2 + $0x20] sm:$0xf] }
 0x509   : > { %v5657_v37 = vrot.slane %v5655_v32, 7  ;;  %4918 = vrot.lane.b32.xlu0 %v4899_v49, %s6996_s12  ;;  %v5653_v54 = vrot.slane %v9542_v36, 4  ;;  %v9643_v56 = vrot.slane %v5664_v42, 7  ;;  %v5667_v60 = vshll.u32 %v5609_v44, 16  ;;  %v9662_v32 = vld [vmem:[#allocation2 + $0x20] sm:$0xf] }
 0x50a   : > { %v5448_v63 = vshll.u32 %v5381_v17, 16  ;;  %v5308_v4 = vsel %vm7179_vm14, %v5303_v16, %v9633_v40  ;;  %v5447_v28 = vrot.slane %v5445_v24, 6  ;;  %v5156_v12 = vshrl.u32 %v5093_v62, 16 }
 0x50b   : > { %v5660_v43 = vor.u32 %v5658_v30, %v5657_v37  ;;  %v9648_v0 = vor.u32 %v5027_v55, %v5024_v57  ;;  %v5662_v21 = vrot.slane %v5657_v37, 4  ;;  %v5669_v23 = vor.u32 %v5667_v60, %v9643_v56  ;;  %v5094_v57 = vld [vmem:[#allocation2 + $0x20] sm:$0xf] }
 0x50c   : > { %v5450_v10 = vrot.slane %v5448_v63, 7  ;;  %5349 = vrot.lane.b32.xlu1 %v5308_v4, %s6996_s12  ;;  %v9654_v44 = vrot.slane %v5156_v12, 7  ;;  %v5159_v7 = vshll.u32 %v5093_v62, 16  ;;  %v5032_v49 = vshrl.u32 %v4950_v26, 16  ;;  %v5382_v37 = vld [vmem:[#allocation2 + $0x20] sm:$0xf] }
 0x50d   : > { %v5661_v36 = vsel %vm7161_vm13, %v5653_v54, %v5660_v43  ;;  %5579 = vrot.lane.b32.xlu0 %v5560_v27, %s6997_s15  ;;  %v5670_v45 = vsel %vm7161_vm13, %v5662_v21, %v5669_v23  ;;  %v5035_v17 = vshll.u32 %v4950_v26, 16  ;;  %v5311_v16 = vrot.slane %v5309_v29, 4  ;;  %v5610_v60 = vld [vmem:[#allocation2 + $0x20] sm:$0xf]  ;;  %v5611_v43 = vld [vmem:[#allocation2 + $0x24] sm:$0xf] }
 0x50e   : > { %5711 = vst.msk [vmem:[#allocation3 + $0x38] sm:$0xf] %vm256_vm0, %v5661_v36  ;;  %v9660_v50 = vor.u32 %v5450_v10, %v5447_v28  ;;  %v4902_v55 = vsel %vm7095_vm7, %v4900_v53, %v4901_v1  ;;  %v5020_v42 = vrot.slane %v9582_v18, 4  ;;  %5712 = vst.msk [vmem:[#allocation3 + $0x44] sm:$0xf] %vm256_vm0, %v5670_v45  ;;  %v5443_v62 = vrot.slane %v9605_v6, 4 }
 0x50f   : > { %v5034_v27 = vrot.slane %v5032_v49, 5  ;;  %v5154_v30 = vrot.slane %v9584_v3, 4  ;;  %v5161_v24 = vor.u32 %v5159_v7, %v9654_v44  ;;  %v5037_v54 = vrot.slane %v5035_v17, 6  ;;  %v5223_v23 = vld [vmem:[#allocation2 + $0x1c] sm:$0xf] }
 0x510   : > { %v5312_v29 = vor.u32 %v5311_v16, %v9633_v40  ;;  %4920 = vrot.lane.b32.xlu1 %v4902_v55, %s6996_s12  ;;  %v5029_v18 = vsel %vm7188_vm2, %v5020_v42, %v9648_v0  ;;  %v5030_v53 = vrot.slane %v9648_v0, 4  ;;  %v5315_v6 = vshll.u32 %v9662_v32, 16  ;;  %v9692_v45 = vld [vmem:[#allocation2 + $0x24] sm:$0xf]  ;;  %5232 = vst.msk [vmem:[#allocation3 + $0x4c] sm:$0xf] %vm256_vm0, %v5223_v23 }
 0x511   : > { %v5165_v63 = vshrl.u32 %v5094_v57, 16  ;;  %5062 = vrot.lane.b32.xlu0 %v5029_v18, %s6998_s10  ;;  %v5452_v3 = vsel %vm7238_vm3, %v5443_v62, %v9660_v50  ;;  %v5319_v40 = vshrl.u32 %v9662_v32, 16  ;;  %v5163_v26 = vrot.slane %v9654_v44, 4  ;;  %v9694_v17 = vld [vmem:[#allocation2 + $0x24] sm:$0xf] }
 0x512   : > { %v5455_v4 = vshrl.u32 %v5382_v37, 16  ;;  %v9686_v28 = vor.u32 %v5037_v54, %v5034_v27  ;;  %v5458_v0 = vshll.u32 %v5382_v37, 16  ;;  %v5673_v21 = vshrl.u32 %v5610_v60, 16  ;;  %v5224_v44 = vld [vmem:[#allocation2 + $0x20] sm:$0xf] }
 0x513   : > { %v9688_v12 = vrot.slane %v5165_v63, 7  ;;  %v5162_v10 = vsel %vm7161_vm13, %v5154_v30, %v5161_v24  ;;  %v5313_v36 = vrot.slane %v5312_v29, 4  ;;  %v5168_v7 = vshll.u32 %v5094_v57, 16  ;;  %5233 = vst.msk [vmem:[#allocation3 + $0x58] sm:$0xf] %vm256_vm0, %v5224_v44 }
 0x514   : > { %v5457_v49 = vrot.slane %v5455_v4, 6  ;;  %5493 = vrot.lane.b32.xlu1 %v5452_v3, %s6998_s10  ;;  %v5460_v32 = vrot.slane %v5458_v0, 7  ;;  %v5675_v16 = vrot.slane %v5673_v21, 7  ;;  %v5676_v55 = vshll.u32 %v5610_v60, 16  ;;  %v4867_v18 = vld [vmem:[#allocation2 + $0x24] sm:$0x1] }
 0x515   : > { %v5682_v42 = vshrl.u32 %v5611_v43, 16  ;;  %v6952_v62 = vld [vmem:[#allocation3 + $0x38] ss:$12 sps:$4 sm:$0xff]   ;;  %5193 = vrot.lane.b32.xlu0 %v5162_v10, %s6997_s15  ;;  %v5317_v57 = vrot.slane %v5315_v6, 5  ;;  %v5170_v27 = vor.u32 %v5168_v7, %v9688_v12  ;;  %v5453_v37 = vrot.slane %v9660_v50, 4 }
 0x516   : > { %v4779_v30 = vsel %vm7179_vm14, %v9603_v41, %v9608_v47  ;;  %v5039_v24 = vsel %vm7188_vm2, %v5030_v53, %v9686_v28  ;;  %v9709_v54 = vor.u32 %v5460_v32, %v5457_v49  ;;  %v5671_v29 = vrot.slane %v9643_v56, 4  ;;  %v5225_v6 = vld [vmem:[#allocation2 + $0x24] sm:$0xf]  ;;  %6832 = vmatmul.mubr.msk.bf16.gmra.mrb[68].mxu0 %vm1563_vm5, %v6952_v62 }
 0x517   : > { %v5678_v60 = vor.u32 %v5676_v55, %v5675_v16  ;;  %4851 = vst.msk [vmem:[#allocation3 + $0x18] sm:$0xf] %vm256_vm0, %v4779_v30  ;;  %v5318_v50 = vsel %vm7179_vm14, %v5313_v36, %v5317_v57  ;;  %v9716_v63 = vrot.slane %v5682_v42, 7  ;;  %v5685_v41 = vshll.u32 %v5611_v43, 16  ;;  %5234 = vst.msk [vmem:[#allocation3 + $0x64] sm:$0xf] %vm256_vm0, %v5225_v6  ;;  %6835 = vmatprep.mubr.msk.bf16.mxu0 %vm7000_vm4, %v9968_v34 }
 0x518   : > { %v5561_v53 = vrot.slane %v5559_v15, 4  ;;  %5064 = vrot.lane.b32.xlu1 %v5039_v24, %s6998_s10  ;;  %v5562_v3 = vrot.slane %v9692_v45, 7  ;;  %v5321_v4 = vrot.slane %v5319_v40, 4  ;;  %v5325_v0 = vshll.u32 %v9694_v17, 16  ;;  %v4951_v21 = vld [vmem:[#allocation2 + $0x24] sm:$0x3] }
 0x519   : > { %v5679_v56 = vsel %vm7161_vm13, %v5671_v29, %v5678_v60  ;;  %5351 = vrot.lane.b32.xlu0 %v5318_v50, %s6996_s12  ;;  %v5171_v59 = vsel %vm7161_vm13, %v5163_v26, %v5170_v27  ;;  %v5680_v15 = vrot.slane %v5675_v16, 4  ;;  %v5687_v43 = vor.u32 %v5685_v41, %v9716_v63  ;;  %v5383_v10 = vld [vmem:[#allocation2 + $0x24] sm:$0xf]  ;;  %v4740_v30 = vld [vmem:[#allocation2 + $0x10] sm:$0xf] }
 0x51a   : > { %5713 = vst.msk [vmem:[#allocation3 + $0x50] sm:$0xf] %vm256_vm0, %v5679_v56  ;;  %v4904_v23 = vrot.slane %v4867_v18, 5  ;;  %v5462_v36 = vsel %vm7238_vm3, %v5453_v37, %v9709_v54  ;;  %v4903_v40 = vrot.slane %v4901_v1, 4  ;;  %v5322_v7 = vor.u32 %v5321_v4, %v5317_v57  ;;  %v5095_v44 = vld [vmem:[#allocation2 + $0x24] sm:$0xf] }
 0x51b   : > { %v5329_v49 = vshrl.u32 %v9694_v17, 16  ;;  %v5688_v26 = vsel %vm7161_vm13, %v5680_v15, %v5687_v43  ;;  %v5689_v32 = vrot.slane %v9716_v63, 4  ;;  %v5042_v16 = vshrl.u32 %v4951_v21, 16 }
 0x51c   : > { %v5045_v55 = vshll.u32 %v4951_v21, 16  ;;  %5195 = vrot.lane.b32.xlu1 %v5171_v59, %s6997_s15  ;;  %5714 = vst.msk [vmem:[#allocation3 + $0x5c] sm:$0xf] %vm256_vm0, %v5688_v26  ;;  %v5563_v5 = vsel %vm7113_vm12, %v5561_v53, %v5562_v3  ;;  %v5327_v1 = vrot.slane %v5325_v0, 5  ;;  %v5465_v42 = vshrl.u32 %v5383_v10, 16 }
 0x51d   : > { %v5468_v17 = vshll.u32 %v5383_v10, 16  ;;  %5495 = vrot.lane.b32.xlu0 %v5462_v36, %s6998_s10  ;;  %v4905_v62 = vsel %vm7095_vm7, %v4903_v40, %v4904_v23  ;;  %v5044_v57 = vrot.slane %v5042_v16, 5  ;;  %v5174_v37 = vshrl.u32 %v5095_v44, 16  ;;  %v4741_v23 = vld [vmem:[#allocation2 + $0x14] sm:$0xf] }
 0x51e   : > { %v5047_v27 = vrot.slane %v5045_v55, 6  ;;  %v5323_v24 = vrot.slane %v5322_v7, 4  ;;  %v5467_v29 = vrot.slane %v5465_v42, 6  ;;  %v5331_v18 = vrot.slane %v5329_v49, 4  ;;  %v4742_v10 = vld [vmem:[#allocation2 + $0x18] sm:$0xf] }
 0x51f   : > { %v5470_v60 = vrot.slane %v5468_v17, 7  ;;  %v5176_v50 = vrot.slane %v5174_v37, 7  ;;  %v5177_v41 = vshll.u32 %v5095_v44, 16  ;;  %v4782_v53 = vrot.slane %v4780_v9, 4  ;;  %v4743_v7 = vld [vmem:[#allocation2 + $0x1c] sm:$0xf] }
 0x520   : > { %v5048_v6 = vor.u32 %v5047_v27, %v5044_v57  ;;  %5581 = vrot.lane.b32.xlu1 %v5563_v5, %s6997_s15  ;;  %v5332_v39 = vor.u32 %v5331_v18, %v5327_v1  ;;  %v4786_v4 = vshll.u32 %v4740_v30, 16  ;;  %v4790_v0 = vshrl.u32 %v4740_v30, 16  ;;  %v4744_v5 = vld [vmem:[#allocation2 + $0x20] sm:$0xf]  ;;  %v4745_v30 = vld [vmem:[#allocation2 + $0x24] sm:$0x1] }
 0x521   : > { %v9754_v56 = vor.u32 %v5470_v60, %v5467_v29  ;;  %4922 = vrot.lane.b32.xlu0 %v4905_v62, %s6996_s12  ;;  %v5040_v21 = vrot.slane %v9686_v28, 4  ;;  %v5463_v59 = vrot.slane %v9709_v54, 4  ;;  %v5179_v15 = vor.u32 %v5177_v41, %v5176_v50 }
 0x522   : > { %v4783_v43 = vor.u32 %v4782_v53, %v9608_v47  ;;  %v5328_v14 = vsel %vm7179_vm14, %v5323_v24, %v5327_v1  ;;  %v5172_v9 = vrot.slane %v9688_v12, 4  ;;  %v5333_v36 = vrot.slane %v5332_v39, 4 }
 0x523   : > { %v4788_v40 = vrot.slane %v4786_v4, 5  ;;  %v6953_v49 = vld [vmem:[#allocation3 + $0x50] ss:$12 sps:$4 sm:$0xff]   ;;  %v5049_v44 = vsel %vm7188_vm2, %v5040_v21, %v5048_v6  ;;  %v5472_v28 = vsel %vm7238_vm3, %v5463_v59, %v9754_v56  ;;  %v4792_v47 = vrot.slane %v4790_v0, 4 }
 0x524   : > { %v4784_v54 = vrot.slane %v4783_v43, 4  ;;  %5353 = vrot.lane.b32.xlu1 %v5328_v14, %s6996_s12  ;;  %v5180_v26 = vsel %vm7161_vm13, %v5172_v9, %v5179_v15  ;;  %v5473_v12 = vrot.slane %v9754_v56, 4  ;;  %v4796_v16 = vshll.u32 %v4741_v23, 16  ;;  %6836 = vmatmul.mubr.msk.bf16.gmra.mrb[72].mxu0 %vm1563_vm5, %v6953_v49  ;;  %v5612_v6 = vld [vmem:[#allocation2 + $0x28] sm:$0xf] }
 0x525   : > { %v4800_v55 = vshrl.u32 %v4741_v23, 16  ;;  %5066 = vrot.lane.b32.xlu0 %v5049_v44, %s6998_s10  ;;  %v4793_v1 = vor.u32 %v4792_v47, %v4788_v40  ;;  %v4806_v42 = vshll.u32 %v4742_v10, 16  ;;  %v4810_v17 = vshrl.u32 %v4742_v10, 16 }
 0x526   : > { %v4789_v61 = vsel %vm7179_vm14, %v4784_v54, %v4788_v40  ;;  %v4798_v62 = vrot.slane %v4796_v16, 5  ;;  %v4816_v27 = vshll.u32 %v4743_v7, 16  ;;  %v4820_v37 = vshrl.u32 %v4743_v7, 16  ;;  %v5528_v7 = vld [vmem:[#allocation2 + $0x28] sm:$0x7] }
 0x527   : > { %4852 = vst.msk [vmem:[#allocation3 + $0x24] sm:$0xf] %vm256_vm0, %v4789_v61  ;;  %v4802_v57 = vrot.slane %v4800_v55, 4  ;;  %v4794_v24 = vrot.slane %v4793_v1, 4  ;;  %v4808_v29 = vrot.slane %v4806_v42, 5  ;;  %v4812_v60 = vrot.slane %v4810_v17, 4 }
 0x528   : > { %v4826_v18 = vshll.u32 %v4744_v5, 16  ;;  %5497 = vrot.lane.b32.xlu1 %v5472_v28, %s6998_s10  ;;  %v4818_v41 = vrot.slane %v4816_v27, 5  ;;  %v4822_v53 = vrot.slane %v4820_v37, 4  ;;  %v4830_v56 = vshrl.u32 %v4744_v5, 16 }
 0x529   : > { %v4803_v50 = vor.u32 %v4802_v57, %v4798_v62  ;;  %5197 = vrot.lane.b32.xlu0 %v5180_v26, %s6997_s15  ;;  %v4799_v39 = vsel %vm7179_vm14, %v4794_v24, %v4798_v62  ;;  %v4813_v4 = vor.u32 %v4812_v60, %v4808_v29  ;;  %v4836_v21 = vshll.u32 %v4745_v30, 16 }
 0x52a   : > { %v4828_v0 = vrot.slane %v4826_v18, 5  ;;  %4853 = vst.msk [vmem:[#allocation3 + $0x30] sm:$0xf] %vm256_vm0, %v4799_v39  ;;  %v4823_v15 = vor.u32 %v4822_v53, %v4818_v41  ;;  %v4832_v43 = vrot.slane %v4830_v56, 4  ;;  %v5691_v23 = vshrl.u32 %v5612_v6, 16  ;;  %v6985_v53 = vld [vmem:[%s9940_s3 + $0x110] sm:$0xff]  }
 0x52b   : > { %v4804_v59 = vrot.slane %v4803_v50, 4  ;;  %v5338_v10 = vsel %vm7179_vm14, %v5333_v36, %v9223_v58  ;;  %v4814_v14 = vrot.slane %v4813_v4, 4  ;;  %v4838_v9 = vrot.slane %v4836_v21, 5  ;;  %v6986_v4 = vld [vmem:[%s9940_s3 + $0x118] sm:$0xff]  }
 0x52c   : > { %v5694_v40 = vshll.u32 %v5612_v6, 16  ;;  %5355 = vrot.lane.b32.xlu1 %v5338_v10, %s6996_s12  ;;  %v4824_v44 = vrot.slane %v4823_v15, 4  ;;  %v4833_v28 = vor.u32 %v4832_v43, %v4828_v0  ;;  %v5693_v54 = vrot.slane %v5691_v23, 7 }
 0x52d   : > { %v4809_v49 = vsel %vm7179_vm14, %v4804_v59, %v4808_v29  ;;  %v4819_v47 = vsel %vm7179_vm14, %v4814_v14, %v4818_v41  ;;  %v5482_v16 = vsel %vm7238_vm3, %v5473_v12, %v5481_v48  ;;  %v5564_v55 = vrot.slane %v5562_v3, 4  ;;  %v4907_v61 = vpop.permute.xlu0 %4906 }
 0x52e   : > { %4854 = vst.msk [vmem:[#allocation3 + $0x3c] sm:$0xf] %vm256_vm0, %v4809_v49  ;;  %4855 = vst.msk [vmem:[#allocation3 + $0x48] sm:$0xf] %vm256_vm0, %v4819_v47  ;;  %v4829_v58 = vsel %vm7179_vm14, %v4824_v44, %v4828_v0  ;;  %v4834_v36 = vrot.slane %v4833_v28, 4  ;;  %v5696_v26 = vor.u32 %v5694_v40, %v5693_v54  ;;  %v5565_v5 = vrot.slane %v5528_v7, 7 }
 0x52f   : > { %4856 = vst.msk [vmem:[#allocation3 + $0x54] sm:$0xf] %vm256_vm0, %v4829_v58 }
 0x530   : > { %5499 = vrot.lane.b32.xlu1 %v5482_v16, %s6998_s10  ;;  %v4839_v1 = vsel %vm7179_vm14, %v4834_v36, %v4838_v9  ;;  %v5697_v13 = vsel %vm7161_vm13, %v5689_v32, %v5696_v26  ;;  %4933 = vst.msk [vmem:[#allocation3] sm:$0xf] %vm526_vm6, %v4907_v61  ;;  %v4909_v35 = vpop.permute.xlu1 %4908  ;;  %v5566_v38 = vsel %vm7113_vm12, %v5564_v55, %v5565_v5 }
 0x531   : > { %4857 = vst.msk [vmem:[#allocation3 + $0x60] sm:$0xf] %vm256_vm0, %v4839_v1  ;;  %5715 = vst.msk [vmem:[#allocation3 + $0x68] sm:$0xf] %vm256_vm0, %v5697_v13  ;;  %v5568_v51 = vpop.permute.xlu0 %5567 }
 0x532   : > { %4934 = vst.msk [vmem:[#allocation3 + $0xc] sm:$0xf] %vm526_vm6, %v4909_v35 }
 0x534   : > { %5583 = vrot.lane.b32.xlu1 %v5566_v38, %s6997_s15 }
 0x535   : > { %v5051_v22 = vpop.permute.xlu0 %5050 }
 0x536   : > { %v5053_v48 = vpop.permute.xlu1 %5052  ;;  %5077 = vst.msk [vmem:[#allocation3] sm:$0xf] %vm674_vm8, %v5051_v22 }
 0x537   : > { %5078 = vst.msk [vmem:[#allocation3 + $0xc] sm:$0xf] %vm674_vm8, %v5053_v48 }
 0x539   : > { %v5182_v63 = vpop.permute.xlu0 %5181 }
 0x53a   : > { %v5184_v45 = vpop.permute.xlu1 %5183  ;;  %5208 = vst.msk [vmem:[#allocation3] sm:$0xf] %vm809_vm9, %v5182_v63 }
 0x53b   : > { %5209 = vst.msk [vmem:[#allocation3 + $0xc] sm:$0xf] %vm809_vm9, %v5184_v45 }
 0x53d   : > { %v5340_v3 = vpop.permute.xlu0 %5339 }
 0x53e   : > { %5366 = vst.msk [vmem:[#allocation3 + $0x4] sm:$0xf] %vm526_vm6, %v5340_v3 }
 0x542   : > { %v5484_v52 = vpop.permute.xlu0 %5483  ;;  %v6970_v18 = vld [vmem:[#allocation3] ss:$12 sps:$4 sm:$0xff]  }
 0x543   : > { %5510 = vst.msk [vmem:[#allocation3 + $0x4] sm:$0xf] %vm674_vm8, %v5484_v52 }
 0x544   : > { %5594 = vst.msk [vmem:[#allocation3 + $0x4] sm:$0xf] %vm809_vm9, %v5568_v51 }
 0x547   : > { %v5570_v32 = vpop.permute.xlu1 %5569 }
 0x548   : > { %v4911_v12 = vpop.permute.xlu0 %4910 }
 0x549   : > { %4935 = vst.msk [vmem:[#allocation3 + $0x18] sm:$0xf] %vm526_vm6, %v4911_v12 }
 0x54b   : > { %v5342_v42 = vpop.permute.xlu1 %5341 }
 0x54c   : > { %v5572_v17 = vpop.permute.xlu0 %5571  ;;  %5367 = vst.msk [vmem:[#allocation3 + $0x10] sm:$0xf] %vm526_vm6, %v5342_v42 }
 0x54f   : > { %v4913_v62 = vpop.permute.xlu1 %4912 }
 0x550   : > { %v5055_v57 = vpop.permute.xlu0 %5054  ;;  %4936 = vst.msk [vmem:[#allocation3 + $0x24] sm:$0xf] %vm526_vm6, %v4913_v62  ;;  %v6984_v62 = vld [vmem:[#allocation3 + $0x68] ss:$0 sps:$4 sm:$0xff]  }
 0x551   : > { %5079 = vst.msk [vmem:[#allocation3 + $0x18] sm:$0xf] %vm674_vm8, %v5055_v57 }
 0x553   : > { %v5486_v27 = vpop.permute.xlu1 %5485 }
 0x554   : > { %v5186_v37 = vpop.permute.xlu0 %5185  ;;  %5511 = vst.msk [vmem:[#allocation3 + $0x10] sm:$0xf] %vm674_vm8, %v5486_v27 }
 0x555   : > { %5210 = vst.msk [vmem:[#allocation3 + $0x18] sm:$0xf] %vm809_vm9, %v5186_v37  ;;  %5595 = vst.msk [vmem:[#allocation3 + $0x10] sm:$0xf] %vm809_vm9, %v5570_v32 }
 0x557   : > { %v5057_v30 = vpop.permute.xlu1 %5056 }
 0x558   : > { %v5344_v24 = vpop.permute.xlu0 %5343  ;;  %5080 = vst.msk [vmem:[#allocation3 + $0x24] sm:$0xf] %vm674_vm8, %v5057_v30 }
 0x559   : > { %5368 = vst.msk [vmem:[#allocation3 + $0x1c] sm:$0xf] %vm526_vm6, %v5344_v24 }
 0x55b   : > { %v5188_v29 = vpop.permute.xlu1 %5187 }
 0x55c   : > { %5211 = vst.msk [vmem:[#allocation3 + $0x24] sm:$0xf] %vm809_vm9, %v5188_v29  ;;  %v6972_v6 = vld [vmem:[#allocation3 + $0x4] ss:$12 sps:$4 sm:$0xff]  }
 0x55d   : > { %v5488_v60 = vpop.permute.xlu0 %5487  ;;  %6004 = vmatprep.mubr.bf16.mxu1 %v6972_v6 }
 0x55e   : > { %5512 = vst.msk [vmem:[#allocation3 + $0x1c] sm:$0xf] %vm674_vm8, %v5488_v60  ;;  %6005 = vmatmul.mubr.bf16.vlgmr.msra.gmra.mrb[60].mxu1 %v6970_v18 }
 0x55f   : > { %5596 = vst.msk [vmem:[#allocation3 + $0x1c] sm:$0xf] %vm809_vm9, %v5572_v17  ;;  %6845 = vmatpush3.bf16.msra.mxu1 %v6985_v53 }
 0x560   : > { %6844 = vmatprep.subr.bf16.mxu1 %v9968_v34 }
 0x561   : > { %v5574_v50 = vpop.permute.xlu1 %5573 }
 0x562   : > { %v4915_v41 = vpop.permute.xlu0 %4914 }
 0x563   : > { %4937 = vst.msk [vmem:[#allocation3 + $0x30] sm:$0xf] %vm526_vm6, %v4915_v41  ;;  %6846 = vmatpush3.bf16.msra.mxu1 %v6986_v4  ;;  %v6975_v9 = vld [vmem:[#allocation3 + $0x18] ss:$12 sps:$4 sm:$0xff]  }
 0x565   : > { %v5346_v56 = vpop.permute.xlu1 %5345 }
 0x566   : > { %v5576_v39 = vpop.permute.xlu0 %5575  ;;  %5369 = vst.msk [vmem:[#allocation3 + $0x28] sm:$0xf] %vm526_vm6, %v5346_v56 }
 0x569   : > { %v4917_v0 = vpop.permute.xlu1 %4916 }
 0x56a   : > { %4938 = vst.msk [vmem:[#allocation3 + $0x3c] sm:$0xf] %vm526_vm6, %v4917_v0  ;;  %v5059_v21 = vpop.permute.xlu0 %5058 }
 0x56b   : > { %5081 = vst.msk [vmem:[#allocation3 + $0x30] sm:$0xf] %vm674_vm8, %v5059_v21  ;;  %v9885_v21 = vld [vmem:[%s9941_s4 + $0x1] ss:$0 sm:$0xff] }
 0x56d   : > { %v5490_v59 = vpop.permute.xlu1 %5489 }
 0x56e   : > { %5513 = vst.msk [vmem:[#allocation3 + $0x28] sm:$0xf] %vm674_vm8, %v5490_v59  ;;  %v5190_v15 = vpop.permute.xlu0 %5189 }
 0x56f   : > { %5597 = vst.msk [vmem:[#allocation3 + $0x28] sm:$0xf] %vm809_vm9, %v5574_v50  ;;  %5212 = vst.msk [vmem:[#allocation3 + $0x30] sm:$0xf] %vm809_vm9, %v5190_v15 }
 0x572   : > { %v5061_v43 = vpop.permute.xlu1 %5060 }
 0x573   : > { %v5348_v23 = vpop.permute.xlu0 %5347  ;;  %5082 = vst.msk [vmem:[#allocation3 + $0x3c] sm:$0xf] %vm674_vm8, %v5061_v43 }
 0x574   : > { %5370 = vst.msk [vmem:[#allocation3 + $0x34] sm:$0xf] %vm526_vm6, %v5348_v23 }
 0x576   : > { %v5192_v10 = vpop.permute.xlu1 %5191  ;;  %v6973_v14 = vld [vmem:[#allocation3 + $0x1c] ss:$12 sps:$4 sm:$0xff]  }
 0x577   : > { %5213 = vst.msk [vmem:[#allocation3 + $0x3c] sm:$0xf] %vm809_vm9, %v5192_v10  ;;  %v5492_v40 = vpop.permute.xlu0 %5491  ;;  %6012 = vmatprep.mubr.bf16.mxu1 %v6973_v14 }
 0x578   : > { %5514 = vst.msk [vmem:[#allocation3 + $0x34] sm:$0xf] %vm674_vm8, %v5492_v40  ;;  %6013 = vmatmul.mubr.bf16.gmra.mrb[64].mxu1 %v6975_v9 }
 0x579   : > { %5598 = vst.msk [vmem:[#allocation3 + $0x34] sm:$0xf] %vm809_vm9, %v5576_v39 }
 0x57a   : > { %v5578_v7 = vpop.permute.xlu1 %5577 }
 0x57b   : > { %v4919_v49 = vpop.permute.xlu0 %4918 }
 0x57c   : > { %4939 = vst.msk [vmem:[#allocation3 + $0x48] sm:$0xf] %vm526_vm6, %v4919_v49 }
 0x57e   : > { %v5350_v44 = vpop.permute.xlu1 %5349  ;;  %v6978_v1 = vld [vmem:[#allocation3 + $0x30] ss:$12 sps:$4 sm:$0xff]  }
 0x57f   : > { %5371 = vst.msk [vmem:[#allocation3 + $0x40] sm:$0xf] %vm526_vm6, %v5350_v44  ;;  %v5580_v28 = vpop.permute.xlu0 %5579 }
 0x582   : > { %v4921_v54 = vpop.permute.xlu1 %4920 }
 0x583   : > { %4940 = vst.msk [vmem:[#allocation3 + $0x54] sm:$0xf] %vm526_vm6, %v4921_v54  ;;  %v5063_v47 = vpop.permute.xlu0 %5062 }
 0x584   : > { %5083 = vst.msk [vmem:[#allocation3 + $0x48] sm:$0xf] %vm674_vm8, %v5063_v47 }
 0x586   : > { %v5494_v58 = vpop.permute.xlu1 %5493 }
 0x587   : > { %5515 = vst.msk [vmem:[#allocation3 + $0x40] sm:$0xf] %vm674_vm8, %v5494_v58  ;;  %v5194_v36 = vpop.permute.xlu0 %5193 }
 0x588   : > { %5599 = vst.msk [vmem:[#allocation3 + $0x40] sm:$0xf] %vm809_vm9, %v5578_v7  ;;  %5214 = vst.msk [vmem:[#allocation3 + $0x48] sm:$0xf] %vm809_vm9, %v5194_v36  ;;  %v6116_v7 = vld [vmem:[%s8489_s22] sm:$0xff] }
 0x58a   : > { %v5065_v26 = vpop.permute.xlu1 %5064 }
 0x58b   : > { %5084 = vst.msk [vmem:[#allocation3 + $0x54] sm:$0xf] %vm674_vm8, %v5065_v26  ;;  %v5352_v16 = vpop.permute.xlu0 %5351 }
 0x58c   : > { %5372 = vst.msk [vmem:[#allocation3 + $0x4c] sm:$0xf] %vm526_vm6, %v5352_v16 }
 0x58e   : > { %v5196_v55 = vpop.permute.xlu1 %5195 }
 0x58f   : > { %5215 = vst.msk [vmem:[#allocation3 + $0x54] sm:$0xf] %vm809_vm9, %v5196_v55  ;;  %v5496_v5 = vpop.permute.xlu0 %5495  ;;  %v6976_v61 = vld [vmem:[#allocation3 + $0x34] ss:$12 sps:$4 sm:$0xff]  }
 0x590   : > { %5516 = vst.msk [vmem:[#allocation3 + $0x4c] sm:$0xf] %vm674_vm8, %v5496_v5  ;;  %6020 = vmatprep.mubr.bf16.mxu1 %v6976_v61 }
 0x591   : > { %5600 = vst.msk [vmem:[#allocation3 + $0x4c] sm:$0xf] %vm809_vm9, %v5580_v28  ;;  %6021 = vmatmul.mubr.bf16.gmra.mrb[68].mxu1 %v6978_v1  ;;  %v6117_v28 = vld [vmem:[%s8489_s22 + $0x8] sm:$0xff] }
 0x592   : > { %v5582_v13 = vpop.permute.xlu1 %5581 }
 0x593   : > { %v4923_v35 = vpop.permute.xlu0 %4922 }
 0x594   : > { %4941 = vst.msk [vmem:[#allocation3 + $0x60] sm:$0xf] %vm526_vm6, %v4923_v35  ;;  %v6118_v35 = vld [vmem:[%s8489_s22 + $0x10] sm:$0xff] }
 0x596   : > { %v5354_v38 = vpop.permute.xlu1 %5353  ;;  %v6981_v52 = vld [vmem:[#allocation3 + $0x48] ss:$12 sps:$4 sm:$0xff]  }
 0x597   : > { %5373 = vst.msk [vmem:[#allocation3 + $0x58] sm:$0xf] %vm526_vm6, %v5354_v38  ;;  %v5067_v51 = vpop.permute.xlu0 %5066 }
 0x598   : > { %5085 = vst.msk [vmem:[#allocation3 + $0x60] sm:$0xf] %vm674_vm8, %v5067_v51 }
 0x59a   : > { %v5498_v48 = vpop.permute.xlu1 %5497 }
 0x59b   : > { %5517 = vst.msk [vmem:[#allocation3 + $0x58] sm:$0xf] %vm674_vm8, %v5498_v48  ;;  %v5198_v22 = vpop.permute.xlu0 %5197 }
 0x59c   : > { %5601 = vst.msk [vmem:[#allocation3 + $0x58] sm:$0xf] %vm809_vm9, %v5582_v13  ;;  %5216 = vst.msk [vmem:[#allocation3 + $0x60] sm:$0xf] %vm809_vm9, %v5198_v22 }
 0x59e   : > { %v5356_v45 = vpop.permute.xlu1 %5355 }
 0x59f   : > { %5374 = vst.msk [vmem:[#allocation3 + $0x64] sm:$0xf] %vm526_vm6, %v5356_v45 }
 0x5a2   : > { %v5500_v63 = vpop.permute.xlu1 %5499 }
 0x5a3   : > { %5518 = vst.msk [vmem:[#allocation3 + $0x64] sm:$0xf] %vm674_vm8, %v5500_v63  ;;  %v6979_v3 = vld [vmem:[#allocation3 + $0x4c] ss:$12 sps:$4 sm:$0xff]  }
 0x5a4   : > { %6028 = vmatprep.mubr.bf16.mxu1 %v6979_v3 }
 0x5a5   : > { %6029 = vmatmul.mubr.bf16.gmra.mrb[72].mxu1 %v6981_v52 }
 0x5a6   : > { %v5584_v32 = vpop.permute.xlu1 %5583 }
 0x5a7   : > { %5602 = vst.msk [vmem:[#allocation3 + $0x64] sm:$0xf] %vm809_vm9, %v5584_v32 }
 0x5ae   : > { %v5732_v12 = vld [vmem:[#allocation3 + $0x60] sm:$0xff] }
 0x5af   : > { %v6472_v42 = vcombine.high %v5732_v12, %v5732_v12  ;;  %v6471_v17 = vcombine.low %v5732_v12, %v5732_v12 }
 0x5b1   : > { %6036 = vmatprep.mubr.bf16.mxu1 %v6472_v42 }
 0x5b2   : > { %6037 = vmatmul.mubr.bf16.gmra.mrb[76].mxu1 %v6471_v17 }
 0x5b3   : > { %6839 = vmatprep.mubr.msk.bf16.mxu1 %vm7000_vm4, %v9968_v34 }
 0x5ba   : > { %6840 = vmatmul.mubr.msk.bf16.vlgmr.msra.gmra.mrb[80].mxu1 %vm1563_vm5, %v6984_v62 }
 0x5bc   : > { %v6078_v57 = vpop.f32.mrb[60].mxu0 }
 0x5bd   : > { %v6825_v27 = vpop.f32.mrb[61].mxu0 }
 0x5be   : > { %v6081_v37 = vpop.f32.mrb[62].mxu0 }
 0x5bf   : > { %v6826_v30 = vpop.f32.mrb[63].mxu0 }
 0x5d7   : > { %v6086_v24 = vpop.f32.mrb[64].mxu0 }
 0x5d8   : > { %v6829_v29 = vpop.f32.mrb[65].mxu0 }
 0x5d9   : > { %v6089_v60 = vpop.f32.mrb[66].mxu0 }
 0x5da   : > { %v6830_v18 = vpop.f32.mrb[67].mxu0 }
 0x5e9   : > { %v6094_v6 = vpop.f32.mrb[68].mxu0 }
 0x5ea   : > { %v6833_v50 = vpop.f32.mrb[69].mxu0 }
 0x5eb   : > { %v6097_v41 = vpop.f32.mrb[70].mxu0 }
 0x5ec   : > { %v6834_v53 = vpop.f32.mrb[71].mxu0 }
 0x5f7   : > { %v9878_v56 = vpop.f32.mrb[72].mxu0 }
 0x5f8   : > { %v6837_v39 = vpop.f32.mrb[73].mxu0 }
 0x5f9   : > { %v9880_v34 = vpop.f32.mrb[74].mxu0 }
 0x5fa   : > { %v6838_v4 = vpop.f32.mrb[75].mxu0 }
 0x631   : > { %v6710_v0 = vpop.f32.mrb[60].mxu1 }
 0x632   : > { %v6711_v59 = vpop.f32.mrb[61].mxu1 }
 0x633   : > { %v6712_v15 = vadd.f32 %v6711_v59, %v6710_v0  ;;  %v6713_v43 = vpop.f32.mrb[62].mxu1  ;;  %v6122_v0 = vld [vmem:[%s8489_s22 + $0x30] sm:$0xff] }
 0x634   : > { %v6714_v23 = vpop.f32.mrb[63].mxu1 }
 0x635   : > { %v6007_v10 = vadd.f32 %v6712_v15, %v9885_v21  ;;  %v6715_v14 = vadd.f32 %v6714_v23, %v6713_v43  ;;  %v6123_v15 = vld [vmem:[%s8489_s22 + $0x38] sm:$0xff] }
 0x637   : > { %v6079_v9 = vadd.f32 %v6078_v57, %v6007_v10  ;;  %v6010_v40 = vadd.f32 %v6715_v14, %v9885_v21  ;;  %v6120_v57 = vld [vmem:[%s8489_s22 + $0x20] sm:$0xff] }
 0x639   : > { %v6125_v49 = vadd.f32 %v6116_v7, %v6079_v9  ;;  %v6082_v44 = vadd.f32 %v6081_v37, %v6010_v40 }
 0x63b   : > { %v6134_v54 = vmul.f32 %v6125_v49, %v7831_v33  ;;  %v6126_v47 = vadd.f32 %v6117_v28, %v6082_v44 }
 0x63d   : > { %6143 = vst.msk [vmem:[%s8489_s22] sm:$0xff] %vm1563_vm5, %v6134_v54  ;;  %v6135_v58 = vmul.f32 %v6126_v47, %v7834_v11  ;;  %v6119_v11 = vld [vmem:[%s8489_s22 + $0x18] sm:$0xff]  ;;  %v6124_v54 = vld [vmem:[%s8489_s22 + $0x40] sm:$0xff] }
 0x63f   : > { %6144 = vst.msk [vmem:[%s8489_s22 + $0x8] sm:$0xff] %vm1563_vm5, %v6135_v58 }
 0x64b   : > { %v6716_v36 = vpop.f32.mrb[64].mxu1 }
 0x64c   : > { %v6717_v26 = vpop.f32.mrb[65].mxu1 }
 0x64d   : > { %v6718_v16 = vadd.f32 %v6717_v26, %v6716_v36  ;;  %v6719_v55 = vpop.f32.mrb[66].mxu1 }
 0x64e   : > { %v6720_v5 = vpop.f32.mrb[67].mxu1 }
 0x64f   : > { %v6015_v61 = vadd.f32 %v6718_v16, %v9885_v21  ;;  %v6721_v1 = vadd.f32 %v6720_v5, %v6719_v55 }
 0x651   : > { %v6087_v13 = vadd.f32 %v6086_v24, %v6015_v61  ;;  %v6018_v33 = vadd.f32 %v6721_v1, %v9885_v21 }
 0x653   : > { %v6127_v38 = vadd.f32 %v6118_v35, %v6087_v13  ;;  %v6090_v51 = vadd.f32 %v6089_v60, %v6018_v33 }
 0x655   : > { %v6136_v48 = vmul.f32 %v6127_v38, %v7886_v2  ;;  %v6128_v22 = vadd.f32 %v6119_v11, %v6090_v51 }
 0x657   : > { %6145 = vst.msk [vmem:[%s8489_s22 + $0x10] sm:$0xff] %vm1563_vm5, %v6136_v48  ;;  %v6137_v45 = vmul.f32 %v6128_v22, %v7890_v31  ;;  %v6121_v31 = vld [vmem:[%s8489_s22 + $0x28] sm:$0xff] }
 0x659   : > { %6146 = vst.msk [vmem:[%s8489_s22 + $0x18] sm:$0xff] %vm1563_vm5, %v6137_v45 }
 0x664   : > { %v6722_v63 = vpop.f32.mrb[68].mxu1 }
 0x665   : > { %v6723_v3 = vpop.f32.mrb[69].mxu1 }
 0x666   : > { %v6724_v52 = vadd.f32 %v6723_v3, %v6722_v63  ;;  %v6725_v32 = vpop.f32.mrb[70].mxu1 }
 0x667   : > { %v6726_v12 = vpop.f32.mrb[71].mxu1 }
 0x668   : > { %v6023_v42 = vadd.f32 %v6724_v52, %v9885_v21  ;;  %v6727_v17 = vadd.f32 %v6726_v12, %v6725_v32 }
 0x66a   : > { %v6095_v62 = vadd.f32 %v6094_v6, %v6023_v42  ;;  %v6026_v2 = vadd.f32 %v6727_v17, %v9885_v21 }
 0x66c   : > { %v6129_v27 = vadd.f32 %v6120_v57, %v6095_v62  ;;  %v6098_v37 = vadd.f32 %v6097_v41, %v6026_v2 }
 0x66e   : > { %v6138_v30 = vmul.f32 %v6129_v27, %v8008_v19  ;;  %v6130_v24 = vadd.f32 %v6121_v31, %v6098_v37 }
 0x670   : > { %6147 = vst.msk [vmem:[%s8489_s22 + $0x20] sm:$0xff] %vm1563_vm5, %v6138_v30  ;;  %v6139_v29 = vmul.f32 %v6130_v24, %v8027_v20 }
 0x672   : > { %6148 = vst.msk [vmem:[%s8489_s22 + $0x28] sm:$0xff] %vm1563_vm5, %v6139_v29 }
 0x678   : > { %v6728_v60 = vpop.f32.mrb[72].mxu1 }
 0x679   : > { %v6729_v18 = vpop.f32.mrb[73].mxu1 }
 0x67a   : > { %v6730_v6 = vadd.f32 %v6729_v18, %v6728_v60  ;;  %v6731_v50 = vpop.f32.mrb[74].mxu1 }
 0x67b   : > { %v6732_v53 = vpop.f32.mrb[75].mxu1 }
 0x67c   : > { %v6031_v41 = vadd.f32 %v6730_v6, %v9885_v21  ;;  %v6733_v39 = vadd.f32 %v6732_v53, %v6731_v50 }
 0x67e   : > { %v6103_v19 = vadd.f32 %v9878_v56, %v6031_v41  ;;  %v6034_v4 = vadd.f32 %v6733_v39, %v9885_v21 }
 0x680   : > { %v6131_v59 = vadd.f32 %v6122_v0, %v6103_v19  ;;  %v6106_v20 = vadd.f32 %v9880_v34, %v6034_v4 }
 0x682   : > { %v6140_v43 = vmul.f32 %v6131_v59, %v8130_v25  ;;  %v6132_v23 = vadd.f32 %v6123_v15, %v6106_v20 }
 0x684   : > { %6149 = vst.msk [vmem:[%s8489_s22 + $0x30] sm:$0xff] %vm1563_vm5, %v6140_v43  ;;  %v6141_v10 = vmul.f32 %v6132_v23, %v8144_v46 }
 0x685   : > { %v6734_v14 = vpop.f32.mrb[76].mxu1 }
 0x686   : > { %v6735_v9 = vpop.f32.mrb[77].mxu1  ;;  %6150 = vst.msk [vmem:[%s8489_s22 + $0x38] sm:$0xff] %vm1563_vm5, %v6141_v10 }
 0x687   : > { %v6736_v56 = vadd.f32 %v6735_v9, %v6734_v14  ;;  %v6737_v40 = vpop.f32.mrb[78].mxu1 }
 0x688   : > { %v6738_v7 = vpop.f32.mrb[79].mxu1 }
 0x689   : > { %v6039_v49 = vadd.f32 %v6736_v56, %v9885_v21 }
 0x68d   : > { %v6110_v34 = vpop.f32.mrb[80].mxu1 }
 0x68e   : > { %v6111_v44 = vadd.f32 %v6110_v34, %v6039_v49  ;;  %v6841_v28 = vpop.f32.mrb[81].mxu1 }
 0x68f   : > { %v6113_v25 = vpop.f32.mrb[82].mxu1 }
 0x690   : > { %v6133_v47 = vadd.f32 %v6124_v54, %v6111_v44  ;;  %v6842_v58 = vpop.f32.mrb[83].mxu1 }
 0x692   : > { %v6142_v36 = vmul.f32 %v6133_v47, %v8181_v8 }
 0x694   : > { %6151 = vst.msk [vmem:[%s8489_s22 + $0x40] sm:$0xff] %vm1563_vm5, %v6142_v36 }
 0x695 PF: > { %s16_s21 = sadd.s32 1, %s6993_s21  }
 0x696   : > { %p13_p4 = scmp.ge.s32.totalorder %s16_s21, 4  }
 0x698   :  { %15 = sbr.rel (!%p13_p4) target bundleno = 1 (0x1), region = 78 }

</bundles_post_ra>
